<compile_context>
chip_gen: v6e
topology: v6e:2x2x1
jax: 0.10.0
libtpu: 0.0.40
codegen_flags: <defaults>
</compile_context>

<pallas_src>
import functools

import numpy as np
import jax
import jax.numpy as jnp
from jax import lax
from jax.experimental import pallas as pl
from jax.experimental.pallas import tpu as pltpu


_VMEM_LIMIT = 32 * 1024 * 1024  # safe on v5e/v6e/v7x; largest call uses ~6 MB
_EPS = 1e-5                     # nn.InstanceNorm2d default


def _round_up(x, m):
    return (x + m - 1) // m * m


# ----------------------------------------------------------------------------
# Fused conv-as-matmul Pallas kernel
#   grid = (batch,), one MXU matmul per grid step (full K resident in VMEM),
#   epilogue: bias + [InstanceNorm (phase-aware)] + [ReLU|tanh] + [skip add].
# ----------------------------------------------------------------------------
def _phase_fold(v, phases):
    if phases == 1:
        return v
    oc = v.shape[1] // phases
    out = v[:, 0:oc]
    for p in range(1, phases):
        out = out + v[:, p * oc:(p + 1) * oc]
    return out


def _phase_tile(v, phases):
    if phases == 1:
        return v
    return jnp.concatenate([v] * phases, axis=1)


def _fused_conv_kernel(*refs, norm, act, phases, has_res):
    if has_res:
        x_ref, w_ref, b_ref, res_ref, o_ref = refs
    else:
        x_ref, w_ref, b_ref, o_ref = refs
        res_ref = None

    # (rows, Kp) bf16 @ (Kp, Np) bf16 -> f32 on the MXU, bias fused.
    y = jnp.dot(x_ref[...], w_ref[...], preferred_element_type=jnp.float32)
    y = y + b_ref[...]

    if norm:
        # InstanceNorm2d(affine=False): per-sample, per-channel over spatial.
        # For the sub-pixel ConvTranspose (phases=4) the 4 phase column groups
        # of one channel are folded into the same statistics.
        rows = y.shape[0]
        cnt = float(rows * phases)
        mean = _phase_tile(
            _phase_fold(jnp.sum(y, axis=0, keepdims=True), phases) / cnt, phases)
        d = y - mean
        var = _phase_tile(
            _phase_fold(jnp.sum(d * d, axis=0, keepdims=True), phases) / cnt, phases)
        y = d * lax.rsqrt(var + _EPS)

    if act == "relu":
        y = jnp.maximum(y, 0.0)
    elif act == "tanh":
        y = jnp.tanh(y)

    if res_ref is not None:  # ResidualBlock tail: x + IN(conv2(...))
        y = y + res_ref[...].astype(jnp.float32)

    o_ref[...] = y.astype(o_ref.dtype)


def _fused_matmul(lhs, w, b, res, *, rows, batch, norm, act, phases, out_dtype):
    """lhs:(batch*rows, Kp) bf16, w:(Kp,Np) bf16, b:(1,Np) f32 -> (batch*rows, Np)."""
    Kp, Np = w.shape
    kern = functools.partial(_fused_conv_kernel, norm=norm, act=act,
                             phases=phases, has_res=res is not None)
    in_specs = [
        pl.BlockSpec((rows, Kp), lambda i: (i, 0)),
        pl.BlockSpec((Kp, Np), lambda i: (0, 0)),
        pl.BlockSpec((1, Np), lambda i: (0, 0)),
    ]
    args = [lhs, w, b]
    if res is not None:
        in_specs.append(pl.BlockSpec((rows, Np), lambda i: (i, 0)))
        args.append(res)

    return pl.pallas_call(
        kern,
        out_shape=jax.ShapeDtypeStruct((batch * rows, Np), out_dtype),
        grid=(batch,),
        in_specs=in_specs,
        out_specs=pl.BlockSpec((rows, Np), lambda i: (i, 0)),
        compiler_params=pltpu.CompilerParams(
            dimension_semantics=("parallel",),
            vmem_limit_bytes=_VMEM_LIMIT,
        ),
    )(*args)


# ----------------------------------------------------------------------------
# Conv / ConvTranspose wrappers (XLA glue feeding the Pallas hot path)
# ----------------------------------------------------------------------------
def _im2col(x, kh, kw, stride, pad):
    # x: NHWC -> patches (N, OH, OW, kh*kw*C), inner order (i, j, c)
    N, H, W, C = x.shape
    xp = jnp.pad(x, ((0, 0), (pad, pad), (pad, pad), (0, 0))) if pad else x
    OH = (H + 2 * pad - kh) // stride + 1
    OW = (W + 2 * pad - kw) // stride + 1
    cols = []
    for i in range(kh):
        for j in range(kw):
            cols.append(xp[:, i:i + stride * OH:stride, j:j + stride * OW:stride, :])
    patches = jnp.stack(cols, axis=3)
    return patches.reshape(N, OH, OW, kh * kw * C), OH, OW


def conv2d(x, layer, *, kh, kw, n_out, stride=1, pad=0, norm=False, act=None,
           phases=1, residual=None, out_dtype=jnp.bfloat16):
    """x: NHWC bf16; layer: {'w':(Kp,Np) bf16, 'b':(1,Np) f32} prepared offline."""
    B = x.shape[0]
    K = kh * kw * x.shape[-1]
    Kp, Np = layer["w"].shape
    patches, OH, OW = _im2col(x, kh, kw, stride, pad)
    lhs = patches.reshape(B * OH * OW, K)
    if Kp != K:
        lhs = jnp.pad(lhs, ((0, 0), (0, Kp - K)))
    res = None
    if residual is not None:
        res = residual.reshape(B * OH * OW, residual.shape[-1])
        if res.shape[1] != Np:
            res = jnp.pad(res, ((0, 0), (0, Np - res.shape[1])))
    y = _fused_matmul(lhs, layer["w"], layer["b"], res, rows=OH * OW, batch=B,
                      norm=norm, act=act, phases=phases, out_dtype=out_dtype)
    return y[:, :n_out].reshape(B, OH, OW, n_out)


def conv_transpose2d(x, layer, *, n_out):
    """ConvTranspose2d(k=3, s=2, p=1, output_padding=1), sub-pixel form.

    One 2x2 stride-1 conv over the un-dilated input producing 4*OC phase
    channels (IN/ReLU fused in the kernel with phase-aware stats), then a
    depth-to-space interleave."""
    B, H, W, C = x.shape
    xz = jnp.pad(x, ((0, 0), (0, 1), (0, 1), (0, 0)))  # halo for the m+1/n+1 taps
    y = conv2d(xz, layer, kh=2, kw=2, n_out=4 * n_out, stride=1, pad=0,
               norm=True, act="relu", phases=4)
    y = y.reshape(B, H, W, 2, 2, n_out)
    return jnp.transpose(y, (0, 1, 3, 2, 4, 5)).reshape(B, 2 * H, 2 * W, n_out)


# ----------------------------------------------------------------------------
# Parameter init (PyTorch layouts) + one-time offline weight preparation
# ----------------------------------------------------------------------------
def init_generator_params(key, input_nc, output_nc, n_residual_blocks):
    params = {}

    def conv_p(key, out_c, in_c, k):
        kw_, kb_ = jax.random.split(key)
        w = 0.05 * jax.random.normal(kw_, (out_c, in_c, k, k), jnp.float32)
        b = 0.05 * jax.random.normal(kb_, (out_c,), jnp.float32)
        return w, b

    def convT_p(key, in_c, out_c, k):
        kw_, kb_ = jax.random.split(key)
        w = 0.05 * jax.random.normal(kw_, (in_c, out_c, k, k), jnp.float32)
        b = 0.05 * jax.random.normal(kb_, (out_c,), jnp.float32)
        return w, b

    keys = jax.random.split(key, 6 + 2 * n_residual_blocks)
    ki = iter(keys)

    params["conv_in_w"], params["conv_in_b"] = conv_p(next(ki), 64, input_nc, 7)
    params["down1_w"], params["down1_b"] = conv_p(next(ki), 128, 64, 3)
    params["down2_w"], params["down2_b"] = conv_p(next(ki), 256, 128, 3)
    for i in range(n_residual_blocks):
        params[f"res{i}_w1"], params[f"res{i}_b1"] = conv_p(next(ki), 256, 256, 3)
        params[f"res{i}_w2"], params[f"res{i}_b2"] = conv_p(next(ki), 256, 256, 3)
    params["up1_w"], params["up1_b"] = convT_p(next(ki), 256, 128, 3)
    params["up2_w"], params["up2_b"] = convT_p(next(ki), 128, 64, 3)
    params["conv_out_w"], params["conv_out_b"] = conv_p(next(ki), output_nc, 64, 7)
    return params


def _prep_conv(w, b):
    # PyTorch Conv2d weight (OC, IC, kH, kW) -> padded bf16 (Kp, Np) matmul RHS.
    w = np.asarray(jax.device_get(w), np.float32)
    b = np.asarray(jax.device_get(b), np.float32)
    OC, IC, KH, KW = w.shape
    K, N = KH * KW * IC, OC
    Kp, Np = _round_up(K, 128), _round_up(N, 128)
    wm = np.zeros((Kp, Np), np.float32)
    wm[:K, :N] = np.transpose(w, (2, 3, 1, 0)).reshape(K, N)
    bm = np.zeros((1, Np), np.float32)
    bm[0, :N] = b
    return {"w": jnp.asarray(wm, jnp.bfloat16), "b": jnp.asarray(bm, jnp.float32)}


def _prep_convT(w, b):
    # PyTorch ConvTranspose2d weight (IC, OC, 3, 3) -> sub-pixel 2x2 conv weight
    # (4*OC, IC, 2, 2): output phase (p,q), tap (di,dj) uses kernel index
    # (p+1-2di, q+1-2dj) when inside [0,3).
    w = np.asarray(jax.device_get(w), np.float32)
    b = np.asarray(jax.device_get(b), np.float32)
    IC, OC, _, _ = w.shape
    wc = np.zeros((4 * OC, IC, 2, 2), np.float32)
    for p in range(2):
        for q in range(2):
            for di in range(2):
                for dj in range(2):
                    ky, kx = p + 1 - 2 * di, q + 1 - 2 * dj
                    if 0 <= ky < 3 and 0 <= kx < 3:
                        wc[(2 * p + q) * OC:(2 * p + q + 1) * OC, :, di, dj] = \
                            w[:, :, ky, kx].T
    return _prep_conv(wc, np.tile(b, 4))


def prepare_params(params, n_residual_blocks):
    prep = {
        "conv_in": _prep_conv(params["conv_in_w"], params["conv_in_b"]),
        "down1": _prep_conv(params["down1_w"], params["down1_b"]),
        "down2": _prep_conv(params["down2_w"], params["down2_b"]),
        "up1": _prep_convT(params["up1_w"], params["up1_b"]),
        "up2": _prep_convT(params["up2_w"], params["up2_b"]),
        "conv_out": _prep_conv(params["conv_out_w"], params["conv_out_b"]),
    }
    for i in range(n_residual_blocks):
        prep[f"res{i}_1"] = _prep_conv(params[f"res{i}_w1"], params[f"res{i}_b1"])
        prep[f"res{i}_2"] = _prep_conv(params[f"res{i}_w2"], params[f"res{i}_b2"])
    return prep


# ----------------------------------------------------------------------------
# Generator forward
# ----------------------------------------------------------------------------
def generator_forward(prep, x_nchw, *, n_residual_blocks, output_nc):
    x = jnp.transpose(x_nchw, (0, 2, 3, 1)).astype(jnp.bfloat16)  # NHWC, bf16

    # initial block: Conv7x7(pad=3) + IN + ReLU (one fused kernel)
    x = conv2d(x, prep["conv_in"], kh=7, kw=7, n_out=64, stride=1, pad=3,
               norm=True, act="relu")

    # downsampling: Conv3x3 stride 2 + IN + ReLU
    x = conv2d(x, prep["down1"], kh=3, kw=3, n_out=128, stride=2, pad=1,
               norm=True, act="relu")
    x = conv2d(x, prep["down2"], kh=3, kw=3, n_out=256, stride=2, pad=1,
               norm=True, act="relu")

    # residual blocks
    # TODO(synk): ResidualBlock source not provided; standard Conv3x3(pad=1)->IN
    # ->ReLU->Conv3x3(pad=1)->IN + skip (zero padding) assumed.
    for i in range(n_residual_blocks):
        r = conv2d(x, prep[f"res{i}_1"], kh=3, kw=3, n_out=256, stride=1, pad=1,
                   norm=True, act="relu")
        x = conv2d(r, prep[f"res{i}_2"], kh=3, kw=3, n_out=256, stride=1, pad=1,
                   norm=True, residual=x)            # IN + skip fused

    # upsampling: ConvTranspose3x3 stride 2 + IN + ReLU (sub-pixel, fused)
    x = conv_transpose2d(x, prep["up1"], n_out=128)
    x = conv_transpose2d(x, prep["up2"], n_out=64)

    # output block: Conv7x7(pad=3) + Tanh (tanh fused into the matmul epilogue)
    x = conv2d(x, prep["conv_out"], kh=7, kw=7, n_out=output_nc, stride=1, pad=3,
               act="tanh", out_dtype=jnp.float32)

    return jnp.transpose(x, (0, 3, 1, 2))  # back to NCHW


# ----------------------------------------------------------------------------
# main
# ----------------------------------------------------------------------------
if __name__ == "__main__":
    INPUT_NC = 4
    OUTPUT_NC = 4
    N_RES = 2
    BATCH, H, W = 2, 16, 16

    key = jax.random.PRNGKey(0)
    k_param, k_input = jax.random.split(key)

    params = init_generator_params(k_param, INPUT_NC, OUTPUT_NC, N_RES)
    prep = prepare_params(params, N_RES)   # weight prep hoisted out of the jit
    x = jax.random.normal(k_input, (BATCH, INPUT_NC, H, W), jnp.float32)

    fwd = jax.jit(functools.partial(generator_forward,
                                    n_residual_blocks=N_RES,
                                    output_nc=OUTPUT_NC))
    out = jax.block_until_ready(fwd(prep, x))

    assert out.shape == (BATCH, OUTPUT_NC, H, W), out.shape
    assert bool(jnp.all(jnp.isfinite(out)))
    assert bool(jnp.all(jnp.abs(out) <= 1.0 + 1e-6))  # tanh range

    print("KERNEL_OK")
</pallas_src>

<mosaic_0001>
module attributes {stable_mosaic.version = 11 : i64} {
  func.func @_fused_conv_kernel(%arg0: i32, %arg1: memref<256x256xbf16, #tpu.memory_space<vmem>>, %arg2: memref<256x128xbf16, #tpu.memory_space<vmem>>, %arg3: memref<1x128xf32, #tpu.memory_space<vmem>>, %arg4: memref<256x128xbf16, #tpu.memory_space<vmem>>) attributes {dimension_semantics = [#tpu.dimension_semantics<parallel>], iteration_bounds = array<i64: 2>, scalar_prefetch = 0 : i64, scratch_operands = 0 : i64, tpu.core_type = #tpu.core_type<tc>, window_params = [{transform_indices = @transform_0, window_bounds = array<i64: 256, 256>}, {pipeline_mode = #tpu.pipeline_mode<synchronous>, transform_indices = @transform_1, window_bounds = array<i64: 256, 128>}, {pipeline_mode = #tpu.pipeline_mode<synchronous>, transform_indices = @transform_2, window_bounds = array<i64: 1, 128>}, {transform_indices = @transform_3, window_bounds = array<i64: 256, 128>}]} {
    %c0 = arith.constant 0 : index
    %c0_0 = arith.constant 0 : index
    %0 = vector.load %arg1[%c0, %c0_0] : memref<256x256xbf16, #tpu.memory_space<vmem>>, vector<256x256xbf16>
    %c0_1 = arith.constant 0 : index
    %c0_2 = arith.constant 0 : index
    %1 = vector.load %arg2[%c0_1, %c0_2] : memref<256x128xbf16, #tpu.memory_space<vmem>>, vector<256x128xbf16>
    %cst = arith.constant dense<0.000000e+00> : vector<256x128xf32>
    %2 = tpu.matmul %0, %1, %cst {dimension_numbers = #tpu.dot_dimension_numbers<[1], [0], [0], [1], [0, 0, 1, 1], [], []>} : vector<256x256xbf16>, vector<256x128xbf16>, vector<256x128xf32> -> vector<256x128xf32>
    %c0_3 = arith.constant 0 : index
    %c0_4 = arith.constant 0 : index
    %3 = vector.load %arg3[%c0_3, %c0_4] : memref<1x128xf32, #tpu.memory_space<vmem>>, vector<1x128xf32>
    %4 = vector.broadcast %3 : vector<1x128xf32> to vector<256x128xf32>
    %5 = arith.addf %2, %4 : vector<256x128xf32>
    %cst_5 = arith.constant dense<0.000000e+00> : vector<128xf32>
    %6 = vector.multi_reduction <add>, %5, %cst_5 [0] : vector<256x128xf32> to vector<128xf32>
    %7 = vector.shape_cast %6 : vector<128xf32> to vector<1x128xf32>
    %cst_6 = arith.constant 2.560000e+02 : f32
    %8 = vector.broadcast %cst_6 : f32 to vector<1x128xf32>
    %9 = arith.divf %7, %8 : vector<1x128xf32>
    %10 = vector.broadcast %9 : vector<1x128xf32> to vector<256x128xf32>
    %11 = arith.subf %5, %10 : vector<256x128xf32>
    %12 = arith.mulf %11, %11 : vector<256x128xf32>
    %cst_7 = arith.constant dense<0.000000e+00> : vector<128xf32>
    %13 = vector.multi_reduction <add>, %12, %cst_7 [0] : vector<256x128xf32> to vector<128xf32>
    %14 = vector.shape_cast %13 : vector<128xf32> to vector<1x128xf32>
    %cst_8 = arith.constant 2.560000e+02 : f32
    %15 = vector.broadcast %cst_8 : f32 to vector<1x128xf32>
    %16 = arith.divf %14, %15 : vector<1x128xf32>
    %cst_9 = arith.constant 9.99999974E-6 : f32
    %17 = vector.broadcast %cst_9 : f32 to vector<1x128xf32>
    %18 = arith.addf %16, %17 : vector<1x128xf32>
    %19 = math.rsqrt %18 : vector<1x128xf32>
    %20 = vector.broadcast %19 : vector<1x128xf32> to vector<256x128xf32>
    %21 = arith.mulf %11, %20 : vector<256x128xf32>
    %cst_10 = arith.constant 0.000000e+00 : f32
    %22 = vector.broadcast %cst_10 : f32 to vector<256x128xf32>
    %23 = arith.maximumf %21, %22 : vector<256x128xf32>
    %24 = arith.truncf %23 : vector<256x128xf32> to vector<256x128xbf16>
    %c0_11 = arith.constant 0 : index
    %c0_12 = arith.constant 0 : index
    %25 = vector.load %arg4[%c0_11, %c0_12] : memref<256x128xbf16, #tpu.memory_space<vmem>>, vector<256x128xbf16>
    tpu.vector_store %arg4[%c0_11, %c0_12], %24 {strides = array<i32>} : memref<256x128xbf16, #tpu.memory_space<vmem>>, vector<256x128xbf16>,
    return
  }
  func.func @transform_0(%arg0: i32) -> (i32, i32) {
    %c0_i32 = arith.constant 0 : i32
    %c0_i32_0 = arith.constant 0 : i32
    return %arg0, %c0_i32 : i32, i32
  }
  func.func @transform_1(%arg0: i32) -> (i32, i32) {
    %c0_i32 = arith.constant 0 : i32
    %c0_i32_0 = arith.constant 0 : i32
    %c0_i32_1 = arith.constant 0 : i32
    return %c0_i32, %c0_i32_0 : i32, i32
  }
  func.func @transform_2(%arg0: i32) -> (i32, i32) {
    %c0_i32 = arith.constant 0 : i32
    %c0_i32_0 = arith.constant 0 : i32
    %c0_i32_1 = arith.constant 0 : i32
    return %c0_i32, %c0_i32_0 : i32, i32
  }
  func.func @transform_3(%arg0: i32) -> (i32, i32) {
    %c0_i32 = arith.constant 0 : i32
    %c0_i32_0 = arith.constant 0 : i32
    return %arg0, %c0_i32 : i32, i32
  }
}

module attributes {stable_mosaic.version = 11 : i64} {
  func.func @_fused_conv_kernel(%arg0: i32, %arg1: memref<64x640xbf16, #tpu.memory_space<vmem>>, %arg2: memref<640x128xbf16, #tpu.memory_space<vmem>>, %arg3: memref<1x128xf32, #tpu.memory_space<vmem>>, %arg4: memref<64x128xbf16, #tpu.memory_space<vmem>>) attributes {dimension_semantics = [#tpu.dimension_semantics<parallel>], iteration_bounds = array<i64: 2>, scalar_prefetch = 0 : i64, scratch_operands = 0 : i64, tpu.core_type = #tpu.core_type<tc>, window_params = [{transform_indices = @transform_0, window_bounds = array<i64: 64, 640>}, {pipeline_mode = #tpu.pipeline_mode<synchronous>, transform_indices = @transform_1, window_bounds = array<i64: 640, 128>}, {pipeline_mode = #tpu.pipeline_mode<synchronous>, transform_indices = @transform_2, window_bounds = array<i64: 1, 128>}, {transform_indices = @transform_3, window_bounds = array<i64: 64, 128>}]} {
    %c0 = arith.constant 0 : index
    %c0_0 = arith.constant 0 : index
    %0 = vector.load %arg1[%c0, %c0_0] : memref<64x640xbf16, #tpu.memory_space<vmem>>, vector<64x640xbf16>
    %c0_1 = arith.constant 0 : index
    %c0_2 = arith.constant 0 : index
    %1 = vector.load %arg2[%c0_1, %c0_2] : memref<640x128xbf16, #tpu.memory_space<vmem>>, vector<640x128xbf16>
    %cst = arith.constant dense<0.000000e+00> : vector<64x128xf32>
    %2 = tpu.matmul %0, %1, %cst {dimension_numbers = #tpu.dot_dimension_numbers<[1], [0], [0], [1], [0, 0, 1, 1], [], []>} : vector<64x640xbf16>, vector<640x128xbf16>, vector<64x128xf32> -> vector<64x128xf32>
    %c0_3 = arith.constant 0 : index
    %c0_4 = arith.constant 0 : index
    %3 = vector.load %arg3[%c0_3, %c0_4] : memref<1x128xf32, #tpu.memory_space<vmem>>, vector<1x128xf32>
    %4 = vector.broadcast %3 : vector<1x128xf32> to vector<64x128xf32>
    %5 = arith.addf %2, %4 : vector<64x128xf32>
    %cst_5 = arith.constant dense<0.000000e+00> : vector<128xf32>
    %6 = vector.multi_reduction <add>, %5, %cst_5 [0] : vector<64x128xf32> to vector<128xf32>
    %7 = vector.shape_cast %6 : vector<128xf32> to vector<1x128xf32>
    %cst_6 = arith.constant 6.400000e+01 : f32
    %8 = vector.broadcast %cst_6 : f32 to vector<1x128xf32>
    %9 = arith.divf %7, %8 : vector<1x128xf32>
    %10 = vector.broadcast %9 : vector<1x128xf32> to vector<64x128xf32>
    %11 = arith.subf %5, %10 : vector<64x128xf32>
    %12 = arith.mulf %11, %11 : vector<64x128xf32>
    %cst_7 = arith.constant dense<0.000000e+00> : vector<128xf32>
    %13 = vector.multi_reduction <add>, %12, %cst_7 [0] : vector<64x128xf32> to vector<128xf32>
    %14 = vector.shape_cast %13 : vector<128xf32> to vector<1x128xf32>
    %cst_8 = arith.constant 6.400000e+01 : f32
    %15 = vector.broadcast %cst_8 : f32 to vector<1x128xf32>
    %16 = arith.divf %14, %15 : vector<1x128xf32>
    %cst_9 = arith.constant 9.99999974E-6 : f32
    %17 = vector.broadcast %cst_9 : f32 to vector<1x128xf32>
    %18 = arith.addf %16, %17 : vector<1x128xf32>
    %19 = math.rsqrt %18 : vector<1x128xf32>
    %20 = vector.broadcast %19 : vector<1x128xf32> to vector<64x128xf32>
    %21 = arith.mulf %11, %20 : vector<64x128xf32>
    %cst_10 = arith.constant 0.000000e+00 : f32
    %22 = vector.broadcast %cst_10 : f32 to vector<64x128xf32>
    %23 = arith.maximumf %21, %22 : vector<64x128xf32>
    %24 = arith.truncf %23 : vector<64x128xf32> to vector<64x128xbf16>
    %c0_11 = arith.constant 0 : index
    %c0_12 = arith.constant 0 : index
    %25 = vector.load %arg4[%c0_11, %c0_12] : memref<64x128xbf16, #tpu.memory_space<vmem>>, vector<64x128xbf16>
    tpu.vector_store %arg4[%c0_11, %c0_12], %24 {strides = array<i32>} : memref<64x128xbf16, #tpu.memory_space<vmem>>, vector<64x128xbf16>,
    return
  }
  func.func @transform_0(%arg0: i32) -> (i32, i32) {
    %c0_i32 = arith.constant 0 : i32
    %c0_i32_0 = arith.constant 0 : i32
    return %arg0, %c0_i32 : i32, i32
  }
  func.func @transform_1(%arg0: i32) -> (i32, i32) {
    %c0_i32 = arith.constant 0 : i32
    %c0_i32_0 = arith.constant 0 : i32
    %c0_i32_1 = arith.constant 0 : i32
    return %c0_i32, %c0_i32_0 : i32, i32
  }
  func.func @transform_2(%arg0: i32) -> (i32, i32) {
    %c0_i32 = arith.constant 0 : i32
    %c0_i32_0 = arith.constant 0 : i32
    %c0_i32_1 = arith.constant 0 : i32
    return %c0_i32, %c0_i32_0 : i32, i32
  }
  func.func @transform_3(%arg0: i32) -> (i32, i32) {
    %c0_i32 = arith.constant 0 : i32
    %c0_i32_0 = arith.constant 0 : i32
    return %arg0, %c0_i32 : i32, i32
  }
}

module attributes {stable_mosaic.version = 11 : i64} {
  func.func @_fused_conv_kernel(%arg0: i32, %arg1: memref<16x1152xbf16, #tpu.memory_space<vmem>>, %arg2: memref<1152x256xbf16, #tpu.memory_space<vmem>>, %arg3: memref<1x256xf32, #tpu.memory_space<vmem>>, %arg4: memref<16x256xbf16, #tpu.memory_space<vmem>>) attributes {dimension_semantics = [#tpu.dimension_semantics<parallel>], iteration_bounds = array<i64: 2>, scalar_prefetch = 0 : i64, scratch_operands = 0 : i64, tpu.core_type = #tpu.core_type<tc>, window_params = [{transform_indices = @transform_0, window_bounds = array<i64: 16, 1152>}, {pipeline_mode = #tpu.pipeline_mode<synchronous>, transform_indices = @transform_1, window_bounds = array<i64: 1152, 256>}, {pipeline_mode = #tpu.pipeline_mode<synchronous>, transform_indices = @transform_2, window_bounds = array<i64: 1, 256>}, {transform_indices = @transform_3, window_bounds = array<i64: 16, 256>}]} {
    %c0 = arith.constant 0 : index
    %c0_0 = arith.constant 0 : index
    %0 = vector.load %arg1[%c0, %c0_0] : memref<16x1152xbf16, #tpu.memory_space<vmem>>, vector<16x1152xbf16>
    %c0_1 = arith.constant 0 : index
    %c0_2 = arith.constant 0 : index
    %1 = vector.load %arg2[%c0_1, %c0_2] : memref<1152x256xbf16, #tpu.memory_space<vmem>>, vector<1152x256xbf16>
    %cst = arith.constant dense<0.000000e+00> : vector<16x256xf32>
    %2 = tpu.matmul %0, %1, %cst {dimension_numbers = #tpu.dot_dimension_numbers<[1], [0], [0], [1], [0, 0, 1, 1], [], []>} : vector<16x1152xbf16>, vector<1152x256xbf16>, vector<16x256xf32> -> vector<16x256xf32>
    %c0_3 = arith.constant 0 : index
    %c0_4 = arith.constant 0 : index
    %3 = vector.load %arg3[%c0_3, %c0_4] : memref<1x256xf32, #tpu.memory_space<vmem>>, vector<1x256xf32>
    %4 = vector.broadcast %3 : vector<1x256xf32> to vector<16x256xf32>
    %5 = arith.addf %2, %4 : vector<16x256xf32>
    %cst_5 = arith.constant dense<0.000000e+00> : vector<256xf32>
    %6 = vector.multi_reduction <add>, %5, %cst_5 [0] : vector<16x256xf32> to vector<256xf32>
    %7 = vector.shape_cast %6 : vector<256xf32> to vector<1x256xf32>
    %cst_6 = arith.constant 1.600000e+01 : f32
    %8 = vector.broadcast %cst_6 : f32 to vector<1x256xf32>
    %9 = arith.divf %7, %8 : vector<1x256xf32>
    %10 = vector.broadcast %9 : vector<1x256xf32> to vector<16x256xf32>
    %11 = arith.subf %5, %10 : vector<16x256xf32>
    %12 = arith.mulf %11, %11 : vector<16x256xf32>
    %cst_7 = arith.constant dense<0.000000e+00> : vector<256xf32>
    %13 = vector.multi_reduction <add>, %12, %cst_7 [0] : vector<16x256xf32> to vector<256xf32>
    %14 = vector.shape_cast %13 : vector<256xf32> to vector<1x256xf32>
    %cst_8 = arith.constant 1.600000e+01 : f32
    %15 = vector.broadcast %cst_8 : f32 to vector<1x256xf32>
    %16 = arith.divf %14, %15 : vector<1x256xf32>
    %cst_9 = arith.constant 9.99999974E-6 : f32
    %17 = vector.broadcast %cst_9 : f32 to vector<1x256xf32>
    %18 = arith.addf %16, %17 : vector<1x256xf32>
    %19 = math.rsqrt %18 : vector<1x256xf32>
    %20 = vector.broadcast %19 : vector<1x256xf32> to vector<16x256xf32>
    %21 = arith.mulf %11, %20 : vector<16x256xf32>
    %cst_10 = arith.constant 0.000000e+00 : f32
    %22 = vector.broadcast %cst_10 : f32 to vector<16x256xf32>
    %23 = arith.maximumf %21, %22 : vector<16x256xf32>
    %24 = arith.truncf %23 : vector<16x256xf32> to vector<16x256xbf16>
    %c0_11 = arith.constant 0 : index
    %c0_12 = arith.constant 0 : index
    %25 = vector.load %arg4[%c0_11, %c0_12] : memref<16x256xbf16, #tpu.memory_space<vmem>>, vector<16x256xbf16>
    tpu.vector_store %arg4[%c0_11, %c0_12], %24 {strides = array<i32>} : memref<16x256xbf16, #tpu.memory_space<vmem>>, vector<16x256xbf16>,
    return
  }
  func.func @transform_0(%arg0: i32) -> (i32, i32) {
    %c0_i32 = arith.constant 0 : i32
    %c0_i32_0 = arith.constant 0 : i32
    return %arg0, %c0_i32 : i32, i32
  }
  func.func @transform_1(%arg0: i32) -> (i32, i32) {
    %c0_i32 = arith.constant 0 : i32
    %c0_i32_0 = arith.constant 0 : i32
    %c0_i32_1 = arith.constant 0 : i32
    return %c0_i32, %c0_i32_0 : i32, i32
  }
  func.func @transform_2(%arg0: i32) -> (i32, i32) {
    %c0_i32 = arith.constant 0 : i32
    %c0_i32_0 = arith.constant 0 : i32
    %c0_i32_1 = arith.constant 0 : i32
    return %c0_i32, %c0_i32_0 : i32, i32
  }
  func.func @transform_3(%arg0: i32) -> (i32, i32) {
    %c0_i32 = arith.constant 0 : i32
    %c0_i32_0 = arith.constant 0 : i32
    return %arg0, %c0_i32 : i32, i32
  }
}

module attributes {stable_mosaic.version = 11 : i64} {
  func.func @_fused_conv_kernel(%arg0: i32, %arg1: memref<16x2304xbf16, #tpu.memory_space<vmem>>, %arg2: memref<2304x256xbf16, #tpu.memory_space<vmem>>, %arg3: memref<1x256xf32, #tpu.memory_space<vmem>>, %arg4: memref<16x256xbf16, #tpu.memory_space<vmem>>, %arg5: memref<16x256xbf16, #tpu.memory_space<vmem>>) attributes {dimension_semantics = [#tpu.dimension_semantics<parallel>], iteration_bounds = array<i64: 2>, scalar_prefetch = 0 : i64, scratch_operands = 0 : i64, tpu.core_type = #tpu.core_type<tc>, window_params = [{transform_indices = @transform_0, window_bounds = array<i64: 16, 2304>}, {pipeline_mode = #tpu.pipeline_mode<synchronous>, transform_indices = @transform_1, window_bounds = array<i64: 2304, 256>}, {pipeline_mode = #tpu.pipeline_mode<synchronous>, transform_indices = @transform_2, window_bounds = array<i64: 1, 256>}, {transform_indices = @transform_3, window_bounds = array<i64: 16, 256>}, {transform_indices = @transform_4, window_bounds = array<i64: 16, 256>}]} {
    %c0 = arith.constant 0 : index
    %c0_0 = arith.constant 0 : index
    %0 = vector.load %arg1[%c0, %c0_0] : memref<16x2304xbf16, #tpu.memory_space<vmem>>, vector<16x2304xbf16>
    %c0_1 = arith.constant 0 : index
    %c0_2 = arith.constant 0 : index
    %1 = vector.load %arg2[%c0_1, %c0_2] : memref<2304x256xbf16, #tpu.memory_space<vmem>>, vector<2304x256xbf16>
    %cst = arith.constant dense<0.000000e+00> : vector<16x256xf32>
    %2 = tpu.matmul %0, %1, %cst {dimension_numbers = #tpu.dot_dimension_numbers<[1], [0], [0], [1], [0, 0, 1, 1], [], []>} : vector<16x2304xbf16>, vector<2304x256xbf16>, vector<16x256xf32> -> vector<16x256xf32>
    %c0_3 = arith.constant 0 : index
    %c0_4 = arith.constant 0 : index
    %3 = vector.load %arg3[%c0_3, %c0_4] : memref<1x256xf32, #tpu.memory_space<vmem>>, vector<1x256xf32>
    %4 = vector.broadcast %3 : vector<1x256xf32> to vector<16x256xf32>
    %5 = arith.addf %2, %4 : vector<16x256xf32>
    %cst_5 = arith.constant dense<0.000000e+00> : vector<256xf32>
    %6 = vector.multi_reduction <add>, %5, %cst_5 [0] : vector<16x256xf32> to vector<256xf32>
    %7 = vector.shape_cast %6 : vector<256xf32> to vector<1x256xf32>
    %cst_6 = arith.constant 1.600000e+01 : f32
    %8 = vector.broadcast %cst_6 : f32 to vector<1x256xf32>
    %9 = arith.divf %7, %8 : vector<1x256xf32>
    %10 = vector.broadcast %9 : vector<1x256xf32> to vector<16x256xf32>
    %11 = arith.subf %5, %10 : vector<16x256xf32>
    %12 = arith.mulf %11, %11 : vector<16x256xf32>
    %cst_7 = arith.constant dense<0.000000e+00> : vector<256xf32>
    %13 = vector.multi_reduction <add>, %12, %cst_7 [0] : vector<16x256xf32> to vector<256xf32>
    %14 = vector.shape_cast %13 : vector<256xf32> to vector<1x256xf32>
    %cst_8 = arith.constant 1.600000e+01 : f32
    %15 = vector.broadcast %cst_8 : f32 to vector<1x256xf32>
    %16 = arith.divf %14, %15 : vector<1x256xf32>
    %cst_9 = arith.constant 9.99999974E-6 : f32
    %17 = vector.broadcast %cst_9 : f32 to vector<1x256xf32>
    %18 = arith.addf %16, %17 : vector<1x256xf32>
    %19 = math.rsqrt %18 : vector<1x256xf32>
    %20 = vector.broadcast %19 : vector<1x256xf32> to vector<16x256xf32>
    %21 = arith.mulf %11, %20 : vector<16x256xf32>
    %c0_10 = arith.constant 0 : index
    %c0_11 = arith.constant 0 : index
    %22 = vector.load %arg4[%c0_10, %c0_11] : memref<16x256xbf16, #tpu.memory_space<vmem>>, vector<16x256xbf16>
    %23 = arith.extf %22 : vector<16x256xbf16> to vector<16x256xf32>
    %24 = arith.addf %21, %23 : vector<16x256xf32>
    %25 = arith.truncf %24 : vector<16x256xf32> to vector<16x256xbf16>
    %c0_12 = arith.constant 0 : index
    %c0_13 = arith.constant 0 : index
    %26 = vector.load %arg5[%c0_12, %c0_13] : memref<16x256xbf16, #tpu.memory_space<vmem>>, vector<16x256xbf16>
    tpu.vector_store %arg5[%c0_12, %c0_13], %25 {strides = array<i32>} : memref<16x256xbf16, #tpu.memory_space<vmem>>, vector<16x256xbf16>,
    return
  }
  func.func @transform_0(%arg0: i32) -> (i32, i32) {
    %c0_i32 = arith.constant 0 : i32
    %c0_i32_0 = arith.constant 0 : i32
    return %arg0, %c0_i32 : i32, i32
  }
  func.func @transform_1(%arg0: i32) -> (i32, i32) {
    %c0_i32 = arith.constant 0 : i32
    %c0_i32_0 = arith.constant 0 : i32
    %c0_i32_1 = arith.constant 0 : i32
    return %c0_i32, %c0_i32_0 : i32, i32
  }
  func.func @transform_2(%arg0: i32) -> (i32, i32) {
    %c0_i32 = arith.constant 0 : i32
    %c0_i32_0 = arith.constant 0 : i32
    %c0_i32_1 = arith.constant 0 : i32
    return %c0_i32, %c0_i32_0 : i32, i32
  }
  func.func @transform_3(%arg0: i32) -> (i32, i32) {
    %c0_i32 = arith.constant 0 : i32
    %c0_i32_0 = arith.constant 0 : i32
    return %arg0, %c0_i32 : i32, i32
  }
  func.func @transform_4(%arg0: i32) -> (i32, i32) {
    %c0_i32 = arith.constant 0 : i32
    %c0_i32_0 = arith.constant 0 : i32
    return %arg0, %c0_i32 : i32, i32
  }
}

module attributes {stable_mosaic.version = 11 : i64} {
  func.func @_fused_conv_kernel(%arg0: i32, %arg1: memref<16x2304xbf16, #tpu.memory_space<vmem>>, %arg2: memref<2304x256xbf16, #tpu.memory_space<vmem>>, %arg3: memref<1x256xf32, #tpu.memory_space<vmem>>, %arg4: memref<16x256xbf16, #tpu.memory_space<vmem>>) attributes {dimension_semantics = [#tpu.dimension_semantics<parallel>], iteration_bounds = array<i64: 2>, scalar_prefetch = 0 : i64, scratch_operands = 0 : i64, tpu.core_type = #tpu.core_type<tc>, window_params = [{transform_indices = @transform_0, window_bounds = array<i64: 16, 2304>}, {pipeline_mode = #tpu.pipeline_mode<synchronous>, transform_indices = @transform_1, window_bounds = array<i64: 2304, 256>}, {pipeline_mode = #tpu.pipeline_mode<synchronous>, transform_indices = @transform_2, window_bounds = array<i64: 1, 256>}, {transform_indices = @transform_3, window_bounds = array<i64: 16, 256>}]} {
    %c0 = arith.constant 0 : index
    %c0_0 = arith.constant 0 : index
    %0 = vector.load %arg1[%c0, %c0_0] : memref<16x2304xbf16, #tpu.memory_space<vmem>>, vector<16x2304xbf16>
    %c0_1 = arith.constant 0 : index
    %c0_2 = arith.constant 0 : index
    %1 = vector.load %arg2[%c0_1, %c0_2] : memref<2304x256xbf16, #tpu.memory_space<vmem>>, vector<2304x256xbf16>
    %cst = arith.constant dense<0.000000e+00> : vector<16x256xf32>
    %2 = tpu.matmul %0, %1, %cst {dimension_numbers = #tpu.dot_dimension_numbers<[1], [0], [0], [1], [0, 0, 1, 1], [], []>} : vector<16x2304xbf16>, vector<2304x256xbf16>, vector<16x256xf32> -> vector<16x256xf32>
    %c0_3 = arith.constant 0 : index
    %c0_4 = arith.constant 0 : index
    %3 = vector.load %arg3[%c0_3, %c0_4] : memref<1x256xf32, #tpu.memory_space<vmem>>, vector<1x256xf32>
    %4 = vector.broadcast %3 : vector<1x256xf32> to vector<16x256xf32>
    %5 = arith.addf %2, %4 : vector<16x256xf32>
    %cst_5 = arith.constant dense<0.000000e+00> : vector<256xf32>
    %6 = vector.multi_reduction <add>, %5, %cst_5 [0] : vector<16x256xf32> to vector<256xf32>
    %7 = vector.shape_cast %6 : vector<256xf32> to vector<1x256xf32>
    %cst_6 = arith.constant 1.600000e+01 : f32
    %8 = vector.broadcast %cst_6 : f32 to vector<1x256xf32>
    %9 = arith.divf %7, %8 : vector<1x256xf32>
    %10 = vector.broadcast %9 : vector<1x256xf32> to vector<16x256xf32>
    %11 = arith.subf %5, %10 : vector<16x256xf32>
    %12 = arith.mulf %11, %11 : vector<16x256xf32>
    %cst_7 = arith.constant dense<0.000000e+00> : vector<256xf32>
    %13 = vector.multi_reduction <add>, %12, %cst_7 [0] : vector<16x256xf32> to vector<256xf32>
    %14 = vector.shape_cast %13 : vector<256xf32> to vector<1x256xf32>
    %cst_8 = arith.constant 1.600000e+01 : f32
    %15 = vector.broadcast %cst_8 : f32 to vector<1x256xf32>
    %16 = arith.divf %14, %15 : vector<1x256xf32>
    %cst_9 = arith.constant 9.99999974E-6 : f32
    %17 = vector.broadcast %cst_9 : f32 to vector<1x256xf32>
    %18 = arith.addf %16, %17 : vector<1x256xf32>
    %19 = math.rsqrt %18 : vector<1x256xf32>
    %20 = vector.broadcast %19 : vector<1x256xf32> to vector<16x256xf32>
    %21 = arith.mulf %11, %20 : vector<16x256xf32>
    %cst_10 = arith.constant 0.000000e+00 : f32
    %22 = vector.broadcast %cst_10 : f32 to vector<16x256xf32>
    %23 = arith.maximumf %21, %22 : vector<16x256xf32>
    %24 = arith.truncf %23 : vector<16x256xf32> to vector<16x256xbf16>
    %c0_11 = arith.constant 0 : index
    %c0_12 = arith.constant 0 : index
    %25 = vector.load %arg4[%c0_11, %c0_12] : memref<16x256xbf16, #tpu.memory_space<vmem>>, vector<16x256xbf16>
    tpu.vector_store %arg4[%c0_11, %c0_12], %24 {strides = array<i32>} : memref<16x256xbf16, #tpu.memory_space<vmem>>, vector<16x256xbf16>,
    return
  }
  func.func @transform_0(%arg0: i32) -> (i32, i32) {
    %c0_i32 = arith.constant 0 : i32
    %c0_i32_0 = arith.constant 0 : i32
    return %arg0, %c0_i32 : i32, i32
  }
  func.func @transform_1(%arg0: i32) -> (i32, i32) {
    %c0_i32 = arith.constant 0 : i32
    %c0_i32_0 = arith.constant 0 : i32
    %c0_i32_1 = arith.constant 0 : i32
    return %c0_i32, %c0_i32_0 : i32, i32
  }
  func.func @transform_2(%arg0: i32) -> (i32, i32) {
    %c0_i32 = arith.constant 0 : i32
    %c0_i32_0 = arith.constant 0 : i32
    %c0_i32_1 = arith.constant 0 : i32
    return %c0_i32, %c0_i32_0 : i32, i32
  }
  func.func @transform_3(%arg0: i32) -> (i32, i32) {
    %c0_i32 = arith.constant 0 : i32
    %c0_i32_0 = arith.constant 0 : i32
    return %arg0, %c0_i32 : i32, i32
  }
}

module attributes {stable_mosaic.version = 11 : i64} {
  func.func @_fused_conv_kernel(%arg0: i32, %arg1: memref<16x1024xbf16, #tpu.memory_space<vmem>>, %arg2: memref<1024x512xbf16, #tpu.memory_space<vmem>>, %arg3: memref<1x512xf32, #tpu.memory_space<vmem>>, %arg4: memref<16x512xbf16, #tpu.memory_space<vmem>>) attributes {dimension_semantics = [#tpu.dimension_semantics<parallel>], iteration_bounds = array<i64: 2>, scalar_prefetch = 0 : i64, scratch_operands = 0 : i64, tpu.core_type = #tpu.core_type<tc>, window_params = [{transform_indices = @transform_0, window_bounds = array<i64: 16, 1024>}, {pipeline_mode = #tpu.pipeline_mode<synchronous>, transform_indices = @transform_1, window_bounds = array<i64: 1024, 512>}, {pipeline_mode = #tpu.pipeline_mode<synchronous>, transform_indices = @transform_2, window_bounds = array<i64: 1, 512>}, {transform_indices = @transform_3, window_bounds = array<i64: 16, 512>}]} {
    %c0 = arith.constant 0 : index
    %c0_0 = arith.constant 0 : index
    %0 = vector.load %arg1[%c0, %c0_0] : memref<16x1024xbf16, #tpu.memory_space<vmem>>, vector<16x1024xbf16>
    %c0_1 = arith.constant 0 : index
    %c0_2 = arith.constant 0 : index
    %1 = vector.load %arg2[%c0_1, %c0_2] : memref<1024x512xbf16, #tpu.memory_space<vmem>>, vector<1024x512xbf16>
    %cst = arith.constant dense<0.000000e+00> : vector<16x512xf32>
    %2 = tpu.matmul %0, %1, %cst {dimension_numbers = #tpu.dot_dimension_numbers<[1], [0], [0], [1], [0, 0, 1, 1], [], []>} : vector<16x1024xbf16>, vector<1024x512xbf16>, vector<16x512xf32> -> vector<16x512xf32>
    %c0_3 = arith.constant 0 : index
    %c0_4 = arith.constant 0 : index
    %3 = vector.load %arg3[%c0_3, %c0_4] : memref<1x512xf32, #tpu.memory_space<vmem>>, vector<1x512xf32>
    %4 = vector.broadcast %3 : vector<1x512xf32> to vector<16x512xf32>
    %5 = arith.addf %2, %4 : vector<16x512xf32>
    %cst_5 = arith.constant dense<0.000000e+00> : vector<512xf32>
    %6 = vector.multi_reduction <add>, %5, %cst_5 [0] : vector<16x512xf32> to vector<512xf32>
    %7 = vector.shape_cast %6 : vector<512xf32> to vector<1x512xf32>
    %8 = vector.extract_strided_slice %7 {offsets = [0, 0], sizes = [1, 128], strides = [1, 1]} : vector<1x512xf32> to vector<1x128xf32>
    %9 = vector.extract_strided_slice %7 {offsets = [0, 128], sizes = [1, 128], strides = [1, 1]} : vector<1x512xf32> to vector<1x128xf32>
    %10 = arith.addf %8, %9 : vector<1x128xf32>
    %11 = vector.extract_strided_slice %7 {offsets = [0, 256], sizes = [1, 128], strides = [1, 1]} : vector<1x512xf32> to vector<1x128xf32>
    %12 = arith.addf %10, %11 : vector<1x128xf32>
    %13 = vector.extract_strided_slice %7 {offsets = [0, 384], sizes = [1, 128], strides = [1, 1]} : vector<1x512xf32> to vector<1x128xf32>
    %14 = arith.addf %12, %13 : vector<1x128xf32>
    %cst_6 = arith.constant 6.400000e+01 : f32
    %15 = vector.broadcast %cst_6 : f32 to vector<1x128xf32>
    %16 = arith.divf %14, %15 : vector<1x128xf32>
    %17 = tpu.concatenate %16, %16, %16, %16 in 1 : vector<1x128xf32>, vector<1x128xf32>, vector<1x128xf32>, vector<1x128xf32> -> vector<1x512xf32>
    %18 = vector.broadcast %17 : vector<1x512xf32> to vector<16x512xf32>
    %19 = arith.subf %5, %18 : vector<16x512xf32>
    %20 = arith.mulf %19, %19 : vector<16x512xf32>
    %cst_7 = arith.constant dense<0.000000e+00> : vector<512xf32>
    %21 = vector.multi_reduction <add>, %20, %cst_7 [0] : vector<16x512xf32> to vector<512xf32>
    %22 = vector.shape_cast %21 : vector<512xf32> to vector<1x512xf32>
    %23 = vector.extract_strided_slice %22 {offsets = [0, 0], sizes = [1, 128], strides = [1, 1]} : vector<1x512xf32> to vector<1x128xf32>
    %24 = vector.extract_strided_slice %22 {offsets = [0, 128], sizes = [1, 128], strides = [1, 1]} : vector<1x512xf32> to vector<1x128xf32>
    %25 = arith.addf %23, %24 : vector<1x128xf32>
    %26 = vector.extract_strided_slice %22 {offsets = [0, 256], sizes = [1, 128], strides = [1, 1]} : vector<1x512xf32> to vector<1x128xf32>
    %27 = arith.addf %25, %26 : vector<1x128xf32>
    %28 = vector.extract_strided_slice %22 {offsets = [0, 384], sizes = [1, 128], strides = [1, 1]} : vector<1x512xf32> to vector<1x128xf32>
    %29 = arith.addf %27, %28 : vector<1x128xf32>
    %cst_8 = arith.constant 6.400000e+01 : f32
    %30 = vector.broadcast %cst_8 : f32 to vector<1x128xf32>
    %31 = arith.divf %29, %30 : vector<1x128xf32>
    %32 = tpu.concatenate %31, %31, %31, %31 in 1 : vector<1x128xf32>, vector<1x128xf32>, vector<1x128xf32>, vector<1x128xf32> -> vector<1x512xf32>
    %cst_9 = arith.constant 9.99999974E-6 : f32
    %33 = vector.broadcast %cst_9 : f32 to vector<1x512xf32>
    %34 = arith.addf %32, %33 : vector<1x512xf32>
    %35 = math.rsqrt %34 : vector<1x512xf32>
    %36 = vector.broadcast %35 : vector<1x512xf32> to vector<16x512xf32>
    %37 = arith.mulf %19, %36 : vector<16x512xf32>
    %cst_10 = arith.constant 0.000000e+00 : f32
    %38 = vector.broadcast %cst_10 : f32 to vector<16x512xf32>
    %39 = arith.maximumf %37, %38 : vector<16x512xf32>
    %40 = arith.truncf %39 : vector<16x512xf32> to vector<16x512xbf16>
    %c0_11 = arith.constant 0 : index
    %c0_12 = arith.constant 0 : index
    %41 = vector.load %arg4[%c0_11, %c0_12] : memref<16x512xbf16, #tpu.memory_space<vmem>>, vector<16x512xbf16>
    tpu.vector_store %arg4[%c0_11, %c0_12], %40 {strides = array<i32>} : memref<16x512xbf16, #tpu.memory_space<vmem>>, vector<16x512xbf16>,
    return
  }
  func.func @transform_0(%arg0: i32) -> (i32, i32) {
    %c0_i32 = arith.constant 0 : i32
    %c0_i32_0 = arith.constant 0 : i32
    return %arg0, %c0_i32 : i32, i32
  }
  func.func @transform_1(%arg0: i32) -> (i32, i32) {
    %c0_i32 = arith.constant 0 : i32
    %c0_i32_0 = arith.constant 0 : i32
    %c0_i32_1 = arith.constant 0 : i32
    return %c0_i32, %c0_i32_0 : i32, i32
  }
  func.func @transform_2(%arg0: i32) -> (i32, i32) {
    %c0_i32 = arith.constant 0 : i32
    %c0_i32_0 = arith.constant 0 : i32
    %c0_i32_1 = arith.constant 0 : i32
    return %c0_i32, %c0_i32_0 : i32, i32
  }
  func.func @transform_3(%arg0: i32) -> (i32, i32) {
    %c0_i32 = arith.constant 0 : i32
    %c0_i32_0 = arith.constant 0 : i32
    return %arg0, %c0_i32 : i32, i32
  }
}

module attributes {stable_mosaic.version = 11 : i64} {
  func.func @_fused_conv_kernel(%arg0: i32, %arg1: memref<64x512xbf16, #tpu.memory_space<vmem>>, %arg2: memref<512x256xbf16, #tpu.memory_space<vmem>>, %arg3: memref<1x256xf32, #tpu.memory_space<vmem>>, %arg4: memref<64x256xbf16, #tpu.memory_space<vmem>>) attributes {dimension_semantics = [#tpu.dimension_semantics<parallel>], iteration_bounds = array<i64: 2>, scalar_prefetch = 0 : i64, scratch_operands = 0 : i64, tpu.core_type = #tpu.core_type<tc>, window_params = [{transform_indices = @transform_0, window_bounds = array<i64: 64, 512>}, {pipeline_mode = #tpu.pipeline_mode<synchronous>, transform_indices = @transform_1, window_bounds = array<i64: 512, 256>}, {pipeline_mode = #tpu.pipeline_mode<synchronous>, transform_indices = @transform_2, window_bounds = array<i64: 1, 256>}, {transform_indices = @transform_3, window_bounds = array<i64: 64, 256>}]} {
    %c0 = arith.constant 0 : index
    %c0_0 = arith.constant 0 : index
    %0 = vector.load %arg1[%c0, %c0_0] : memref<64x512xbf16, #tpu.memory_space<vmem>>, vector<64x512xbf16>
    %c0_1 = arith.constant 0 : index
    %c0_2 = arith.constant 0 : index
    %1 = vector.load %arg2[%c0_1, %c0_2] : memref<512x256xbf16, #tpu.memory_space<vmem>>, vector<512x256xbf16>
    %cst = arith.constant dense<0.000000e+00> : vector<64x256xf32>
    %2 = tpu.matmul %0, %1, %cst {dimension_numbers = #tpu.dot_dimension_numbers<[1], [0], [0], [1], [0, 0, 1, 1], [], []>} : vector<64x512xbf16>, vector<512x256xbf16>, vector<64x256xf32> -> vector<64x256xf32>
    %c0_3 = arith.constant 0 : index
    %c0_4 = arith.constant 0 : index
    %3 = vector.load %arg3[%c0_3, %c0_4] : memref<1x256xf32, #tpu.memory_space<vmem>>, vector<1x256xf32>
    %4 = vector.broadcast %3 : vector<1x256xf32> to vector<64x256xf32>
    %5 = arith.addf %2, %4 : vector<64x256xf32>
    %cst_5 = arith.constant dense<0.000000e+00> : vector<256xf32>
    %6 = vector.multi_reduction <add>, %5, %cst_5 [0] : vector<64x256xf32> to vector<256xf32>
    %7 = vector.shape_cast %6 : vector<256xf32> to vector<1x256xf32>
    %8 = vector.extract_strided_slice %7 {offsets = [0, 0], sizes = [1, 64], strides = [1, 1]} : vector<1x256xf32> to vector<1x64xf32>
    %9 = vector.extract_strided_slice %7 {offsets = [0, 64], sizes = [1, 64], strides = [1, 1]} : vector<1x256xf32> to vector<1x64xf32>
    %10 = arith.addf %8, %9 : vector<1x64xf32>
    %11 = vector.extract_strided_slice %7 {offsets = [0, 128], sizes = [1, 64], strides = [1, 1]} : vector<1x256xf32> to vector<1x64xf32>
    %12 = arith.addf %10, %11 : vector<1x64xf32>
    %13 = vector.extract_strided_slice %7 {offsets = [0, 192], sizes = [1, 64], strides = [1, 1]} : vector<1x256xf32> to vector<1x64xf32>
    %14 = arith.addf %12, %13 : vector<1x64xf32>
    %cst_6 = arith.constant 2.560000e+02 : f32
    %15 = vector.broadcast %cst_6 : f32 to vector<1x64xf32>
    %16 = arith.divf %14, %15 : vector<1x64xf32>
    %17 = tpu.concatenate %16, %16, %16, %16 in 1 : vector<1x64xf32>, vector<1x64xf32>, vector<1x64xf32>, vector<1x64xf32> -> vector<1x256xf32>
    %18 = vector.broadcast %17 : vector<1x256xf32> to vector<64x256xf32>
    %19 = arith.subf %5, %18 : vector<64x256xf32>
    %20 = arith.mulf %19, %19 : vector<64x256xf32>
    %cst_7 = arith.constant dense<0.000000e+00> : vector<256xf32>
    %21 = vector.multi_reduction <add>, %20, %cst_7 [0] : vector<64x256xf32> to vector<256xf32>
    %22 = vector.shape_cast %21 : vector<256xf32> to vector<1x256xf32>
    %23 = vector.extract_strided_slice %22 {offsets = [0, 0], sizes = [1, 64], strides = [1, 1]} : vector<1x256xf32> to vector<1x64xf32>
    %24 = vector.extract_strided_slice %22 {offsets = [0, 64], sizes = [1, 64], strides = [1, 1]} : vector<1x256xf32> to vector<1x64xf32>
    %25 = arith.addf %23, %24 : vector<1x64xf32>
    %26 = vector.extract_strided_slice %22 {offsets = [0, 128], sizes = [1, 64], strides = [1, 1]} : vector<1x256xf32> to vector<1x64xf32>
    %27 = arith.addf %25, %26 : vector<1x64xf32>
    %28 = vector.extract_strided_slice %22 {offsets = [0, 192], sizes = [1, 64], strides = [1, 1]} : vector<1x256xf32> to vector<1x64xf32>
    %29 = arith.addf %27, %28 : vector<1x64xf32>
    %cst_8 = arith.constant 2.560000e+02 : f32
    %30 = vector.broadcast %cst_8 : f32 to vector<1x64xf32>
    %31 = arith.divf %29, %30 : vector<1x64xf32>
    %32 = tpu.concatenate %31, %31, %31, %31 in 1 : vector<1x64xf32>, vector<1x64xf32>, vector<1x64xf32>, vector<1x64xf32> -> vector<1x256xf32>
    %cst_9 = arith.constant 9.99999974E-6 : f32
    %33 = vector.broadcast %cst_9 : f32 to vector<1x256xf32>
    %34 = arith.addf %32, %33 : vector<1x256xf32>
    %35 = math.rsqrt %34 : vector<1x256xf32>
    %36 = vector.broadcast %35 : vector<1x256xf32> to vector<64x256xf32>
    %37 = arith.mulf %19, %36 : vector<64x256xf32>
    %cst_10 = arith.constant 0.000000e+00 : f32
    %38 = vector.broadcast %cst_10 : f32 to vector<64x256xf32>
    %39 = arith.maximumf %37, %38 : vector<64x256xf32>
    %40 = arith.truncf %39 : vector<64x256xf32> to vector<64x256xbf16>
    %c0_11 = arith.constant 0 : index
    %c0_12 = arith.constant 0 : index
    %41 = vector.load %arg4[%c0_11, %c0_12] : memref<64x256xbf16, #tpu.memory_space<vmem>>, vector<64x256xbf16>
    tpu.vector_store %arg4[%c0_11, %c0_12], %40 {strides = array<i32>} : memref<64x256xbf16, #tpu.memory_space<vmem>>, vector<64x256xbf16>,
    return
  }
  func.func @transform_0(%arg0: i32) -> (i32, i32) {
    %c0_i32 = arith.constant 0 : i32
    %c0_i32_0 = arith.constant 0 : i32
    return %arg0, %c0_i32 : i32, i32
  }
  func.func @transform_1(%arg0: i32) -> (i32, i32) {
    %c0_i32 = arith.constant 0 : i32
    %c0_i32_0 = arith.constant 0 : i32
    %c0_i32_1 = arith.constant 0 : i32
    return %c0_i32, %c0_i32_0 : i32, i32
  }
  func.func @transform_2(%arg0: i32) -> (i32, i32) {
    %c0_i32 = arith.constant 0 : i32
    %c0_i32_0 = arith.constant 0 : i32
    %c0_i32_1 = arith.constant 0 : i32
    return %c0_i32, %c0_i32_0 : i32, i32
  }
  func.func @transform_3(%arg0: i32) -> (i32, i32) {
    %c0_i32 = arith.constant 0 : i32
    %c0_i32_0 = arith.constant 0 : i32
    return %arg0, %c0_i32 : i32, i32
  }
}

module attributes {stable_mosaic.version = 11 : i64} {
  func.func @_fused_conv_kernel(%arg0: i32, %arg1: memref<256x3200xbf16, #tpu.memory_space<vmem>>, %arg2: memref<3200x128xbf16, #tpu.memory_space<vmem>>, %arg3: memref<1x128xf32, #tpu.memory_space<vmem>>, %arg4: memref<256x128xf32, #tpu.memory_space<vmem>>) attributes {dimension_semantics = [#tpu.dimension_semantics<parallel>], iteration_bounds = array<i64: 2>, scalar_prefetch = 0 : i64, scratch_operands = 0 : i64, tpu.core_type = #tpu.core_type<tc>, window_params = [{transform_indices = @transform_0, window_bounds = array<i64: 256, 3200>}, {pipeline_mode = #tpu.pipeline_mode<synchronous>, transform_indices = @transform_1, window_bounds = array<i64: 3200, 128>}, {pipeline_mode = #tpu.pipeline_mode<synchronous>, transform_indices = @transform_2, window_bounds = array<i64: 1, 128>}, {transform_indices = @transform_3, window_bounds = array<i64: 256, 128>}]} {
    %c0 = arith.constant 0 : index
    %c0_0 = arith.constant 0 : index
    %0 = vector.load %arg1[%c0, %c0_0] : memref<256x3200xbf16, #tpu.memory_space<vmem>>, vector<256x3200xbf16>
    %c0_1 = arith.constant 0 : index
    %c0_2 = arith.constant 0 : index
    %1 = vector.load %arg2[%c0_1, %c0_2] : memref<3200x128xbf16, #tpu.memory_space<vmem>>, vector<3200x128xbf16>
    %cst = arith.constant dense<0.000000e+00> : vector<256x128xf32>
    %2 = tpu.matmul %0, %1, %cst {dimension_numbers = #tpu.dot_dimension_numbers<[1], [0], [0], [1], [0, 0, 1, 1], [], []>} : vector<256x3200xbf16>, vector<3200x128xbf16>, vector<256x128xf32> -> vector<256x128xf32>
    %c0_3 = arith.constant 0 : index
    %c0_4 = arith.constant 0 : index
    %3 = vector.load %arg3[%c0_3, %c0_4] : memref<1x128xf32, #tpu.memory_space<vmem>>, vector<1x128xf32>
    %4 = vector.broadcast %3 : vector<1x128xf32> to vector<256x128xf32>
    %5 = arith.addf %2, %4 : vector<256x128xf32>
    %6 = math.tanh %5 : vector<256x128xf32>
    %c0_5 = arith.constant 0 : index
    %c0_6 = arith.constant 0 : index
    %7 = vector.load %arg4[%c0_5, %c0_6] : memref<256x128xf32, #tpu.memory_space<vmem>>, vector<256x128xf32>
    tpu.vector_store %arg4[%c0_5, %c0_6], %6 {strides = array<i32>} : memref<256x128xf32, #tpu.memory_space<vmem>>, vector<256x128xf32>,
    return
  }
  func.func @transform_0(%arg0: i32) -> (i32, i32) {
    %c0_i32 = arith.constant 0 : i32
    %c0_i32_0 = arith.constant 0 : i32
    return %arg0, %c0_i32 : i32, i32
  }
  func.func @transform_1(%arg0: i32) -> (i32, i32) {
    %c0_i32 = arith.constant 0 : i32
    %c0_i32_0 = arith.constant 0 : i32
    %c0_i32_1 = arith.constant 0 : i32
    return %c0_i32, %c0_i32_0 : i32, i32
  }
  func.func @transform_2(%arg0: i32) -> (i32, i32) {
    %c0_i32 = arith.constant 0 : i32
    %c0_i32_0 = arith.constant 0 : i32
    %c0_i32_1 = arith.constant 0 : i32
    return %c0_i32, %c0_i32_0 : i32, i32
  }
  func.func @transform_3(%arg0: i32) -> (i32, i32) {
    %c0_i32 = arith.constant 0 : i32
    %c0_i32_0 = arith.constant 0 : i32
    return %arg0, %c0_i32 : i32, i32
  }
}

</mosaic_0001>

<bundles_post_ra>
// kernel: generator_forward.10
= control target key start
LH: loop header
LB: loop body
LE: loop exit
PB: predicated region body
PF: predicated region fallthrough
CT: control target
= control target key end

     0   :  { %s1540_s12 = smov 0   ;;  %s2084_s0 = inlined_call_operand.vmem [shape: bf16[512,256], index: 0, kind: input, shape index: {}]   ;;  %s2085_s1 = inlined_call_operand.vmem [shape: bf16[256,128], index: 1, kind: input, shape index: {}]   ;;  %s2086_s2 = inlined_call_operand.vmem [shape: f32[1,128], index: 2, kind: input, shape index: {}]   ;;  %s2087_s3 = inlined_call_operand.vmem [shape: bf16[512,128], index: 3, kind: output, shape index: {}]  }
   0x1 LB: > { %s1089_s13 = sadd.s32 4294967295, %s1518_s12   ;;  %p1093_p0 = scmp.ge.s32.totalorder %s1518_s12, 1  ;;  %s1518_s12 = sphi %s1540_s12, %s13_s12  }
   0x2   : > { %p139_p1 = scmp.lt.s32.totalorder %s1518_s12, 3 }
   0x4   : > { %p140_p2 = pnand %p1093_p0, %p139_p1 }
   0x5   : > { %s1094_s16 = sshll.u32 (!%p140_p2), %s1089_s13, 5 }
   0x6   : > { %143 = sbr.rel (%p140_p2) target bundleno = 473 (0x1d9), region = 32  ;;  %p165_p3 = scmp.lt.s32.totalorder (!%p140_p2), %s1094_s16, 63 }
   0xb   : > { %v1446_v0 = vld [vmem:[%s2085_s1 + $0x78] sm:$0xff]   ;;  %v1448_v2 = vld [vmem:[%s2085_s1 + $0x70] sm:$0xff]   ;;  %v1450_v4 = vld [vmem:[%s2085_s1 + $0x68] sm:$0xff]   ;;  %s2089_s16 = smov (!%p165_p3, %s1094_s16), 63 }
   0xc   : > { %v1447_v1 = vld [vmem:[%s2085_s1 + $0x38] sm:$0xff]   ;;  %1310 = vmatprep.subr.bf16.mxu0 %v1446_v0  ;;  %1422 = vmatprep.subr.bf16.mxu1 %v1446_v0  ;;  %v1449_v3 = vld [vmem:[%s2085_s1 + $0x30] sm:$0xff]   ;;  %v1451_v5 = vld [vmem:[%s2085_s1 + $0x28] sm:$0xff]   ;;  %s1182_s4 = sshll.u32 %s2089_s16, 3  ;;  %s1098_s28 = sshll.u32 %s2089_s16, 2 }
   0xd   : > { %1311 = vmatpush3.bf16.msra.mxu0 %v1447_v1  ;;  %1430 = vmatpush3.bf16.msra.mxu1 %v1447_v1  ;;  %v1452_v6 = vld [vmem:[%s2085_s1 + $0x60] sm:$0xff]   ;;  %v1454_v8 = vld [vmem:[%s2085_s1 + $0x58] sm:$0xff]   ;;  %s1581_s9 = scalar_lea.vmem %s2084_s0, %s1182_s4  ;;  %v1456_v10 = vld [vmem:[%s2085_s1 + $0x50] sm:$0xff]   ;;  %s2063_s4 = scalar_lea.vmem %s2087_s3, %s1098_s28 }
   0xe   : > { %1312 = vmatprep.subr.bf16.mxu0 %v1448_v2  ;;  %1423 = vmatprep.subr.bf16.mxu1 %v1448_v2  ;;  %v1453_v7 = vld [vmem:[%s2085_s1 + $0x20] sm:$0xff]   ;;  %v1455_v9 = vld [vmem:[%s2085_s1 + $0x18] sm:$0xff]   ;;  %v1457_v12 = vld [vmem:[%s2085_s1 + $0x10] sm:$0xff]  }
   0xf   : > { %v1464_v11 = vld [vmem:[%s1581_s9 + $0x4] ss:$8 sps:$4 sm:$0xff]   ;;  %v1462_v18 = vld [vmem:[%s1581_s9] ss:$8 sps:$4 sm:$0xff]   ;;  %v1465_v19 = vld [vmem:[%s1581_s9 + $0x14] ss:$8 sps:$4 sm:$0xff]  }
  0x10   : > { %537 = vmatprep.mubr.bf16.mxu0 %v1464_v11  ;;  %v1458_v13 = vld [vmem:[%s2085_s1 + $0x48] sm:$0xff]   ;;  %v1460_v16 = vld [vmem:[%s2085_s1 + $0x40] sm:$0xff]   ;;  %v1480_v21 = vld [vmem:[%s1581_s9 + $0x94] ss:$8 sps:$4 sm:$0xff]  }
  0x11   : > { %1313 = vmatpush3.bf16.msra.mxu0 %v1449_v3  ;;  %1431 = vmatpush3.bf16.msra.mxu1 %v1449_v3  ;;  %v1476_v14 = vld [vmem:[%s1581_s9 + $0x84] ss:$8 sps:$4 sm:$0xff]   ;;  %v1474_v20 = vld [vmem:[%s1581_s9 + $0x80] ss:$8 sps:$4 sm:$0xff]   ;;  %v1467_v22 = vld [vmem:[%s1581_s9 + $0x10] ss:$8 sps:$4 sm:$0xff]  }
  0x12   : > { %1314 = vmatprep.subr.bf16.mxu0 %v1450_v4  ;;  %1424 = vmatprep.subr.bf16.mxu1 %v1450_v4  ;;  %v1459_v15 = vld [vmem:[%s2085_s1 + $0x8] sm:$0xff]   ;;  %v1461_v17 = vld [vmem:[%s2085_s1] sm:$0xff]   ;;  %v1482_v24 = vld [vmem:[%s1581_s9 + $0x90] ss:$8 sps:$4 sm:$0xff]  }
  0x13   : > { %601 = vmatprep.mubr.bf16.mxu1 %v1476_v14  ;;  %v1468_v23 = vld [vmem:[%s1581_s9 + $0x24] ss:$8 sps:$4 sm:$0xff]   ;;  %v1470_v26 = vld [vmem:[%s1581_s9 + $0x20] ss:$8 sps:$4 sm:$0xff]   ;;  %v1471_v27 = vld [vmem:[%s1581_s9 + $0x34] ss:$8 sps:$4 sm:$0xff]  }
  0x14   : > { %v1486_v25 = vld [vmem:[%s1581_s9 + $0xa4] ss:$8 sps:$4 sm:$0xff]   ;;  %v1488_v28 = vld [vmem:[%s1581_s9 + $0xa0] ss:$8 sps:$4 sm:$0xff]   ;;  %v1492_v29 = vld [vmem:[%s1581_s9 + $0xb4] ss:$8 sps:$4 sm:$0xff]  }
  0x15   : > { %1315 = vmatpush3.bf16.msra.mxu0 %v1451_v5  ;;  %1432 = vmatpush3.bf16.msra.mxu1 %v1451_v5  ;;  %v1473_v30 = vld [vmem:[%s1581_s9 + $0x30] ss:$8 sps:$4 sm:$0xff]   ;;  %v1477_v31 = vld [vmem:[%s1581_s9 + $0x44] ss:$8 sps:$4 sm:$0xff]   ;;  %v1479_v34 = vld [vmem:[%s1581_s9 + $0x40] ss:$8 sps:$4 sm:$0xff]  }
  0x16   : > { %1316 = vmatprep.subr.bf16.mxu0 %v1452_v6  ;;  %1425 = vmatprep.subr.bf16.mxu1 %v1452_v6  ;;  %v1494_v32 = vld [vmem:[%s1581_s9 + $0xb0] ss:$8 sps:$4 sm:$0xff]   ;;  %v1498_v33 = vld [vmem:[%s1581_s9 + $0xc4] ss:$8 sps:$4 sm:$0xff]   ;;  %v1483_v35 = vld [vmem:[%s1581_s9 + $0x54] ss:$8 sps:$4 sm:$0xff]  }
  0x17   : > { %v1500_v36 = vld [vmem:[%s1581_s9 + $0xc0] ss:$8 sps:$4 sm:$0xff]   ;;  %v1501_v37 = vld [vmem:[%s1581_s9 + $0xd4] ss:$8 sps:$4 sm:$0xff]   ;;  %v1485_v38 = vld [vmem:[%s1581_s9 + $0x50] ss:$8 sps:$4 sm:$0xff]  }
  0x18   : > { %v1489_v39 = vld [vmem:[%s1581_s9 + $0x64] ss:$8 sps:$4 sm:$0xff]   ;;  %v1503_v40 = vld [vmem:[%s1581_s9 + $0xd0] ss:$8 sps:$4 sm:$0xff]   ;;  %v1491_v42 = vld [vmem:[%s1581_s9 + $0x60] ss:$8 sps:$4 sm:$0xff]  }
  0x19   : > { %1317 = vmatpush3.bf16.msra.mxu0 %v1453_v7  ;;  %1433 = vmatpush3.bf16.msra.mxu1 %v1453_v7  ;;  %v1504_v41 = vld [vmem:[%s1581_s9 + $0xe4] ss:$8 sps:$4 sm:$0xff]   ;;  %v1495_v43 = vld [vmem:[%s1581_s9 + $0x74] ss:$8 sps:$4 sm:$0xff]   ;;  %v1506_v44 = vld [vmem:[%s1581_s9 + $0xe0] ss:$8 sps:$4 sm:$0xff]  }
  0x1a   : > { %1318 = vmatprep.subr.bf16.mxu0 %v1454_v8  ;;  %1426 = vmatprep.subr.bf16.mxu1 %v1454_v8  ;;  %v1507_v45 = vld [vmem:[%s1581_s9 + $0xf4] ss:$8 sps:$4 sm:$0xff]   ;;  %v1497_v46 = vld [vmem:[%s1581_s9 + $0x70] ss:$8 sps:$4 sm:$0xff]  }
  0x1b   : > { %v1509_v47 = vld [vmem:[%s1581_s9 + $0xf0] ss:$8 sps:$4 sm:$0xff]  }
  0x1d   : > { %1319 = vmatpush3.bf16.msra.mxu0 %v1455_v9  ;;  %1434 = vmatpush3.bf16.msra.mxu1 %v1455_v9 }
  0x1e   : > { %1320 = vmatprep.subr.bf16.mxu0 %v1456_v10  ;;  %1427 = vmatprep.subr.bf16.mxu1 %v1456_v10 }
  0x21   : > { %1321 = vmatpush3.bf16.msra.mxu0 %v1457_v12  ;;  %1435 = vmatpush3.bf16.msra.mxu1 %v1457_v12 }
  0x22   : > { %1322 = vmatprep.subr.bf16.mxu0 %v1458_v13  ;;  %1428 = vmatprep.subr.bf16.mxu1 %v1458_v13 }
  0x25   : > { %1323 = vmatpush3.bf16.msra.mxu0 %v1459_v15  ;;  %1436 = vmatpush3.bf16.msra.mxu1 %v1459_v15 }
  0x26   : > { %1324 = vmatprep.subr.bf16.mxu0 %v1460_v16  ;;  %1429 = vmatprep.subr.bf16.mxu1 %v1460_v16 }
  0x29   : > { %1325 = vmatpush3.bf16.msra.mxu0 %v1461_v17  ;;  %1437 = vmatpush3.bf16.msra.mxu1 %v1461_v17 }
  0x2c   : > { %538 = vmatmul.mubr.bf16.vlgmr.msra.gmra.mxu0 %v1462_v18  ;;  %602 = vmatmul.mubr.bf16.vlgmr.msra.gmra.mxu1 %v1474_v20 }
  0x2d   : > { %545 = vmatprep.mubr.bf16.mxu0 %v1465_v19  ;;  %609 = vmatprep.mubr.bf16.mxu1 %v1480_v21  ;;  %v1673_v21 = vld [vmem:[%s2086_s2] ss:$0 sm:$0xff] }
  0x34   : > { %546 = vmatmul.mubr.bf16.gmra.mxu0 %v1467_v22  ;;  %610 = vmatmul.mubr.bf16.gmra.mxu1 %v1482_v24 }
  0x35   : > { %553 = vmatprep.mubr.bf16.mxu0 %v1468_v23  ;;  %617 = vmatprep.mubr.bf16.mxu1 %v1486_v25 }
  0x3c   : > { %554 = vmatmul.mubr.bf16.gmra.mxu0 %v1470_v26  ;;  %618 = vmatmul.mubr.bf16.gmra.mxu1 %v1488_v28 }
  0x3d   : > { %561 = vmatprep.mubr.bf16.mxu0 %v1471_v27  ;;  %625 = vmatprep.mubr.bf16.mxu1 %v1492_v29 }
  0x44   : > { %562 = vmatmul.mubr.bf16.gmra.mxu0 %v1473_v30  ;;  %626 = vmatmul.mubr.bf16.gmra.mxu1 %v1494_v32 }
  0x45   : > { %569 = vmatprep.mubr.bf16.mxu0 %v1477_v31  ;;  %633 = vmatprep.mubr.bf16.mxu1 %v1498_v33 }
  0x4c   : > { %570 = vmatmul.mubr.bf16.gmra.mxu0 %v1479_v34  ;;  %634 = vmatmul.mubr.bf16.gmra.mxu1 %v1500_v36 }
  0x4d   : > { %577 = vmatprep.mubr.bf16.mxu0 %v1483_v35  ;;  %641 = vmatprep.mubr.bf16.mxu1 %v1501_v37 }
  0x54   : > { %578 = vmatmul.mubr.bf16.gmra.mxu0 %v1485_v38  ;;  %642 = vmatmul.mubr.bf16.gmra.mxu1 %v1503_v40 }
  0x55   : > { %585 = vmatprep.mubr.bf16.mxu0 %v1489_v39  ;;  %649 = vmatprep.mubr.bf16.mxu1 %v1504_v41 }
  0x5c   : > { %586 = vmatmul.mubr.bf16.gmra.mxu0 %v1491_v42  ;;  %650 = vmatmul.mubr.bf16.gmra.mxu1 %v1506_v44 }
  0x5d   : > { %593 = vmatprep.mubr.bf16.mxu0 %v1495_v43  ;;  %657 = vmatprep.mubr.bf16.mxu1 %v1507_v45 }
  0x64   : > { %594 = vmatmul.mubr.bf16.gmra.mxu0 %v1497_v46  ;;  %658 = vmatmul.mubr.bf16.gmra.mxu1 %v1509_v47 }
  0xec   : > { %v1326_v48 = vpop.f32.mrf.mxu0  ;;  %v1636_v49 = vpop.f32.mrf.mxu1 }
  0xee   : > { %v1327_v50 = vpop.f32.mrf.mxu0  ;;  %v1638_v51 = vpop.f32.mrf.mxu1 }
  0xef   : > { %v1328_v18 = vadd.f32 %v1327_v50, %v1326_v48 }
  0xf0   : > { %v1329_v52 = vpop.f32.mrf.mxu0  ;;  %v1640_v53 = vpop.f32.mrf.mxu1 }
  0xf1   : > { %v1681_v27 = vadd.f32 %v1328_v18, %v1673_v21 }
  0xf2   : > { %v1330_v54 = vpop.f32.mrf.mxu0  ;;  %v1642_v55 = vpop.f32.mrf.mxu1 }
  0xf3   : > { %v1331_v15 = vadd.f32 %v1330_v54, %v1329_v52 }
  0xf4   : > { %v1332_v56 = vpop.f32.mrf.mxu0  ;;  %v1644_v57 = vpop.f32.mrf.mxu1 }
  0xf5   : > { %v1676_v23 = vadd.f32 %v1331_v15, %v1673_v21 }
  0xf6   : > { %v1333_v58 = vpop.f32.mrf.mxu0  ;;  %v1646_v59 = vpop.f32.mrf.mxu1 }
  0xf7   : > { %v1334_v19 = vadd.f32 %v1333_v58, %v1332_v56  ;;  %v666_v32 = vadd.f32 %v1676_v23, %v1681_v27 }
  0xf8   : > { %v1335_v60 = vpop.f32.mrf.mxu0  ;;  %v1648_v61 = vpop.f32.mrf.mxu1 }
  0xf9   : > { %v1684_v28 = vadd.f32 %v1334_v19, %v1673_v21 }
  0xfa   : > { %v1336_v62 = vpop.f32.mrf.mxu0  ;;  %v1650_v63 = vpop.f32.mrf.mxu1 }
  0xfb   : > { %v1337_v24 = vadd.f32 %v1336_v62, %v1335_v60  ;;  %v667_v36 = vadd.f32 %v666_v32, %v1684_v28 }
  0xfc   : > { %v1338_v0 = vpop.f32.mrf.mxu0  ;;  %v1652_v1 = vpop.f32.mrf.mxu1 }
  0xfd   : > { %v1691_v33 = vadd.f32 %v1337_v24, %v1673_v21 }
  0xfe   : > { %v1339_v2 = vpop.f32.mrf.mxu0  ;;  %v1654_v3 = vpop.f32.mrf.mxu1 }
  0xff   : > { %v1340_v29 = vadd.f32 %v1339_v2, %v1338_v0  ;;  %v668_v41 = vadd.f32 %v667_v36, %v1691_v33 }
 0x100   : > { %v1341_v4 = vpop.f32.mrf.mxu0  ;;  %v1656_v5 = vpop.f32.mrf.mxu1 }
 0x101   : > { %v1695_v37 = vadd.f32 %v1340_v29, %v1673_v21 }
 0x102   : > { %v1342_v6 = vpop.f32.mrf.mxu0  ;;  %v1658_v7 = vpop.f32.mrf.mxu1 }
 0x103   : > { %v1343_v34 = vadd.f32 %v1342_v6, %v1341_v4  ;;  %v669_v45 = vadd.f32 %v668_v41, %v1695_v37 }
 0x104   : > { %v1344_v8 = vpop.f32.mrf.mxu0  ;;  %v1660_v9 = vpop.f32.mrf.mxu1 }
 0x105   : > { %v1701_v42 = vadd.f32 %v1343_v34, %v1673_v21 }
 0x106   : > { %v1345_v10 = vpop.f32.mrf.mxu0  ;;  %v1662_v11 = vpop.f32.mrf.mxu1 }
 0x107   : > { %v1346_v38 = vadd.f32 %v1345_v10, %v1344_v8  ;;  %v670_v52 = vadd.f32 %v669_v45, %v1701_v42 }
 0x108   : > { %v1347_v12 = vpop.f32.mrf.mxu0  ;;  %v1664_v13 = vpop.f32.mrf.mxu1 }
 0x109   : > { %v1705_v46 = vadd.f32 %v1346_v38, %v1673_v21 }
 0x10a   : > { %v1348_v14 = vpop.f32.mrf.mxu0  ;;  %v1666_v16 = vpop.f32.mrf.mxu1 }
 0x10b   : > { %v1349_v43 = vadd.f32 %v1348_v14, %v1347_v12  ;;  %v671_v60 = vadd.f32 %v670_v52, %v1705_v46 }
 0x10c   : > { %v1350_v17 = vpop.f32.mrf.mxu0  ;;  %v1668_v20 = vpop.f32.mrf.mxu1 }
 0x10d   : > { %v1711_v54 = vadd.f32 %v1349_v43, %v1673_v21 }
 0x10e   : > { %v1351_v22 = vpop.f32.mrf.mxu0  ;;  %v1678_v25 = vpop.f32.mrf.mxu1 }
 0x10f   : > { %v1352_v47 = vadd.f32 %v1351_v22, %v1350_v17  ;;  %v672_v6 = vadd.f32 %v671_v60, %v1711_v54 }
 0x110   : > { %v1353_v26 = vpop.f32.mrf.mxu0  ;;  %v1686_v31 = vpop.f32.mrf.mxu1 }
 0x111   : > { %v1715_v62 = vadd.f32 %v1352_v47, %v1673_v21 }
 0x112   : > { %v1354_v30 = vpop.f32.mrf.mxu0  ;;  %v1697_v40 = vpop.f32.mrf.mxu1 }
 0x113   : > { %v1355_v56 = vadd.f32 %v1354_v30, %v1353_v26  ;;  %v673_v14 = vadd.f32 %v672_v6, %v1715_v62 }
 0x114   : > { %v1356_v35 = vpop.f32.mrf.mxu0  ;;  %v1707_v50 = vpop.f32.mrf.mxu1 }
 0x115   : > { %v1721_v8 = vadd.f32 %v1355_v56, %v1673_v21 }
 0x116   : > { %v1357_v39 = vpop.f32.mrf.mxu0  ;;  %v1717_v4 = vpop.f32.mrf.mxu1 }
 0x117   : > { %v1358_v0 = vadd.f32 %v1357_v39, %v1356_v35  ;;  %v674_v22 = vadd.f32 %v673_v14, %v1721_v8 }
 0x118   : > { %v1359_v44 = vpop.f32.mrf.mxu0  ;;  %v1407_v19 = vpop.f32.mrf.mxu1 }
 0x119   : > { %v1725_v15 = vadd.f32 %v1358_v0, %v1673_v21 }
 0x11a   : > { %v1360_v48 = vpop.f32.mrf.mxu0  ;;  %v1408_v35 = vpop.f32.mrf.mxu1 }
 0x11b   : > { %v1361_v10 = vadd.f32 %v1360_v48, %v1359_v44  ;;  %v675_v30 = vadd.f32 %v674_v22, %v1725_v15  ;;  %v1376_v48 = vadd.f32 %v1638_v51, %v1636_v49 }
 0x11c   : > { %v1362_v58 = vpop.f32.mrf.mxu0  ;;  %v1410_v47 = vpop.f32.mrf.mxu1 }
 0x11d   : > { %v1729_v24 = vadd.f32 %v1361_v10, %v1673_v21  ;;  %v1753_v6 = vadd.f32 %v1376_v48, %v1673_v21  ;;  %v1382_v10 = vadd.f32 %v1646_v59, %v1644_v57  ;;  %v1391_v59 = vadd.f32 %v1658_v7, %v1656_v5 }
 0x11e   : > { %v1363_v2 = vpop.f32.mrf.mxu0 }
 0x11f   : > { %v1364_v17 = vadd.f32 %v1363_v2, %v1362_v58  ;;  %v676_v36 = vadd.f32 %v675_v30, %v1729_v24  ;;  %v1379_v58 = vadd.f32 %v1642_v55, %v1640_v53  ;;  %v1411_v2 = vpop.f32.mrf.mxu1  ;;  %v1385_v53 = vadd.f32 %v1650_v63, %v1648_v61 }
 0x120   : > { %v1365_v12 = vpop.f32.mrf.mxu0  ;;  %v1765_v14 = vadd.f32 %v1382_v10, %v1673_v21 }
 0x121   : > { %v1733_v32 = vadd.f32 %v1364_v17, %v1673_v21  ;;  %v1759_v51 = vadd.f32 %v1379_v58, %v1673_v21  ;;  %v1388_v17 = vadd.f32 %v1654_v3, %v1652_v1  ;;  %v1771_v57 = vadd.f32 %v1385_v53, %v1673_v21 }
 0x122   : > { %v1366_v18 = vpop.f32.mrf.mxu0  ;;  %v1783_v1 = vadd.f32 %v1391_v59, %v1673_v21  ;;  %v1397_v3 = vadd.f32 %v1666_v16, %v1664_v13 }
 0x123   : > { %v1367_v26 = vadd.f32 %v1366_v18, %v1365_v12  ;;  %v677_v43 = vadd.f32 %v676_v36, %v1733_v32  ;;  %v1413_v12 = vpop.f32.mrf.mxu1  ;;  %v1777_v63 = vadd.f32 %v1388_v17, %v1673_v21 }
 0x124   : > { %v1368_v29 = vpop.f32.mrf.mxu0 }
 0x125   : > { %v1737_v38 = vadd.f32 %v1367_v26, %v1673_v21  ;;  %v1414_v61 = vpop.f32.mrf.mxu1  ;;  %v1394_v26 = vadd.f32 %v1662_v11, %v1660_v9  ;;  %v1795_v9 = vadd.f32 %v1397_v3, %v1673_v21  ;;  %v1403_v11 = vadd.f32 %v1697_v40, %v1686_v31 }
 0x126   : > { %v1369_v34 = vpop.f32.mrf.mxu0 }
 0x127   : > { %v1370_v39 = vadd.f32 %v1369_v34, %v1368_v29  ;;  %v678_v52 = vadd.f32 %v677_v43, %v1737_v38  ;;  %v1416_v5 = vpop.f32.mrf.mxu1  ;;  %v1789_v7 = vadd.f32 %v1394_v26, %v1673_v21  ;;  %v1400_v34 = vadd.f32 %v1678_v25, %v1668_v20 }
 0x128   : > { %v1371_v41 = vpop.f32.mrf.mxu0  ;;  %v1406_v43 = vadd.f32 %v1717_v4, %v1707_v50  ;;  %v1807_v20 = vadd.f32 %v1403_v11, %v1673_v21 }
 0x129   : > { %v1741_v44 = vadd.f32 %v1370_v39, %v1673_v21  ;;  %v1417_v13 = vpop.f32.mrf.mxu1  ;;  %v1801_v16 = vadd.f32 %v1400_v34, %v1673_v21 }
 0x12a   : > { %v1372_v45 = vpop.f32.mrf.mxu0  ;;  %v1812_v40 = vadd.f32 %v1406_v43, %v1673_v21 }
 0x12b   : > { %v1373_v56 = vadd.f32 %v1372_v45, %v1371_v41  ;;  %v679_v60 = vadd.f32 %v678_v52, %v1741_v44  ;;  %v1409_v45 = vadd.f32 %v1408_v35, %v1407_v19  ;;  %v1419_v48 = vpop.f32.mrf.mxu1  ;;  %v1412_v52 = vadd.f32 %v1411_v2, %v1410_v47 }
 0x12c   : > { %v1418_v19 = vadd.f32 %v1417_v13, %v1416_v5 }
 0x12d   : > { %v1750_v0 = vadd.f32 %v1373_v56, %v1673_v21  ;;  %v1816_v58 = vadd.f32 %v1409_v45, %v1673_v21  ;;  %v1420_v50 = vpop.f32.mrf.mxu1  ;;  %v1820_v10 = vadd.f32 %v1412_v52, %v1673_v21 }
 0x12e   : > { %v1421_v53 = vadd.f32 %v1420_v50, %v1419_v48  ;;  %v1828_v2 = vadd.f32 %v1418_v19, %v1673_v21 }
 0x12f   : > { %v680_v49 = vadd.f32 %v679_v60, %v1750_v0  ;;  %v1415_v60 = vadd.f32 %v1414_v61, %v1413_v12 }
 0x130   : > { %v1832_v12 = vadd.f32 %v1421_v53, %v1673_v21 }
 0x131   : > { %v681_v55 = vadd.f32 %v680_v49, %v1753_v6  ;;  %v1824_v49 = vadd.f32 %v1415_v60, %v1673_v21 }
 0x133   : > { %v682_v18 = vadd.f32 %v681_v55, %v1759_v51 }
 0x135   : > { %v683_v22 = vadd.f32 %v682_v18, %v1765_v14 }
 0x137   : > { %v684_v29 = vadd.f32 %v683_v22, %v1771_v57 }
 0x139   : > { %v685_v30 = vadd.f32 %v684_v29, %v1777_v63 }
 0x13b   : > { %v686_v36 = vadd.f32 %v685_v30, %v1783_v1 }
 0x13d   : > { %v687_v39 = vadd.f32 %v686_v36, %v1789_v7 }
 0x13f   : > { %v688_v41 = vadd.f32 %v687_v39, %v1795_v9 }
 0x141   : > { %v689_v25 = vadd.f32 %v688_v41, %v1801_v16 }
 0x143   : > { %v690_v31 = vadd.f32 %v689_v25, %v1807_v20 }
 0x145   : > { %v691_v56 = vadd.f32 %v690_v31, %v1812_v40 }
 0x147   : > { %v692_v4 = vadd.f32 %v691_v56, %v1816_v58 }
 0x149   : > { %v693_v35 = vadd.f32 %v692_v4, %v1820_v10 }
 0x14b   : > { %v694_v47 = vadd.f32 %v693_v35, %v1824_v49 }
 0x14d   : > { %v695_v55 = vadd.f32 %v694_v47, %v1828_v2 }
 0x14f   : > { %v696_v17 = vadd.f32 %v695_v55, %v1832_v12 }
 0x151   : > { %v697_v18 = vrot.slane %v696_v17, 4 }
 0x153   : > { %v698_v59 = vadd.f32 %v697_v18, %v696_v17 }
 0x155   : > { %v699_v22 = vrot.slane %v698_v59, 2 }
 0x157   : > { %v700_v61 = vadd.f32 %v699_v22, %v698_v59 }
 0x159   : > { %v701_v26 = vrot.slane %v700_v61, 1 }
 0x15b   : > { %v702_v29 = vadd.f32 %v701_v26, %v700_v61 }
 0x15d   : > { %v1835_v3 = vmul.f32 0.00390625, %v702_v29 }
 0x15f   : > { %v1839_v30 = vsub.f32 %v1681_v27, %v1835_v3  ;;  %v1843_v5 = vsub.f32 %v1676_v23, %v1835_v3  ;;  %v1847_v21 = vsub.f32 %v1684_v28, %v1835_v3  ;;  %v1855_v11 = vsub.f32 %v1691_v33, %v1835_v3 }
 0x160   : > { %v1859_v27 = vsub.f32 %v1695_v37, %v1835_v3  ;;  %v1865_v28 = vsub.f32 %v1701_v42, %v1835_v3  ;;  %v1871_v33 = vsub.f32 %v1705_v46, %v1835_v3  ;;  %v1877_v25 = vsub.f32 %v1711_v54, %v1835_v3 }
 0x161   : > { %v737_v34 = vmul.f32 %v1839_v30, %v1839_v30  ;;  %v738_v36 = vmul.f32 %v1843_v5, %v1843_v5  ;;  %v739_v23 = vmul.f32 %v1847_v21, %v1847_v21  ;;  %v740_v13 = vmul.f32 %v1855_v11, %v1855_v11 }
 0x162   : > { %v741_v37 = vmul.f32 %v1859_v27, %v1859_v27  ;;  %v742_v42 = vmul.f32 %v1865_v28, %v1865_v28  ;;  %v1883_v48 = vsub.f32 %v1715_v62, %v1835_v3  ;;  %v743_v46 = vmul.f32 %v1871_v33, %v1871_v33 }
 0x163   : > { %v769_v39 = vadd.f32 %v738_v36, %v737_v34  ;;  %v1889_v52 = vsub.f32 %v1721_v8, %v1835_v3  ;;  %v744_v54 = vmul.f32 %v1877_v25, %v1877_v25  ;;  %v1895_v60 = vsub.f32 %v1725_v15, %v1835_v3 }
 0x164   : > { %v745_v62 = vmul.f32 %v1883_v48, %v1883_v48  ;;  %v1901_v4 = vsub.f32 %v1729_v24, %v1835_v3  ;;  %v1907_v35 = vsub.f32 %v1733_v32, %v1835_v3  ;;  %v1913_v47 = vsub.f32 %v1737_v38, %v1835_v3 }
 0x165   : > { %v770_v41 = vadd.f32 %v769_v39, %v739_v23  ;;  %v746_v8 = vmul.f32 %v1889_v52, %v1889_v52  ;;  %v747_v15 = vmul.f32 %v1895_v60, %v1895_v60  ;;  %v1919_v17 = vsub.f32 %v1741_v44, %v1835_v3 }
 0x166   : > { %v748_v24 = vmul.f32 %v1901_v4, %v1901_v4  ;;  %v749_v32 = vmul.f32 %v1907_v35, %v1907_v35  ;;  %v1925_v59 = vsub.f32 %v1750_v0, %v1835_v3  ;;  %v750_v38 = vmul.f32 %v1913_v47, %v1913_v47 }
 0x167   : > { %v771_v43 = vadd.f32 %v770_v41, %v740_v13  ;;  %v1931_v61 = vsub.f32 %v1753_v6, %v1835_v3  ;;  %v751_v44 = vmul.f32 %v1919_v17, %v1919_v17  ;;  %v1937_v29 = vsub.f32 %v1759_v51, %v1835_v3 }
 0x168   : > { %v752_v0 = vmul.f32 %v1925_v59, %v1925_v59  ;;  %v1943_v36 = vsub.f32 %v1765_v14, %v1835_v3  ;;  %v1949_v39 = vsub.f32 %v1771_v57, %v1835_v3  ;;  %v1955_v41 = vsub.f32 %v1777_v63, %v1835_v3 }
 0x169   : > { %v772_v45 = vadd.f32 %v771_v43, %v741_v37  ;;  %v753_v6 = vmul.f32 %v1931_v61, %v1931_v61  ;;  %v754_v51 = vmul.f32 %v1937_v29, %v1937_v29  ;;  %v1961_v43 = vsub.f32 %v1783_v1, %v1835_v3 }
 0x16a   : > { %v755_v14 = vmul.f32 %v1943_v36, %v1943_v36  ;;  %v756_v57 = vmul.f32 %v1949_v39, %v1949_v39  ;;  %v757_v63 = vmul.f32 %v1955_v41, %v1955_v41 }
 0x16b   : > { %v773_v31 = vadd.f32 %v772_v45, %v742_v42  ;;  %v1967_v45 = vsub.f32 %v1789_v7, %v1835_v3  ;;  %v758_v1 = vmul.f32 %v1961_v43, %v1961_v43 }
 0x16d   : > { %v774_v56 = vadd.f32 %v773_v31, %v743_v46  ;;  %v1973_v31 = vsub.f32 %v1795_v9, %v1835_v3  ;;  %v759_v7 = vmul.f32 %v1967_v45, %v1967_v45 }
 0x16f   : > { %v775_v50 = vadd.f32 %v774_v56, %v744_v54  ;;  %v1979_v56 = vsub.f32 %v1801_v16, %v1835_v3  ;;  %v732_v16 = vsub.f32 %v1816_v58, %v1835_v3  ;;  %v736_v58 = vsub.f32 %v1832_v12, %v1835_v3 }
 0x171   : > { %v776_v19 = vadd.f32 %v775_v50, %v745_v62  ;;  %v730_v50 = vsub.f32 %v1807_v20, %v1835_v3 }
 0x173   : > { %v777_v53 = vadd.f32 %v776_v19, %v746_v8  ;;  %v760_v8 = vmul.f32 %v1973_v31, %v1973_v31  ;;  %v731_v19 = vsub.f32 %v1812_v40, %v1835_v3  ;;  %v735_v40 = vsub.f32 %v1828_v2, %v1835_v3 }
 0x175   : > { %v778_v55 = vadd.f32 %v777_v53, %v747_v15  ;;  %v761_v15 = vmul.f32 %v1979_v56, %v1979_v56  ;;  %v763_v20 = vmul.f32 %v731_v19, %v731_v19 }
 0x177   : > { %v779_v18 = vadd.f32 %v778_v55, %v748_v24  ;;  %v762_v24 = vmul.f32 %v730_v50, %v730_v50 }
 0x179   : > { %v780_v22 = vadd.f32 %v779_v18, %v749_v32  ;;  %v733_v32 = vsub.f32 %v1820_v10, %v1835_v3  ;;  %v768_v10 = vmul.f32 %v736_v58, %v736_v58 }
 0x17b   : > { %v781_v26 = vadd.f32 %v780_v22, %v750_v38  ;;  %v734_v38 = vsub.f32 %v1824_v49, %v1835_v3  ;;  %v764_v22 = vmul.f32 %v732_v16, %v732_v16 }
 0x17d   : > { %v782_v34 = vadd.f32 %v781_v26, %v751_v44  ;;  %v765_v26 = vmul.f32 %v733_v32, %v733_v32 }
 0x17f   : > { %v783_v23 = vadd.f32 %v782_v34, %v752_v0  ;;  %v766_v34 = vmul.f32 %v734_v38, %v734_v38 }
 0x181   : > { %v784_v13 = vadd.f32 %v783_v23, %v753_v6  ;;  %v767_v23 = vmul.f32 %v735_v40, %v735_v40 }
 0x183   : > { %v785_v37 = vadd.f32 %v784_v13, %v754_v51 }
 0x185   : > { %v786_v42 = vadd.f32 %v785_v37, %v755_v14 }
 0x187   : > { %v787_v46 = vadd.f32 %v786_v42, %v756_v57 }
 0x189   : > { %v788_v54 = vadd.f32 %v787_v46, %v757_v63 }
 0x18b   : > { %v789_v62 = vadd.f32 %v788_v54, %v758_v1 }
 0x18d   : > { %v790_v9 = vadd.f32 %v789_v62, %v759_v7 }
 0x18f   : > { %v791_v53 = vadd.f32 %v790_v9, %v760_v8 }
 0x191   : > { %v792_v55 = vadd.f32 %v791_v53, %v761_v15 }
 0x193   : > { %v793_v18 = vadd.f32 %v792_v55, %v762_v24 }
 0x195   : > { %v794_v44 = vadd.f32 %v793_v18, %v763_v20 }
 0x197   : > { %v795_v0 = vadd.f32 %v794_v44, %v764_v22 }
 0x199   : > { %v796_v6 = vadd.f32 %v795_v0, %v765_v26 }
 0x19b   : > { %v797_v51 = vadd.f32 %v796_v6, %v766_v34 }
 0x19d   : > { %v798_v13 = vadd.f32 %v797_v51, %v767_v23 }
 0x19f   : > { %v799_v14 = vadd.f32 %v798_v13, %v768_v10 }
 0x1a1   : > { %v800_v37 = vrot.slane %v799_v14, 4 }
 0x1a3   : > { %v801_v57 = vadd.f32 %v800_v37, %v799_v14 }
 0x1a5   : > { %v802_v49 = vrot.slane %v801_v57, 2 }
 0x1a7   : > { %v803_v42 = vadd.f32 %v802_v49, %v801_v57 }
 0x1a9   : > { %v804_v63 = vrot.slane %v803_v42, 1 }
 0x1ab   : > { %v805_v46 = vadd.f32 %v804_v63, %v803_v42 }
 0x1ad   : > { %v806_v1 = vmul.f32 0.00390625, %v805_v46 }
 0x1af   : > { %v807_v2 = vadd.f32 1e-05, %v806_v1 }
 0x1b1   : > { %1510 = vrsqrt.f32 %v807_v2 }
 0x1be   : > { %v1511_v54 = vpop.eup %1510 }
 0x1bf   : > { %v2002_v7 = vmul.f32 %v1511_v54, %v1839_v30  ;;  %v2005_v12 = vmul.f32 %v1511_v54, %v1843_v5  ;;  %v2008_v3 = vmul.f32 %v1511_v54, %v1847_v21  ;;  %v2011_v62 = vmul.f32 %v1511_v54, %v1855_v11 }
 0x1c0   : > { %v2014_v8 = vmul.f32 %v1511_v54, %v1859_v27  ;;  %v2017_v9 = vmul.f32 %v1511_v54, %v1865_v28  ;;  %v2020_v15 = vmul.f32 %v1511_v54, %v1871_v33  ;;  %v2023_v30 = vmul.f32 %v1511_v54, %v1877_v25 }
 0x1c1   : > { %v2026_v5 = vmul.f32 %v1511_v54, %v1883_v48  ;;  %v818_v21 = vmul.f32 %v1511_v54, %v1889_v52  ;;  %v819_v11 = vmul.f32 %v1511_v54, %v1895_v60  ;;  %v820_v53 = vmul.f32 %v1511_v54, %v1901_v4 }
 0x1c2   : > { %v821_v27 = vmul.f32 %v1511_v54, %v1907_v35  ;;  %v822_v28 = vmul.f32 %v1511_v54, %v1913_v47  ;;  %v823_v24 = vmul.f32 %v1511_v54, %v1919_v17  ;;  %v824_v33 = vmul.f32 %v1511_v54, %v1925_v59 }
 0x1c3   : > { %v2036_v25 = vmul.f32 %v1511_v54, %v1931_v61  ;;  %v826_v48 = vmul.f32 %v1511_v54, %v1937_v29  ;;  %v827_v55 = vmul.f32 %v1511_v54, %v1943_v36  ;;  %v828_v52 = vmul.f32 %v1511_v54, %v1949_v39 }
 0x1c4   : > { %v829_v60 = vmul.f32 %v1511_v54, %v1955_v41  ;;  %v830_v4 = vmul.f32 %v1511_v54, %v1961_v43  ;;  %v831_v35 = vmul.f32 %v1511_v54, %v1967_v45  ;;  %v832_v47 = vmul.f32 %v1511_v54, %v1973_v31 }
 0x1c5   : > { %v2046_v17 = vmul.f32 %v1511_v54, %v1979_v56  ;;  %v834_v59 = vmul.f32 %v1511_v54, %v730_v50  ;;  %v835_v61 = vmul.f32 %v1511_v54, %v731_v19  ;;  %v836_v20 = vmul.f32 %v1511_v54, %v732_v16 }
 0x1c6   : > { %v837_v18 = vmul.f32 %v1511_v54, %v733_v32  ;;  %v838_v29 = vmul.f32 %v1511_v54, %v734_v38  ;;  %v839_v22 = vmul.f32 %v1511_v54, %v735_v40  ;;  %v840_v36 = vmul.f32 %v1511_v54, %v736_v58 }
 0x1c7   : > { %v841_v39 = vmax.f32 %v2002_v7, 0.0  ;;  %v842_v41 = vmax.f32 %v2005_v12, 0.0  ;;  %v843_v43 = vmax.f32 %v2008_v3, 0.0  ;;  %v844_v45 = vmax.f32 %v2011_v62, 0.0 }
 0x1c8   : > { %v845_v31 = vmax.f32 %v2014_v8, 0.0  ;;  %v846_v56 = vmax.f32 %v2017_v9, 0.0  ;;  %v847_v50 = vmax.f32 %v2020_v15, 0.0  ;;  %v848_v19 = vmax.f32 %v2023_v30, 0.0 }
 0x1c9   : > { %v849_v16 = vmax.f32 %v2026_v5, 0.0  ;;  %v850_v32 = vmax.f32 %v818_v21, 0.0  ;;  %v851_v38 = vmax.f32 %v819_v11, 0.0  ;;  %v852_v44 = vmax.f32 %v820_v53, 0.0 }
 0x1ca   : > { %v853_v40 = vmax.f32 %v821_v27, 0.0  ;;  %v854_v26 = vmax.f32 %v822_v28, 0.0  ;;  %v855_v0 = vmax.f32 %v823_v24, 0.0  ;;  %v856_v58 = vmax.f32 %v824_v33, 0.0 }
 0x1cb   : > { %v857_v34 = vmax.f32 %v2036_v25, 0.0  ;;  %v858_v6 = vmax.f32 %v826_v48, 0.0  ;;  %v859_v23 = vmax.f32 %v827_v55, 0.0  ;;  %v860_v51 = vmax.f32 %v828_v52, 0.0 }
 0x1cc   : > { %v861_v10 = vmax.f32 %v829_v60, 0.0  ;;  %v862_v13 = vmax.f32 %v830_v4, 0.0  ;;  %v863_v14 = vmax.f32 %v831_v35, 0.0  ;;  %v864_v37 = vmax.f32 %v832_v47, 0.0 }
 0x1cd   : > { %v865_v57 = vmax.f32 %v2046_v17, 0.0  ;;  %v866_v49 = vmax.f32 %v834_v59, 0.0  ;;  %v867_v42 = vmax.f32 %v835_v61, 0.0  ;;  %v868_v63 = vmax.f32 %v836_v20, 0.0 }
 0x1ce   : > { %v869_v46 = vmax.f32 %v837_v18, 0.0  ;;  %v870_v1 = vmax.f32 %v838_v29, 0.0  ;;  %v871_v2 = vmax.f32 %v839_v22, 0.0  ;;  %v872_v54 = vmax.f32 %v840_v36, 0.0 }
 0x1cf   : > { %v1218_v7 = vpack.c.bf16 %v842_v41, %v841_v39  ;;  %v1223_v12 = vpack.c.bf16 %v844_v45, %v843_v43  ;;  %v1228_v3 = vpack.c.bf16 %v846_v56, %v845_v31  ;;  %v1233_v62 = vpack.c.bf16 %v848_v19, %v847_v50 }
 0x1d0   : > { %v1238_v8 = vpack.c.bf16 %v850_v32, %v849_v16  ;;  %v1243_v9 = vpack.c.bf16 %v852_v44, %v851_v38  ;;  %v1248_v15 = vpack.c.bf16 %v854_v26, %v853_v40  ;;  %v1253_v30 = vpack.c.bf16 %v856_v58, %v855_v0 }
 0x1d1   : > { %1219 = vst [vmem:[%s2063_s4] sm:$0xff] %v1218_v7   ;;  %1295 = vst [vmem:[%s2063_s4 + $0x8] sm:$0xff] %v1223_v12   ;;  %v1258_v5 = vpack.c.bf16 %v858_v6, %v857_v34  ;;  %v1263_v21 = vpack.c.bf16 %v860_v51, %v859_v23  ;;  %v1268_v11 = vpack.c.bf16 %v862_v13, %v861_v10 }
 0x1d2   : > { %1296 = vst [vmem:[%s2063_s4 + $0x10] sm:$0xff] %v1228_v3   ;;  %1297 = vst [vmem:[%s2063_s4 + $0x18] sm:$0xff] %v1233_v62   ;;  %v1273_v53 = vpack.c.bf16 %v864_v37, %v863_v14  ;;  %v1278_v27 = vpack.c.bf16 %v866_v49, %v865_v57  ;;  %v1283_v28 = vpack.c.bf16 %v868_v63, %v867_v42 }
 0x1d3   : > { %1298 = vst [vmem:[%s2063_s4 + $0x20] sm:$0xff] %v1238_v8   ;;  %1299 = vst [vmem:[%s2063_s4 + $0x28] sm:$0xff] %v1243_v9   ;;  %v1288_v24 = vpack.c.bf16 %v870_v1, %v869_v46  ;;  %v1293_v33 = vpack.c.bf16 %v872_v54, %v871_v2 }
 0x1d4   : > { %1300 = vst [vmem:[%s2063_s4 + $0x30] sm:$0xff] %v1248_v15   ;;  %1301 = vst [vmem:[%s2063_s4 + $0x38] sm:$0xff] %v1253_v30  }
 0x1d5   : > { %1302 = vst [vmem:[%s2063_s4 + $0x40] sm:$0xff] %v1258_v5   ;;  %1303 = vst [vmem:[%s2063_s4 + $0x48] sm:$0xff] %v1263_v21  }
 0x1d6   : > { %1304 = vst [vmem:[%s2063_s4 + $0x50] sm:$0xff] %v1268_v11   ;;  %1305 = vst [vmem:[%s2063_s4 + $0x58] sm:$0xff] %v1273_v53  }
 0x1d7   : > { %1306 = vst [vmem:[%s2063_s4 + $0x60] sm:$0xff] %v1278_v27   ;;  %1307 = vst [vmem:[%s2063_s4 + $0x68] sm:$0xff] %v1283_v28  }
 0x1d8   : > { %1308 = vst [vmem:[%s2063_s4 + $0x70] sm:$0xff] %v1288_v24   ;;  %1309 = vst [vmem:[%s2063_s4 + $0x78] sm:$0xff] %v1293_v33  }
 0x1d9 PF: > { %s13_s12 = sadd.s32 1, %s1518_s12  }
 0x1da   : > { %p10_p4 = scmp.ge.s32.totalorder %s13_s12, 4  }
 0x1dc   :  { %12 = sbr.rel (!%p10_p4) target bundleno = 1 (0x1), region = 62 }

// kernel: generator_forward.11
= control target key start
LH: loop header
LB: loop body
LE: loop exit
PB: predicated region body
PF: predicated region fallthrough
CT: control target
= control target key end

     0   :  { %s1337_s12 = smov 0   ;;  %s1505_s0 = inlined_call_operand.vmem [shape: bf16[128,640], index: 0, kind: input, shape index: {}]   ;;  %s1506_s1 = inlined_call_operand.vmem [shape: bf16[640,128], index: 1, kind: input, shape index: {}]   ;;  %s1507_s2 = inlined_call_operand.vmem [shape: f32[1,128], index: 2, kind: input, shape index: {}]   ;;  %s1508_s3 = inlined_call_operand.vmem [shape: bf16[128,128], index: 3, kind: output, shape index: {}]  }
   0x1 LB: > { %s987_s13 = sadd.s32 4294967295, %s1315_s12   ;;  %p991_p0 = scmp.ge.s32.totalorder %s1315_s12, 1  ;;  %s1315_s12 = sphi %s1337_s12, %s13_s12  }
   0x2   : > { %p139_p1 = scmp.lt.s32.totalorder %s1315_s12, 3 }
   0x4   : > { %p140_p2 = pnand %p991_p0, %p139_p1 }
   0x5   : > { %s992_s19 = sshll.u32 (!%p140_p2), %s987_s13, 3 }
   0x6   : > { %143 = sbr.rel (%p140_p2) target bundleno = 363 (0x16b), region = 32  ;;  %p165_p3 = scmp.lt.s32.totalorder (!%p140_p2), %s992_s19, 15 }
   0xb   : > { %v1239_v0 = vld [vmem:[%s1506_s1 + $0x78] sm:$0xff]   ;;  %v1243_v4 = vld [vmem:[%s1506_s1 + $0x70] sm:$0xff]   ;;  %v1247_v8 = vld [vmem:[%s1506_s1 + $0x68] sm:$0xff]   ;;  %s1510_s19 = smov (!%p165_p3, %s992_s19), 15 }
   0xc   : > { %v1240_v1 = vld [vmem:[%s1506_s1 + $0xf8] sm:$0xff]   ;;  %1098 = vmatprep.subr.bf16.mxu0 %v1239_v0  ;;  %v1244_v5 = vld [vmem:[%s1506_s1 + $0xf0] sm:$0xff]   ;;  %v1248_v9 = vld [vmem:[%s1506_s1 + $0xe8] sm:$0xff]   ;;  %s1230_s16 = smul.u32 20, %s1510_s19  ;;  %s995_s26 = sshll.u32 %s1510_s19, 2 }
   0xd   : > { %v1241_v2 = vld [vmem:[%s1506_s1 + $0x38] sm:$0xff]   ;;  %1138 = vmatprep.subr.bf16.mxu1 %v1240_v1  ;;  %v1245_v6 = vld [vmem:[%s1506_s1 + $0x30] sm:$0xff]   ;;  %v1249_v10 = vld [vmem:[%s1506_s1 + $0x28] sm:$0xff]   ;;  %s175_s28 = scalar_lea.vmem %s1508_s3, %s995_s26 }
   0xe   : > { %v1242_v3 = vld [vmem:[%s1506_s1 + $0xb8] sm:$0xff]   ;;  %1099 = vmatpush3.bf16.msra.mxu0 %v1241_v2  ;;  %v1246_v7 = vld [vmem:[%s1506_s1 + $0xb0] sm:$0xff]   ;;  %v1250_v11 = vld [vmem:[%s1506_s1 + $0xa8] sm:$0xff]   ;;  %s1443_s13 = scalar_lea.vmem %s1505_s0, %s1230_s16 }
   0xf   : > { %1139 = vmatpush3.bf16.msra.mxu1 %v1242_v3  ;;  %1100 = vmatprep.subr.bf16.mxu0 %v1243_v4  ;;  %v1251_v12 = vld [vmem:[%s1506_s1 + $0x60] sm:$0xff]   ;;  %v1255_v16 = vld [vmem:[%s1506_s1 + $0x58] sm:$0xff]   ;;  %v1259_v20 = vld [vmem:[%s1506_s1 + $0x50] sm:$0xff]  }
  0x10   : > { %1140 = vmatprep.subr.bf16.mxu1 %v1244_v5  ;;  %v1252_v13 = vld [vmem:[%s1506_s1 + $0xe0] sm:$0xff]   ;;  %v1256_v17 = vld [vmem:[%s1506_s1 + $0xd8] sm:$0xff]   ;;  %v1260_v21 = vld [vmem:[%s1506_s1 + $0xd0] sm:$0xff]  }
  0x11   : > { %v1253_v14 = vld [vmem:[%s1506_s1 + $0x20] sm:$0xff]   ;;  %v1257_v18 = vld [vmem:[%s1506_s1 + $0x18] sm:$0xff]   ;;  %v1261_v22 = vld [vmem:[%s1506_s1 + $0x10] sm:$0xff]  }
  0x12   : > { %1101 = vmatpush3.bf16.msra.mxu0 %v1245_v6  ;;  %v1254_v15 = vld [vmem:[%s1506_s1 + $0xa0] sm:$0xff]   ;;  %v1258_v19 = vld [vmem:[%s1506_s1 + $0x98] sm:$0xff]   ;;  %v1262_v23 = vld [vmem:[%s1506_s1 + $0x90] sm:$0xff]  }
  0x13   : > { %1141 = vmatpush3.bf16.msra.mxu1 %v1246_v7  ;;  %1102 = vmatprep.subr.bf16.mxu0 %v1247_v8  ;;  %v1263_v24 = vld [vmem:[%s1506_s1 + $0x48] sm:$0xff]   ;;  %v1267_v28 = vld [vmem:[%s1506_s1 + $0x40] sm:$0xff]   ;;  %v1277_v36 = vld [vmem:[%s1506_s1 + $0x138] sm:$0xff]  }
  0x14   : > { %1142 = vmatprep.subr.bf16.mxu1 %v1248_v9  ;;  %v1264_v25 = vld [vmem:[%s1506_s1 + $0xc8] sm:$0xff]   ;;  %v1268_v29 = vld [vmem:[%s1506_s1 + $0xc0] sm:$0xff]   ;;  %v1278_v37 = vld [vmem:[%s1506_s1 + $0x130] sm:$0xff]  }
  0x15   : > { %v1265_v26 = vld [vmem:[%s1506_s1 + $0x8] sm:$0xff]   ;;  %v1269_v30 = vld [vmem:[%s1506_s1] sm:$0xff]   ;;  %v1289_v45 = vld [vmem:[%s1443_s13 + $0x5c] ss:$20 sps:$4 sm:$0xff]  }
  0x16   : > { %1103 = vmatpush3.bf16.msra.mxu0 %v1249_v10  ;;  %v1266_v27 = vld [vmem:[%s1506_s1 + $0x88] sm:$0xff]   ;;  %v1270_v31 = vld [vmem:[%s1506_s1 + $0x80] sm:$0xff]   ;;  %v1293_v46 = vld [vmem:[%s1506_s1 + $0x118] sm:$0xff]  }
  0x17   : > { %1143 = vmatpush3.bf16.msra.mxu1 %v1250_v11  ;;  %1104 = vmatprep.subr.bf16.mxu0 %v1251_v12  ;;  %v1271_v32 = vld [vmem:[%s1443_s13] ss:$20 sps:$4 sm:$0xff]   ;;  %v1273_v33 = vld [vmem:[%s1443_s13 + $0x4] ss:$20 sps:$4 sm:$0xff]   ;;  %v1274_v34 = vld [vmem:[%s1443_s13 + $0x8] ss:$20 sps:$4 sm:$0xff]  }
  0x18   : > { %1144 = vmatprep.subr.bf16.mxu1 %v1252_v13  ;;  %v1276_v35 = vld [vmem:[%s1443_s13 + $0xc] ss:$20 sps:$4 sm:$0xff]   ;;  %665 = vmatprep.mubr.bf16.mxu0 %v1273_v33  ;;  %v1281_v39 = vld [vmem:[%s1443_s13 + $0x34] ss:$20 sps:$4 sm:$0xff]   ;;  %v1284_v42 = vld [vmem:[%s1443_s13 + $0x30] ss:$20 sps:$4 sm:$0xff]  }
  0x19   : > { %730 = vmatprep.mubr.bf16.mxu1 %v1276_v35  ;;  %v1279_v38 = vld [vmem:[%s1443_s13 + $0x2c] ss:$20 sps:$4 sm:$0xff]   ;;  %v1283_v40 = vld [vmem:[%s1443_s13 + $0x28] ss:$20 sps:$4 sm:$0xff]   ;;  %v1291_v47 = vld [vmem:[%s1443_s13 + $0x50] ss:$20 sps:$4 sm:$0xff]  }
  0x1a   : > { %1105 = vmatpush3.bf16.msra.mxu0 %v1253_v14  ;;  %v1285_v41 = vld [vmem:[%s1506_s1 + $0x128] sm:$0xff]   ;;  %v1286_v44 = vld [vmem:[%s1506_s1 + $0x120] sm:$0xff]   ;;  %v1295_v49 = vld [vmem:[%s1443_s13 + $0x7c] ss:$20 sps:$4 sm:$0xff]  }
  0x1b   : > { %1145 = vmatpush3.bf16.msra.mxu1 %v1254_v15  ;;  %1106 = vmatprep.subr.bf16.mxu0 %v1255_v16  ;;  %v1287_v43 = vld [vmem:[%s1443_s13 + $0x54] ss:$20 sps:$4 sm:$0xff]   ;;  %v1292_v48 = vld [vmem:[%s1443_s13 + $0x58] ss:$20 sps:$4 sm:$0xff]   ;;  %v1303_v55 = vld [vmem:[%s1443_s13 + $0x10] ss:$20 sps:$4 sm:$0xff]  }
  0x1c   : > { %1146 = vmatprep.subr.bf16.mxu1 %v1256_v17  ;;  %v1297_v50 = vld [vmem:[%s1443_s13 + $0x84] ss:$20 sps:$4 sm:$0xff]   ;;  %v1294_v51 = vld [vmem:[%s1506_s1 + $0x110] sm:$0xff]   ;;  %v1301_v52 = vld [vmem:[%s1506_s1 + $0x108] sm:$0xff]  }
  0x1d   : > { %v1299_v53 = vld [vmem:[%s1443_s13 + $0x78] ss:$20 sps:$4 sm:$0xff]   ;;  %v1300_v54 = vld [vmem:[%s1443_s13 + $0x80] ss:$20 sps:$4 sm:$0xff]   ;;  %v1306_v59 = vld [vmem:[%s1443_s13 + $0x88] ss:$20 sps:$4 sm:$0xff]  }
  0x1e   : > { %1107 = vmatpush3.bf16.msra.mxu0 %v1257_v18  ;;  %v1304_v56 = vld [vmem:[%s1443_s13 + $0x60] ss:$20 sps:$4 sm:$0xff]   ;;  %v1305_v58 = vld [vmem:[%s1443_s13 + $0x38] ss:$20 sps:$4 sm:$0xff]  }
  0x1f   : > { %1147 = vmatpush3.bf16.msra.mxu1 %v1258_v19  ;;  %1108 = vmatprep.subr.bf16.mxu0 %v1259_v20  ;;  %v1302_v57 = vld [vmem:[%s1506_s1 + $0x100] sm:$0xff]  }
  0x20   : > { %1148 = vmatprep.subr.bf16.mxu1 %v1260_v21 }
  0x22   : > { %1109 = vmatpush3.bf16.msra.mxu0 %v1261_v22 }
  0x23   : > { %1149 = vmatpush3.bf16.msra.mxu1 %v1262_v23  ;;  %1110 = vmatprep.subr.bf16.mxu0 %v1263_v24 }
  0x24   : > { %1150 = vmatprep.subr.bf16.mxu1 %v1264_v25 }
  0x26   : > { %1111 = vmatpush3.bf16.msra.mxu0 %v1265_v26 }
  0x27   : > { %1151 = vmatpush3.bf16.msra.mxu1 %v1266_v27  ;;  %1112 = vmatprep.subr.bf16.mxu0 %v1267_v28 }
  0x28   : > { %1152 = vmatprep.subr.bf16.mxu1 %v1268_v29  ;;  %v996_v29 = vld [vmem:[%s1507_s2] ss:$0 sm:$0xff] }
  0x2a   : > { %1113 = vmatpush3.bf16.msra.mxu0 %v1269_v30 }
  0x2b   : > { %1153 = vmatpush3.bf16.msra.mxu1 %v1270_v31  ;;  %1190 = vmatprep.subr.bf16.mxu0 %v1277_v36 }
  0x2c   : > { %1214 = vmatprep.subr.bf16.mxu1 %v1277_v36 }
  0x2d   : > { %666 = vmatmul.mubr.bf16.vlgmr.msra.gmra.mxu0 %v1271_v32 }
  0x2e   : > { %731 = vmatmul.mubr.bf16.vlgmr.msra.gmra.mxu1 %v1274_v34  ;;  %1191 = vmatpush3.bf16.msra.mxu0 %v1277_v36 }
  0x2f   : > { %1222 = vmatpush3.bf16.msra.mxu1 %v1277_v36  ;;  %1192 = vmatprep.subr.bf16.mxu0 %v1278_v37 }
  0x30   : > { %1215 = vmatprep.subr.bf16.mxu1 %v1278_v37  ;;  %673 = vmatprep.mubr.bf16.mxu0 %v1279_v38 }
  0x31   : > { %738 = vmatprep.mubr.bf16.mxu1 %v1281_v39 }
  0x32   : > { %1193 = vmatpush3.bf16.msra.mxu0 %v1278_v37 }
  0x33   : > { %1223 = vmatpush3.bf16.msra.mxu1 %v1278_v37  ;;  %1194 = vmatprep.subr.bf16.mxu0 %v1285_v41 }
  0x34   : > { %1216 = vmatprep.subr.bf16.mxu1 %v1285_v41 }
  0x35   : > { %674 = vmatmul.mubr.bf16.gmra.mxu0 %v1283_v40 }
  0x36   : > { %739 = vmatmul.mubr.bf16.gmra.mxu1 %v1284_v42  ;;  %681 = vmatprep.mubr.bf16.mxu0 %v1287_v43 }
  0x37   : > { %1195 = vmatpush3.bf16.msra.mxu0 %v1285_v41  ;;  %746 = vmatprep.mubr.bf16.mxu1 %v1289_v45 }
  0x38   : > { %1224 = vmatpush3.bf16.msra.mxu1 %v1285_v41  ;;  %1196 = vmatprep.subr.bf16.mxu0 %v1286_v44 }
  0x39   : > { %1217 = vmatprep.subr.bf16.mxu1 %v1286_v44 }
  0x3b   : > { %1197 = vmatpush3.bf16.msra.mxu0 %v1286_v44 }
  0x3c   : > { %1225 = vmatpush3.bf16.msra.mxu1 %v1286_v44  ;;  %1198 = vmatprep.subr.bf16.mxu0 %v1293_v46 }
  0x3d   : > { %682 = vmatmul.mubr.bf16.gmra.mxu0 %v1291_v47  ;;  %1218 = vmatprep.subr.bf16.mxu1 %v1293_v46 }
  0x3e   : > { %747 = vmatmul.mubr.bf16.gmra.mxu1 %v1292_v48  ;;  %689 = vmatprep.mubr.bf16.mxu0 %v1295_v49 }
  0x3f   : > { %1199 = vmatpush3.bf16.msra.mxu0 %v1293_v46  ;;  %754 = vmatprep.mubr.bf16.mxu1 %v1297_v50 }
  0x40   : > { %1226 = vmatpush3.bf16.msra.mxu1 %v1293_v46  ;;  %1200 = vmatprep.subr.bf16.mxu0 %v1294_v51 }
  0x41   : > { %1219 = vmatprep.subr.bf16.mxu1 %v1294_v51 }
  0x43   : > { %1201 = vmatpush3.bf16.msra.mxu0 %v1294_v51 }
  0x44   : > { %1227 = vmatpush3.bf16.msra.mxu1 %v1294_v51  ;;  %1202 = vmatprep.subr.bf16.mxu0 %v1301_v52 }
  0x45   : > { %690 = vmatmul.mubr.bf16.gmra.mxu0 %v1299_v53  ;;  %1220 = vmatprep.subr.bf16.mxu1 %v1301_v52 }
  0x46   : > { %755 = vmatmul.mubr.bf16.gmra.mxu1 %v1300_v54  ;;  %1206 = vmatprep.mubr.bf16.mxu0 %v1303_v55 }
  0x47   : > { %1203 = vmatpush3.bf16.msra.mxu0 %v1301_v52  ;;  %1210 = vmatprep.mubr.bf16.mxu1 %v1304_v56 }
  0x48   : > { %1228 = vmatpush3.bf16.msra.mxu1 %v1301_v52  ;;  %1204 = vmatprep.subr.bf16.mxu0 %v1302_v57 }
  0x49   : > { %1221 = vmatprep.subr.bf16.mxu1 %v1302_v57 }
  0x4b   : > { %1205 = vmatpush3.bf16.msra.mxu0 %v1302_v57 }
  0x4c   : > { %1229 = vmatpush3.bf16.msra.mxu1 %v1302_v57 }
  0x4e   : > { %1207 = vmatmul.mubr.bf16.vlgmr.msra.gmra.mxu0 %v1305_v58 }
  0x4f   : > { %1211 = vmatmul.mubr.bf16.vlgmr.msra.gmra.mxu1 %v1306_v59 }
  0xed   : > { %v1114_v60 = vpop.f32.mrf.mxu0 }
  0xee   : > { %v1154_v61 = vpop.f32.mrf.mxu1 }
  0xef   : > { %v1115_v62 = vpop.f32.mrf.mxu0 }
  0xf0   : > { %v1155_v63 = vpop.f32.mrf.mxu1  ;;  %v1116_v26 = vadd.f32 %v1115_v62, %v1114_v60 }
  0xf1   : > { %v1117_v0 = vpop.f32.mrf.mxu0  ;;  %v1156_v35 = vadd.f32 %v1155_v63, %v1154_v61 }
  0xf2   : > { %v1157_v1 = vpop.f32.mrf.mxu1  ;;  %v668_v34 = vadd.f32 %v1116_v26, %v996_v29 }
  0xf3   : > { %v1118_v2 = vpop.f32.mrf.mxu0 }
  0xf4   : > { %v1158_v3 = vpop.f32.mrf.mxu1  ;;  %v1119_v27 = vadd.f32 %v1118_v2, %v1117_v0  ;;  %v733_v49 = vadd.f32 %v1156_v35, %v668_v34 }
  0xf5   : > { %v1120_v4 = vpop.f32.mrf.mxu0  ;;  %v1159_v37 = vadd.f32 %v1158_v3, %v1157_v1 }
  0xf6   : > { %v1160_v5 = vpop.f32.mrf.mxu1  ;;  %v671_v36 = vadd.f32 %v1119_v27, %v996_v29 }
  0xf7   : > { %v1121_v6 = vpop.f32.mrf.mxu0 }
  0xf8   : > { %v1161_v7 = vpop.f32.mrf.mxu1  ;;  %v1122_v31 = vadd.f32 %v1121_v6, %v1120_v4  ;;  %v736_v50 = vadd.f32 %v1159_v37, %v671_v36 }
  0xf9   : > { %v1123_v8 = vpop.f32.mrf.mxu0  ;;  %v1162_v42 = vadd.f32 %v1161_v7, %v1160_v5 }
  0xfa   : > { %v1163_v9 = vpop.f32.mrf.mxu1  ;;  %v676_v41 = vadd.f32 %v1122_v31, %v996_v29 }
  0xfb   : > { %v1124_v10 = vpop.f32.mrf.mxu0 }
  0xfc   : > { %v1164_v11 = vpop.f32.mrf.mxu1  ;;  %v1125_v32 = vadd.f32 %v1124_v10, %v1123_v8  ;;  %v741_v55 = vadd.f32 %v1162_v42, %v676_v41 }
  0xfd   : > { %v1126_v12 = vpop.f32.mrf.mxu0  ;;  %v1165_v44 = vadd.f32 %v1164_v11, %v1163_v9 }
  0xfe   : > { %v1166_v13 = vpop.f32.mrf.mxu1  ;;  %v679_v43 = vadd.f32 %v1125_v32, %v996_v29 }
  0xff   : > { %v1127_v14 = vpop.f32.mrf.mxu0 }
 0x100   : > { %v1167_v15 = vpop.f32.mrf.mxu1  ;;  %v1128_v39 = vadd.f32 %v1127_v14, %v1126_v12  ;;  %v744_v60 = vadd.f32 %v1165_v44, %v679_v43 }
 0x101   : > { %v1129_v16 = vpop.f32.mrf.mxu0  ;;  %v1168_v52 = vadd.f32 %v1167_v15, %v1166_v13 }
 0x102   : > { %v1169_v17 = vpop.f32.mrf.mxu1  ;;  %v684_v51 = vadd.f32 %v1128_v39, %v996_v29 }
 0x103   : > { %v1130_v18 = vpop.f32.mrf.mxu0 }
 0x104   : > { %v1170_v19 = vpop.f32.mrf.mxu1  ;;  %v1131_v45 = vadd.f32 %v1130_v18, %v1129_v16  ;;  %v749_v2 = vadd.f32 %v1168_v52, %v684_v51 }
 0x105   : > { %v1132_v20 = vpop.f32.mrf.mxu0  ;;  %v1171_v59 = vadd.f32 %v1170_v19, %v1169_v17 }
 0x106   : > { %v1172_v21 = vpop.f32.mrf.mxu1  ;;  %v687_v58 = vadd.f32 %v1131_v45, %v996_v29 }
 0x107   : > { %v1133_v22 = vpop.f32.mrf.mxu0 }
 0x108   : > { %v1173_v23 = vpop.f32.mrf.mxu1  ;;  %v1134_v48 = vadd.f32 %v1133_v22, %v1132_v20  ;;  %v752_v10 = vadd.f32 %v1171_v59, %v687_v58 }
 0x109   : > { %v1135_v24 = vpop.f32.mrf.mxu0  ;;  %v1174_v63 = vadd.f32 %v1173_v23, %v1172_v21 }
 0x10a   : > { %v1175_v25 = vpop.f32.mrf.mxu1  ;;  %v692_v62 = vadd.f32 %v1134_v48, %v996_v29 }
 0x10b   : > { %v1136_v28 = vpop.f32.mrf.mxu0 }
 0x10c   : > { %v1176_v30 = vpop.f32.mrf.mxu1  ;;  %v1137_v54 = vadd.f32 %v1136_v28, %v1135_v24  ;;  %v757_v8 = vadd.f32 %v1174_v63, %v692_v62 }
 0x10d   : > { %v1177_v4 = vadd.f32 %v1176_v30, %v1175_v25 }
 0x10e   : > { %v1208_v33 = vpop.f32.mrf.mxu0  ;;  %v695_v3 = vadd.f32 %v1137_v54, %v996_v29 }
 0x10f   : > { %v1212_v38 = vpop.f32.mrf.mxu1  ;;  %v806_v0 = vadd.f32 %v1208_v33, %v741_v55 }
 0x110   : > { %v797_v40 = vpop.f32.mrf.mxu0  ;;  %v760_v12 = vadd.f32 %v1177_v4, %v695_v3  ;;  %v822_v15 = vadd.f32 %v1212_v38, %v757_v8 }
 0x111   : > { %v813_v46 = vpop.f32.mrf.mxu1  ;;  %v798_v56 = vadd.f32 %v797_v40, %v733_v49 }
 0x112   : > { %v1209_v47 = vpop.f32.mrf.mxu0  ;;  %v814_v9 = vadd.f32 %v813_v46, %v749_v2 }
 0x113   : > { %v1213_v61 = vpop.f32.mrf.mxu1  ;;  %v809_v5 = vadd.f32 %v1209_v47, %v744_v60 }
 0x114   : > { %v800_v53 = vpop.f32.mrf.mxu0  ;;  %v825_v17 = vadd.f32 %v1213_v61, %v760_v12 }
 0x115   : > { %v801_v57 = vadd.f32 %v800_v53, %v736_v50  ;;  %v816_v7 = vpop.f32.mrf.mxu1 }
 0x116   : > { %v817_v13 = vadd.f32 %v816_v7, %v752_v10 }
 0x117   : > { %v828_v1 = vadd.f32 %v801_v57, %v798_v56 }
 0x119   : > { %v829_v6 = vadd.f32 %v828_v1, %v806_v0 }
 0x11b   : > { %v830_v11 = vadd.f32 %v829_v6, %v809_v5 }
 0x11d   : > { %v831_v14 = vadd.f32 %v830_v11, %v814_v9 }
 0x11f   : > { %v832_v16 = vadd.f32 %v831_v14, %v817_v13 }
 0x121   : > { %v833_v18 = vadd.f32 %v832_v16, %v822_v15 }
 0x123   : > { %v834_v19 = vadd.f32 %v833_v18, %v825_v17 }
 0x125   : > { %v835_v20 = vrot.slane %v834_v19, 4 }
 0x127   : > { %v836_v21 = vadd.f32 %v835_v20, %v834_v19 }
 0x129   : > { %v837_v22 = vrot.slane %v836_v21, 2 }
 0x12b   : > { %v838_v23 = vadd.f32 %v837_v22, %v836_v21 }
 0x12d   : > { %v839_v24 = vrot.slane %v838_v23, 1 }
 0x12f   : > { %v840_v25 = vadd.f32 %v839_v24, %v838_v23 }
 0x131   : > { %v842_v26 = vmul.f32 0.015625, %v840_v25 }
 0x133   : > { %v843_v27 = vsub.f32 %v798_v56, %v842_v26  ;;  %v844_v28 = vsub.f32 %v801_v57, %v842_v26  ;;  %v845_v29 = vsub.f32 %v806_v0, %v842_v26  ;;  %v846_v30 = vsub.f32 %v809_v5, %v842_v26 }
 0x134   : > { %v847_v33 = vsub.f32 %v814_v9, %v842_v26  ;;  %v848_v36 = vsub.f32 %v817_v13, %v842_v26  ;;  %v849_v39 = vsub.f32 %v822_v15, %v842_v26  ;;  %v850_v42 = vsub.f32 %v825_v17, %v842_v26 }
 0x135   : > { %v851_v31 = vmul.f32 %v843_v27, %v843_v27  ;;  %v852_v32 = vmul.f32 %v844_v28, %v844_v28  ;;  %v853_v34 = vmul.f32 %v845_v29, %v845_v29  ;;  %v854_v37 = vmul.f32 %v846_v30, %v846_v30 }
 0x136   : > { %v855_v40 = vmul.f32 %v847_v33, %v847_v33  ;;  %v856_v43 = vmul.f32 %v848_v36, %v848_v36  ;;  %v857_v45 = vmul.f32 %v849_v39, %v849_v39  ;;  %v858_v47 = vmul.f32 %v850_v42, %v850_v42 }
 0x137   : > { %v859_v35 = vadd.f32 %v852_v32, %v851_v31 }
 0x139   : > { %v860_v38 = vadd.f32 %v859_v35, %v853_v34 }
 0x13b   : > { %v861_v41 = vadd.f32 %v860_v38, %v854_v37 }
 0x13d   : > { %v862_v44 = vadd.f32 %v861_v41, %v855_v40 }
 0x13f   : > { %v863_v46 = vadd.f32 %v862_v44, %v856_v43 }
 0x141   : > { %v864_v48 = vadd.f32 %v863_v46, %v857_v45 }
 0x143   : > { %v865_v49 = vadd.f32 %v864_v48, %v858_v47 }
 0x145   : > { %v866_v50 = vrot.slane %v865_v49, 4 }
 0x147   : > { %v867_v51 = vadd.f32 %v866_v50, %v865_v49 }
 0x149   : > { %v868_v52 = vrot.slane %v867_v51, 2 }
 0x14b   : > { %v869_v53 = vadd.f32 %v868_v52, %v867_v51 }
 0x14d   : > { %v870_v54 = vrot.slane %v869_v53, 1 }
 0x14f   : > { %v871_v55 = vadd.f32 %v870_v54, %v869_v53 }
 0x151   : > { %v872_v56 = vmul.f32 0.015625, %v871_v55 }
 0x153   : > { %v873_v57 = vadd.f32 1e-05, %v872_v56 }
 0x155   : > { %1307 = vrsqrt.f32 %v873_v57 }
 0x162   : > { %v1308_v58 = vpop.eup %1307 }
 0x163   : > { %v875_v59 = vmul.f32 %v1308_v58, %v843_v27  ;;  %v876_v60 = vmul.f32 %v1308_v58, %v844_v28  ;;  %v877_v61 = vmul.f32 %v1308_v58, %v845_v29  ;;  %v878_v62 = vmul.f32 %v1308_v58, %v846_v30 }
 0x164   : > { %v879_v63 = vmul.f32 %v1308_v58, %v847_v33  ;;  %v880_v0 = vmul.f32 %v1308_v58, %v848_v36  ;;  %v881_v1 = vmul.f32 %v1308_v58, %v849_v39  ;;  %v882_v2 = vmul.f32 %v1308_v58, %v850_v42 }
 0x165   : > { %v883_v3 = vmax.f32 %v875_v59, 0.0  ;;  %v884_v4 = vmax.f32 %v876_v60, 0.0  ;;  %v885_v5 = vmax.f32 %v877_v61, 0.0  ;;  %v886_v6 = vmax.f32 %v878_v62, 0.0 }
 0x166   : > { %v887_v7 = vmax.f32 %v879_v63, 0.0  ;;  %v888_v8 = vmax.f32 %v880_v0, 0.0  ;;  %v889_v9 = vmax.f32 %v881_v1, 0.0  ;;  %v890_v10 = vmax.f32 %v882_v2, 0.0 }
 0x167   : > { %v1078_v11 = vpack.c.bf16 %v884_v4, %v883_v3  ;;  %v1083_v12 = vpack.c.bf16 %v886_v6, %v885_v5 }
 0x168   : > { %v1088_v13 = vpack.c.bf16 %v888_v8, %v887_v7  ;;  %v1093_v14 = vpack.c.bf16 %v890_v10, %v889_v9 }
 0x169   : > { %1079 = vst [vmem:[%s175_s28] sm:$0xff] %v1078_v11   ;;  %1095 = vst [vmem:[%s175_s28 + $0x8] sm:$0xff] %v1083_v12  }
 0x16a   : > { %1096 = vst [vmem:[%s175_s28 + $0x10] sm:$0xff] %v1088_v13   ;;  %1097 = vst [vmem:[%s175_s28 + $0x18] sm:$0xff] %v1093_v14  }
 0x16b PF: > { %s13_s12 = sadd.s32 1, %s1315_s12  }
 0x16c   : > { %p10_p4 = scmp.ge.s32.totalorder %s13_s12, 4  }
 0x16e   :  { %12 = sbr.rel (!%p10_p4) target bundleno = 1 (0x1), region = 62 }

// kernel: generator_forward.12
= control target key start
LH: loop header
LB: loop body
LE: loop exit
PB: predicated region body
PF: predicated region fallthrough
CT: control target
= control target key end

     0   :  { %s1894_s12 = smov 0   ;;  %s2363_s0 = inlined_call_operand.vmem [shape: bf16[32,1152], index: 0, kind: input, shape index: {}]   ;;  %s2364_s1 = inlined_call_operand.vmem [shape: bf16[1152,256], index: 1, kind: input, shape index: {}]   ;;  %s2365_s2 = inlined_call_operand.vmem [shape: f32[1,256], index: 2, kind: input, shape index: {}]   ;;  %s2366_s3 = inlined_call_operand.vmem [shape: bf16[32,256], index: 3, kind: output, shape index: {}]  }
   0x1 LB: > { %s1452_s13 = sadd.s32 4294967295, %s1871_s12   ;;  %p1456_p0 = scmp.ge.s32.totalorder %s1871_s12, 1  ;;  %s1871_s12 = sphi %s1894_s12, %s13_s12  }
   0x2   : > { %p139_p1 = scmp.lt.s32.totalorder %s1871_s12, 3 }
   0x4   : > { %p140_p2 = pnand %p1456_p0, %p139_p1 }
   0x5   : > { %s1457_s22 = sshll.u32 (!%p140_p2), %s1452_s13, 1 }
   0x6   : > { %143 = sbr.rel (%p140_p2) target bundleno = 432 (0x1b0), region = 32  ;;  %p166_p3 = scmp.lt.s32.totalorder (!%p140_p2), %s1457_s22, 3 }
   0xb   : > { %v1632_v0 = vld [vmem:[%s2364_s1 + $0x74] ss:$8 sps:$4 sm:$0xff]   ;;  %v1634_v1 = vld [vmem:[%s2364_s1 + $0x70] ss:$8 sps:$4 sm:$0xff]   ;;  %v1638_v4 = vld [vmem:[%s2364_s1 + $0x64] ss:$8 sps:$4 sm:$0xff]  }
   0xc   : > { %1112 = vmatprep.subr.bf16.mxu0 %v1632_v0  ;;  %v1635_v2 = vld [vmem:[%s2364_s1 + $0x174] ss:$8 sps:$4 sm:$0xff]   ;;  %v1637_v3 = vld [vmem:[%s2364_s1 + $0x170] ss:$8 sps:$4 sm:$0xff]   ;;  %v1640_v5 = vld [vmem:[%s2364_s1 + $0x60] ss:$8 sps:$4 sm:$0xff]  }
   0xd   : > { %1113 = vmatpush1.bf16.msra.mxu0 %v1634_v1  ;;  %1155 = vmatprep.subr.bf16.mxu1 %v1635_v2  ;;  %v1641_v6 = vld [vmem:[%s2364_s1 + $0x164] ss:$8 sps:$4 sm:$0xff]   ;;  %v1643_v7 = vld [vmem:[%s2364_s1 + $0x160] ss:$8 sps:$4 sm:$0xff]   ;;  %v1644_v8 = vld [vmem:[%s2364_s1 + $0x54] ss:$8 sps:$4 sm:$0xff]  }
   0xe   : > { %1156 = vmatpush1.bf16.msra.mxu1 %v1637_v3  ;;  %1114 = vmatprep.subr.bf16.mxu0 %v1638_v4  ;;  %v1646_v9 = vld [vmem:[%s2364_s1 + $0x50] ss:$8 sps:$4 sm:$0xff]   ;;  %v1647_v10 = vld [vmem:[%s2364_s1 + $0x154] ss:$8 sps:$4 sm:$0xff]   ;;  %v1650_v11 = vld [vmem:[%s2364_s1 + $0x44] ss:$8 sps:$4 sm:$0xff]  }
   0xf   : > { %1157 = vmatprep.subr.bf16.mxu1 %v1641_v6  ;;  %v1649_v12 = vld [vmem:[%s2364_s1 + $0x150] ss:$8 sps:$4 sm:$0xff]   ;;  %v1653_v13 = vld [vmem:[%s2364_s1 + $0x144] ss:$8 sps:$4 sm:$0xff]   ;;  %v1652_v14 = vld [vmem:[%s2364_s1 + $0x40] ss:$8 sps:$4 sm:$0xff]  }
  0x10   : > { %v1656_v15 = vld [vmem:[%s2364_s1 + $0x34] ss:$8 sps:$4 sm:$0xff]   ;;  %v1655_v16 = vld [vmem:[%s2364_s1 + $0x140] ss:$8 sps:$4 sm:$0xff]   ;;  %v1658_v18 = vld [vmem:[%s2364_s1 + $0x30] ss:$8 sps:$4 sm:$0xff]  }
  0x11   : > { %1115 = vmatpush1.bf16.msra.mxu0 %v1640_v5  ;;  %v1659_v17 = vld [vmem:[%s2364_s1 + $0x134] ss:$8 sps:$4 sm:$0xff]   ;;  %v1662_v19 = vld [vmem:[%s2364_s1 + $0x24] ss:$8 sps:$4 sm:$0xff]   ;;  %v1661_v20 = vld [vmem:[%s2364_s1 + $0x130] ss:$8 sps:$4 sm:$0xff]  }
  0x12   : > { %1116 = vmatprep.subr.bf16.mxu0 %v1644_v8  ;;  %1158 = vmatpush1.bf16.msra.mxu1 %v1643_v7  ;;  %v1665_v21 = vld [vmem:[%s2364_s1 + $0x124] ss:$8 sps:$4 sm:$0xff]   ;;  %v1664_v22 = vld [vmem:[%s2364_s1 + $0x20] ss:$8 sps:$4 sm:$0xff]   ;;  %v1668_v23 = vld [vmem:[%s2364_s1 + $0x14] ss:$8 sps:$4 sm:$0xff]  }
  0x13   : > { %1159 = vmatprep.subr.bf16.mxu1 %v1647_v10  ;;  %v1667_v24 = vld [vmem:[%s2364_s1 + $0x120] ss:$8 sps:$4 sm:$0xff]   ;;  %v1671_v25 = vld [vmem:[%s2364_s1 + $0x114] ss:$8 sps:$4 sm:$0xff]   ;;  %v1670_v26 = vld [vmem:[%s2364_s1 + $0x10] ss:$8 sps:$4 sm:$0xff]  }
  0x14   : > { %v1674_v27 = vld [vmem:[%s2364_s1 + $0x4] ss:$8 sps:$4 sm:$0xff]   ;;  %v1673_v28 = vld [vmem:[%s2364_s1 + $0x110] ss:$8 sps:$4 sm:$0xff]   ;;  %v1676_v30 = vld [vmem:[%s2364_s1] ss:$8 sps:$4 sm:$0xff]  }
  0x15   : > { %1117 = vmatpush1.bf16.msra.mxu0 %v1646_v9  ;;  %v1677_v29 = vld [vmem:[%s2364_s1 + $0x104] ss:$8 sps:$4 sm:$0xff]   ;;  %v1680_v31 = vld [vmem:[%s2364_s1 + $0xf4] ss:$8 sps:$4 sm:$0xff]   ;;  %v1679_v32 = vld [vmem:[%s2364_s1 + $0x100] ss:$8 sps:$4 sm:$0xff]  }
  0x16   : > { %1118 = vmatprep.subr.bf16.mxu0 %v1650_v11  ;;  %1160 = vmatpush1.bf16.msra.mxu1 %v1649_v12  ;;  %v1683_v33 = vld [vmem:[%s2364_s1 + $0x1f4] ss:$8 sps:$4 sm:$0xff]   ;;  %v1682_v34 = vld [vmem:[%s2364_s1 + $0xf0] ss:$8 sps:$4 sm:$0xff]   ;;  %v1686_v35 = vld [vmem:[%s2364_s1 + $0xe4] ss:$8 sps:$4 sm:$0xff]  }
  0x17   : > { %1161 = vmatprep.subr.bf16.mxu1 %v1653_v13  ;;  %s2368_s22 = smov (!%p166_p3, %s1457_s22), 3  ;;  %v1685_v36 = vld [vmem:[%s2364_s1 + $0x1f0] ss:$8 sps:$4 sm:$0xff]   ;;  %v1689_v37 = vld [vmem:[%s2364_s1 + $0x1e4] ss:$8 sps:$4 sm:$0xff]  }
  0x18   : > { %v1688_v38 = vld [vmem:[%s2364_s1 + $0xe0] ss:$8 sps:$4 sm:$0xff]   ;;  %v1692_v39 = vld [vmem:[%s2364_s1 + $0xd4] ss:$8 sps:$4 sm:$0xff]   ;;  %s1622_s19 = smul.u32 36, %s2368_s22 }
  0x19   : > { %1119 = vmatpush1.bf16.msra.mxu0 %v1652_v14  ;;  %v1691_v40 = vld [vmem:[%s2364_s1 + $0x1e0] ss:$8 sps:$4 sm:$0xff]   ;;  %v1695_v41 = vld [vmem:[%s2364_s1 + $0x1d4] ss:$8 sps:$4 sm:$0xff]   ;;  %v1694_v42 = vld [vmem:[%s2364_s1 + $0xd0] ss:$8 sps:$4 sm:$0xff]  }
  0x1a   : > { %1120 = vmatprep.subr.bf16.mxu0 %v1656_v15  ;;  %1162 = vmatpush1.bf16.msra.mxu1 %v1655_v16  ;;  %v1698_v43 = vld [vmem:[%s2364_s1 + $0xc4] ss:$8 sps:$4 sm:$0xff]   ;;  %s2042_s13 = scalar_lea.vmem %s2363_s0, %s1622_s19  ;;  %v1697_v44 = vld [vmem:[%s2364_s1 + $0x1d0] ss:$8 sps:$4 sm:$0xff]   ;;  %v1700_v46 = vld [vmem:[%s2364_s1 + $0xc0] ss:$8 sps:$4 sm:$0xff]  }
  0x1b   : > { %1163 = vmatprep.subr.bf16.mxu1 %v1659_v17  ;;  %v1701_v45 = vld [vmem:[%s2364_s1 + $0x1c4] ss:$8 sps:$4 sm:$0xff]   ;;  %v1704_v48 = vld [vmem:[%s2364_s1 + $0xb4] ss:$8 sps:$4 sm:$0xff]   ;;  %v1703_v49 = vld [vmem:[%s2364_s1 + $0x1c0] ss:$8 sps:$4 sm:$0xff]  }
  0x1c   : > { %v1729_v47 = vld [vmem:[%s2042_s13 + $0x4] ss:$36 sps:$4 sm:$0xff]   ;;  %v1707_v50 = vld [vmem:[%s2364_s1 + $0x1b4] ss:$8 sps:$4 sm:$0xff]   ;;  %v1736_v51 = vld [vmem:[%s2042_s13 + $0xc] ss:$36 sps:$4 sm:$0xff]  }
  0x1d   : > { %1121 = vmatpush1.bf16.msra.mxu0 %v1658_v18  ;;  %1144 = vmatprep.mubr.bf16.mxu0 %v1729_v47  ;;  %v1706_v52 = vld [vmem:[%s2364_s1 + $0xb0] ss:$8 sps:$4 sm:$0xff]   ;;  %v1710_v53 = vld [vmem:[%s2364_s1 + $0xa4] ss:$8 sps:$4 sm:$0xff]   ;;  %v1712_v56 = vld [vmem:[%s2364_s1 + $0xa0] ss:$8 sps:$4 sm:$0xff]  }
  0x1e   : > { %1122 = vmatprep.subr.bf16.mxu0 %v1662_v19  ;;  %1164 = vmatpush1.bf16.msra.mxu1 %v1661_v20  ;;  %v1709_v54 = vld [vmem:[%s2364_s1 + $0x1b0] ss:$8 sps:$4 sm:$0xff]   ;;  %v1713_v55 = vld [vmem:[%s2364_s1 + $0x1a4] ss:$8 sps:$4 sm:$0xff]   ;;  %v1716_v57 = vld [vmem:[%s2364_s1 + $0x94] ss:$8 sps:$4 sm:$0xff]  }
  0x1f   : > { %1165 = vmatprep.subr.bf16.mxu1 %v1665_v21  ;;  %1187 = vmatprep.mubr.bf16.mxu1 %v1736_v51  ;;  %v1715_v58 = vld [vmem:[%s2364_s1 + $0x1a0] ss:$8 sps:$4 sm:$0xff]   ;;  %v1719_v59 = vld [vmem:[%s2364_s1 + $0x194] ss:$8 sps:$4 sm:$0xff]   ;;  %v1718_v60 = vld [vmem:[%s2364_s1 + $0x90] ss:$8 sps:$4 sm:$0xff]  }
  0x20   : > { %v1722_v61 = vld [vmem:[%s2364_s1 + $0x84] ss:$8 sps:$4 sm:$0xff]   ;;  %v1721_v62 = vld [vmem:[%s2364_s1 + $0x190] ss:$8 sps:$4 sm:$0xff]   ;;  %v1724_v0 = vld [vmem:[%s2364_s1 + $0x80] ss:$8 sps:$4 sm:$0xff]  }
  0x21   : > { %1123 = vmatpush1.bf16.msra.mxu0 %v1664_v22  ;;  %v1725_v63 = vld [vmem:[%s2364_s1 + $0x184] ss:$8 sps:$4 sm:$0xff]   ;;  %v1733_v1 = vld [vmem:[%s2364_s1 + $0x274] ss:$8 sps:$4 sm:$0xff]   ;;  %v1730_v2 = vld [vmem:[%s2364_s1 + $0x180] ss:$8 sps:$4 sm:$0xff]  }
  0x22   : > { %1124 = vmatprep.subr.bf16.mxu0 %v1668_v23  ;;  %1166 = vmatpush1.bf16.msra.mxu1 %v1667_v24  ;;  %v1727_v3 = vld [vmem:[%s2042_s13] ss:$36 sps:$4 sm:$0xff]   ;;  %v1739_v4 = vld [vmem:[%s2364_s1 + $0x374] ss:$8 sps:$4 sm:$0xff]   ;;  %v1731_v5 = vld [vmem:[%s2364_s1 + $0x270] ss:$8 sps:$4 sm:$0xff]  }
  0x23   : > { %1167 = vmatprep.subr.bf16.mxu1 %v1671_v25  ;;  %v1734_v6 = vld [vmem:[%s2042_s13 + $0x8] ss:$36 sps:$4 sm:$0xff]   ;;  %v1737_v8 = vld [vmem:[%s2364_s1 + $0x370] ss:$8 sps:$4 sm:$0xff]   ;;  %v1748_v11 = vld [vmem:[%s2364_s1 + $0x254] ss:$8 sps:$4 sm:$0xff]  }
  0x24   : > { %v1742_v7 = vld [vmem:[%s2364_s1 + $0x264] ss:$8 sps:$4 sm:$0xff]   ;;  %v1740_v10 = vld [vmem:[%s2364_s1 + $0x260] ss:$8 sps:$4 sm:$0xff]   ;;  %v1751_v13 = vld [vmem:[%s2364_s1 + $0x354] ss:$8 sps:$4 sm:$0xff]  }
  0x25   : > { %1125 = vmatpush1.bf16.msra.mxu0 %v1670_v26  ;;  %v1745_v9 = vld [vmem:[%s2364_s1 + $0x364] ss:$8 sps:$4 sm:$0xff]   ;;  %v1743_v12 = vld [vmem:[%s2364_s1 + $0x360] ss:$8 sps:$4 sm:$0xff]   ;;  %v1746_v14 = vld [vmem:[%s2364_s1 + $0x250] ss:$8 sps:$4 sm:$0xff]  }
  0x26   : > { %1126 = vmatprep.subr.bf16.mxu0 %v1674_v27  ;;  %1168 = vmatpush1.bf16.msra.mxu1 %v1673_v28  ;;  %v1754_v15 = vld [vmem:[%s2364_s1 + $0x244] ss:$8 sps:$4 sm:$0xff]   ;;  %v1749_v16 = vld [vmem:[%s2364_s1 + $0x350] ss:$8 sps:$4 sm:$0xff]   ;;  %v1752_v18 = vld [vmem:[%s2364_s1 + $0x240] ss:$8 sps:$4 sm:$0xff]  }
  0x27   : > { %1169 = vmatprep.subr.bf16.mxu1 %v1677_v29  ;;  %v1757_v17 = vld [vmem:[%s2364_s1 + $0x344] ss:$8 sps:$4 sm:$0xff]   ;;  %v1760_v19 = vld [vmem:[%s2364_s1 + $0x234] ss:$8 sps:$4 sm:$0xff]   ;;  %v1755_v20 = vld [vmem:[%s2364_s1 + $0x340] ss:$8 sps:$4 sm:$0xff]  }
  0x28   : > { %v1763_v21 = vld [vmem:[%s2364_s1 + $0x334] ss:$8 sps:$4 sm:$0xff]   ;;  %v1758_v22 = vld [vmem:[%s2364_s1 + $0x230] ss:$8 sps:$4 sm:$0xff]   ;;  %v1766_v23 = vld [vmem:[%s2364_s1 + $0x224] ss:$8 sps:$4 sm:$0xff]  }
  0x29   : > { %1127 = vmatpush1.bf16.msra.mxu0 %v1676_v30  ;;  %v1761_v24 = vld [vmem:[%s2364_s1 + $0x330] ss:$8 sps:$4 sm:$0xff]   ;;  %v1769_v25 = vld [vmem:[%s2364_s1 + $0x324] ss:$8 sps:$4 sm:$0xff]   ;;  %v1764_v26 = vld [vmem:[%s2364_s1 + $0x220] ss:$8 sps:$4 sm:$0xff]  }
  0x2a   : > { %1128 = vmatprep.subr.bf16.mxu0 %v1680_v31  ;;  %1170 = vmatpush1.bf16.msra.mxu1 %v1679_v32  ;;  %v1772_v27 = vld [vmem:[%s2364_s1 + $0x214] ss:$8 sps:$4 sm:$0xff]   ;;  %v1767_v28 = vld [vmem:[%s2364_s1 + $0x320] ss:$8 sps:$4 sm:$0xff]   ;;  %v1770_v30 = vld [vmem:[%s2364_s1 + $0x210] ss:$8 sps:$4 sm:$0xff]  }
  0x2b   : > { %1171 = vmatprep.subr.bf16.mxu1 %v1683_v33  ;;  %v1775_v29 = vld [vmem:[%s2364_s1 + $0x314] ss:$8 sps:$4 sm:$0xff]   ;;  %v1773_v31 = vld [vmem:[%s2364_s1 + $0x310] ss:$8 sps:$4 sm:$0xff]   ;;  %v1778_v32 = vld [vmem:[%s2364_s1 + $0x204] ss:$8 sps:$4 sm:$0xff]  }
  0x2c   : > { %v1832_v33 = vld [vmem:[%s2042_s13 + $0x14] ss:$36 sps:$4 sm:$0xff]   ;;  %v1805_v51 = vld [vmem:[%s2364_s1 + $0x3c4] ss:$8 sps:$4 sm:$0xff]  }
  0x2d   : > { %1129 = vmatpush2.bf16.msra.mxu0 %v1682_v34  ;;  %v1781_v34 = vld [vmem:[%s2364_s1 + $0x304] ss:$8 sps:$4 sm:$0xff]   ;;  %v1799_v47 = vld [vmem:[%s2364_s1 + $0x3d4] ss:$8 sps:$4 sm:$0xff]  }
  0x2e   : > { %1130 = vmatprep.subr.bf16.mxu0 %v1686_v35  ;;  %1172 = vmatpush2.bf16.msra.mxu1 %v1685_v36  ;;  %v1776_v35 = vld [vmem:[%s2364_s1 + $0x200] ss:$8 sps:$4 sm:$0xff]  }
  0x2f   : > { %1173 = vmatprep.subr.bf16.mxu1 %v1689_v37  ;;  %v1838_v36 = vld [vmem:[%s2042_s13 + $0x1c] ss:$36 sps:$4 sm:$0xff]  }
  0x30   : > { %v1784_v37 = vld [vmem:[%s2364_s1 + $0x2f4] ss:$8 sps:$4 sm:$0xff]  }
  0x31   : > { %1131 = vmatpush2.bf16.msra.mxu0 %v1688_v38  ;;  %v1779_v38 = vld [vmem:[%s2364_s1 + $0x300] ss:$8 sps:$4 sm:$0xff]  }
  0x32   : > { %1132 = vmatprep.subr.bf16.mxu0 %v1692_v39  ;;  %1174 = vmatpush2.bf16.msra.mxu1 %v1691_v40  ;;  %v1787_v39 = vld [vmem:[%s2364_s1 + $0x3f4] ss:$8 sps:$4 sm:$0xff]   ;;  %v1782_v40 = vld [vmem:[%s2364_s1 + $0x2f0] ss:$8 sps:$4 sm:$0xff]  }
  0x33   : > { %1175 = vmatprep.subr.bf16.mxu1 %v1695_v41  ;;  %v1790_v41 = vld [vmem:[%s2364_s1 + $0x2e4] ss:$8 sps:$4 sm:$0xff]  }
  0x35   : > { %1133 = vmatpush2.bf16.msra.mxu0 %v1694_v42  ;;  %v1785_v42 = vld [vmem:[%s2364_s1 + $0x3f0] ss:$8 sps:$4 sm:$0xff]  }
  0x36   : > { %1134 = vmatprep.subr.bf16.mxu0 %v1698_v43  ;;  %1176 = vmatpush2.bf16.msra.mxu1 %v1697_v44  ;;  %v1793_v43 = vld [vmem:[%s2364_s1 + $0x3e4] ss:$8 sps:$4 sm:$0xff]   ;;  %v1788_v44 = vld [vmem:[%s2364_s1 + $0x2e0] ss:$8 sps:$4 sm:$0xff]  }
  0x37   : > { %1177 = vmatprep.subr.bf16.mxu1 %v1701_v45  ;;  %v1796_v45 = vld [vmem:[%s2364_s1 + $0x2d4] ss:$8 sps:$4 sm:$0xff]  }
  0x39   : > { %1135 = vmatpush2.bf16.msra.mxu0 %v1700_v46  ;;  %v1791_v46 = vld [vmem:[%s2364_s1 + $0x3e0] ss:$8 sps:$4 sm:$0xff]  }
  0x3a   : > { %1136 = vmatprep.subr.bf16.mxu0 %v1704_v48  ;;  %1178 = vmatpush2.bf16.msra.mxu1 %v1703_v49  ;;  %v1794_v48 = vld [vmem:[%s2364_s1 + $0x2d0] ss:$8 sps:$4 sm:$0xff]   ;;  %v1802_v49 = vld [vmem:[%s2364_s1 + $0x2c4] ss:$8 sps:$4 sm:$0xff]  }
  0x3b   : > { %1179 = vmatprep.subr.bf16.mxu1 %v1707_v50  ;;  %v1797_v50 = vld [vmem:[%s2364_s1 + $0x3d0] ss:$8 sps:$4 sm:$0xff]  }
  0x3d   : > { %1137 = vmatpush2.bf16.msra.mxu0 %v1706_v52  ;;  %v1800_v52 = vld [vmem:[%s2364_s1 + $0x2c0] ss:$8 sps:$4 sm:$0xff]  }
  0x3e   : > { %1138 = vmatprep.subr.bf16.mxu0 %v1710_v53  ;;  %1180 = vmatpush2.bf16.msra.mxu1 %v1709_v54  ;;  %v1808_v53 = vld [vmem:[%s2364_s1 + $0x2b4] ss:$8 sps:$4 sm:$0xff]   ;;  %v1803_v54 = vld [vmem:[%s2364_s1 + $0x3c0] ss:$8 sps:$4 sm:$0xff]  }
  0x3f   : > { %1181 = vmatprep.subr.bf16.mxu1 %v1713_v55  ;;  %v1811_v55 = vld [vmem:[%s2364_s1 + $0x3b4] ss:$8 sps:$4 sm:$0xff]  }
  0x41   : > { %1139 = vmatpush2.bf16.msra.mxu0 %v1712_v56  ;;  %v1806_v56 = vld [vmem:[%s2364_s1 + $0x2b0] ss:$8 sps:$4 sm:$0xff]  }
  0x42   : > { %1140 = vmatprep.subr.bf16.mxu0 %v1716_v57  ;;  %1182 = vmatpush2.bf16.msra.mxu1 %v1715_v58  ;;  %v1814_v57 = vld [vmem:[%s2364_s1 + $0x2a4] ss:$8 sps:$4 sm:$0xff]   ;;  %v1809_v58 = vld [vmem:[%s2364_s1 + $0x3b0] ss:$8 sps:$4 sm:$0xff]  }
  0x43   : > { %1183 = vmatprep.subr.bf16.mxu1 %v1719_v59  ;;  %v1817_v59 = vld [vmem:[%s2364_s1 + $0x3a4] ss:$8 sps:$4 sm:$0xff]  }
  0x45   : > { %1141 = vmatpush2.bf16.msra.mxu0 %v1718_v60  ;;  %v1812_v60 = vld [vmem:[%s2364_s1 + $0x2a0] ss:$8 sps:$4 sm:$0xff]  }
  0x46   : > { %1142 = vmatprep.subr.bf16.mxu0 %v1722_v61  ;;  %1184 = vmatpush2.bf16.msra.mxu1 %v1721_v62  ;;  %v1820_v61 = vld [vmem:[%s2364_s1 + $0x294] ss:$8 sps:$4 sm:$0xff]   ;;  %v1815_v62 = vld [vmem:[%s2364_s1 + $0x3a0] ss:$8 sps:$4 sm:$0xff]  }
  0x47   : > { %1185 = vmatprep.subr.bf16.mxu1 %v1725_v63  ;;  %v1823_v63 = vld [vmem:[%s2364_s1 + $0x394] ss:$8 sps:$4 sm:$0xff]  }
  0x49   : > { %1143 = vmatpush2.bf16.msra.mxu0 %v1724_v0  ;;  %v1818_v0 = vld [vmem:[%s2364_s1 + $0x290] ss:$8 sps:$4 sm:$0xff]  }
  0x4a   : > { %1198 = vmatprep.subr.bf16.mxu0 %v1733_v1  ;;  %1186 = vmatpush2.bf16.msra.mxu1 %v1730_v2  ;;  %v1826_v1 = vld [vmem:[%s2364_s1 + $0x284] ss:$8 sps:$4 sm:$0xff]   ;;  %v1821_v2 = vld [vmem:[%s2364_s1 + $0x390] ss:$8 sps:$4 sm:$0xff]  }
  0x4b   : > { %1241 = vmatprep.subr.bf16.mxu1 %v1739_v4  ;;  %v1824_v4 = vld [vmem:[%s2364_s1 + $0x280] ss:$8 sps:$4 sm:$0xff]  }
  0x4c   : > { %1145 = vmatmul.mubr.bf16.vlgmr.msra.gmra.mxu0 %v1727_v3  ;;  %v1829_v3 = vld [vmem:[%s2364_s1 + $0x384] ss:$8 sps:$4 sm:$0xff]  }
  0x4d   : > { %1199 = vmatpush1.bf16.msra.mxu0 %v1731_v5  ;;  %1188 = vmatmul.mubr.bf16.vlgmr.msra.gmra.mxu1 %v1734_v6  ;;  %v1835_v5 = vld [vmem:[%s2364_s1 + $0x474] ss:$8 sps:$4 sm:$0xff]   ;;  %v1827_v6 = vld [vmem:[%s2364_s1 + $0x380] ss:$8 sps:$4 sm:$0xff]  }
  0x4e   : > { %1200 = vmatprep.subr.bf16.mxu0 %v1742_v7  ;;  %1242 = vmatpush1.bf16.msra.mxu1 %v1737_v8  ;;  %v1830_v7 = vld [vmem:[%s2042_s13 + $0x10] ss:$36 sps:$4 sm:$0xff]  }
  0x4f   : > { %1243 = vmatprep.subr.bf16.mxu1 %v1745_v9  ;;  %1230 = vmatprep.mubr.bf16.mxu0 %v1832_v33  ;;  %v1833_v8 = vld [vmem:[%s2364_s1 + $0x470] ss:$8 sps:$4 sm:$0xff]  }
  0x50   : > { %1273 = vmatprep.mubr.bf16.mxu1 %v1838_v36  ;;  %v1836_v9 = vld [vmem:[%s2042_s13 + $0x18] ss:$36 sps:$4 sm:$0xff]   ;;  %v334_v36 = vld [vmem:[%s2365_s2] sm:$0x3] }
  0x51   : > { %1201 = vmatpush1.bf16.msra.mxu0 %v1740_v10  ;;  %v1841_v10 = vld [vmem:[%s2364_s1 + $0x464] ss:$8 sps:$4 sm:$0xff]  }
  0x52   : > { %1202 = vmatprep.subr.bf16.mxu0 %v1748_v11  ;;  %1244 = vmatpush1.bf16.msra.mxu1 %v1743_v12  ;;  %v1839_v11 = vld [vmem:[%s2364_s1 + $0x460] ss:$8 sps:$4 sm:$0xff]   ;;  %v1873_v12 = vmov 0  }
  0x53   : > { %1245 = vmatprep.subr.bf16.mxu1 %v1751_v13  ;;  %v1844_v13 = vld [vmem:[%s2364_s1 + $0x454] ss:$8 sps:$4 sm:$0xff]  }
  0x55   : > { %1203 = vmatpush1.bf16.msra.mxu0 %v1746_v14  ;;  %v1842_v14 = vld [vmem:[%s2364_s1 + $0x450] ss:$8 sps:$4 sm:$0xff]  }
  0x56   : > { %1204 = vmatprep.subr.bf16.mxu0 %v1754_v15  ;;  %1246 = vmatpush1.bf16.msra.mxu1 %v1749_v16  ;;  %v1847_v15 = vld [vmem:[%s2364_s1 + $0x444] ss:$8 sps:$4 sm:$0xff]   ;;  %v1845_v16 = vld [vmem:[%s2364_s1 + $0x440] ss:$8 sps:$4 sm:$0xff]  }
  0x57   : > { %1247 = vmatprep.subr.bf16.mxu1 %v1757_v17  ;;  %v1850_v17 = vld [vmem:[%s2364_s1 + $0x434] ss:$8 sps:$4 sm:$0xff]  }
  0x59   : > { %1205 = vmatpush1.bf16.msra.mxu0 %v1752_v18  ;;  %v1848_v18 = vld [vmem:[%s2364_s1 + $0x430] ss:$8 sps:$4 sm:$0xff]  }
  0x5a   : > { %1206 = vmatprep.subr.bf16.mxu0 %v1760_v19  ;;  %1248 = vmatpush1.bf16.msra.mxu1 %v1755_v20  ;;  %v1853_v19 = vld [vmem:[%s2364_s1 + $0x424] ss:$8 sps:$4 sm:$0xff]   ;;  %v1851_v20 = vld [vmem:[%s2364_s1 + $0x420] ss:$8 sps:$4 sm:$0xff]  }
  0x5b   : > { %1249 = vmatprep.subr.bf16.mxu1 %v1763_v21  ;;  %v1856_v21 = vld [vmem:[%s2364_s1 + $0x414] ss:$8 sps:$4 sm:$0xff]  }
  0x5d   : > { %1207 = vmatpush1.bf16.msra.mxu0 %v1758_v22  ;;  %v1854_v22 = vld [vmem:[%s2364_s1 + $0x410] ss:$8 sps:$4 sm:$0xff]  }
  0x5e   : > { %1208 = vmatprep.subr.bf16.mxu0 %v1766_v23  ;;  %1250 = vmatpush1.bf16.msra.mxu1 %v1761_v24  ;;  %v1859_v23 = vld [vmem:[%s2364_s1 + $0x404] ss:$8 sps:$4 sm:$0xff]   ;;  %v1857_v24 = vld [vmem:[%s2364_s1 + $0x400] ss:$8 sps:$4 sm:$0xff]  }
  0x5f   : > { %1251 = vmatprep.subr.bf16.mxu1 %v1769_v25  ;;  %v1860_v25 = vld [vmem:[%s2042_s13 + $0x20] ss:$36 sps:$4 sm:$0xff]   ;;  %s1619_s13 = sshll.u32 %s2368_s22, 3 }
  0x60   : > { %s177_s18 = scalar_lea.vmem %s2366_s3, %s1619_s13 }
  0x61   : > { %1209 = vmatpush1.bf16.msra.mxu0 %v1764_v26 }
  0x62   : > { %1210 = vmatprep.subr.bf16.mxu0 %v1772_v27  ;;  %1252 = vmatpush1.bf16.msra.mxu1 %v1767_v28 }
  0x63   : > { %1253 = vmatprep.subr.bf16.mxu1 %v1775_v29  ;;  %v336_v29 = vlaneseq }
  0x65   : > { %1211 = vmatpush1.bf16.msra.mxu0 %v1770_v30 }
  0x66   : > { %1212 = vmatprep.subr.bf16.mxu0 %v1778_v32  ;;  %1254 = vmatpush1.bf16.msra.mxu1 %v1773_v31  ;;  %v337_v32 = vshrl.u32 %v336_v29, 7 }
  0x67   : > { %1255 = vmatprep.subr.bf16.mxu1 %v1781_v34 }
  0x69   : > { %1213 = vmatpush1.bf16.msra.mxu0 %v1776_v35  ;;  %v338_v35 = vsub.s32 0, %v337_v32 }
  0x6a   : > { %1214 = vmatprep.subr.bf16.mxu0 %v1784_v37  ;;  %1256 = vmatpush1.bf16.msra.mxu1 %v1779_v38  ;;  %v342_v38 = vsub.s32 1, %v337_v32 }
  0x6b   : > { %1257 = vmatprep.subr.bf16.mxu1 %v1787_v39 }
  0x6d   : > { %1215 = vmatpush2.bf16.msra.mxu0 %v1782_v40  ;;  %v339_v40 = vrot.slane %v334_v36, %v338_v35 }
  0x6e   : > { %1216 = vmatprep.subr.bf16.mxu0 %v1790_v41  ;;  %1258 = vmatpush2.bf16.msra.mxu1 %v1785_v42 }
  0x6f   : > { %1259 = vmatprep.subr.bf16.mxu1 %v1793_v43  ;;  %v343_v43 = vrot.slane %v334_v36, %v342_v38 }
  0x71   : > { %1217 = vmatpush2.bf16.msra.mxu0 %v1788_v44 }
  0x72   : > { %1218 = vmatprep.subr.bf16.mxu0 %v1796_v45  ;;  %1260 = vmatpush2.bf16.msra.mxu1 %v1791_v46 }
  0x73   : > { %1261 = vmatprep.subr.bf16.mxu1 %v1799_v47 }
  0x75   : > { %1219 = vmatpush2.bf16.msra.mxu0 %v1794_v48 }
  0x76   : > { %1220 = vmatprep.subr.bf16.mxu0 %v1802_v49  ;;  %1262 = vmatpush2.bf16.msra.mxu1 %v1797_v50 }
  0x77   : > { %1263 = vmatprep.subr.bf16.mxu1 %v1805_v51 }
  0x79   : > { %1221 = vmatpush2.bf16.msra.mxu0 %v1800_v52 }
  0x7a   : > { %1222 = vmatprep.subr.bf16.mxu0 %v1808_v53  ;;  %1264 = vmatpush2.bf16.msra.mxu1 %v1803_v54 }
  0x7b   : > { %1265 = vmatprep.subr.bf16.mxu1 %v1811_v55 }
  0x7d   : > { %1223 = vmatpush2.bf16.msra.mxu0 %v1806_v56 }
  0x7e   : > { %1224 = vmatprep.subr.bf16.mxu0 %v1814_v57  ;;  %1266 = vmatpush2.bf16.msra.mxu1 %v1809_v58 }
  0x7f   : > { %1267 = vmatprep.subr.bf16.mxu1 %v1817_v59 }
  0x81   : > { %1225 = vmatpush2.bf16.msra.mxu0 %v1812_v60 }
  0x82   : > { %1226 = vmatprep.subr.bf16.mxu0 %v1820_v61  ;;  %1268 = vmatpush2.bf16.msra.mxu1 %v1815_v62 }
  0x83   : > { %1269 = vmatprep.subr.bf16.mxu1 %v1823_v63 }
  0x85   : > { %1227 = vmatpush2.bf16.msra.mxu0 %v1818_v0 }
  0x86   : > { %1228 = vmatprep.subr.bf16.mxu0 %v1826_v1  ;;  %1270 = vmatpush2.bf16.msra.mxu1 %v1821_v2 }
  0x87   : > { %1271 = vmatprep.subr.bf16.mxu1 %v1829_v3 }
  0x89   : > { %1229 = vmatpush2.bf16.msra.mxu0 %v1824_v4 }
  0x8a   : > { %1284 = vmatprep.subr.bf16.mxu0 %v1835_v5  ;;  %1272 = vmatpush2.bf16.msra.mxu1 %v1827_v6 }
  0x8c   : > { %1231 = vmatmul.mubr.bf16.vlgmr.msra.gmra.mxu0 %v1830_v7 }
  0x8d   : > { %1285 = vmatpush1.bf16.msra.mxu0 %v1833_v8  ;;  %1316 = vmatprep.mubr.bf16.mxu0 %v1873_v12 }
  0x8e   : > { %1274 = vmatmul.mubr.bf16.vlgmr.msra.gmra.mxu1 %v1836_v9  ;;  %1286 = vmatprep.subr.bf16.mxu0 %v1841_v10 }
  0x91   : > { %1287 = vmatpush1.bf16.msra.mxu0 %v1839_v11 }
  0x92   : > { %1288 = vmatprep.subr.bf16.mxu0 %v1844_v13 }
  0x95   : > { %1289 = vmatpush1.bf16.msra.mxu0 %v1842_v14 }
  0x96   : > { %1290 = vmatprep.subr.bf16.mxu0 %v1847_v15 }
  0x99   : > { %1291 = vmatpush1.bf16.msra.mxu0 %v1845_v16 }
  0x9a   : > { %1292 = vmatprep.subr.bf16.mxu0 %v1850_v17 }
  0x9d   : > { %1293 = vmatpush1.bf16.msra.mxu0 %v1848_v18 }
  0x9e   : > { %1294 = vmatprep.subr.bf16.mxu0 %v1853_v19 }
  0xa1   : > { %1295 = vmatpush1.bf16.msra.mxu0 %v1851_v20 }
  0xa2   : > { %1296 = vmatprep.subr.bf16.mxu0 %v1856_v21 }
  0xa5   : > { %1297 = vmatpush1.bf16.msra.mxu0 %v1854_v22 }
  0xa6   : > { %1298 = vmatprep.subr.bf16.mxu0 %v1859_v23 }
  0xa9   : > { %1299 = vmatpush1.bf16.msra.mxu0 %v1857_v24 }
  0xac   : > { %1317 = vmatmul.mubr.bf16.vlgmr.msra.gmra.mxu0 %v1860_v25 }
 0x10c   : > { %v1146_v26 = vpop.f32.mrf.mxu0 }
 0x10d   : > { %v1189_v28 = vpop.f32.mrf.mxu1  ;;  %v1147_v44 = vadd.f32 %v1146_v26, %v339_v40 }
 0x10e   : > { %v1148_v27 = vpop.f32.mrf.mxu0 }
 0x10f   : > { %v1191_v31 = vpop.f32.mrf.mxu1  ;;  %v1149_v48 = vadd.f32 %v1148_v27, %v343_v43  ;;  %v1190_v50 = vadd.f32 %v1189_v28, %v1147_v44 }
 0x110   : > { %v1150_v30 = vpop.f32.mrf.mxu0 }
 0x111   : > { %v1193_v34 = vpop.f32.mrf.mxu1  ;;  %v1151_v45 = vadd.f32 %v1150_v30, %v339_v40  ;;  %v1192_v54 = vadd.f32 %v1191_v31, %v1149_v48 }
 0x112   : > { %v1152_v33 = vpop.f32.mrf.mxu0 }
 0x113   : > { %v1195_v39 = vpop.f32.mrf.mxu1  ;;  %v1153_v49 = vadd.f32 %v1152_v33, %v343_v43  ;;  %v1194_v51 = vadd.f32 %v1193_v34, %v1151_v45 }
 0x115   : > { %v1196_v55 = vadd.f32 %v1195_v39, %v1153_v49 }
 0x14c   : > { %v1232_v37 = vpop.f32.mrf.mxu0 }
 0x14d   : > { %v1233_v56 = vadd.f32 %v1232_v37, %v1190_v50 }
 0x14e   : > { %v1234_v41 = vpop.f32.mrf.mxu0  ;;  %v1275_v42 = vpop.f32.mrf.mxu1 }
 0x14f   : > { %v1235_v59 = vadd.f32 %v1234_v41, %v1192_v54  ;;  %v1276_v63 = vadd.f32 %v1275_v42, %v1233_v56 }
 0x150   : > { %v1236_v46 = vpop.f32.mrf.mxu0  ;;  %v1277_v47 = vpop.f32.mrf.mxu1 }
 0x151   : > { %v1237_v57 = vadd.f32 %v1236_v46, %v1194_v51  ;;  %v1278_v2 = vadd.f32 %v1277_v47, %v1235_v59 }
 0x152   : > { %v1238_v52 = vpop.f32.mrf.mxu0  ;;  %v1279_v53 = vpop.f32.mrf.mxu1 }
 0x153   : > { %v1239_v60 = vadd.f32 %v1238_v52, %v1196_v55  ;;  %v1280_v0 = vadd.f32 %v1279_v53, %v1237_v57 }
 0x154   : > { %v1281_v61 = vpop.f32.mrf.mxu1 }
 0x155   : > { %v1282_v3 = vadd.f32 %v1281_v61, %v1239_v60 }
 0x16c   : > { %v1318_v58 = vpop.f32.mrf.mxu0 }
 0x16d   : > { %v1319_v4 = vadd.f32 %v1318_v58, %v1276_v63 }
 0x16e   : > { %v1320_v62 = vpop.f32.mrf.mxu0 }
 0x16f   : > { %v1321_v7 = vadd.f32 %v1320_v62, %v1278_v2 }
 0x170   : > { %v1322_v1 = vpop.f32.mrf.mxu0 }
 0x171   : > { %v1323_v5 = vadd.f32 %v1322_v1, %v1280_v0 }
 0x172   : > { %v1324_v6 = vpop.f32.mrf.mxu0 }
 0x173   : > { %v1327_v8 = vadd.f32 %v1323_v5, %v1319_v4  ;;  %v1325_v9 = vadd.f32 %v1324_v6, %v1282_v3 }
 0x175   : > { %v1328_v10 = vrot.slane %v1327_v8, 4  ;;  %v1334_v11 = vadd.f32 %v1325_v9, %v1321_v7 }
 0x177   : > { %v1329_v12 = vadd.f32 %v1328_v10, %v1327_v8  ;;  %v1335_v13 = vrot.slane %v1334_v11, 4 }
 0x179   : > { %v1330_v14 = vrot.slane %v1329_v12, 2  ;;  %v1336_v15 = vadd.f32 %v1335_v13, %v1334_v11 }
 0x17b   : > { %v1331_v16 = vadd.f32 %v1330_v14, %v1329_v12  ;;  %v1337_v17 = vrot.slane %v1336_v15, 2 }
 0x17d   : > { %v1332_v18 = vrot.slane %v1331_v16, 1  ;;  %v1338_v19 = vadd.f32 %v1337_v17, %v1336_v15 }
 0x17f   : > { %v1333_v20 = vadd.f32 %v1332_v18, %v1331_v16  ;;  %v1339_v21 = vrot.slane %v1338_v19, 1 }
 0x181   : > { %v1342_v22 = vmul.f32 0.0625, %v1333_v20  ;;  %v1340_v23 = vadd.f32 %v1339_v21, %v1338_v19 }
 0x183   : > { %v1344_v24 = vsub.f32 %v1319_v4, %v1342_v22  ;;  %v1346_v25 = vsub.f32 %v1323_v5, %v1342_v22  ;;  %v1343_v26 = vmul.f32 0.0625, %v1340_v23 }
 0x185   : > { %v1348_v27 = vmul.f32 %v1344_v24, %v1344_v24  ;;  %v1350_v28 = vmul.f32 %v1346_v25, %v1346_v25  ;;  %v1345_v29 = vsub.f32 %v1321_v7, %v1343_v26  ;;  %v1347_v30 = vsub.f32 %v1325_v9, %v1343_v26 }
 0x187   : > { %v1352_v31 = vadd.f32 %v1350_v28, %v1348_v27  ;;  %v1349_v32 = vmul.f32 %v1345_v29, %v1345_v29  ;;  %v1351_v33 = vmul.f32 %v1347_v30, %v1347_v30 }
 0x189   : > { %v1353_v34 = vrot.slane %v1352_v31, 4  ;;  %v1359_v35 = vadd.f32 %v1351_v33, %v1349_v32 }
 0x18b   : > { %v1354_v36 = vadd.f32 %v1353_v34, %v1352_v31  ;;  %v1360_v37 = vrot.slane %v1359_v35, 4 }
 0x18d   : > { %v1355_v38 = vrot.slane %v1354_v36, 2  ;;  %v1361_v39 = vadd.f32 %v1360_v37, %v1359_v35 }
 0x18f   : > { %v1356_v40 = vadd.f32 %v1355_v38, %v1354_v36  ;;  %v1362_v41 = vrot.slane %v1361_v39, 2 }
 0x191   : > { %v1357_v42 = vrot.slane %v1356_v40, 1  ;;  %v1363_v43 = vadd.f32 %v1362_v41, %v1361_v39 }
 0x193   : > { %v1358_v44 = vadd.f32 %v1357_v42, %v1356_v40  ;;  %v1364_v45 = vrot.slane %v1363_v43, 1 }
 0x195   : > { %v1366_v46 = vmul.f32 0.0625, %v1358_v44  ;;  %v1365_v47 = vadd.f32 %v1364_v45, %v1363_v43 }
 0x197   : > { %v1368_v48 = vadd.f32 1e-05, %v1366_v46  ;;  %v1367_v49 = vmul.f32 0.0625, %v1365_v47 }
 0x199   : > { %1861 = vrsqrt.f32 %v1368_v48  ;;  %v1369_v50 = vadd.f32 1e-05, %v1367_v49 }
 0x19b   : > { %1863 = vrsqrt.f32 %v1369_v50 }
 0x1a6   : > { %v1862_v51 = vpop.eup %1861 }
 0x1a7   : > { %v1372_v52 = vmul.f32 %v1862_v51, %v1344_v24  ;;  %v1374_v53 = vmul.f32 %v1862_v51, %v1346_v25 }
 0x1a8   : > { %v1864_v54 = vpop.eup %1863 }
 0x1a9   : > { %v1373_v55 = vmul.f32 %v1864_v54, %v1345_v29  ;;  %v1375_v56 = vmul.f32 %v1864_v54, %v1347_v30  ;;  %v1376_v57 = vmax.f32 %v1372_v52, 0.0  ;;  %v1378_v58 = vmax.f32 %v1374_v53, 0.0 }
 0x1ab   : > { %v1377_v59 = vmax.f32 %v1373_v55, 0.0  ;;  %v1379_v60 = vmax.f32 %v1375_v56, 0.0 }
 0x1ad   : > { %v1620_v61 = vpack.c.bf16 %v1377_v59, %v1376_v57  ;;  %v1621_v62 = vpack.c.bf16 %v1379_v60, %v1378_v58 }
 0x1af   : > { %1392 = vst [vmem:[%s177_s18] sm:$0xff] %v1620_v61  ;;  %1393 = vst [vmem:[%s177_s18 + $0x8] sm:$0xff] %v1621_v62 }
 0x1b0 PF: > { %s13_s12 = sadd.s32 1, %s1871_s12  }
 0x1b1   : > { %p10_p4 = scmp.ge.s32.totalorder %s13_s12, 4  }
 0x1b3   :  { %12 = sbr.rel (!%p10_p4) target bundleno = 1 (0x1), region = 62 }

// kernel: generator_forward.14
= control target key start
LH: loop header
LB: loop body
LE: loop exit
PB: predicated region body
PF: predicated region fallthrough
CT: control target
= control target key end

     0   :  { %s3441_s15 = smov 0   ;;  %s4354_s0 = inlined_call_operand.vmem [shape: bf16[32,2304], index: 0, kind: input, shape index: {}]   ;;  %s4355_s1 = inlined_call_operand.vmem [shape: bf16[2304,256], index: 1, kind: input, shape index: {}]   ;;  %s4356_s2 = inlined_call_operand.vmem [shape: f32[1,256], index: 2, kind: input, shape index: {}]   ;;  %s4357_s3 = inlined_call_operand.vmem [shape: bf16[32,256], index: 3, kind: input, shape index: {}]   ;;  %s4358_s4 = inlined_call_operand.vmem [shape: bf16[32,256], index: 4, kind: output, shape index: {}]  }
   0x1 LB: > { %s2609_s16 = sadd.s32 4294967295, %s3414_s15   ;;  %p2613_p0 = scmp.ge.s32.totalorder %s3414_s15, 1  ;;  %s3414_s15 = sphi %s3441_s15, %s14_s15  }
   0x2   : > { %p176_p1 = scmp.lt.s32.totalorder %s3414_s15, 3 }
   0x4   : > { %p177_p2 = pnand %p2613_p0, %p176_p1 }
   0x5   : > { %s2614_s27 = sshll.u32 (!%p177_p2), %s2609_s16, 1 }
   0x6   : > { %180 = sbr.rel (%p177_p2) target bundleno = 592 (0x250), region = 36  ;;  %p211_p3 = scmp.lt.s32.totalorder (!%p177_p2), %s2614_s27, 3 }
   0xb   : > { %v2945_v0 = vld [vmem:[%s4355_s1 + $0x74] ss:$8 sps:$4 sm:$0xff]   ;;  %v2947_v1 = vld [vmem:[%s4355_s1 + $0x70] ss:$8 sps:$4 sm:$0xff]   ;;  %v2951_v4 = vld [vmem:[%s4355_s1 + $0x64] ss:$8 sps:$4 sm:$0xff]  }
   0xc   : > { %2079 = vmatprep.subr.bf16.mxu0 %v2945_v0  ;;  %v2948_v2 = vld [vmem:[%s4355_s1 + $0x174] ss:$8 sps:$4 sm:$0xff]   ;;  %v2950_v3 = vld [vmem:[%s4355_s1 + $0x170] ss:$8 sps:$4 sm:$0xff]   ;;  %v2953_v5 = vld [vmem:[%s4355_s1 + $0x60] ss:$8 sps:$4 sm:$0xff]  }
   0xd   : > { %2080 = vmatpush1.bf16.msra.mxu0 %v2947_v1  ;;  %2122 = vmatprep.subr.bf16.mxu1 %v2948_v2  ;;  %v2954_v6 = vld [vmem:[%s4355_s1 + $0x164] ss:$8 sps:$4 sm:$0xff]   ;;  %v2956_v7 = vld [vmem:[%s4355_s1 + $0x160] ss:$8 sps:$4 sm:$0xff]   ;;  %v2957_v8 = vld [vmem:[%s4355_s1 + $0x54] ss:$8 sps:$4 sm:$0xff]  }
   0xe   : > { %2123 = vmatpush1.bf16.msra.mxu1 %v2950_v3  ;;  %2081 = vmatprep.subr.bf16.mxu0 %v2951_v4  ;;  %v2959_v9 = vld [vmem:[%s4355_s1 + $0x50] ss:$8 sps:$4 sm:$0xff]   ;;  %v2960_v10 = vld [vmem:[%s4355_s1 + $0x154] ss:$8 sps:$4 sm:$0xff]   ;;  %v2963_v11 = vld [vmem:[%s4355_s1 + $0x44] ss:$8 sps:$4 sm:$0xff]  }
   0xf   : > { %2124 = vmatprep.subr.bf16.mxu1 %v2954_v6  ;;  %v2962_v12 = vld [vmem:[%s4355_s1 + $0x150] ss:$8 sps:$4 sm:$0xff]   ;;  %v2966_v13 = vld [vmem:[%s4355_s1 + $0x144] ss:$8 sps:$4 sm:$0xff]   ;;  %v2965_v14 = vld [vmem:[%s4355_s1 + $0x40] ss:$8 sps:$4 sm:$0xff]  }
  0x10   : > { %v2969_v15 = vld [vmem:[%s4355_s1 + $0x34] ss:$8 sps:$4 sm:$0xff]   ;;  %v2968_v16 = vld [vmem:[%s4355_s1 + $0x140] ss:$8 sps:$4 sm:$0xff]   ;;  %v2971_v18 = vld [vmem:[%s4355_s1 + $0x30] ss:$8 sps:$4 sm:$0xff]  }
  0x11   : > { %2082 = vmatpush1.bf16.msra.mxu0 %v2953_v5  ;;  %v2972_v17 = vld [vmem:[%s4355_s1 + $0x134] ss:$8 sps:$4 sm:$0xff]   ;;  %v2975_v19 = vld [vmem:[%s4355_s1 + $0x24] ss:$8 sps:$4 sm:$0xff]   ;;  %v2974_v20 = vld [vmem:[%s4355_s1 + $0x130] ss:$8 sps:$4 sm:$0xff]  }
  0x12   : > { %2083 = vmatprep.subr.bf16.mxu0 %v2957_v8  ;;  %2125 = vmatpush1.bf16.msra.mxu1 %v2956_v7  ;;  %v2978_v21 = vld [vmem:[%s4355_s1 + $0x124] ss:$8 sps:$4 sm:$0xff]   ;;  %v2977_v22 = vld [vmem:[%s4355_s1 + $0x20] ss:$8 sps:$4 sm:$0xff]   ;;  %v2981_v23 = vld [vmem:[%s4355_s1 + $0x14] ss:$8 sps:$4 sm:$0xff]  }
  0x13   : > { %2126 = vmatprep.subr.bf16.mxu1 %v2960_v10  ;;  %v2980_v24 = vld [vmem:[%s4355_s1 + $0x120] ss:$8 sps:$4 sm:$0xff]   ;;  %v2984_v25 = vld [vmem:[%s4355_s1 + $0x114] ss:$8 sps:$4 sm:$0xff]   ;;  %v2983_v26 = vld [vmem:[%s4355_s1 + $0x10] ss:$8 sps:$4 sm:$0xff]  }
  0x14   : > { %v2987_v27 = vld [vmem:[%s4355_s1 + $0x4] ss:$8 sps:$4 sm:$0xff]   ;;  %v2986_v28 = vld [vmem:[%s4355_s1 + $0x110] ss:$8 sps:$4 sm:$0xff]   ;;  %v2989_v30 = vld [vmem:[%s4355_s1] ss:$8 sps:$4 sm:$0xff]  }
  0x15   : > { %2084 = vmatpush1.bf16.msra.mxu0 %v2959_v9  ;;  %v2990_v29 = vld [vmem:[%s4355_s1 + $0x104] ss:$8 sps:$4 sm:$0xff]   ;;  %v2993_v31 = vld [vmem:[%s4355_s1 + $0xf4] ss:$8 sps:$4 sm:$0xff]   ;;  %v2992_v32 = vld [vmem:[%s4355_s1 + $0x100] ss:$8 sps:$4 sm:$0xff]  }
  0x16   : > { %2085 = vmatprep.subr.bf16.mxu0 %v2963_v11  ;;  %2127 = vmatpush1.bf16.msra.mxu1 %v2962_v12  ;;  %v2996_v33 = vld [vmem:[%s4355_s1 + $0x1f4] ss:$8 sps:$4 sm:$0xff]   ;;  %v2995_v34 = vld [vmem:[%s4355_s1 + $0xf0] ss:$8 sps:$4 sm:$0xff]   ;;  %v2999_v35 = vld [vmem:[%s4355_s1 + $0xe4] ss:$8 sps:$4 sm:$0xff]  }
  0x17   : > { %2128 = vmatprep.subr.bf16.mxu1 %v2966_v13  ;;  %s4360_s27 = smov (!%p211_p3, %s2614_s27), 3  ;;  %v2998_v36 = vld [vmem:[%s4355_s1 + $0x1f0] ss:$8 sps:$4 sm:$0xff]   ;;  %v3002_v37 = vld [vmem:[%s4355_s1 + $0x1e4] ss:$8 sps:$4 sm:$0xff]  }
  0x18   : > { %v3001_v38 = vld [vmem:[%s4355_s1 + $0xe0] ss:$8 sps:$4 sm:$0xff]   ;;  %v3005_v39 = vld [vmem:[%s4355_s1 + $0xd4] ss:$8 sps:$4 sm:$0xff]   ;;  %s2936_s25 = smul.u32 72, %s4360_s27  ;;  %s2932_s19 = sshll.u32 %s4360_s27, 3 }
  0x19   : > { %2086 = vmatpush1.bf16.msra.mxu0 %v2965_v14  ;;  %v3004_v40 = vld [vmem:[%s4355_s1 + $0x1e0] ss:$8 sps:$4 sm:$0xff]   ;;  %v3008_v41 = vld [vmem:[%s4355_s1 + $0x1d4] ss:$8 sps:$4 sm:$0xff]   ;;  %v3007_v42 = vld [vmem:[%s4355_s1 + $0xd0] ss:$8 sps:$4 sm:$0xff]   ;;  %s222_s22 = scalar_lea.vmem %s4357_s3, %s2932_s19  ;;  %s229_s24 = scalar_lea.vmem %s4358_s4, %s2932_s19 }
  0x1a   : > { %2087 = vmatprep.subr.bf16.mxu0 %v2969_v15  ;;  %2129 = vmatpush1.bf16.msra.mxu1 %v2968_v16  ;;  %v3011_v43 = vld [vmem:[%s4355_s1 + $0xc4] ss:$8 sps:$4 sm:$0xff]   ;;  %s3589_s10 = scalar_lea.vmem %s4354_s0, %s2936_s25  ;;  %v3010_v44 = vld [vmem:[%s4355_s1 + $0x1d0] ss:$8 sps:$4 sm:$0xff]   ;;  %v3013_v46 = vld [vmem:[%s4355_s1 + $0xc0] ss:$8 sps:$4 sm:$0xff]  }
  0x1b   : > { %2130 = vmatprep.subr.bf16.mxu1 %v2972_v17  ;;  %v3014_v45 = vld [vmem:[%s4355_s1 + $0x1c4] ss:$8 sps:$4 sm:$0xff]   ;;  %v3017_v48 = vld [vmem:[%s4355_s1 + $0xb4] ss:$8 sps:$4 sm:$0xff]   ;;  %v3016_v49 = vld [vmem:[%s4355_s1 + $0x1c0] ss:$8 sps:$4 sm:$0xff]  }
  0x1c   : > { %v3042_v47 = vld [vmem:[%s3589_s10 + $0x4] ss:$72 sps:$4 sm:$0xff]   ;;  %v3020_v50 = vld [vmem:[%s4355_s1 + $0x1b4] ss:$8 sps:$4 sm:$0xff]   ;;  %v3019_v52 = vld [vmem:[%s4355_s1 + $0xb0] ss:$8 sps:$4 sm:$0xff]  }
  0x1d   : > { %2088 = vmatpush1.bf16.msra.mxu0 %v2971_v18  ;;  %2111 = vmatprep.mubr.bf16.mxu0 %v3042_v47  ;;  %v3049_v51 = vld [vmem:[%s3589_s10 + $0xc] ss:$72 sps:$4 sm:$0xff]   ;;  %v3022_v54 = vld [vmem:[%s4355_s1 + $0x1b0] ss:$8 sps:$4 sm:$0xff]   ;;  %v3025_v56 = vld [vmem:[%s4355_s1 + $0xa0] ss:$8 sps:$4 sm:$0xff]  }
  0x1e   : > { %2089 = vmatprep.subr.bf16.mxu0 %v2975_v19  ;;  %2131 = vmatpush1.bf16.msra.mxu1 %v2974_v20  ;;  %v3023_v53 = vld [vmem:[%s4355_s1 + $0xa4] ss:$8 sps:$4 sm:$0xff]   ;;  %v3029_v57 = vld [vmem:[%s4355_s1 + $0x94] ss:$8 sps:$4 sm:$0xff]   ;;  %v3028_v58 = vld [vmem:[%s4355_s1 + $0x1a0] ss:$8 sps:$4 sm:$0xff]  }
  0x1f   : > { %2132 = vmatprep.subr.bf16.mxu1 %v2978_v21  ;;  %2154 = vmatprep.mubr.bf16.mxu1 %v3049_v51  ;;  %v3026_v55 = vld [vmem:[%s4355_s1 + $0x1a4] ss:$8 sps:$4 sm:$0xff]   ;;  %v3032_v59 = vld [vmem:[%s4355_s1 + $0x194] ss:$8 sps:$4 sm:$0xff]   ;;  %v3031_v60 = vld [vmem:[%s4355_s1 + $0x90] ss:$8 sps:$4 sm:$0xff]  }
  0x20   : > { %v3035_v61 = vld [vmem:[%s4355_s1 + $0x84] ss:$8 sps:$4 sm:$0xff]   ;;  %v3034_v62 = vld [vmem:[%s4355_s1 + $0x190] ss:$8 sps:$4 sm:$0xff]   ;;  %v3037_v0 = vld [vmem:[%s4355_s1 + $0x80] ss:$8 sps:$4 sm:$0xff]  }
  0x21   : > { %2090 = vmatpush1.bf16.msra.mxu0 %v2977_v22  ;;  %v3038_v63 = vld [vmem:[%s4355_s1 + $0x184] ss:$8 sps:$4 sm:$0xff]   ;;  %v3046_v1 = vld [vmem:[%s4355_s1 + $0x274] ss:$8 sps:$4 sm:$0xff]   ;;  %v3043_v2 = vld [vmem:[%s4355_s1 + $0x180] ss:$8 sps:$4 sm:$0xff]  }
  0x22   : > { %2091 = vmatprep.subr.bf16.mxu0 %v2981_v23  ;;  %2133 = vmatpush1.bf16.msra.mxu1 %v2980_v24  ;;  %v3040_v3 = vld [vmem:[%s3589_s10] ss:$72 sps:$4 sm:$0xff]   ;;  %v3052_v4 = vld [vmem:[%s4355_s1 + $0x374] ss:$8 sps:$4 sm:$0xff]   ;;  %v3044_v5 = vld [vmem:[%s4355_s1 + $0x270] ss:$8 sps:$4 sm:$0xff]  }
  0x23   : > { %2134 = vmatprep.subr.bf16.mxu1 %v2984_v25  ;;  %v3047_v6 = vld [vmem:[%s3589_s10 + $0x8] ss:$72 sps:$4 sm:$0xff]   ;;  %v3055_v7 = vld [vmem:[%s4355_s1 + $0x264] ss:$8 sps:$4 sm:$0xff]   ;;  %v3061_v11 = vld [vmem:[%s4355_s1 + $0x254] ss:$8 sps:$4 sm:$0xff]  }
  0x24   : > { %v3050_v8 = vld [vmem:[%s4355_s1 + $0x370] ss:$8 sps:$4 sm:$0xff]   ;;  %v3058_v9 = vld [vmem:[%s4355_s1 + $0x364] ss:$8 sps:$4 sm:$0xff]   ;;  %v3053_v10 = vld [vmem:[%s4355_s1 + $0x260] ss:$8 sps:$4 sm:$0xff]  }
  0x25   : > { %2092 = vmatpush1.bf16.msra.mxu0 %v2983_v26  ;;  %v3056_v12 = vld [vmem:[%s4355_s1 + $0x360] ss:$8 sps:$4 sm:$0xff]   ;;  %v3064_v13 = vld [vmem:[%s4355_s1 + $0x354] ss:$8 sps:$4 sm:$0xff]   ;;  %v3059_v14 = vld [vmem:[%s4355_s1 + $0x250] ss:$8 sps:$4 sm:$0xff]  }
  0x26   : > { %2093 = vmatprep.subr.bf16.mxu0 %v2987_v27  ;;  %2135 = vmatpush1.bf16.msra.mxu1 %v2986_v28  ;;  %v3067_v15 = vld [vmem:[%s4355_s1 + $0x244] ss:$8 sps:$4 sm:$0xff]   ;;  %v3062_v16 = vld [vmem:[%s4355_s1 + $0x350] ss:$8 sps:$4 sm:$0xff]   ;;  %v3065_v18 = vld [vmem:[%s4355_s1 + $0x240] ss:$8 sps:$4 sm:$0xff]  }
  0x27   : > { %2136 = vmatprep.subr.bf16.mxu1 %v2990_v29  ;;  %v3070_v17 = vld [vmem:[%s4355_s1 + $0x344] ss:$8 sps:$4 sm:$0xff]   ;;  %v3073_v19 = vld [vmem:[%s4355_s1 + $0x234] ss:$8 sps:$4 sm:$0xff]   ;;  %v3068_v20 = vld [vmem:[%s4355_s1 + $0x340] ss:$8 sps:$4 sm:$0xff]  }
  0x28   : > { %v3076_v21 = vld [vmem:[%s4355_s1 + $0x334] ss:$8 sps:$4 sm:$0xff]   ;;  %v3071_v22 = vld [vmem:[%s4355_s1 + $0x230] ss:$8 sps:$4 sm:$0xff]   ;;  %v3079_v23 = vld [vmem:[%s4355_s1 + $0x224] ss:$8 sps:$4 sm:$0xff]  }
  0x29   : > { %2094 = vmatpush1.bf16.msra.mxu0 %v2989_v30  ;;  %v3074_v24 = vld [vmem:[%s4355_s1 + $0x330] ss:$8 sps:$4 sm:$0xff]   ;;  %v3082_v25 = vld [vmem:[%s4355_s1 + $0x324] ss:$8 sps:$4 sm:$0xff]   ;;  %v3077_v26 = vld [vmem:[%s4355_s1 + $0x220] ss:$8 sps:$4 sm:$0xff]  }
  0x2a   : > { %2095 = vmatprep.subr.bf16.mxu0 %v2993_v31  ;;  %2137 = vmatpush1.bf16.msra.mxu1 %v2992_v32  ;;  %v3085_v27 = vld [vmem:[%s4355_s1 + $0x214] ss:$8 sps:$4 sm:$0xff]   ;;  %v3080_v28 = vld [vmem:[%s4355_s1 + $0x320] ss:$8 sps:$4 sm:$0xff]   ;;  %v3083_v30 = vld [vmem:[%s4355_s1 + $0x210] ss:$8 sps:$4 sm:$0xff]  }
  0x2b   : > { %2138 = vmatprep.subr.bf16.mxu1 %v2996_v33  ;;  %v3088_v29 = vld [vmem:[%s4355_s1 + $0x314] ss:$8 sps:$4 sm:$0xff]   ;;  %v3086_v31 = vld [vmem:[%s4355_s1 + $0x310] ss:$8 sps:$4 sm:$0xff]   ;;  %v3091_v32 = vld [vmem:[%s4355_s1 + $0x204] ss:$8 sps:$4 sm:$0xff]  }
  0x2c   : > { %v3145_v33 = vld [vmem:[%s3589_s10 + $0x14] ss:$72 sps:$4 sm:$0xff]   ;;  %v3118_v51 = vld [vmem:[%s4355_s1 + $0x3c4] ss:$8 sps:$4 sm:$0xff]  }
  0x2d   : > { %2096 = vmatpush2.bf16.msra.mxu0 %v2995_v34  ;;  %v3094_v34 = vld [vmem:[%s4355_s1 + $0x304] ss:$8 sps:$4 sm:$0xff]   ;;  %v3112_v47 = vld [vmem:[%s4355_s1 + $0x3d4] ss:$8 sps:$4 sm:$0xff]  }
  0x2e   : > { %2097 = vmatprep.subr.bf16.mxu0 %v2999_v35  ;;  %2139 = vmatpush2.bf16.msra.mxu1 %v2998_v36  ;;  %v3089_v35 = vld [vmem:[%s4355_s1 + $0x200] ss:$8 sps:$4 sm:$0xff]   ;;  %v3151_v36 = vld [vmem:[%s3589_s10 + $0x1c] ss:$72 sps:$4 sm:$0xff]  }
  0x2f   : > { %2140 = vmatprep.subr.bf16.mxu1 %v3002_v37  ;;  %v3097_v37 = vld [vmem:[%s4355_s1 + $0x2f4] ss:$8 sps:$4 sm:$0xff]  }
  0x31   : > { %2098 = vmatpush2.bf16.msra.mxu0 %v3001_v38  ;;  %v3092_v38 = vld [vmem:[%s4355_s1 + $0x300] ss:$8 sps:$4 sm:$0xff]  }
  0x32   : > { %2099 = vmatprep.subr.bf16.mxu0 %v3005_v39  ;;  %2141 = vmatpush2.bf16.msra.mxu1 %v3004_v40  ;;  %v3100_v39 = vld [vmem:[%s4355_s1 + $0x3f4] ss:$8 sps:$4 sm:$0xff]   ;;  %v3095_v40 = vld [vmem:[%s4355_s1 + $0x2f0] ss:$8 sps:$4 sm:$0xff]  }
  0x33   : > { %2142 = vmatprep.subr.bf16.mxu1 %v3008_v41  ;;  %v3103_v41 = vld [vmem:[%s4355_s1 + $0x2e4] ss:$8 sps:$4 sm:$0xff]  }
  0x35   : > { %2100 = vmatpush2.bf16.msra.mxu0 %v3007_v42  ;;  %v3098_v42 = vld [vmem:[%s4355_s1 + $0x3f0] ss:$8 sps:$4 sm:$0xff]  }
  0x36   : > { %2101 = vmatprep.subr.bf16.mxu0 %v3011_v43  ;;  %2143 = vmatpush2.bf16.msra.mxu1 %v3010_v44  ;;  %v3106_v43 = vld [vmem:[%s4355_s1 + $0x3e4] ss:$8 sps:$4 sm:$0xff]   ;;  %v3101_v44 = vld [vmem:[%s4355_s1 + $0x2e0] ss:$8 sps:$4 sm:$0xff]  }
  0x37   : > { %2144 = vmatprep.subr.bf16.mxu1 %v3014_v45  ;;  %v3109_v45 = vld [vmem:[%s4355_s1 + $0x2d4] ss:$8 sps:$4 sm:$0xff]  }
  0x39   : > { %2102 = vmatpush2.bf16.msra.mxu0 %v3013_v46  ;;  %v3104_v46 = vld [vmem:[%s4355_s1 + $0x3e0] ss:$8 sps:$4 sm:$0xff]  }
  0x3a   : > { %2103 = vmatprep.subr.bf16.mxu0 %v3017_v48  ;;  %2145 = vmatpush2.bf16.msra.mxu1 %v3016_v49  ;;  %v3107_v48 = vld [vmem:[%s4355_s1 + $0x2d0] ss:$8 sps:$4 sm:$0xff]   ;;  %v3115_v49 = vld [vmem:[%s4355_s1 + $0x2c4] ss:$8 sps:$4 sm:$0xff]  }
  0x3b   : > { %2146 = vmatprep.subr.bf16.mxu1 %v3020_v50  ;;  %v3110_v50 = vld [vmem:[%s4355_s1 + $0x3d0] ss:$8 sps:$4 sm:$0xff]  }
  0x3d   : > { %2104 = vmatpush2.bf16.msra.mxu0 %v3019_v52  ;;  %v3113_v52 = vld [vmem:[%s4355_s1 + $0x2c0] ss:$8 sps:$4 sm:$0xff]  }
  0x3e   : > { %2105 = vmatprep.subr.bf16.mxu0 %v3023_v53  ;;  %2147 = vmatpush2.bf16.msra.mxu1 %v3022_v54  ;;  %v3121_v53 = vld [vmem:[%s4355_s1 + $0x2b4] ss:$8 sps:$4 sm:$0xff]   ;;  %v3116_v54 = vld [vmem:[%s4355_s1 + $0x3c0] ss:$8 sps:$4 sm:$0xff]  }
  0x3f   : > { %2148 = vmatprep.subr.bf16.mxu1 %v3026_v55  ;;  %v3124_v55 = vld [vmem:[%s4355_s1 + $0x3b4] ss:$8 sps:$4 sm:$0xff]  }
  0x41   : > { %2106 = vmatpush2.bf16.msra.mxu0 %v3025_v56  ;;  %v3119_v56 = vld [vmem:[%s4355_s1 + $0x2b0] ss:$8 sps:$4 sm:$0xff]  }
  0x42   : > { %2107 = vmatprep.subr.bf16.mxu0 %v3029_v57  ;;  %2149 = vmatpush2.bf16.msra.mxu1 %v3028_v58  ;;  %v3127_v57 = vld [vmem:[%s4355_s1 + $0x2a4] ss:$8 sps:$4 sm:$0xff]   ;;  %v3122_v58 = vld [vmem:[%s4355_s1 + $0x3b0] ss:$8 sps:$4 sm:$0xff]  }
  0x43   : > { %2150 = vmatprep.subr.bf16.mxu1 %v3032_v59  ;;  %v3130_v59 = vld [vmem:[%s4355_s1 + $0x3a4] ss:$8 sps:$4 sm:$0xff]  }
  0x45   : > { %2108 = vmatpush2.bf16.msra.mxu0 %v3031_v60  ;;  %v3125_v60 = vld [vmem:[%s4355_s1 + $0x2a0] ss:$8 sps:$4 sm:$0xff]  }
  0x46   : > { %2109 = vmatprep.subr.bf16.mxu0 %v3035_v61  ;;  %2151 = vmatpush2.bf16.msra.mxu1 %v3034_v62  ;;  %v3133_v61 = vld [vmem:[%s4355_s1 + $0x294] ss:$8 sps:$4 sm:$0xff]   ;;  %v3128_v62 = vld [vmem:[%s4355_s1 + $0x3a0] ss:$8 sps:$4 sm:$0xff]  }
  0x47   : > { %2152 = vmatprep.subr.bf16.mxu1 %v3038_v63  ;;  %v3136_v63 = vld [vmem:[%s4355_s1 + $0x394] ss:$8 sps:$4 sm:$0xff]  }
  0x49   : > { %2110 = vmatpush2.bf16.msra.mxu0 %v3037_v0  ;;  %v3131_v0 = vld [vmem:[%s4355_s1 + $0x290] ss:$8 sps:$4 sm:$0xff]  }
  0x4a   : > { %2165 = vmatprep.subr.bf16.mxu0 %v3046_v1  ;;  %2153 = vmatpush2.bf16.msra.mxu1 %v3043_v2  ;;  %v3139_v1 = vld [vmem:[%s4355_s1 + $0x284] ss:$8 sps:$4 sm:$0xff]   ;;  %v3134_v2 = vld [vmem:[%s4355_s1 + $0x390] ss:$8 sps:$4 sm:$0xff]  }
  0x4b   : > { %2208 = vmatprep.subr.bf16.mxu1 %v3052_v4  ;;  %v3137_v4 = vld [vmem:[%s4355_s1 + $0x280] ss:$8 sps:$4 sm:$0xff]  }
  0x4c   : > { %2112 = vmatmul.mubr.bf16.vlgmr.msra.gmra.mxu0 %v3040_v3  ;;  %v3142_v3 = vld [vmem:[%s4355_s1 + $0x384] ss:$8 sps:$4 sm:$0xff]  }
  0x4d   : > { %2166 = vmatpush1.bf16.msra.mxu0 %v3044_v5  ;;  %2155 = vmatmul.mubr.bf16.vlgmr.msra.gmra.mxu1 %v3047_v6  ;;  %v3148_v5 = vld [vmem:[%s4355_s1 + $0x474] ss:$8 sps:$4 sm:$0xff]   ;;  %v3140_v6 = vld [vmem:[%s4355_s1 + $0x380] ss:$8 sps:$4 sm:$0xff]  }
  0x4e   : > { %2167 = vmatprep.subr.bf16.mxu0 %v3055_v7  ;;  %2209 = vmatpush1.bf16.msra.mxu1 %v3050_v8  ;;  %v3143_v7 = vld [vmem:[%s3589_s10 + $0x10] ss:$72 sps:$4 sm:$0xff]   ;;  %v3154_v8 = vld [vmem:[%s4355_s1 + $0x574] ss:$8 sps:$4 sm:$0xff]  }
  0x4f   : > { %2210 = vmatprep.subr.bf16.mxu1 %v3058_v9  ;;  %2197 = vmatprep.mubr.bf16.mxu0 %v3145_v33  ;;  %v3146_v9 = vld [vmem:[%s4355_s1 + $0x470] ss:$8 sps:$4 sm:$0xff]   ;;  %v3187_v33 = vld [vmem:[%s4355_s1 + $0x414] ss:$8 sps:$4 sm:$0xff]  }
  0x50   : > { %2240 = vmatprep.mubr.bf16.mxu1 %v3151_v36  ;;  %v3185_v36 = vld [vmem:[%s4355_s1 + $0x410] ss:$8 sps:$4 sm:$0xff]  }
  0x51   : > { %2168 = vmatpush1.bf16.msra.mxu0 %v3053_v10  ;;  %v3149_v10 = vld [vmem:[%s3589_s10 + $0x18] ss:$72 sps:$4 sm:$0xff]  }
  0x52   : > { %2169 = vmatprep.subr.bf16.mxu0 %v3061_v11  ;;  %2211 = vmatpush1.bf16.msra.mxu1 %v3056_v12  ;;  %v3157_v11 = vld [vmem:[%s4355_s1 + $0x464] ss:$8 sps:$4 sm:$0xff]   ;;  %v3152_v12 = vld [vmem:[%s4355_s1 + $0x570] ss:$8 sps:$4 sm:$0xff]  }
  0x53   : > { %2212 = vmatprep.subr.bf16.mxu1 %v3064_v13  ;;  %v3160_v13 = vld [vmem:[%s4355_s1 + $0x564] ss:$8 sps:$4 sm:$0xff]  }
  0x55   : > { %2170 = vmatpush1.bf16.msra.mxu0 %v3059_v14  ;;  %v3155_v14 = vld [vmem:[%s4355_s1 + $0x460] ss:$8 sps:$4 sm:$0xff]  }
  0x56   : > { %2171 = vmatprep.subr.bf16.mxu0 %v3067_v15  ;;  %2213 = vmatpush1.bf16.msra.mxu1 %v3062_v16  ;;  %v3163_v15 = vld [vmem:[%s4355_s1 + $0x454] ss:$8 sps:$4 sm:$0xff]   ;;  %v3158_v16 = vld [vmem:[%s4355_s1 + $0x560] ss:$8 sps:$4 sm:$0xff]  }
  0x57   : > { %2214 = vmatprep.subr.bf16.mxu1 %v3070_v17  ;;  %v3166_v17 = vld [vmem:[%s4355_s1 + $0x554] ss:$8 sps:$4 sm:$0xff]  }
  0x59   : > { %2172 = vmatpush1.bf16.msra.mxu0 %v3065_v18  ;;  %v3247_v18 = vld [vmem:[%s3589_s10 + $0x24] ss:$72 sps:$4 sm:$0xff]  }
  0x5a   : > { %2173 = vmatprep.subr.bf16.mxu0 %v3073_v19  ;;  %2215 = vmatpush1.bf16.msra.mxu1 %v3068_v20  ;;  %v3161_v19 = vld [vmem:[%s4355_s1 + $0x450] ss:$8 sps:$4 sm:$0xff]  }
  0x5b   : > { %2216 = vmatprep.subr.bf16.mxu1 %v3076_v21  ;;  %v3164_v20 = vld [vmem:[%s4355_s1 + $0x550] ss:$8 sps:$4 sm:$0xff]   ;;  %v3169_v21 = vld [vmem:[%s4355_s1 + $0x444] ss:$8 sps:$4 sm:$0xff]  }
  0x5d   : > { %2174 = vmatpush1.bf16.msra.mxu0 %v3071_v22  ;;  %v3253_v22 = vld [vmem:[%s3589_s10 + $0x2c] ss:$72 sps:$4 sm:$0xff]  }
  0x5e   : > { %2175 = vmatprep.subr.bf16.mxu0 %v3079_v23  ;;  %2217 = vmatpush1.bf16.msra.mxu1 %v3074_v24  ;;  %v3172_v23 = vld [vmem:[%s4355_s1 + $0x544] ss:$8 sps:$4 sm:$0xff]   ;;  %v3167_v24 = vld [vmem:[%s4355_s1 + $0x440] ss:$8 sps:$4 sm:$0xff]  }
  0x5f   : > { %2218 = vmatprep.subr.bf16.mxu1 %v3082_v25  ;;  %v3175_v25 = vld [vmem:[%s4355_s1 + $0x434] ss:$8 sps:$4 sm:$0xff]  }
  0x61   : > { %2176 = vmatpush1.bf16.msra.mxu0 %v3077_v26  ;;  %v3170_v26 = vld [vmem:[%s4355_s1 + $0x540] ss:$8 sps:$4 sm:$0xff]  }
  0x62   : > { %2177 = vmatprep.subr.bf16.mxu0 %v3085_v27  ;;  %2219 = vmatpush1.bf16.msra.mxu1 %v3080_v28  ;;  %v3178_v27 = vld [vmem:[%s4355_s1 + $0x534] ss:$8 sps:$4 sm:$0xff]   ;;  %v3173_v28 = vld [vmem:[%s4355_s1 + $0x430] ss:$8 sps:$4 sm:$0xff]  }
  0x63   : > { %2220 = vmatprep.subr.bf16.mxu1 %v3088_v29  ;;  %v3181_v29 = vld [vmem:[%s4355_s1 + $0x424] ss:$8 sps:$4 sm:$0xff]  }
  0x65   : > { %2178 = vmatpush1.bf16.msra.mxu0 %v3083_v30  ;;  %v3176_v30 = vld [vmem:[%s4355_s1 + $0x530] ss:$8 sps:$4 sm:$0xff]  }
  0x66   : > { %2179 = vmatprep.subr.bf16.mxu0 %v3091_v32  ;;  %2221 = vmatpush1.bf16.msra.mxu1 %v3086_v31  ;;  %v3184_v31 = vld [vmem:[%s4355_s1 + $0x524] ss:$8 sps:$4 sm:$0xff]   ;;  %v3179_v32 = vld [vmem:[%s4355_s1 + $0x420] ss:$8 sps:$4 sm:$0xff]  }
  0x67   : > { %2222 = vmatprep.subr.bf16.mxu1 %v3094_v34  ;;  %v3182_v34 = vld [vmem:[%s4355_s1 + $0x520] ss:$8 sps:$4 sm:$0xff]  }
  0x69   : > { %2180 = vmatpush1.bf16.msra.mxu0 %v3089_v35  ;;  %v3190_v35 = vld [vmem:[%s4355_s1 + $0x514] ss:$8 sps:$4 sm:$0xff]  }
  0x6a   : > { %2181 = vmatprep.subr.bf16.mxu0 %v3097_v37  ;;  %2223 = vmatpush1.bf16.msra.mxu1 %v3092_v38  ;;  %v3193_v37 = vld [vmem:[%s4355_s1 + $0x404] ss:$8 sps:$4 sm:$0xff]   ;;  %v3188_v38 = vld [vmem:[%s4355_s1 + $0x510] ss:$8 sps:$4 sm:$0xff]  }
  0x6b   : > { %2224 = vmatprep.subr.bf16.mxu1 %v3100_v39  ;;  %v3196_v39 = vld [vmem:[%s4355_s1 + $0x504] ss:$8 sps:$4 sm:$0xff]  }
  0x6d   : > { %2182 = vmatpush2.bf16.msra.mxu0 %v3095_v40  ;;  %v3191_v40 = vld [vmem:[%s4355_s1 + $0x400] ss:$8 sps:$4 sm:$0xff]  }
  0x6e   : > { %2183 = vmatprep.subr.bf16.mxu0 %v3103_v41  ;;  %2225 = vmatpush2.bf16.msra.mxu1 %v3098_v42  ;;  %v3199_v41 = vld [vmem:[%s4355_s1 + $0x4f4] ss:$8 sps:$4 sm:$0xff]   ;;  %v3194_v42 = vld [vmem:[%s4355_s1 + $0x500] ss:$8 sps:$4 sm:$0xff]  }
  0x6f   : > { %2226 = vmatprep.subr.bf16.mxu1 %v3106_v43  ;;  %v3202_v43 = vld [vmem:[%s4355_s1 + $0x5f4] ss:$8 sps:$4 sm:$0xff]  }
  0x71   : > { %2184 = vmatpush2.bf16.msra.mxu0 %v3101_v44  ;;  %v3197_v44 = vld [vmem:[%s4355_s1 + $0x4f0] ss:$8 sps:$4 sm:$0xff]  }
  0x72   : > { %2185 = vmatprep.subr.bf16.mxu0 %v3109_v45  ;;  %2227 = vmatpush2.bf16.msra.mxu1 %v3104_v46  ;;  %v3205_v45 = vld [vmem:[%s4355_s1 + $0x4e4] ss:$8 sps:$4 sm:$0xff]   ;;  %v3200_v46 = vld [vmem:[%s4355_s1 + $0x5f0] ss:$8 sps:$4 sm:$0xff]  }
  0x73   : > { %2228 = vmatprep.subr.bf16.mxu1 %v3112_v47  ;;  %v3208_v47 = vld [vmem:[%s4355_s1 + $0x5e4] ss:$8 sps:$4 sm:$0xff]  }
  0x75   : > { %2186 = vmatpush2.bf16.msra.mxu0 %v3107_v48  ;;  %v3203_v48 = vld [vmem:[%s4355_s1 + $0x4e0] ss:$8 sps:$4 sm:$0xff]  }
  0x76   : > { %2187 = vmatprep.subr.bf16.mxu0 %v3115_v49  ;;  %2229 = vmatpush2.bf16.msra.mxu1 %v3110_v50  ;;  %v3211_v49 = vld [vmem:[%s4355_s1 + $0x4d4] ss:$8 sps:$4 sm:$0xff]   ;;  %v3206_v50 = vld [vmem:[%s4355_s1 + $0x5e0] ss:$8 sps:$4 sm:$0xff]  }
  0x77   : > { %2230 = vmatprep.subr.bf16.mxu1 %v3118_v51  ;;  %v3214_v51 = vld [vmem:[%s4355_s1 + $0x5d4] ss:$8 sps:$4 sm:$0xff]  }
  0x79   : > { %2188 = vmatpush2.bf16.msra.mxu0 %v3113_v52  ;;  %v3209_v52 = vld [vmem:[%s4355_s1 + $0x4d0] ss:$8 sps:$4 sm:$0xff]  }
  0x7a   : > { %2189 = vmatprep.subr.bf16.mxu0 %v3121_v53  ;;  %2231 = vmatpush2.bf16.msra.mxu1 %v3116_v54  ;;  %v3217_v53 = vld [vmem:[%s4355_s1 + $0x4c4] ss:$8 sps:$4 sm:$0xff]   ;;  %v3212_v54 = vld [vmem:[%s4355_s1 + $0x5d0] ss:$8 sps:$4 sm:$0xff]  }
  0x7b   : > { %2232 = vmatprep.subr.bf16.mxu1 %v3124_v55  ;;  %v3220_v55 = vld [vmem:[%s4355_s1 + $0x5c4] ss:$8 sps:$4 sm:$0xff]  }
  0x7d   : > { %2190 = vmatpush2.bf16.msra.mxu0 %v3119_v56  ;;  %v3215_v56 = vld [vmem:[%s4355_s1 + $0x4c0] ss:$8 sps:$4 sm:$0xff]  }
  0x7e   : > { %2191 = vmatprep.subr.bf16.mxu0 %v3127_v57  ;;  %2233 = vmatpush2.bf16.msra.mxu1 %v3122_v58  ;;  %v3223_v57 = vld [vmem:[%s4355_s1 + $0x4b4] ss:$8 sps:$4 sm:$0xff]   ;;  %v3218_v58 = vld [vmem:[%s4355_s1 + $0x5c0] ss:$8 sps:$4 sm:$0xff]  }
  0x7f   : > { %2234 = vmatprep.subr.bf16.mxu1 %v3130_v59  ;;  %v3226_v59 = vld [vmem:[%s4355_s1 + $0x5b4] ss:$8 sps:$4 sm:$0xff]  }
  0x81   : > { %2192 = vmatpush2.bf16.msra.mxu0 %v3125_v60  ;;  %v3221_v60 = vld [vmem:[%s4355_s1 + $0x4b0] ss:$8 sps:$4 sm:$0xff]  }
  0x82   : > { %2193 = vmatprep.subr.bf16.mxu0 %v3133_v61  ;;  %2235 = vmatpush2.bf16.msra.mxu1 %v3128_v62  ;;  %v3229_v61 = vld [vmem:[%s4355_s1 + $0x4a4] ss:$8 sps:$4 sm:$0xff]   ;;  %v3224_v62 = vld [vmem:[%s4355_s1 + $0x5b0] ss:$8 sps:$4 sm:$0xff]  }
  0x83   : > { %2236 = vmatprep.subr.bf16.mxu1 %v3136_v63  ;;  %v3232_v63 = vld [vmem:[%s4355_s1 + $0x5a4] ss:$8 sps:$4 sm:$0xff]  }
  0x85   : > { %2194 = vmatpush2.bf16.msra.mxu0 %v3131_v0  ;;  %v3227_v0 = vld [vmem:[%s4355_s1 + $0x4a0] ss:$8 sps:$4 sm:$0xff]  }
  0x86   : > { %2195 = vmatprep.subr.bf16.mxu0 %v3139_v1  ;;  %2237 = vmatpush2.bf16.msra.mxu1 %v3134_v2  ;;  %v3235_v1 = vld [vmem:[%s4355_s1 + $0x494] ss:$8 sps:$4 sm:$0xff]   ;;  %v3230_v2 = vld [vmem:[%s4355_s1 + $0x5a0] ss:$8 sps:$4 sm:$0xff]  }
  0x87   : > { %2238 = vmatprep.subr.bf16.mxu1 %v3142_v3  ;;  %v3238_v3 = vld [vmem:[%s4355_s1 + $0x594] ss:$8 sps:$4 sm:$0xff]  }
  0x89   : > { %2196 = vmatpush2.bf16.msra.mxu0 %v3137_v4  ;;  %v3233_v4 = vld [vmem:[%s4355_s1 + $0x490] ss:$8 sps:$4 sm:$0xff]  }
  0x8a   : > { %2251 = vmatprep.subr.bf16.mxu0 %v3148_v5  ;;  %2239 = vmatpush2.bf16.msra.mxu1 %v3140_v6  ;;  %v3241_v5 = vld [vmem:[%s4355_s1 + $0x484] ss:$8 sps:$4 sm:$0xff]   ;;  %v3236_v6 = vld [vmem:[%s4355_s1 + $0x590] ss:$8 sps:$4 sm:$0xff]  }
  0x8b   : > { %2294 = vmatprep.subr.bf16.mxu1 %v3154_v8  ;;  %v3244_v8 = vld [vmem:[%s4355_s1 + $0x584] ss:$8 sps:$4 sm:$0xff]  }
  0x8c   : > { %2198 = vmatmul.mubr.bf16.vlgmr.msra.gmra.mxu0 %v3143_v7  ;;  %v3239_v7 = vld [vmem:[%s4355_s1 + $0x480] ss:$8 sps:$4 sm:$0xff]  }
  0x8d   : > { %2252 = vmatpush1.bf16.msra.mxu0 %v3146_v9  ;;  %2241 = vmatmul.mubr.bf16.vlgmr.msra.gmra.mxu1 %v3149_v10  ;;  %v3242_v9 = vld [vmem:[%s4355_s1 + $0x580] ss:$8 sps:$4 sm:$0xff]   ;;  %v3250_v10 = vld [vmem:[%s4355_s1 + $0x674] ss:$8 sps:$4 sm:$0xff]  }
  0x8e   : > { %2253 = vmatprep.subr.bf16.mxu0 %v3157_v11  ;;  %2295 = vmatpush1.bf16.msra.mxu1 %v3152_v12  ;;  %v3245_v11 = vld [vmem:[%s3589_s10 + $0x20] ss:$72 sps:$4 sm:$0xff]   ;;  %v3248_v12 = vld [vmem:[%s4355_s1 + $0x670] ss:$8 sps:$4 sm:$0xff]  }
  0x8f   : > { %2296 = vmatprep.subr.bf16.mxu1 %v3160_v13  ;;  %2283 = vmatprep.mubr.bf16.mxu0 %v3247_v18  ;;  %v3251_v13 = vld [vmem:[%s3589_s10 + $0x28] ss:$72 sps:$4 sm:$0xff]   ;;  %v3355_v18 = vld [vmem:[%s3589_s10 + $0x3c] ss:$72 sps:$4 sm:$0xff]  }
  0x90   : > { %2326 = vmatprep.mubr.bf16.mxu1 %v3253_v22  ;;  %v3260_v22 = vld [vmem:[%s4355_s1 + $0x760] ss:$8 sps:$4 sm:$0xff]  }
  0x91   : > { %2254 = vmatpush1.bf16.msra.mxu0 %v3155_v14  ;;  %v3256_v14 = vld [vmem:[%s4355_s1 + $0x774] ss:$8 sps:$4 sm:$0xff]  }
  0x92   : > { %2255 = vmatprep.subr.bf16.mxu0 %v3163_v15  ;;  %2297 = vmatpush1.bf16.msra.mxu1 %v3158_v16  ;;  %v3349_v15 = vld [vmem:[%s3589_s10 + $0x34] ss:$72 sps:$4 sm:$0xff]   ;;  %v3259_v16 = vld [vmem:[%s4355_s1 + $0x664] ss:$8 sps:$4 sm:$0xff]  }
  0x93   : > { %2298 = vmatprep.subr.bf16.mxu1 %v3166_v17  ;;  %v3254_v17 = vld [vmem:[%s4355_s1 + $0x770] ss:$8 sps:$4 sm:$0xff]  }
  0x95   : > { %2256 = vmatpush1.bf16.msra.mxu0 %v3161_v19  ;;  %v3262_v19 = vld [vmem:[%s4355_s1 + $0x764] ss:$8 sps:$4 sm:$0xff]  }
  0x96   : > { %2257 = vmatprep.subr.bf16.mxu0 %v3169_v21  ;;  %2299 = vmatpush1.bf16.msra.mxu1 %v3164_v20  ;;  %v3257_v20 = vld [vmem:[%s4355_s1 + $0x660] ss:$8 sps:$4 sm:$0xff]   ;;  %v3265_v21 = vld [vmem:[%s4355_s1 + $0x654] ss:$8 sps:$4 sm:$0xff]  }
  0x97   : > { %2300 = vmatprep.subr.bf16.mxu1 %v3172_v23  ;;  %v3268_v23 = vld [vmem:[%s4355_s1 + $0x754] ss:$8 sps:$4 sm:$0xff]  }
  0x99   : > { %2258 = vmatpush1.bf16.msra.mxu0 %v3167_v24  ;;  %v3263_v24 = vld [vmem:[%s4355_s1 + $0x650] ss:$8 sps:$4 sm:$0xff]  }
  0x9a   : > { %2259 = vmatprep.subr.bf16.mxu0 %v3175_v25  ;;  %2301 = vmatpush1.bf16.msra.mxu1 %v3170_v26  ;;  %v3271_v25 = vld [vmem:[%s4355_s1 + $0x644] ss:$8 sps:$4 sm:$0xff]   ;;  %v3266_v26 = vld [vmem:[%s4355_s1 + $0x750] ss:$8 sps:$4 sm:$0xff]  }
  0x9b   : > { %2302 = vmatprep.subr.bf16.mxu1 %v3178_v27  ;;  %v3274_v27 = vld [vmem:[%s4355_s1 + $0x744] ss:$8 sps:$4 sm:$0xff]  }
  0x9d   : > { %2260 = vmatpush1.bf16.msra.mxu0 %v3173_v28  ;;  %v3269_v28 = vld [vmem:[%s4355_s1 + $0x640] ss:$8 sps:$4 sm:$0xff]  }
  0x9e   : > { %2261 = vmatprep.subr.bf16.mxu0 %v3181_v29  ;;  %2303 = vmatpush1.bf16.msra.mxu1 %v3176_v30  ;;  %v3277_v29 = vld [vmem:[%s4355_s1 + $0x634] ss:$8 sps:$4 sm:$0xff]   ;;  %v3272_v30 = vld [vmem:[%s4355_s1 + $0x740] ss:$8 sps:$4 sm:$0xff]  }
  0x9f   : > { %2304 = vmatprep.subr.bf16.mxu1 %v3184_v31  ;;  %v3280_v31 = vld [vmem:[%s4355_s1 + $0x734] ss:$8 sps:$4 sm:$0xff]  }
  0xa1   : > { %2262 = vmatpush1.bf16.msra.mxu0 %v3179_v32  ;;  %v3275_v32 = vld [vmem:[%s4355_s1 + $0x630] ss:$8 sps:$4 sm:$0xff]  }
  0xa2   : > { %2263 = vmatprep.subr.bf16.mxu0 %v3187_v33  ;;  %2305 = vmatpush1.bf16.msra.mxu1 %v3182_v34  ;;  %v3283_v33 = vld [vmem:[%s4355_s1 + $0x624] ss:$8 sps:$4 sm:$0xff]   ;;  %v3278_v34 = vld [vmem:[%s4355_s1 + $0x730] ss:$8 sps:$4 sm:$0xff]  }
  0xa3   : > { %2306 = vmatprep.subr.bf16.mxu1 %v3190_v35  ;;  %v3286_v35 = vld [vmem:[%s4355_s1 + $0x724] ss:$8 sps:$4 sm:$0xff]  }
  0xa5   : > { %2264 = vmatpush1.bf16.msra.mxu0 %v3185_v36  ;;  %v3281_v36 = vld [vmem:[%s4355_s1 + $0x620] ss:$8 sps:$4 sm:$0xff]  }
  0xa6   : > { %2265 = vmatprep.subr.bf16.mxu0 %v3193_v37  ;;  %2307 = vmatpush1.bf16.msra.mxu1 %v3188_v38  ;;  %v3289_v37 = vld [vmem:[%s4355_s1 + $0x614] ss:$8 sps:$4 sm:$0xff]   ;;  %v3284_v38 = vld [vmem:[%s4355_s1 + $0x720] ss:$8 sps:$4 sm:$0xff]  }
  0xa7   : > { %2308 = vmatprep.subr.bf16.mxu1 %v3196_v39  ;;  %v3292_v39 = vld [vmem:[%s4355_s1 + $0x714] ss:$8 sps:$4 sm:$0xff]  }
  0xa9   : > { %2266 = vmatpush1.bf16.msra.mxu0 %v3191_v40  ;;  %v3287_v40 = vld [vmem:[%s4355_s1 + $0x610] ss:$8 sps:$4 sm:$0xff]  }
  0xaa   : > { %2267 = vmatprep.subr.bf16.mxu0 %v3199_v41  ;;  %2309 = vmatpush1.bf16.msra.mxu1 %v3194_v42  ;;  %v3295_v41 = vld [vmem:[%s4355_s1 + $0x604] ss:$8 sps:$4 sm:$0xff]   ;;  %v3290_v42 = vld [vmem:[%s4355_s1 + $0x710] ss:$8 sps:$4 sm:$0xff]  }
  0xab   : > { %2310 = vmatprep.subr.bf16.mxu1 %v3202_v43  ;;  %v3298_v43 = vld [vmem:[%s4355_s1 + $0x704] ss:$8 sps:$4 sm:$0xff]  }
  0xad   : > { %2268 = vmatpush2.bf16.msra.mxu0 %v3197_v44  ;;  %v3293_v44 = vld [vmem:[%s4355_s1 + $0x600] ss:$8 sps:$4 sm:$0xff]  }
  0xae   : > { %2269 = vmatprep.subr.bf16.mxu0 %v3205_v45  ;;  %2311 = vmatpush2.bf16.msra.mxu1 %v3200_v46  ;;  %v3301_v45 = vld [vmem:[%s4355_s1 + $0x6f4] ss:$8 sps:$4 sm:$0xff]   ;;  %v3296_v46 = vld [vmem:[%s4355_s1 + $0x700] ss:$8 sps:$4 sm:$0xff]  }
  0xaf   : > { %2312 = vmatprep.subr.bf16.mxu1 %v3208_v47  ;;  %v3304_v47 = vld [vmem:[%s4355_s1 + $0x7f4] ss:$8 sps:$4 sm:$0xff]  }
  0xb1   : > { %2270 = vmatpush2.bf16.msra.mxu0 %v3203_v48  ;;  %v3299_v48 = vld [vmem:[%s4355_s1 + $0x6f0] ss:$8 sps:$4 sm:$0xff]  }
  0xb2   : > { %2271 = vmatprep.subr.bf16.mxu0 %v3211_v49  ;;  %2313 = vmatpush2.bf16.msra.mxu1 %v3206_v50  ;;  %v3307_v49 = vld [vmem:[%s4355_s1 + $0x6e4] ss:$8 sps:$4 sm:$0xff]   ;;  %v3302_v50 = vld [vmem:[%s4355_s1 + $0x7f0] ss:$8 sps:$4 sm:$0xff]  }
  0xb3   : > { %2314 = vmatprep.subr.bf16.mxu1 %v3214_v51  ;;  %v3310_v51 = vld [vmem:[%s4355_s1 + $0x7e4] ss:$8 sps:$4 sm:$0xff]  }
  0xb5   : > { %2272 = vmatpush2.bf16.msra.mxu0 %v3209_v52  ;;  %v3305_v52 = vld [vmem:[%s4355_s1 + $0x6e0] ss:$8 sps:$4 sm:$0xff]  }
  0xb6   : > { %2273 = vmatprep.subr.bf16.mxu0 %v3217_v53  ;;  %2315 = vmatpush2.bf16.msra.mxu1 %v3212_v54  ;;  %v3313_v53 = vld [vmem:[%s4355_s1 + $0x6d4] ss:$8 sps:$4 sm:$0xff]   ;;  %v3308_v54 = vld [vmem:[%s4355_s1 + $0x7e0] ss:$8 sps:$4 sm:$0xff]  }
  0xb7   : > { %2316 = vmatprep.subr.bf16.mxu1 %v3220_v55  ;;  %v3316_v55 = vld [vmem:[%s4355_s1 + $0x7d4] ss:$8 sps:$4 sm:$0xff]  }
  0xb9   : > { %2274 = vmatpush2.bf16.msra.mxu0 %v3215_v56  ;;  %v3311_v56 = vld [vmem:[%s4355_s1 + $0x6d0] ss:$8 sps:$4 sm:$0xff]  }
  0xba   : > { %2275 = vmatprep.subr.bf16.mxu0 %v3223_v57  ;;  %2317 = vmatpush2.bf16.msra.mxu1 %v3218_v58  ;;  %v3319_v57 = vld [vmem:[%s4355_s1 + $0x6c4] ss:$8 sps:$4 sm:$0xff]   ;;  %v3314_v58 = vld [vmem:[%s4355_s1 + $0x7d0] ss:$8 sps:$4 sm:$0xff]  }
  0xbb   : > { %2318 = vmatprep.subr.bf16.mxu1 %v3226_v59  ;;  %v3322_v59 = vld [vmem:[%s4355_s1 + $0x7c4] ss:$8 sps:$4 sm:$0xff]  }
  0xbd   : > { %2276 = vmatpush2.bf16.msra.mxu0 %v3221_v60  ;;  %v3317_v60 = vld [vmem:[%s4355_s1 + $0x6c0] ss:$8 sps:$4 sm:$0xff]  }
  0xbe   : > { %2277 = vmatprep.subr.bf16.mxu0 %v3229_v61  ;;  %2319 = vmatpush2.bf16.msra.mxu1 %v3224_v62  ;;  %v3325_v61 = vld [vmem:[%s4355_s1 + $0x6b4] ss:$8 sps:$4 sm:$0xff]   ;;  %v3320_v62 = vld [vmem:[%s4355_s1 + $0x7c0] ss:$8 sps:$4 sm:$0xff]  }
  0xbf   : > { %2320 = vmatprep.subr.bf16.mxu1 %v3232_v63  ;;  %v3328_v63 = vld [vmem:[%s4355_s1 + $0x7b4] ss:$8 sps:$4 sm:$0xff]  }
  0xc1   : > { %2278 = vmatpush2.bf16.msra.mxu0 %v3227_v0  ;;  %v3323_v0 = vld [vmem:[%s4355_s1 + $0x6b0] ss:$8 sps:$4 sm:$0xff]  }
  0xc2   : > { %2279 = vmatprep.subr.bf16.mxu0 %v3235_v1  ;;  %2321 = vmatpush2.bf16.msra.mxu1 %v3230_v2  ;;  %v3331_v1 = vld [vmem:[%s4355_s1 + $0x6a4] ss:$8 sps:$4 sm:$0xff]   ;;  %v3326_v2 = vld [vmem:[%s4355_s1 + $0x7b0] ss:$8 sps:$4 sm:$0xff]  }
  0xc3   : > { %2322 = vmatprep.subr.bf16.mxu1 %v3238_v3  ;;  %v3334_v3 = vld [vmem:[%s4355_s1 + $0x7a4] ss:$8 sps:$4 sm:$0xff]  }
  0xc5   : > { %2280 = vmatpush2.bf16.msra.mxu0 %v3233_v4  ;;  %v3329_v4 = vld [vmem:[%s4355_s1 + $0x6a0] ss:$8 sps:$4 sm:$0xff]  }
  0xc6   : > { %2281 = vmatprep.subr.bf16.mxu0 %v3241_v5  ;;  %2323 = vmatpush2.bf16.msra.mxu1 %v3236_v6  ;;  %v3337_v5 = vld [vmem:[%s4355_s1 + $0x694] ss:$8 sps:$4 sm:$0xff]   ;;  %v3332_v6 = vld [vmem:[%s4355_s1 + $0x7a0] ss:$8 sps:$4 sm:$0xff]  }
  0xc7   : > { %2324 = vmatprep.subr.bf16.mxu1 %v3244_v8  ;;  %v3335_v8 = vld [vmem:[%s4355_s1 + $0x690] ss:$8 sps:$4 sm:$0xff]  }
  0xc9   : > { %2282 = vmatpush2.bf16.msra.mxu0 %v3239_v7  ;;  %v3340_v7 = vld [vmem:[%s4355_s1 + $0x794] ss:$8 sps:$4 sm:$0xff]  }
  0xca   : > { %2337 = vmatprep.subr.bf16.mxu0 %v3250_v10  ;;  %2325 = vmatpush2.bf16.msra.mxu1 %v3242_v9  ;;  %v3343_v9 = vld [vmem:[%s4355_s1 + $0x684] ss:$8 sps:$4 sm:$0xff]   ;;  %v3338_v10 = vld [vmem:[%s4355_s1 + $0x790] ss:$8 sps:$4 sm:$0xff]  }
  0xcb   : > { %2380 = vmatprep.subr.bf16.mxu1 %v3256_v14  ;;  %v3344_v14 = vld [vmem:[%s4355_s1 + $0x780] ss:$8 sps:$4 sm:$0xff]  }
  0xcc   : > { %2284 = vmatmul.mubr.bf16.vlgmr.msra.gmra.mxu0 %v3245_v11  ;;  %v3346_v11 = vld [vmem:[%s4355_s1 + $0x784] ss:$8 sps:$4 sm:$0xff]  }
  0xcd   : > { %2338 = vmatpush1.bf16.msra.mxu0 %v3248_v12  ;;  %2369 = vmatprep.mubr.bf16.mxu0 %v3349_v15  ;;  %v3341_v12 = vld [vmem:[%s4355_s1 + $0x680] ss:$8 sps:$4 sm:$0xff]   ;;  %v3347_v15 = vld [vmem:[%s3589_s10 + $0x30] ss:$72 sps:$4 sm:$0xff]  }
  0xce   : > { %2327 = vmatmul.mubr.bf16.vlgmr.msra.gmra.mxu1 %v3251_v13  ;;  %2339 = vmatprep.subr.bf16.mxu0 %v3259_v16  ;;  %v3352_v13 = vld [vmem:[%s4355_s1 + $0x874] ss:$8 sps:$4 sm:$0xff]   ;;  %v3350_v16 = vld [vmem:[%s4355_s1 + $0x870] ss:$8 sps:$4 sm:$0xff]  }
  0xcf   : > { %2381 = vmatpush1.bf16.msra.mxu1 %v3254_v17  ;;  %2412 = vmatprep.mubr.bf16.mxu1 %v3355_v18  ;;  %v3403_v17 = vld [vmem:[%s3589_s10 + $0x44] ss:$72 sps:$4 sm:$0xff]   ;;  %v3353_v18 = vld [vmem:[%s3589_s10 + $0x38] ss:$72 sps:$4 sm:$0xff]  }
  0xd0   : > { %2382 = vmatprep.subr.bf16.mxu1 %v3262_v19  ;;  %v3358_v19 = vld [vmem:[%s4355_s1 + $0x864] ss:$8 sps:$4 sm:$0xff]  }
  0xd1   : > { %2340 = vmatpush1.bf16.msra.mxu0 %v3257_v20  ;;  %v3356_v20 = vld [vmem:[%s4355_s1 + $0x860] ss:$8 sps:$4 sm:$0xff]  }
  0xd2   : > { %2341 = vmatprep.subr.bf16.mxu0 %v3265_v21  ;;  %v3361_v21 = vld [vmem:[%s4355_s1 + $0x854] ss:$8 sps:$4 sm:$0xff]  }
  0xd3   : > { %2383 = vmatpush1.bf16.msra.mxu1 %v3260_v22  ;;  %v3359_v22 = vld [vmem:[%s4355_s1 + $0x850] ss:$8 sps:$4 sm:$0xff]  }
  0xd4   : > { %2384 = vmatprep.subr.bf16.mxu1 %v3268_v23  ;;  %v3364_v23 = vld [vmem:[%s4355_s1 + $0x844] ss:$8 sps:$4 sm:$0xff]  }
  0xd5   : > { %2342 = vmatpush1.bf16.msra.mxu0 %v3263_v24  ;;  %v3362_v24 = vld [vmem:[%s4355_s1 + $0x840] ss:$8 sps:$4 sm:$0xff]  }
  0xd6   : > { %2343 = vmatprep.subr.bf16.mxu0 %v3271_v25  ;;  %v3367_v25 = vld [vmem:[%s4355_s1 + $0x834] ss:$8 sps:$4 sm:$0xff]  }
  0xd7   : > { %2385 = vmatpush1.bf16.msra.mxu1 %v3266_v26  ;;  %v3365_v26 = vld [vmem:[%s4355_s1 + $0x830] ss:$8 sps:$4 sm:$0xff]  }
  0xd8   : > { %2386 = vmatprep.subr.bf16.mxu1 %v3274_v27  ;;  %v3370_v27 = vld [vmem:[%s4355_s1 + $0x824] ss:$8 sps:$4 sm:$0xff]  }
  0xd9   : > { %2344 = vmatpush1.bf16.msra.mxu0 %v3269_v28  ;;  %v3368_v28 = vld [vmem:[%s4355_s1 + $0x820] ss:$8 sps:$4 sm:$0xff]  }
  0xda   : > { %2345 = vmatprep.subr.bf16.mxu0 %v3277_v29  ;;  %v3373_v29 = vld [vmem:[%s4355_s1 + $0x814] ss:$8 sps:$4 sm:$0xff]  }
  0xdb   : > { %2387 = vmatpush1.bf16.msra.mxu1 %v3272_v30  ;;  %v3371_v30 = vld [vmem:[%s4355_s1 + $0x810] ss:$8 sps:$4 sm:$0xff]  }
  0xdc   : > { %2388 = vmatprep.subr.bf16.mxu1 %v3280_v31  ;;  %v3376_v31 = vld [vmem:[%s4355_s1 + $0x804] ss:$8 sps:$4 sm:$0xff]  }
  0xdd   : > { %2346 = vmatpush1.bf16.msra.mxu0 %v3275_v32  ;;  %v3374_v32 = vld [vmem:[%s4355_s1 + $0x800] ss:$8 sps:$4 sm:$0xff]  }
  0xde   : > { %2347 = vmatprep.subr.bf16.mxu0 %v3283_v33  ;;  %v3379_v33 = vld [vmem:[%s4355_s1 + $0x8f4] ss:$8 sps:$4 sm:$0xff]  }
  0xdf   : > { %2389 = vmatpush1.bf16.msra.mxu1 %v3278_v34  ;;  %v3377_v34 = vld [vmem:[%s4355_s1 + $0x8f0] ss:$8 sps:$4 sm:$0xff]  }
  0xe0   : > { %2390 = vmatprep.subr.bf16.mxu1 %v3286_v35  ;;  %v3382_v35 = vld [vmem:[%s4355_s1 + $0x8e4] ss:$8 sps:$4 sm:$0xff]  }
  0xe1   : > { %2348 = vmatpush1.bf16.msra.mxu0 %v3281_v36  ;;  %v3380_v36 = vld [vmem:[%s4355_s1 + $0x8e0] ss:$8 sps:$4 sm:$0xff]  }
  0xe2   : > { %2349 = vmatprep.subr.bf16.mxu0 %v3289_v37  ;;  %v3385_v37 = vld [vmem:[%s4355_s1 + $0x8d4] ss:$8 sps:$4 sm:$0xff]  }
  0xe3   : > { %2391 = vmatpush1.bf16.msra.mxu1 %v3284_v38  ;;  %v3383_v38 = vld [vmem:[%s4355_s1 + $0x8d0] ss:$8 sps:$4 sm:$0xff]  }
  0xe4   : > { %2392 = vmatprep.subr.bf16.mxu1 %v3292_v39  ;;  %v3388_v39 = vld [vmem:[%s4355_s1 + $0x8c4] ss:$8 sps:$4 sm:$0xff]  }
  0xe5   : > { %2350 = vmatpush1.bf16.msra.mxu0 %v3287_v40  ;;  %v3386_v40 = vld [vmem:[%s4355_s1 + $0x8c0] ss:$8 sps:$4 sm:$0xff]  }
  0xe6   : > { %2351 = vmatprep.subr.bf16.mxu0 %v3295_v41  ;;  %v3391_v41 = vld [vmem:[%s4355_s1 + $0x8b4] ss:$8 sps:$4 sm:$0xff]  }
  0xe7   : > { %2393 = vmatpush1.bf16.msra.mxu1 %v3290_v42  ;;  %v3389_v42 = vld [vmem:[%s4355_s1 + $0x8b0] ss:$8 sps:$4 sm:$0xff]  }
  0xe8   : > { %2394 = vmatprep.subr.bf16.mxu1 %v3298_v43  ;;  %v3394_v43 = vld [vmem:[%s4355_s1 + $0x8a4] ss:$8 sps:$4 sm:$0xff]  }
  0xe9   : > { %2352 = vmatpush1.bf16.msra.mxu0 %v3293_v44  ;;  %v3392_v44 = vld [vmem:[%s4355_s1 + $0x8a0] ss:$8 sps:$4 sm:$0xff]  }
  0xea   : > { %2353 = vmatprep.subr.bf16.mxu0 %v3301_v45  ;;  %v3397_v45 = vld [vmem:[%s4355_s1 + $0x894] ss:$8 sps:$4 sm:$0xff]  }
  0xeb   : > { %2395 = vmatpush1.bf16.msra.mxu1 %v3296_v46  ;;  %v3395_v46 = vld [vmem:[%s4355_s1 + $0x890] ss:$8 sps:$4 sm:$0xff]  }
  0xec   : > { %2396 = vmatprep.subr.bf16.mxu1 %v3304_v47  ;;  %v3400_v47 = vld [vmem:[%s4355_s1 + $0x884] ss:$8 sps:$4 sm:$0xff]  }
  0xed   : > { %2354 = vmatpush2.bf16.msra.mxu0 %v3299_v48  ;;  %v3398_v48 = vld [vmem:[%s4355_s1 + $0x880] ss:$8 sps:$4 sm:$0xff]  }
  0xee   : > { %2355 = vmatprep.subr.bf16.mxu0 %v3307_v49  ;;  %v3401_v49 = vld [vmem:[%s3589_s10 + $0x40] ss:$72 sps:$4 sm:$0xff]  }
  0xef   : > { %2397 = vmatpush2.bf16.msra.mxu1 %v3302_v50 }
  0xf0   : > { %2398 = vmatprep.subr.bf16.mxu1 %v3310_v51 }
  0xf1   : > { %2356 = vmatpush2.bf16.msra.mxu0 %v3305_v52 }
  0xf2   : > { %2357 = vmatprep.subr.bf16.mxu0 %v3313_v53 }
  0xf3   : > { %2399 = vmatpush2.bf16.msra.mxu1 %v3308_v54 }
  0xf4   : > { %2400 = vmatprep.subr.bf16.mxu1 %v3316_v55 }
  0xf5   : > { %2358 = vmatpush2.bf16.msra.mxu0 %v3311_v56 }
  0xf6   : > { %2359 = vmatprep.subr.bf16.mxu0 %v3319_v57 }
  0xf7   : > { %2401 = vmatpush2.bf16.msra.mxu1 %v3314_v58 }
  0xf8   : > { %2402 = vmatprep.subr.bf16.mxu1 %v3322_v59 }
  0xf9   : > { %2360 = vmatpush2.bf16.msra.mxu0 %v3317_v60 }
  0xfa   : > { %2361 = vmatprep.subr.bf16.mxu0 %v3325_v61  ;;  %v539_v61 = vlaneseq }
  0xfb   : > { %2403 = vmatpush2.bf16.msra.mxu1 %v3320_v62 }
  0xfc   : > { %2404 = vmatprep.subr.bf16.mxu1 %v3328_v63 }
  0xfd   : > { %2362 = vmatpush2.bf16.msra.mxu0 %v3323_v0  ;;  %v540_v0 = vshrl.u32 %v539_v61, 7 }
  0xfe   : > { %2363 = vmatprep.subr.bf16.mxu0 %v3331_v1 }
  0xff   : > { %2405 = vmatpush2.bf16.msra.mxu1 %v3326_v2 }
 0x100   : > { %2406 = vmatprep.subr.bf16.mxu1 %v3334_v3 }
 0x101   : > { %2364 = vmatpush2.bf16.msra.mxu0 %v3329_v4  ;;  %v541_v4 = vsub.s32 0, %v540_v0 }
 0x102   : > { %2365 = vmatprep.subr.bf16.mxu0 %v3337_v5  ;;  %v537_v5 = vld [vmem:[%s4356_s2] sm:$0x3] }
 0x103   : > { %2407 = vmatpush2.bf16.msra.mxu1 %v3332_v6 }
 0x104   : > { %2408 = vmatprep.subr.bf16.mxu1 %v3340_v7  ;;  %v545_v7 = vsub.s32 1, %v540_v0 }
 0x105   : > { %2366 = vmatpush2.bf16.msra.mxu0 %v3335_v8 }
 0x106   : > { %2367 = vmatprep.subr.bf16.mxu0 %v3343_v9 }
 0x107   : > { %2409 = vmatpush2.bf16.msra.mxu1 %v3338_v10  ;;  %v542_v10 = vrot.slane %v537_v5, %v541_v4 }
 0x108   : > { %2410 = vmatprep.subr.bf16.mxu1 %v3346_v11  ;;  %v546_v11 = vrot.slane %v537_v5, %v545_v7 }
 0x109   : > { %2368 = vmatpush2.bf16.msra.mxu0 %v3341_v12 }
 0x10a   : > { %2423 = vmatprep.subr.bf16.mxu0 %v3352_v13 }
 0x10b   : > { %2411 = vmatpush2.bf16.msra.mxu1 %v3344_v14 }
 0x10c   : > { %2370 = vmatmul.mubr.bf16.vlgmr.msra.gmra.mxu0 %v3347_v15  ;;  %v2113_v50 = vpop.f32.mrf.mxu0 }
 0x10d   : > { %2424 = vmatpush1.bf16.msra.mxu0 %v3350_v16  ;;  %2455 = vmatprep.mubr.bf16.mxu0 %v3403_v17  ;;  %v2156_v52 = vpop.f32.mrf.mxu1  ;;  %v2114_v14 = vadd.f32 %v2113_v50, %v542_v10 }
 0x10e   : > { %2413 = vmatmul.mubr.bf16.vlgmr.msra.gmra.mxu1 %v3353_v18  ;;  %2425 = vmatprep.subr.bf16.mxu0 %v3358_v19  ;;  %v2115_v51 = vpop.f32.mrf.mxu0 }
 0x10f   : > { %v2158_v54 = vpop.f32.mrf.mxu1  ;;  %v2116_v16 = vadd.f32 %v2115_v51, %v546_v11 }
 0x110   : > { %v2117_v53 = vpop.f32.mrf.mxu0 }
 0x111   : > { %2426 = vmatpush1.bf16.msra.mxu0 %v3356_v20  ;;  %v2160_v56 = vpop.f32.mrf.mxu1  ;;  %v2118_v15 = vadd.f32 %v2117_v53, %v542_v10  ;;  %v2157_v20 = vadd.f32 %v2156_v52, %v2114_v14 }
 0x112   : > { %2427 = vmatprep.subr.bf16.mxu0 %v3361_v21  ;;  %v2119_v55 = vpop.f32.mrf.mxu0 }
 0x113   : > { %v2162_v58 = vpop.f32.mrf.mxu1  ;;  %v2120_v17 = vadd.f32 %v2119_v55, %v546_v11  ;;  %v2161_v21 = vadd.f32 %v2160_v56, %v2118_v15 }
 0x115   : > { %2428 = vmatpush1.bf16.msra.mxu0 %v3359_v22 }
 0x116   : > { %2429 = vmatprep.subr.bf16.mxu0 %v3364_v23  ;;  %v2159_v23 = vadd.f32 %v2158_v54, %v2116_v16 }
 0x119   : > { %2430 = vmatpush1.bf16.msra.mxu0 %v3362_v24  ;;  %v2163_v24 = vadd.f32 %v2162_v58, %v2120_v17 }
 0x11a   : > { %2431 = vmatprep.subr.bf16.mxu0 %v3367_v25 }
 0x11d   : > { %2432 = vmatpush1.bf16.msra.mxu0 %v3365_v26 }
 0x11e   : > { %2433 = vmatprep.subr.bf16.mxu0 %v3370_v27 }
 0x121   : > { %2434 = vmatpush1.bf16.msra.mxu0 %v3368_v28 }
 0x122   : > { %2435 = vmatprep.subr.bf16.mxu0 %v3373_v29 }
 0x125   : > { %2436 = vmatpush1.bf16.msra.mxu0 %v3371_v30 }
 0x126   : > { %2437 = vmatprep.subr.bf16.mxu0 %v3376_v31 }
 0x129   : > { %2438 = vmatpush1.bf16.msra.mxu0 %v3374_v32 }
 0x12a   : > { %2439 = vmatprep.subr.bf16.mxu0 %v3379_v33 }
 0x12d   : > { %2440 = vmatpush2.bf16.msra.mxu0 %v3377_v34 }
 0x12e   : > { %2441 = vmatprep.subr.bf16.mxu0 %v3382_v35 }
 0x131   : > { %2442 = vmatpush2.bf16.msra.mxu0 %v3380_v36 }
 0x132   : > { %2443 = vmatprep.subr.bf16.mxu0 %v3385_v37 }
 0x135   : > { %2444 = vmatpush2.bf16.msra.mxu0 %v3383_v38 }
 0x136   : > { %2445 = vmatprep.subr.bf16.mxu0 %v3388_v39 }
 0x139   : > { %2446 = vmatpush2.bf16.msra.mxu0 %v3386_v40 }
 0x13a   : > { %2447 = vmatprep.subr.bf16.mxu0 %v3391_v41 }
 0x13d   : > { %2448 = vmatpush2.bf16.msra.mxu0 %v3389_v42 }
 0x13e   : > { %2449 = vmatprep.subr.bf16.mxu0 %v3394_v43 }
 0x141   : > { %2450 = vmatpush2.bf16.msra.mxu0 %v3392_v44 }
 0x142   : > { %2451 = vmatprep.subr.bf16.mxu0 %v3397_v45 }
 0x145   : > { %2452 = vmatpush2.bf16.msra.mxu0 %v3395_v46 }
 0x146   : > { %2453 = vmatprep.subr.bf16.mxu0 %v3400_v47 }
 0x149   : > { %2454 = vmatpush2.bf16.msra.mxu0 %v3398_v48 }
 0x14c   : > { %2456 = vmatmul.mubr.bf16.vlgmr.msra.gmra.mxu0 %v3401_v49  ;;  %v2199_v57 = vpop.f32.mrf.mxu0 }
 0x14d   : > { %v2242_v60 = vpop.f32.mrf.mxu1  ;;  %v2200_v25 = vadd.f32 %v2199_v57, %v2157_v20 }
 0x14e   : > { %v2201_v59 = vpop.f32.mrf.mxu0 }
 0x14f   : > { %v2244_v63 = vpop.f32.mrf.mxu1  ;;  %v2202_v28 = vadd.f32 %v2201_v59, %v2159_v23  ;;  %v2243_v32 = vadd.f32 %v2242_v60, %v2200_v25 }
 0x150   : > { %v2203_v62 = vpop.f32.mrf.mxu0 }
 0x151   : > { %v2246_v2 = vpop.f32.mrf.mxu1  ;;  %v2204_v26 = vadd.f32 %v2203_v62, %v2161_v21  ;;  %v2245_v34 = vadd.f32 %v2244_v63, %v2202_v28 }
 0x152   : > { %v2205_v1 = vpop.f32.mrf.mxu0 }
 0x153   : > { %v2248_v6 = vpop.f32.mrf.mxu1  ;;  %v2206_v29 = vadd.f32 %v2205_v1, %v2163_v24  ;;  %v2247_v33 = vadd.f32 %v2246_v2, %v2204_v26 }
 0x155   : > { %v2249_v35 = vadd.f32 %v2248_v6, %v2206_v29 }
 0x18c   : > { %v2285_v3 = vpop.f32.mrf.mxu0 }
 0x18d   : > { %v2286_v36 = vadd.f32 %v2285_v3, %v2243_v32 }
 0x18e   : > { %v2287_v8 = vpop.f32.mrf.mxu0  ;;  %v2328_v9 = vpop.f32.mrf.mxu1 }
 0x18f   : > { %v2288_v40 = vadd.f32 %v2287_v8, %v2245_v34  ;;  %v2329_v42 = vadd.f32 %v2328_v9, %v2286_v36 }
 0x190   : > { %v2289_v12 = vpop.f32.mrf.mxu0  ;;  %v2330_v13 = vpop.f32.mrf.mxu1 }
 0x191   : > { %v2290_v37 = vadd.f32 %v2289_v12, %v2247_v33  ;;  %v2331_v46 = vadd.f32 %v2330_v13, %v2288_v40 }
 0x192   : > { %v2291_v18 = vpop.f32.mrf.mxu0  ;;  %v2332_v19 = vpop.f32.mrf.mxu1 }
 0x193   : > { %v2292_v41 = vadd.f32 %v2291_v18, %v2249_v35  ;;  %v2333_v43 = vadd.f32 %v2332_v19, %v2290_v37 }
 0x194   : > { %v2334_v27 = vpop.f32.mrf.mxu1 }
 0x195   : > { %v2335_v47 = vadd.f32 %v2334_v27, %v2292_v41 }
 0x1cc   : > { %v2371_v22 = vpop.f32.mrf.mxu0 }
 0x1cd   : > { %v2372_v48 = vadd.f32 %v2371_v22, %v2329_v42 }
 0x1ce   : > { %v2373_v30 = vpop.f32.mrf.mxu0  ;;  %v2414_v31 = vpop.f32.mrf.mxu1 }
 0x1cf   : > { %v2374_v51 = vadd.f32 %v2373_v30, %v2331_v46  ;;  %v2415_v55 = vadd.f32 %v2414_v31, %v2372_v48 }
 0x1d0   : > { %v2375_v38 = vpop.f32.mrf.mxu0  ;;  %v2416_v39 = vpop.f32.mrf.mxu1 }
 0x1d1   : > { %v2376_v49 = vadd.f32 %v2375_v38, %v2333_v43  ;;  %v2417_v58 = vadd.f32 %v2416_v39, %v2374_v51  ;;  %v2515_v43 = vld [vmem:[%s222_s22] sm:$0xff] }
 0x1d2   : > { %v2377_v44 = vpop.f32.mrf.mxu0  ;;  %v2418_v45 = vpop.f32.mrf.mxu1  ;;  %v2517_v46 = vunpack.c.l.bf16 %v2515_v43 }
 0x1d3   : > { %v2378_v52 = vadd.f32 %v2377_v44, %v2335_v47  ;;  %v2419_v56 = vadd.f32 %v2418_v45, %v2376_v49  ;;  %v2516_v44 = vld [vmem:[%s222_s22 + $0x8] sm:$0xff] }
 0x1d4   : > { %v2420_v53 = vpop.f32.mrf.mxu1  ;;  %v2519_v47 = vunpack.c.l.bf16 %v2516_v44  ;;  %v2520_v51 = vunpack.c.h.bf16 %v2516_v44 }
 0x1d5   : > { %v2421_v59 = vadd.f32 %v2420_v53, %v2378_v52 }
 0x20c   : > { %v2457_v50 = vpop.f32.mrf.mxu0 }
 0x20d   : > { %v2458_v60 = vadd.f32 %v2457_v50, %v2415_v55  ;;  %v2518_v50 = vunpack.c.h.bf16 %v2515_v43 }
 0x20e   : > { %v2459_v54 = vpop.f32.mrf.mxu0 }
 0x20f   : > { %v2460_v63 = vadd.f32 %v2459_v54, %v2417_v58 }
 0x210   : > { %v2461_v57 = vpop.f32.mrf.mxu0 }
 0x211   : > { %v2462_v61 = vadd.f32 %v2461_v57, %v2419_v56 }
 0x212   : > { %v2463_v62 = vpop.f32.mrf.mxu0 }
 0x213   : > { %v2466_v0 = vadd.f32 %v2462_v61, %v2458_v60  ;;  %v2464_v1 = vadd.f32 %v2463_v62, %v2421_v59 }
 0x215   : > { %v2467_v2 = vrot.slane %v2466_v0, 4  ;;  %v2473_v3 = vadd.f32 %v2464_v1, %v2460_v63 }
 0x217   : > { %v2468_v4 = vadd.f32 %v2467_v2, %v2466_v0  ;;  %v2474_v5 = vrot.slane %v2473_v3, 4 }
 0x219   : > { %v2469_v6 = vrot.slane %v2468_v4, 2  ;;  %v2475_v7 = vadd.f32 %v2474_v5, %v2473_v3 }
 0x21b   : > { %v2470_v8 = vadd.f32 %v2469_v6, %v2468_v4  ;;  %v2476_v9 = vrot.slane %v2475_v7, 2 }
 0x21d   : > { %v2471_v10 = vrot.slane %v2470_v8, 1  ;;  %v2477_v11 = vadd.f32 %v2476_v9, %v2475_v7 }
 0x21f   : > { %v2472_v12 = vadd.f32 %v2471_v10, %v2470_v8  ;;  %v2478_v13 = vrot.slane %v2477_v11, 1 }
 0x221   : > { %v2481_v14 = vmul.f32 0.0625, %v2472_v12  ;;  %v2479_v15 = vadd.f32 %v2478_v13, %v2477_v11 }
 0x223   : > { %v2483_v16 = vsub.f32 %v2458_v60, %v2481_v14  ;;  %v2485_v17 = vsub.f32 %v2462_v61, %v2481_v14  ;;  %v2482_v18 = vmul.f32 0.0625, %v2479_v15 }
 0x225   : > { %v2487_v19 = vmul.f32 %v2483_v16, %v2483_v16  ;;  %v2489_v20 = vmul.f32 %v2485_v17, %v2485_v17  ;;  %v2484_v21 = vsub.f32 %v2460_v63, %v2482_v18  ;;  %v2486_v22 = vsub.f32 %v2464_v1, %v2482_v18 }
 0x227   : > { %v2491_v23 = vadd.f32 %v2489_v20, %v2487_v19  ;;  %v2488_v24 = vmul.f32 %v2484_v21, %v2484_v21  ;;  %v2490_v25 = vmul.f32 %v2486_v22, %v2486_v22 }
 0x229   : > { %v2492_v26 = vrot.slane %v2491_v23, 4  ;;  %v2498_v27 = vadd.f32 %v2490_v25, %v2488_v24 }
 0x22b   : > { %v2493_v28 = vadd.f32 %v2492_v26, %v2491_v23  ;;  %v2499_v29 = vrot.slane %v2498_v27, 4 }
 0x22d   : > { %v2494_v30 = vrot.slane %v2493_v28, 2  ;;  %v2500_v31 = vadd.f32 %v2499_v29, %v2498_v27 }
 0x22f   : > { %v2495_v32 = vadd.f32 %v2494_v30, %v2493_v28  ;;  %v2501_v33 = vrot.slane %v2500_v31, 2 }
 0x231   : > { %v2496_v34 = vrot.slane %v2495_v32, 1  ;;  %v2502_v35 = vadd.f32 %v2501_v33, %v2500_v31 }
 0x233   : > { %v2497_v36 = vadd.f32 %v2496_v34, %v2495_v32  ;;  %v2503_v37 = vrot.slane %v2502_v35, 1 }
 0x235   : > { %v2505_v38 = vmul.f32 0.0625, %v2497_v36  ;;  %v2504_v39 = vadd.f32 %v2503_v37, %v2502_v35 }
 0x237   : > { %v2507_v40 = vadd.f32 1e-05, %v2505_v38  ;;  %v2506_v41 = vmul.f32 0.0625, %v2504_v39 }
 0x239   : > { %3404 = vrsqrt.f32 %v2507_v40  ;;  %v2508_v42 = vadd.f32 1e-05, %v2506_v41 }
 0x23b   : > { %3406 = vrsqrt.f32 %v2508_v42 }
 0x246   : > { %v3405_v45 = vpop.eup %3404 }
 0x247   : > { %v2511_v48 = vmul.f32 %v3405_v45, %v2483_v16  ;;  %v2513_v49 = vmul.f32 %v3405_v45, %v2485_v17 }
 0x248   : > { %v3407_v52 = vpop.eup %3406 }
 0x249   : > { %v2512_v53 = vmul.f32 %v3407_v52, %v2484_v21  ;;  %v2514_v54 = vmul.f32 %v3407_v52, %v2486_v22  ;;  %v2521_v55 = vadd.f32 %v2517_v46, %v2511_v48  ;;  %v2523_v56 = vadd.f32 %v2519_v47, %v2513_v49 }
 0x24b   : > { %v2522_v57 = vadd.f32 %v2518_v50, %v2512_v53  ;;  %v2524_v58 = vadd.f32 %v2520_v51, %v2514_v54 }
 0x24d   : > { %v2934_v59 = vpack.c.bf16 %v2522_v57, %v2521_v55  ;;  %v2935_v60 = vpack.c.bf16 %v2524_v58, %v2523_v56 }
 0x24f   : > { %2537 = vst [vmem:[%s229_s24] sm:$0xff] %v2934_v59  ;;  %2538 = vst [vmem:[%s229_s24 + $0x8] sm:$0xff] %v2935_v60 }
 0x250 PF: > { %s14_s15 = sadd.s32 1, %s3414_s15  }
 0x251   : > { %p11_p4 = scmp.ge.s32.totalorder %s14_s15, 4  }
 0x253   :  { %13 = sbr.rel (!%p11_p4) target bundleno = 1 (0x1), region = 69 }

// kernel: generator_forward.13
= control target key start
LH: loop header
LB: loop body
LE: loop exit
PB: predicated region body
PF: predicated region fallthrough
CT: control target
= control target key end

     0   :  { %s3362_s12 = smov 0   ;;  %s4272_s0 = inlined_call_operand.vmem [shape: bf16[32,2304], index: 0, kind: input, shape index: {}]   ;;  %s4273_s1 = inlined_call_operand.vmem [shape: bf16[2304,256], index: 1, kind: input, shape index: {}]   ;;  %s4274_s2 = inlined_call_operand.vmem [shape: f32[1,256], index: 2, kind: input, shape index: {}]   ;;  %s4275_s3 = inlined_call_operand.vmem [shape: bf16[32,256], index: 3, kind: output, shape index: {}]  }
   0x1 LB: > { %s2539_s13 = sadd.s32 4294967295, %s3340_s12   ;;  %p2543_p0 = scmp.ge.s32.totalorder %s3340_s12, 1  ;;  %s3340_s12 = sphi %s3362_s12, %s13_s12  }
   0x2   : > { %p139_p1 = scmp.lt.s32.totalorder %s3340_s12, 3 }
   0x4   : > { %p140_p2 = pnand %p2543_p0, %p139_p1 }
   0x5   : > { %s2544_s22 = sshll.u32 (!%p140_p2), %s2539_s13, 1 }
   0x6   : > { %143 = sbr.rel (%p140_p2) target bundleno = 592 (0x250), region = 32  ;;  %p166_p3 = scmp.lt.s32.totalorder (!%p140_p2), %s2544_s22, 3 }
   0xb   : > { %v2871_v0 = vld [vmem:[%s4273_s1 + $0x74] ss:$8 sps:$4 sm:$0xff]   ;;  %v2873_v1 = vld [vmem:[%s4273_s1 + $0x70] ss:$8 sps:$4 sm:$0xff]   ;;  %v2877_v4 = vld [vmem:[%s4273_s1 + $0x64] ss:$8 sps:$4 sm:$0xff]  }
   0xc   : > { %2027 = vmatprep.subr.bf16.mxu0 %v2871_v0  ;;  %v2874_v2 = vld [vmem:[%s4273_s1 + $0x174] ss:$8 sps:$4 sm:$0xff]   ;;  %v2876_v3 = vld [vmem:[%s4273_s1 + $0x170] ss:$8 sps:$4 sm:$0xff]   ;;  %v2879_v5 = vld [vmem:[%s4273_s1 + $0x60] ss:$8 sps:$4 sm:$0xff]  }
   0xd   : > { %2028 = vmatpush1.bf16.msra.mxu0 %v2873_v1  ;;  %2070 = vmatprep.subr.bf16.mxu1 %v2874_v2  ;;  %v2880_v6 = vld [vmem:[%s4273_s1 + $0x164] ss:$8 sps:$4 sm:$0xff]   ;;  %v2882_v7 = vld [vmem:[%s4273_s1 + $0x160] ss:$8 sps:$4 sm:$0xff]   ;;  %v2883_v8 = vld [vmem:[%s4273_s1 + $0x54] ss:$8 sps:$4 sm:$0xff]  }
   0xe   : > { %2071 = vmatpush1.bf16.msra.mxu1 %v2876_v3  ;;  %2029 = vmatprep.subr.bf16.mxu0 %v2877_v4  ;;  %v2885_v9 = vld [vmem:[%s4273_s1 + $0x50] ss:$8 sps:$4 sm:$0xff]   ;;  %v2886_v10 = vld [vmem:[%s4273_s1 + $0x154] ss:$8 sps:$4 sm:$0xff]   ;;  %v2889_v11 = vld [vmem:[%s4273_s1 + $0x44] ss:$8 sps:$4 sm:$0xff]  }
   0xf   : > { %2072 = vmatprep.subr.bf16.mxu1 %v2880_v6  ;;  %v2888_v12 = vld [vmem:[%s4273_s1 + $0x150] ss:$8 sps:$4 sm:$0xff]   ;;  %v2892_v13 = vld [vmem:[%s4273_s1 + $0x144] ss:$8 sps:$4 sm:$0xff]   ;;  %v2891_v14 = vld [vmem:[%s4273_s1 + $0x40] ss:$8 sps:$4 sm:$0xff]  }
  0x10   : > { %v2895_v15 = vld [vmem:[%s4273_s1 + $0x34] ss:$8 sps:$4 sm:$0xff]   ;;  %v2894_v16 = vld [vmem:[%s4273_s1 + $0x140] ss:$8 sps:$4 sm:$0xff]   ;;  %v2897_v18 = vld [vmem:[%s4273_s1 + $0x30] ss:$8 sps:$4 sm:$0xff]  }
  0x11   : > { %2030 = vmatpush1.bf16.msra.mxu0 %v2879_v5  ;;  %v2898_v17 = vld [vmem:[%s4273_s1 + $0x134] ss:$8 sps:$4 sm:$0xff]   ;;  %v2901_v19 = vld [vmem:[%s4273_s1 + $0x24] ss:$8 sps:$4 sm:$0xff]   ;;  %v2900_v20 = vld [vmem:[%s4273_s1 + $0x130] ss:$8 sps:$4 sm:$0xff]  }
  0x12   : > { %2031 = vmatprep.subr.bf16.mxu0 %v2883_v8  ;;  %2073 = vmatpush1.bf16.msra.mxu1 %v2882_v7  ;;  %v2904_v21 = vld [vmem:[%s4273_s1 + $0x124] ss:$8 sps:$4 sm:$0xff]   ;;  %v2903_v22 = vld [vmem:[%s4273_s1 + $0x20] ss:$8 sps:$4 sm:$0xff]   ;;  %v2907_v23 = vld [vmem:[%s4273_s1 + $0x14] ss:$8 sps:$4 sm:$0xff]  }
  0x13   : > { %2074 = vmatprep.subr.bf16.mxu1 %v2886_v10  ;;  %v2906_v24 = vld [vmem:[%s4273_s1 + $0x120] ss:$8 sps:$4 sm:$0xff]   ;;  %v2910_v25 = vld [vmem:[%s4273_s1 + $0x114] ss:$8 sps:$4 sm:$0xff]   ;;  %v2909_v26 = vld [vmem:[%s4273_s1 + $0x10] ss:$8 sps:$4 sm:$0xff]  }
  0x14   : > { %v2913_v27 = vld [vmem:[%s4273_s1 + $0x4] ss:$8 sps:$4 sm:$0xff]   ;;  %v2912_v28 = vld [vmem:[%s4273_s1 + $0x110] ss:$8 sps:$4 sm:$0xff]   ;;  %v2915_v30 = vld [vmem:[%s4273_s1] ss:$8 sps:$4 sm:$0xff]  }
  0x15   : > { %2032 = vmatpush1.bf16.msra.mxu0 %v2885_v9  ;;  %v2916_v29 = vld [vmem:[%s4273_s1 + $0x104] ss:$8 sps:$4 sm:$0xff]   ;;  %v2919_v31 = vld [vmem:[%s4273_s1 + $0xf4] ss:$8 sps:$4 sm:$0xff]   ;;  %v2918_v32 = vld [vmem:[%s4273_s1 + $0x100] ss:$8 sps:$4 sm:$0xff]  }
  0x16   : > { %2033 = vmatprep.subr.bf16.mxu0 %v2889_v11  ;;  %2075 = vmatpush1.bf16.msra.mxu1 %v2888_v12  ;;  %v2922_v33 = vld [vmem:[%s4273_s1 + $0x1f4] ss:$8 sps:$4 sm:$0xff]   ;;  %v2921_v34 = vld [vmem:[%s4273_s1 + $0xf0] ss:$8 sps:$4 sm:$0xff]   ;;  %v2925_v35 = vld [vmem:[%s4273_s1 + $0xe4] ss:$8 sps:$4 sm:$0xff]  }
  0x17   : > { %2076 = vmatprep.subr.bf16.mxu1 %v2892_v13  ;;  %s4277_s22 = smov (!%p166_p3, %s2544_s22), 3  ;;  %v2924_v36 = vld [vmem:[%s4273_s1 + $0x1f0] ss:$8 sps:$4 sm:$0xff]   ;;  %v2928_v37 = vld [vmem:[%s4273_s1 + $0x1e4] ss:$8 sps:$4 sm:$0xff]  }
  0x18   : > { %v2927_v38 = vld [vmem:[%s4273_s1 + $0xe0] ss:$8 sps:$4 sm:$0xff]   ;;  %v2931_v39 = vld [vmem:[%s4273_s1 + $0xd4] ss:$8 sps:$4 sm:$0xff]   ;;  %s2862_s19 = smul.u32 72, %s4277_s22  ;;  %s2859_s15 = sshll.u32 %s4277_s22, 3 }
  0x19   : > { %2034 = vmatpush1.bf16.msra.mxu0 %v2891_v14  ;;  %v2930_v40 = vld [vmem:[%s4273_s1 + $0x1e0] ss:$8 sps:$4 sm:$0xff]   ;;  %v2934_v41 = vld [vmem:[%s4273_s1 + $0x1d4] ss:$8 sps:$4 sm:$0xff]   ;;  %v2933_v42 = vld [vmem:[%s4273_s1 + $0xd0] ss:$8 sps:$4 sm:$0xff]   ;;  %s177_s18 = scalar_lea.vmem %s4275_s3, %s2859_s15 }
  0x1a   : > { %2035 = vmatprep.subr.bf16.mxu0 %v2895_v15  ;;  %2077 = vmatpush1.bf16.msra.mxu1 %v2894_v16  ;;  %v2937_v43 = vld [vmem:[%s4273_s1 + $0xc4] ss:$8 sps:$4 sm:$0xff]   ;;  %s3510_s13 = scalar_lea.vmem %s4272_s0, %s2862_s19  ;;  %v2936_v44 = vld [vmem:[%s4273_s1 + $0x1d0] ss:$8 sps:$4 sm:$0xff]   ;;  %v2939_v46 = vld [vmem:[%s4273_s1 + $0xc0] ss:$8 sps:$4 sm:$0xff]  }
  0x1b   : > { %2078 = vmatprep.subr.bf16.mxu1 %v2898_v17  ;;  %v2940_v45 = vld [vmem:[%s4273_s1 + $0x1c4] ss:$8 sps:$4 sm:$0xff]   ;;  %v2943_v48 = vld [vmem:[%s4273_s1 + $0xb4] ss:$8 sps:$4 sm:$0xff]   ;;  %v2942_v49 = vld [vmem:[%s4273_s1 + $0x1c0] ss:$8 sps:$4 sm:$0xff]  }
  0x1c   : > { %v2968_v47 = vld [vmem:[%s3510_s13 + $0x4] ss:$72 sps:$4 sm:$0xff]   ;;  %v2946_v50 = vld [vmem:[%s4273_s1 + $0x1b4] ss:$8 sps:$4 sm:$0xff]   ;;  %v2945_v52 = vld [vmem:[%s4273_s1 + $0xb0] ss:$8 sps:$4 sm:$0xff]  }
  0x1d   : > { %2036 = vmatpush1.bf16.msra.mxu0 %v2897_v18  ;;  %2059 = vmatprep.mubr.bf16.mxu0 %v2968_v47  ;;  %v2975_v51 = vld [vmem:[%s3510_s13 + $0xc] ss:$72 sps:$4 sm:$0xff]   ;;  %v2948_v54 = vld [vmem:[%s4273_s1 + $0x1b0] ss:$8 sps:$4 sm:$0xff]   ;;  %v2951_v56 = vld [vmem:[%s4273_s1 + $0xa0] ss:$8 sps:$4 sm:$0xff]  }
  0x1e   : > { %2037 = vmatprep.subr.bf16.mxu0 %v2901_v19  ;;  %2079 = vmatpush1.bf16.msra.mxu1 %v2900_v20  ;;  %v2949_v53 = vld [vmem:[%s4273_s1 + $0xa4] ss:$8 sps:$4 sm:$0xff]   ;;  %v2955_v57 = vld [vmem:[%s4273_s1 + $0x94] ss:$8 sps:$4 sm:$0xff]   ;;  %v2954_v58 = vld [vmem:[%s4273_s1 + $0x1a0] ss:$8 sps:$4 sm:$0xff]  }
  0x1f   : > { %2080 = vmatprep.subr.bf16.mxu1 %v2904_v21  ;;  %2102 = vmatprep.mubr.bf16.mxu1 %v2975_v51  ;;  %v2952_v55 = vld [vmem:[%s4273_s1 + $0x1a4] ss:$8 sps:$4 sm:$0xff]   ;;  %v2958_v59 = vld [vmem:[%s4273_s1 + $0x194] ss:$8 sps:$4 sm:$0xff]   ;;  %v2957_v60 = vld [vmem:[%s4273_s1 + $0x90] ss:$8 sps:$4 sm:$0xff]  }
  0x20   : > { %v2961_v61 = vld [vmem:[%s4273_s1 + $0x84] ss:$8 sps:$4 sm:$0xff]   ;;  %v2960_v62 = vld [vmem:[%s4273_s1 + $0x190] ss:$8 sps:$4 sm:$0xff]   ;;  %v2963_v0 = vld [vmem:[%s4273_s1 + $0x80] ss:$8 sps:$4 sm:$0xff]  }
  0x21   : > { %2038 = vmatpush1.bf16.msra.mxu0 %v2903_v22  ;;  %v2964_v63 = vld [vmem:[%s4273_s1 + $0x184] ss:$8 sps:$4 sm:$0xff]   ;;  %v2972_v1 = vld [vmem:[%s4273_s1 + $0x274] ss:$8 sps:$4 sm:$0xff]   ;;  %v2969_v2 = vld [vmem:[%s4273_s1 + $0x180] ss:$8 sps:$4 sm:$0xff]  }
  0x22   : > { %2039 = vmatprep.subr.bf16.mxu0 %v2907_v23  ;;  %2081 = vmatpush1.bf16.msra.mxu1 %v2906_v24  ;;  %v2966_v3 = vld [vmem:[%s3510_s13] ss:$72 sps:$4 sm:$0xff]   ;;  %v2978_v4 = vld [vmem:[%s4273_s1 + $0x374] ss:$8 sps:$4 sm:$0xff]   ;;  %v2970_v5 = vld [vmem:[%s4273_s1 + $0x270] ss:$8 sps:$4 sm:$0xff]  }
  0x23   : > { %2082 = vmatprep.subr.bf16.mxu1 %v2910_v25  ;;  %v2973_v6 = vld [vmem:[%s3510_s13 + $0x8] ss:$72 sps:$4 sm:$0xff]   ;;  %v2981_v7 = vld [vmem:[%s4273_s1 + $0x264] ss:$8 sps:$4 sm:$0xff]   ;;  %v2987_v11 = vld [vmem:[%s4273_s1 + $0x254] ss:$8 sps:$4 sm:$0xff]  }
  0x24   : > { %v2976_v8 = vld [vmem:[%s4273_s1 + $0x370] ss:$8 sps:$4 sm:$0xff]   ;;  %v2984_v9 = vld [vmem:[%s4273_s1 + $0x364] ss:$8 sps:$4 sm:$0xff]   ;;  %v2979_v10 = vld [vmem:[%s4273_s1 + $0x260] ss:$8 sps:$4 sm:$0xff]  }
  0x25   : > { %2040 = vmatpush1.bf16.msra.mxu0 %v2909_v26  ;;  %v2982_v12 = vld [vmem:[%s4273_s1 + $0x360] ss:$8 sps:$4 sm:$0xff]   ;;  %v2990_v13 = vld [vmem:[%s4273_s1 + $0x354] ss:$8 sps:$4 sm:$0xff]   ;;  %v2985_v14 = vld [vmem:[%s4273_s1 + $0x250] ss:$8 sps:$4 sm:$0xff]  }
  0x26   : > { %2041 = vmatprep.subr.bf16.mxu0 %v2913_v27  ;;  %2083 = vmatpush1.bf16.msra.mxu1 %v2912_v28  ;;  %v2993_v15 = vld [vmem:[%s4273_s1 + $0x244] ss:$8 sps:$4 sm:$0xff]   ;;  %v2988_v16 = vld [vmem:[%s4273_s1 + $0x350] ss:$8 sps:$4 sm:$0xff]   ;;  %v2991_v18 = vld [vmem:[%s4273_s1 + $0x240] ss:$8 sps:$4 sm:$0xff]  }
  0x27   : > { %2084 = vmatprep.subr.bf16.mxu1 %v2916_v29  ;;  %v2996_v17 = vld [vmem:[%s4273_s1 + $0x344] ss:$8 sps:$4 sm:$0xff]   ;;  %v2999_v19 = vld [vmem:[%s4273_s1 + $0x234] ss:$8 sps:$4 sm:$0xff]   ;;  %v2994_v20 = vld [vmem:[%s4273_s1 + $0x340] ss:$8 sps:$4 sm:$0xff]  }
  0x28   : > { %v3002_v21 = vld [vmem:[%s4273_s1 + $0x334] ss:$8 sps:$4 sm:$0xff]   ;;  %v2997_v22 = vld [vmem:[%s4273_s1 + $0x230] ss:$8 sps:$4 sm:$0xff]   ;;  %v3005_v23 = vld [vmem:[%s4273_s1 + $0x224] ss:$8 sps:$4 sm:$0xff]  }
  0x29   : > { %2042 = vmatpush1.bf16.msra.mxu0 %v2915_v30  ;;  %v3000_v24 = vld [vmem:[%s4273_s1 + $0x330] ss:$8 sps:$4 sm:$0xff]   ;;  %v3008_v25 = vld [vmem:[%s4273_s1 + $0x324] ss:$8 sps:$4 sm:$0xff]   ;;  %v3003_v26 = vld [vmem:[%s4273_s1 + $0x220] ss:$8 sps:$4 sm:$0xff]  }
  0x2a   : > { %2043 = vmatprep.subr.bf16.mxu0 %v2919_v31  ;;  %2085 = vmatpush1.bf16.msra.mxu1 %v2918_v32  ;;  %v3011_v27 = vld [vmem:[%s4273_s1 + $0x214] ss:$8 sps:$4 sm:$0xff]   ;;  %v3006_v28 = vld [vmem:[%s4273_s1 + $0x320] ss:$8 sps:$4 sm:$0xff]   ;;  %v3009_v30 = vld [vmem:[%s4273_s1 + $0x210] ss:$8 sps:$4 sm:$0xff]  }
  0x2b   : > { %2086 = vmatprep.subr.bf16.mxu1 %v2922_v33  ;;  %v3014_v29 = vld [vmem:[%s4273_s1 + $0x314] ss:$8 sps:$4 sm:$0xff]   ;;  %v3012_v31 = vld [vmem:[%s4273_s1 + $0x310] ss:$8 sps:$4 sm:$0xff]   ;;  %v3017_v32 = vld [vmem:[%s4273_s1 + $0x204] ss:$8 sps:$4 sm:$0xff]  }
  0x2c   : > { %v3071_v33 = vld [vmem:[%s3510_s13 + $0x14] ss:$72 sps:$4 sm:$0xff]   ;;  %v3044_v51 = vld [vmem:[%s4273_s1 + $0x3c4] ss:$8 sps:$4 sm:$0xff]  }
  0x2d   : > { %2044 = vmatpush2.bf16.msra.mxu0 %v2921_v34  ;;  %v3020_v34 = vld [vmem:[%s4273_s1 + $0x304] ss:$8 sps:$4 sm:$0xff]   ;;  %v3038_v47 = vld [vmem:[%s4273_s1 + $0x3d4] ss:$8 sps:$4 sm:$0xff]  }
  0x2e   : > { %2045 = vmatprep.subr.bf16.mxu0 %v2925_v35  ;;  %2087 = vmatpush2.bf16.msra.mxu1 %v2924_v36  ;;  %v3015_v35 = vld [vmem:[%s4273_s1 + $0x200] ss:$8 sps:$4 sm:$0xff]   ;;  %v3077_v36 = vld [vmem:[%s3510_s13 + $0x1c] ss:$72 sps:$4 sm:$0xff]  }
  0x2f   : > { %2088 = vmatprep.subr.bf16.mxu1 %v2928_v37  ;;  %v3023_v37 = vld [vmem:[%s4273_s1 + $0x2f4] ss:$8 sps:$4 sm:$0xff]  }
  0x31   : > { %2046 = vmatpush2.bf16.msra.mxu0 %v2927_v38  ;;  %v3018_v38 = vld [vmem:[%s4273_s1 + $0x300] ss:$8 sps:$4 sm:$0xff]  }
  0x32   : > { %2047 = vmatprep.subr.bf16.mxu0 %v2931_v39  ;;  %2089 = vmatpush2.bf16.msra.mxu1 %v2930_v40  ;;  %v3026_v39 = vld [vmem:[%s4273_s1 + $0x3f4] ss:$8 sps:$4 sm:$0xff]   ;;  %v3021_v40 = vld [vmem:[%s4273_s1 + $0x2f0] ss:$8 sps:$4 sm:$0xff]  }
  0x33   : > { %2090 = vmatprep.subr.bf16.mxu1 %v2934_v41  ;;  %v3029_v41 = vld [vmem:[%s4273_s1 + $0x2e4] ss:$8 sps:$4 sm:$0xff]  }
  0x35   : > { %2048 = vmatpush2.bf16.msra.mxu0 %v2933_v42  ;;  %v3024_v42 = vld [vmem:[%s4273_s1 + $0x3f0] ss:$8 sps:$4 sm:$0xff]  }
  0x36   : > { %2049 = vmatprep.subr.bf16.mxu0 %v2937_v43  ;;  %2091 = vmatpush2.bf16.msra.mxu1 %v2936_v44  ;;  %v3032_v43 = vld [vmem:[%s4273_s1 + $0x3e4] ss:$8 sps:$4 sm:$0xff]   ;;  %v3027_v44 = vld [vmem:[%s4273_s1 + $0x2e0] ss:$8 sps:$4 sm:$0xff]  }
  0x37   : > { %2092 = vmatprep.subr.bf16.mxu1 %v2940_v45  ;;  %v3035_v45 = vld [vmem:[%s4273_s1 + $0x2d4] ss:$8 sps:$4 sm:$0xff]  }
  0x39   : > { %2050 = vmatpush2.bf16.msra.mxu0 %v2939_v46  ;;  %v3030_v46 = vld [vmem:[%s4273_s1 + $0x3e0] ss:$8 sps:$4 sm:$0xff]  }
  0x3a   : > { %2051 = vmatprep.subr.bf16.mxu0 %v2943_v48  ;;  %2093 = vmatpush2.bf16.msra.mxu1 %v2942_v49  ;;  %v3033_v48 = vld [vmem:[%s4273_s1 + $0x2d0] ss:$8 sps:$4 sm:$0xff]   ;;  %v3041_v49 = vld [vmem:[%s4273_s1 + $0x2c4] ss:$8 sps:$4 sm:$0xff]  }
  0x3b   : > { %2094 = vmatprep.subr.bf16.mxu1 %v2946_v50  ;;  %v3036_v50 = vld [vmem:[%s4273_s1 + $0x3d0] ss:$8 sps:$4 sm:$0xff]  }
  0x3d   : > { %2052 = vmatpush2.bf16.msra.mxu0 %v2945_v52  ;;  %v3039_v52 = vld [vmem:[%s4273_s1 + $0x2c0] ss:$8 sps:$4 sm:$0xff]  }
  0x3e   : > { %2053 = vmatprep.subr.bf16.mxu0 %v2949_v53  ;;  %2095 = vmatpush2.bf16.msra.mxu1 %v2948_v54  ;;  %v3047_v53 = vld [vmem:[%s4273_s1 + $0x2b4] ss:$8 sps:$4 sm:$0xff]   ;;  %v3042_v54 = vld [vmem:[%s4273_s1 + $0x3c0] ss:$8 sps:$4 sm:$0xff]  }
  0x3f   : > { %2096 = vmatprep.subr.bf16.mxu1 %v2952_v55  ;;  %v3050_v55 = vld [vmem:[%s4273_s1 + $0x3b4] ss:$8 sps:$4 sm:$0xff]  }
  0x41   : > { %2054 = vmatpush2.bf16.msra.mxu0 %v2951_v56  ;;  %v3045_v56 = vld [vmem:[%s4273_s1 + $0x2b0] ss:$8 sps:$4 sm:$0xff]  }
  0x42   : > { %2055 = vmatprep.subr.bf16.mxu0 %v2955_v57  ;;  %2097 = vmatpush2.bf16.msra.mxu1 %v2954_v58  ;;  %v3053_v57 = vld [vmem:[%s4273_s1 + $0x2a4] ss:$8 sps:$4 sm:$0xff]   ;;  %v3048_v58 = vld [vmem:[%s4273_s1 + $0x3b0] ss:$8 sps:$4 sm:$0xff]  }
  0x43   : > { %2098 = vmatprep.subr.bf16.mxu1 %v2958_v59  ;;  %v3056_v59 = vld [vmem:[%s4273_s1 + $0x3a4] ss:$8 sps:$4 sm:$0xff]  }
  0x45   : > { %2056 = vmatpush2.bf16.msra.mxu0 %v2957_v60  ;;  %v3051_v60 = vld [vmem:[%s4273_s1 + $0x2a0] ss:$8 sps:$4 sm:$0xff]  }
  0x46   : > { %2057 = vmatprep.subr.bf16.mxu0 %v2961_v61  ;;  %2099 = vmatpush2.bf16.msra.mxu1 %v2960_v62  ;;  %v3059_v61 = vld [vmem:[%s4273_s1 + $0x294] ss:$8 sps:$4 sm:$0xff]   ;;  %v3054_v62 = vld [vmem:[%s4273_s1 + $0x3a0] ss:$8 sps:$4 sm:$0xff]  }
  0x47   : > { %2100 = vmatprep.subr.bf16.mxu1 %v2964_v63  ;;  %v3062_v63 = vld [vmem:[%s4273_s1 + $0x394] ss:$8 sps:$4 sm:$0xff]  }
  0x49   : > { %2058 = vmatpush2.bf16.msra.mxu0 %v2963_v0  ;;  %v3057_v0 = vld [vmem:[%s4273_s1 + $0x290] ss:$8 sps:$4 sm:$0xff]  }
  0x4a   : > { %2113 = vmatprep.subr.bf16.mxu0 %v2972_v1  ;;  %2101 = vmatpush2.bf16.msra.mxu1 %v2969_v2  ;;  %v3065_v1 = vld [vmem:[%s4273_s1 + $0x284] ss:$8 sps:$4 sm:$0xff]   ;;  %v3060_v2 = vld [vmem:[%s4273_s1 + $0x390] ss:$8 sps:$4 sm:$0xff]  }
  0x4b   : > { %2156 = vmatprep.subr.bf16.mxu1 %v2978_v4  ;;  %v3063_v4 = vld [vmem:[%s4273_s1 + $0x280] ss:$8 sps:$4 sm:$0xff]  }
  0x4c   : > { %2060 = vmatmul.mubr.bf16.vlgmr.msra.gmra.mxu0 %v2966_v3  ;;  %v3068_v3 = vld [vmem:[%s4273_s1 + $0x384] ss:$8 sps:$4 sm:$0xff]  }
  0x4d   : > { %2114 = vmatpush1.bf16.msra.mxu0 %v2970_v5  ;;  %2103 = vmatmul.mubr.bf16.vlgmr.msra.gmra.mxu1 %v2973_v6  ;;  %v3074_v5 = vld [vmem:[%s4273_s1 + $0x474] ss:$8 sps:$4 sm:$0xff]   ;;  %v3066_v6 = vld [vmem:[%s4273_s1 + $0x380] ss:$8 sps:$4 sm:$0xff]  }
  0x4e   : > { %2115 = vmatprep.subr.bf16.mxu0 %v2981_v7  ;;  %2157 = vmatpush1.bf16.msra.mxu1 %v2976_v8  ;;  %v3069_v7 = vld [vmem:[%s3510_s13 + $0x10] ss:$72 sps:$4 sm:$0xff]   ;;  %v3080_v8 = vld [vmem:[%s4273_s1 + $0x574] ss:$8 sps:$4 sm:$0xff]  }
  0x4f   : > { %2158 = vmatprep.subr.bf16.mxu1 %v2984_v9  ;;  %2145 = vmatprep.mubr.bf16.mxu0 %v3071_v33  ;;  %v3072_v9 = vld [vmem:[%s4273_s1 + $0x470] ss:$8 sps:$4 sm:$0xff]   ;;  %v3113_v33 = vld [vmem:[%s4273_s1 + $0x414] ss:$8 sps:$4 sm:$0xff]  }
  0x50   : > { %2188 = vmatprep.mubr.bf16.mxu1 %v3077_v36  ;;  %v3111_v36 = vld [vmem:[%s4273_s1 + $0x410] ss:$8 sps:$4 sm:$0xff]  }
  0x51   : > { %2116 = vmatpush1.bf16.msra.mxu0 %v2979_v10  ;;  %v3075_v10 = vld [vmem:[%s3510_s13 + $0x18] ss:$72 sps:$4 sm:$0xff]  }
  0x52   : > { %2117 = vmatprep.subr.bf16.mxu0 %v2987_v11  ;;  %2159 = vmatpush1.bf16.msra.mxu1 %v2982_v12  ;;  %v3083_v11 = vld [vmem:[%s4273_s1 + $0x464] ss:$8 sps:$4 sm:$0xff]   ;;  %v3078_v12 = vld [vmem:[%s4273_s1 + $0x570] ss:$8 sps:$4 sm:$0xff]  }
  0x53   : > { %2160 = vmatprep.subr.bf16.mxu1 %v2990_v13  ;;  %v3086_v13 = vld [vmem:[%s4273_s1 + $0x564] ss:$8 sps:$4 sm:$0xff]  }
  0x55   : > { %2118 = vmatpush1.bf16.msra.mxu0 %v2985_v14  ;;  %v3081_v14 = vld [vmem:[%s4273_s1 + $0x460] ss:$8 sps:$4 sm:$0xff]  }
  0x56   : > { %2119 = vmatprep.subr.bf16.mxu0 %v2993_v15  ;;  %2161 = vmatpush1.bf16.msra.mxu1 %v2988_v16  ;;  %v3089_v15 = vld [vmem:[%s4273_s1 + $0x454] ss:$8 sps:$4 sm:$0xff]   ;;  %v3084_v16 = vld [vmem:[%s4273_s1 + $0x560] ss:$8 sps:$4 sm:$0xff]  }
  0x57   : > { %2162 = vmatprep.subr.bf16.mxu1 %v2996_v17  ;;  %v3092_v17 = vld [vmem:[%s4273_s1 + $0x554] ss:$8 sps:$4 sm:$0xff]  }
  0x59   : > { %2120 = vmatpush1.bf16.msra.mxu0 %v2991_v18  ;;  %v3173_v18 = vld [vmem:[%s3510_s13 + $0x24] ss:$72 sps:$4 sm:$0xff]  }
  0x5a   : > { %2121 = vmatprep.subr.bf16.mxu0 %v2999_v19  ;;  %2163 = vmatpush1.bf16.msra.mxu1 %v2994_v20  ;;  %v3087_v19 = vld [vmem:[%s4273_s1 + $0x450] ss:$8 sps:$4 sm:$0xff]  }
  0x5b   : > { %2164 = vmatprep.subr.bf16.mxu1 %v3002_v21  ;;  %v3090_v20 = vld [vmem:[%s4273_s1 + $0x550] ss:$8 sps:$4 sm:$0xff]   ;;  %v3095_v21 = vld [vmem:[%s4273_s1 + $0x444] ss:$8 sps:$4 sm:$0xff]  }
  0x5d   : > { %2122 = vmatpush1.bf16.msra.mxu0 %v2997_v22  ;;  %v3179_v22 = vld [vmem:[%s3510_s13 + $0x2c] ss:$72 sps:$4 sm:$0xff]  }
  0x5e   : > { %2123 = vmatprep.subr.bf16.mxu0 %v3005_v23  ;;  %2165 = vmatpush1.bf16.msra.mxu1 %v3000_v24  ;;  %v3098_v23 = vld [vmem:[%s4273_s1 + $0x544] ss:$8 sps:$4 sm:$0xff]   ;;  %v3093_v24 = vld [vmem:[%s4273_s1 + $0x440] ss:$8 sps:$4 sm:$0xff]  }
  0x5f   : > { %2166 = vmatprep.subr.bf16.mxu1 %v3008_v25  ;;  %v3101_v25 = vld [vmem:[%s4273_s1 + $0x434] ss:$8 sps:$4 sm:$0xff]  }
  0x61   : > { %2124 = vmatpush1.bf16.msra.mxu0 %v3003_v26  ;;  %v3096_v26 = vld [vmem:[%s4273_s1 + $0x540] ss:$8 sps:$4 sm:$0xff]  }
  0x62   : > { %2125 = vmatprep.subr.bf16.mxu0 %v3011_v27  ;;  %2167 = vmatpush1.bf16.msra.mxu1 %v3006_v28  ;;  %v3104_v27 = vld [vmem:[%s4273_s1 + $0x534] ss:$8 sps:$4 sm:$0xff]   ;;  %v3099_v28 = vld [vmem:[%s4273_s1 + $0x430] ss:$8 sps:$4 sm:$0xff]  }
  0x63   : > { %2168 = vmatprep.subr.bf16.mxu1 %v3014_v29  ;;  %v3107_v29 = vld [vmem:[%s4273_s1 + $0x424] ss:$8 sps:$4 sm:$0xff]  }
  0x65   : > { %2126 = vmatpush1.bf16.msra.mxu0 %v3009_v30  ;;  %v3102_v30 = vld [vmem:[%s4273_s1 + $0x530] ss:$8 sps:$4 sm:$0xff]  }
  0x66   : > { %2127 = vmatprep.subr.bf16.mxu0 %v3017_v32  ;;  %2169 = vmatpush1.bf16.msra.mxu1 %v3012_v31  ;;  %v3110_v31 = vld [vmem:[%s4273_s1 + $0x524] ss:$8 sps:$4 sm:$0xff]   ;;  %v3105_v32 = vld [vmem:[%s4273_s1 + $0x420] ss:$8 sps:$4 sm:$0xff]  }
  0x67   : > { %2170 = vmatprep.subr.bf16.mxu1 %v3020_v34  ;;  %v3108_v34 = vld [vmem:[%s4273_s1 + $0x520] ss:$8 sps:$4 sm:$0xff]  }
  0x69   : > { %2128 = vmatpush1.bf16.msra.mxu0 %v3015_v35  ;;  %v3116_v35 = vld [vmem:[%s4273_s1 + $0x514] ss:$8 sps:$4 sm:$0xff]  }
  0x6a   : > { %2129 = vmatprep.subr.bf16.mxu0 %v3023_v37  ;;  %2171 = vmatpush1.bf16.msra.mxu1 %v3018_v38  ;;  %v3119_v37 = vld [vmem:[%s4273_s1 + $0x404] ss:$8 sps:$4 sm:$0xff]   ;;  %v3114_v38 = vld [vmem:[%s4273_s1 + $0x510] ss:$8 sps:$4 sm:$0xff]  }
  0x6b   : > { %2172 = vmatprep.subr.bf16.mxu1 %v3026_v39  ;;  %v3122_v39 = vld [vmem:[%s4273_s1 + $0x504] ss:$8 sps:$4 sm:$0xff]  }
  0x6d   : > { %2130 = vmatpush2.bf16.msra.mxu0 %v3021_v40  ;;  %v3117_v40 = vld [vmem:[%s4273_s1 + $0x400] ss:$8 sps:$4 sm:$0xff]  }
  0x6e   : > { %2131 = vmatprep.subr.bf16.mxu0 %v3029_v41  ;;  %2173 = vmatpush2.bf16.msra.mxu1 %v3024_v42  ;;  %v3125_v41 = vld [vmem:[%s4273_s1 + $0x4f4] ss:$8 sps:$4 sm:$0xff]   ;;  %v3120_v42 = vld [vmem:[%s4273_s1 + $0x500] ss:$8 sps:$4 sm:$0xff]  }
  0x6f   : > { %2174 = vmatprep.subr.bf16.mxu1 %v3032_v43  ;;  %v3128_v43 = vld [vmem:[%s4273_s1 + $0x5f4] ss:$8 sps:$4 sm:$0xff]  }
  0x71   : > { %2132 = vmatpush2.bf16.msra.mxu0 %v3027_v44  ;;  %v3123_v44 = vld [vmem:[%s4273_s1 + $0x4f0] ss:$8 sps:$4 sm:$0xff]  }
  0x72   : > { %2133 = vmatprep.subr.bf16.mxu0 %v3035_v45  ;;  %2175 = vmatpush2.bf16.msra.mxu1 %v3030_v46  ;;  %v3131_v45 = vld [vmem:[%s4273_s1 + $0x4e4] ss:$8 sps:$4 sm:$0xff]   ;;  %v3126_v46 = vld [vmem:[%s4273_s1 + $0x5f0] ss:$8 sps:$4 sm:$0xff]  }
  0x73   : > { %2176 = vmatprep.subr.bf16.mxu1 %v3038_v47  ;;  %v3134_v47 = vld [vmem:[%s4273_s1 + $0x5e4] ss:$8 sps:$4 sm:$0xff]  }
  0x75   : > { %2134 = vmatpush2.bf16.msra.mxu0 %v3033_v48  ;;  %v3129_v48 = vld [vmem:[%s4273_s1 + $0x4e0] ss:$8 sps:$4 sm:$0xff]  }
  0x76   : > { %2135 = vmatprep.subr.bf16.mxu0 %v3041_v49  ;;  %2177 = vmatpush2.bf16.msra.mxu1 %v3036_v50  ;;  %v3137_v49 = vld [vmem:[%s4273_s1 + $0x4d4] ss:$8 sps:$4 sm:$0xff]   ;;  %v3132_v50 = vld [vmem:[%s4273_s1 + $0x5e0] ss:$8 sps:$4 sm:$0xff]  }
  0x77   : > { %2178 = vmatprep.subr.bf16.mxu1 %v3044_v51  ;;  %v3140_v51 = vld [vmem:[%s4273_s1 + $0x5d4] ss:$8 sps:$4 sm:$0xff]  }
  0x79   : > { %2136 = vmatpush2.bf16.msra.mxu0 %v3039_v52  ;;  %v3135_v52 = vld [vmem:[%s4273_s1 + $0x4d0] ss:$8 sps:$4 sm:$0xff]  }
  0x7a   : > { %2137 = vmatprep.subr.bf16.mxu0 %v3047_v53  ;;  %2179 = vmatpush2.bf16.msra.mxu1 %v3042_v54  ;;  %v3143_v53 = vld [vmem:[%s4273_s1 + $0x4c4] ss:$8 sps:$4 sm:$0xff]   ;;  %v3138_v54 = vld [vmem:[%s4273_s1 + $0x5d0] ss:$8 sps:$4 sm:$0xff]  }
  0x7b   : > { %2180 = vmatprep.subr.bf16.mxu1 %v3050_v55  ;;  %v3146_v55 = vld [vmem:[%s4273_s1 + $0x5c4] ss:$8 sps:$4 sm:$0xff]  }
  0x7d   : > { %2138 = vmatpush2.bf16.msra.mxu0 %v3045_v56  ;;  %v3141_v56 = vld [vmem:[%s4273_s1 + $0x4c0] ss:$8 sps:$4 sm:$0xff]  }
  0x7e   : > { %2139 = vmatprep.subr.bf16.mxu0 %v3053_v57  ;;  %2181 = vmatpush2.bf16.msra.mxu1 %v3048_v58  ;;  %v3149_v57 = vld [vmem:[%s4273_s1 + $0x4b4] ss:$8 sps:$4 sm:$0xff]   ;;  %v3144_v58 = vld [vmem:[%s4273_s1 + $0x5c0] ss:$8 sps:$4 sm:$0xff]  }
  0x7f   : > { %2182 = vmatprep.subr.bf16.mxu1 %v3056_v59  ;;  %v3152_v59 = vld [vmem:[%s4273_s1 + $0x5b4] ss:$8 sps:$4 sm:$0xff]  }
  0x81   : > { %2140 = vmatpush2.bf16.msra.mxu0 %v3051_v60  ;;  %v3147_v60 = vld [vmem:[%s4273_s1 + $0x4b0] ss:$8 sps:$4 sm:$0xff]  }
  0x82   : > { %2141 = vmatprep.subr.bf16.mxu0 %v3059_v61  ;;  %2183 = vmatpush2.bf16.msra.mxu1 %v3054_v62  ;;  %v3155_v61 = vld [vmem:[%s4273_s1 + $0x4a4] ss:$8 sps:$4 sm:$0xff]   ;;  %v3150_v62 = vld [vmem:[%s4273_s1 + $0x5b0] ss:$8 sps:$4 sm:$0xff]  }
  0x83   : > { %2184 = vmatprep.subr.bf16.mxu1 %v3062_v63  ;;  %v3158_v63 = vld [vmem:[%s4273_s1 + $0x5a4] ss:$8 sps:$4 sm:$0xff]  }
  0x85   : > { %2142 = vmatpush2.bf16.msra.mxu0 %v3057_v0  ;;  %v3153_v0 = vld [vmem:[%s4273_s1 + $0x4a0] ss:$8 sps:$4 sm:$0xff]  }
  0x86   : > { %2143 = vmatprep.subr.bf16.mxu0 %v3065_v1  ;;  %2185 = vmatpush2.bf16.msra.mxu1 %v3060_v2  ;;  %v3161_v1 = vld [vmem:[%s4273_s1 + $0x494] ss:$8 sps:$4 sm:$0xff]   ;;  %v3156_v2 = vld [vmem:[%s4273_s1 + $0x5a0] ss:$8 sps:$4 sm:$0xff]  }
  0x87   : > { %2186 = vmatprep.subr.bf16.mxu1 %v3068_v3  ;;  %v3164_v3 = vld [vmem:[%s4273_s1 + $0x594] ss:$8 sps:$4 sm:$0xff]  }
  0x89   : > { %2144 = vmatpush2.bf16.msra.mxu0 %v3063_v4  ;;  %v3159_v4 = vld [vmem:[%s4273_s1 + $0x490] ss:$8 sps:$4 sm:$0xff]  }
  0x8a   : > { %2199 = vmatprep.subr.bf16.mxu0 %v3074_v5  ;;  %2187 = vmatpush2.bf16.msra.mxu1 %v3066_v6  ;;  %v3167_v5 = vld [vmem:[%s4273_s1 + $0x484] ss:$8 sps:$4 sm:$0xff]   ;;  %v3162_v6 = vld [vmem:[%s4273_s1 + $0x590] ss:$8 sps:$4 sm:$0xff]  }
  0x8b   : > { %2242 = vmatprep.subr.bf16.mxu1 %v3080_v8  ;;  %v3170_v8 = vld [vmem:[%s4273_s1 + $0x584] ss:$8 sps:$4 sm:$0xff]  }
  0x8c   : > { %2146 = vmatmul.mubr.bf16.vlgmr.msra.gmra.mxu0 %v3069_v7  ;;  %v3165_v7 = vld [vmem:[%s4273_s1 + $0x480] ss:$8 sps:$4 sm:$0xff]  }
  0x8d   : > { %2200 = vmatpush1.bf16.msra.mxu0 %v3072_v9  ;;  %2189 = vmatmul.mubr.bf16.vlgmr.msra.gmra.mxu1 %v3075_v10  ;;  %v3168_v9 = vld [vmem:[%s4273_s1 + $0x580] ss:$8 sps:$4 sm:$0xff]   ;;  %v3176_v10 = vld [vmem:[%s4273_s1 + $0x674] ss:$8 sps:$4 sm:$0xff]  }
  0x8e   : > { %2201 = vmatprep.subr.bf16.mxu0 %v3083_v11  ;;  %2243 = vmatpush1.bf16.msra.mxu1 %v3078_v12  ;;  %v3171_v11 = vld [vmem:[%s3510_s13 + $0x20] ss:$72 sps:$4 sm:$0xff]   ;;  %v3174_v12 = vld [vmem:[%s4273_s1 + $0x670] ss:$8 sps:$4 sm:$0xff]  }
  0x8f   : > { %2244 = vmatprep.subr.bf16.mxu1 %v3086_v13  ;;  %2231 = vmatprep.mubr.bf16.mxu0 %v3173_v18  ;;  %v3177_v13 = vld [vmem:[%s3510_s13 + $0x28] ss:$72 sps:$4 sm:$0xff]   ;;  %v3281_v18 = vld [vmem:[%s3510_s13 + $0x3c] ss:$72 sps:$4 sm:$0xff]  }
  0x90   : > { %2274 = vmatprep.mubr.bf16.mxu1 %v3179_v22  ;;  %v3186_v22 = vld [vmem:[%s4273_s1 + $0x760] ss:$8 sps:$4 sm:$0xff]  }
  0x91   : > { %2202 = vmatpush1.bf16.msra.mxu0 %v3081_v14  ;;  %v3182_v14 = vld [vmem:[%s4273_s1 + $0x774] ss:$8 sps:$4 sm:$0xff]  }
  0x92   : > { %2203 = vmatprep.subr.bf16.mxu0 %v3089_v15  ;;  %2245 = vmatpush1.bf16.msra.mxu1 %v3084_v16  ;;  %v3275_v15 = vld [vmem:[%s3510_s13 + $0x34] ss:$72 sps:$4 sm:$0xff]   ;;  %v3185_v16 = vld [vmem:[%s4273_s1 + $0x664] ss:$8 sps:$4 sm:$0xff]  }
  0x93   : > { %2246 = vmatprep.subr.bf16.mxu1 %v3092_v17  ;;  %v3180_v17 = vld [vmem:[%s4273_s1 + $0x770] ss:$8 sps:$4 sm:$0xff]  }
  0x95   : > { %2204 = vmatpush1.bf16.msra.mxu0 %v3087_v19  ;;  %v3188_v19 = vld [vmem:[%s4273_s1 + $0x764] ss:$8 sps:$4 sm:$0xff]  }
  0x96   : > { %2205 = vmatprep.subr.bf16.mxu0 %v3095_v21  ;;  %2247 = vmatpush1.bf16.msra.mxu1 %v3090_v20  ;;  %v3183_v20 = vld [vmem:[%s4273_s1 + $0x660] ss:$8 sps:$4 sm:$0xff]   ;;  %v3191_v21 = vld [vmem:[%s4273_s1 + $0x654] ss:$8 sps:$4 sm:$0xff]  }
  0x97   : > { %2248 = vmatprep.subr.bf16.mxu1 %v3098_v23  ;;  %v3194_v23 = vld [vmem:[%s4273_s1 + $0x754] ss:$8 sps:$4 sm:$0xff]  }
  0x99   : > { %2206 = vmatpush1.bf16.msra.mxu0 %v3093_v24  ;;  %v3189_v24 = vld [vmem:[%s4273_s1 + $0x650] ss:$8 sps:$4 sm:$0xff]  }
  0x9a   : > { %2207 = vmatprep.subr.bf16.mxu0 %v3101_v25  ;;  %2249 = vmatpush1.bf16.msra.mxu1 %v3096_v26  ;;  %v3197_v25 = vld [vmem:[%s4273_s1 + $0x644] ss:$8 sps:$4 sm:$0xff]   ;;  %v3192_v26 = vld [vmem:[%s4273_s1 + $0x750] ss:$8 sps:$4 sm:$0xff]  }
  0x9b   : > { %2250 = vmatprep.subr.bf16.mxu1 %v3104_v27  ;;  %v3200_v27 = vld [vmem:[%s4273_s1 + $0x744] ss:$8 sps:$4 sm:$0xff]  }
  0x9d   : > { %2208 = vmatpush1.bf16.msra.mxu0 %v3099_v28  ;;  %v3195_v28 = vld [vmem:[%s4273_s1 + $0x640] ss:$8 sps:$4 sm:$0xff]  }
  0x9e   : > { %2209 = vmatprep.subr.bf16.mxu0 %v3107_v29  ;;  %2251 = vmatpush1.bf16.msra.mxu1 %v3102_v30  ;;  %v3203_v29 = vld [vmem:[%s4273_s1 + $0x634] ss:$8 sps:$4 sm:$0xff]   ;;  %v3198_v30 = vld [vmem:[%s4273_s1 + $0x740] ss:$8 sps:$4 sm:$0xff]  }
  0x9f   : > { %2252 = vmatprep.subr.bf16.mxu1 %v3110_v31  ;;  %v3206_v31 = vld [vmem:[%s4273_s1 + $0x734] ss:$8 sps:$4 sm:$0xff]  }
  0xa1   : > { %2210 = vmatpush1.bf16.msra.mxu0 %v3105_v32  ;;  %v3201_v32 = vld [vmem:[%s4273_s1 + $0x630] ss:$8 sps:$4 sm:$0xff]  }
  0xa2   : > { %2211 = vmatprep.subr.bf16.mxu0 %v3113_v33  ;;  %2253 = vmatpush1.bf16.msra.mxu1 %v3108_v34  ;;  %v3209_v33 = vld [vmem:[%s4273_s1 + $0x624] ss:$8 sps:$4 sm:$0xff]   ;;  %v3204_v34 = vld [vmem:[%s4273_s1 + $0x730] ss:$8 sps:$4 sm:$0xff]  }
  0xa3   : > { %2254 = vmatprep.subr.bf16.mxu1 %v3116_v35  ;;  %v3212_v35 = vld [vmem:[%s4273_s1 + $0x724] ss:$8 sps:$4 sm:$0xff]  }
  0xa5   : > { %2212 = vmatpush1.bf16.msra.mxu0 %v3111_v36  ;;  %v3207_v36 = vld [vmem:[%s4273_s1 + $0x620] ss:$8 sps:$4 sm:$0xff]  }
  0xa6   : > { %2213 = vmatprep.subr.bf16.mxu0 %v3119_v37  ;;  %2255 = vmatpush1.bf16.msra.mxu1 %v3114_v38  ;;  %v3215_v37 = vld [vmem:[%s4273_s1 + $0x614] ss:$8 sps:$4 sm:$0xff]   ;;  %v3210_v38 = vld [vmem:[%s4273_s1 + $0x720] ss:$8 sps:$4 sm:$0xff]  }
  0xa7   : > { %2256 = vmatprep.subr.bf16.mxu1 %v3122_v39  ;;  %v3218_v39 = vld [vmem:[%s4273_s1 + $0x714] ss:$8 sps:$4 sm:$0xff]  }
  0xa9   : > { %2214 = vmatpush1.bf16.msra.mxu0 %v3117_v40  ;;  %v3213_v40 = vld [vmem:[%s4273_s1 + $0x610] ss:$8 sps:$4 sm:$0xff]  }
  0xaa   : > { %2215 = vmatprep.subr.bf16.mxu0 %v3125_v41  ;;  %2257 = vmatpush1.bf16.msra.mxu1 %v3120_v42  ;;  %v3221_v41 = vld [vmem:[%s4273_s1 + $0x604] ss:$8 sps:$4 sm:$0xff]   ;;  %v3216_v42 = vld [vmem:[%s4273_s1 + $0x710] ss:$8 sps:$4 sm:$0xff]  }
  0xab   : > { %2258 = vmatprep.subr.bf16.mxu1 %v3128_v43  ;;  %v3224_v43 = vld [vmem:[%s4273_s1 + $0x704] ss:$8 sps:$4 sm:$0xff]  }
  0xad   : > { %2216 = vmatpush2.bf16.msra.mxu0 %v3123_v44  ;;  %v3219_v44 = vld [vmem:[%s4273_s1 + $0x600] ss:$8 sps:$4 sm:$0xff]  }
  0xae   : > { %2217 = vmatprep.subr.bf16.mxu0 %v3131_v45  ;;  %2259 = vmatpush2.bf16.msra.mxu1 %v3126_v46  ;;  %v3227_v45 = vld [vmem:[%s4273_s1 + $0x6f4] ss:$8 sps:$4 sm:$0xff]   ;;  %v3222_v46 = vld [vmem:[%s4273_s1 + $0x700] ss:$8 sps:$4 sm:$0xff]  }
  0xaf   : > { %2260 = vmatprep.subr.bf16.mxu1 %v3134_v47  ;;  %v3230_v47 = vld [vmem:[%s4273_s1 + $0x7f4] ss:$8 sps:$4 sm:$0xff]  }
  0xb1   : > { %2218 = vmatpush2.bf16.msra.mxu0 %v3129_v48  ;;  %v3225_v48 = vld [vmem:[%s4273_s1 + $0x6f0] ss:$8 sps:$4 sm:$0xff]  }
  0xb2   : > { %2219 = vmatprep.subr.bf16.mxu0 %v3137_v49  ;;  %2261 = vmatpush2.bf16.msra.mxu1 %v3132_v50  ;;  %v3233_v49 = vld [vmem:[%s4273_s1 + $0x6e4] ss:$8 sps:$4 sm:$0xff]   ;;  %v3228_v50 = vld [vmem:[%s4273_s1 + $0x7f0] ss:$8 sps:$4 sm:$0xff]  }
  0xb3   : > { %2262 = vmatprep.subr.bf16.mxu1 %v3140_v51  ;;  %v3236_v51 = vld [vmem:[%s4273_s1 + $0x7e4] ss:$8 sps:$4 sm:$0xff]  }
  0xb5   : > { %2220 = vmatpush2.bf16.msra.mxu0 %v3135_v52  ;;  %v3231_v52 = vld [vmem:[%s4273_s1 + $0x6e0] ss:$8 sps:$4 sm:$0xff]  }
  0xb6   : > { %2221 = vmatprep.subr.bf16.mxu0 %v3143_v53  ;;  %2263 = vmatpush2.bf16.msra.mxu1 %v3138_v54  ;;  %v3239_v53 = vld [vmem:[%s4273_s1 + $0x6d4] ss:$8 sps:$4 sm:$0xff]   ;;  %v3234_v54 = vld [vmem:[%s4273_s1 + $0x7e0] ss:$8 sps:$4 sm:$0xff]  }
  0xb7   : > { %2264 = vmatprep.subr.bf16.mxu1 %v3146_v55  ;;  %v3242_v55 = vld [vmem:[%s4273_s1 + $0x7d4] ss:$8 sps:$4 sm:$0xff]  }
  0xb9   : > { %2222 = vmatpush2.bf16.msra.mxu0 %v3141_v56  ;;  %v3237_v56 = vld [vmem:[%s4273_s1 + $0x6d0] ss:$8 sps:$4 sm:$0xff]  }
  0xba   : > { %2223 = vmatprep.subr.bf16.mxu0 %v3149_v57  ;;  %2265 = vmatpush2.bf16.msra.mxu1 %v3144_v58  ;;  %v3245_v57 = vld [vmem:[%s4273_s1 + $0x6c4] ss:$8 sps:$4 sm:$0xff]   ;;  %v3240_v58 = vld [vmem:[%s4273_s1 + $0x7d0] ss:$8 sps:$4 sm:$0xff]  }
  0xbb   : > { %2266 = vmatprep.subr.bf16.mxu1 %v3152_v59  ;;  %v3248_v59 = vld [vmem:[%s4273_s1 + $0x7c4] ss:$8 sps:$4 sm:$0xff]  }
  0xbd   : > { %2224 = vmatpush2.bf16.msra.mxu0 %v3147_v60  ;;  %v3243_v60 = vld [vmem:[%s4273_s1 + $0x6c0] ss:$8 sps:$4 sm:$0xff]  }
  0xbe   : > { %2225 = vmatprep.subr.bf16.mxu0 %v3155_v61  ;;  %2267 = vmatpush2.bf16.msra.mxu1 %v3150_v62  ;;  %v3251_v61 = vld [vmem:[%s4273_s1 + $0x6b4] ss:$8 sps:$4 sm:$0xff]   ;;  %v3246_v62 = vld [vmem:[%s4273_s1 + $0x7c0] ss:$8 sps:$4 sm:$0xff]  }
  0xbf   : > { %2268 = vmatprep.subr.bf16.mxu1 %v3158_v63  ;;  %v3254_v63 = vld [vmem:[%s4273_s1 + $0x7b4] ss:$8 sps:$4 sm:$0xff]  }
  0xc1   : > { %2226 = vmatpush2.bf16.msra.mxu0 %v3153_v0  ;;  %v3249_v0 = vld [vmem:[%s4273_s1 + $0x6b0] ss:$8 sps:$4 sm:$0xff]  }
  0xc2   : > { %2227 = vmatprep.subr.bf16.mxu0 %v3161_v1  ;;  %2269 = vmatpush2.bf16.msra.mxu1 %v3156_v2  ;;  %v3257_v1 = vld [vmem:[%s4273_s1 + $0x6a4] ss:$8 sps:$4 sm:$0xff]   ;;  %v3252_v2 = vld [vmem:[%s4273_s1 + $0x7b0] ss:$8 sps:$4 sm:$0xff]  }
  0xc3   : > { %2270 = vmatprep.subr.bf16.mxu1 %v3164_v3  ;;  %v3260_v3 = vld [vmem:[%s4273_s1 + $0x7a4] ss:$8 sps:$4 sm:$0xff]  }
  0xc5   : > { %2228 = vmatpush2.bf16.msra.mxu0 %v3159_v4  ;;  %v3255_v4 = vld [vmem:[%s4273_s1 + $0x6a0] ss:$8 sps:$4 sm:$0xff]  }
  0xc6   : > { %2229 = vmatprep.subr.bf16.mxu0 %v3167_v5  ;;  %2271 = vmatpush2.bf16.msra.mxu1 %v3162_v6  ;;  %v3263_v5 = vld [vmem:[%s4273_s1 + $0x694] ss:$8 sps:$4 sm:$0xff]   ;;  %v3258_v6 = vld [vmem:[%s4273_s1 + $0x7a0] ss:$8 sps:$4 sm:$0xff]  }
  0xc7   : > { %2272 = vmatprep.subr.bf16.mxu1 %v3170_v8  ;;  %v3261_v8 = vld [vmem:[%s4273_s1 + $0x690] ss:$8 sps:$4 sm:$0xff]  }
  0xc9   : > { %2230 = vmatpush2.bf16.msra.mxu0 %v3165_v7  ;;  %v3266_v7 = vld [vmem:[%s4273_s1 + $0x794] ss:$8 sps:$4 sm:$0xff]  }
  0xca   : > { %2285 = vmatprep.subr.bf16.mxu0 %v3176_v10  ;;  %2273 = vmatpush2.bf16.msra.mxu1 %v3168_v9  ;;  %v3269_v9 = vld [vmem:[%s4273_s1 + $0x684] ss:$8 sps:$4 sm:$0xff]   ;;  %v3264_v10 = vld [vmem:[%s4273_s1 + $0x790] ss:$8 sps:$4 sm:$0xff]  }
  0xcb   : > { %2328 = vmatprep.subr.bf16.mxu1 %v3182_v14  ;;  %v3270_v14 = vld [vmem:[%s4273_s1 + $0x780] ss:$8 sps:$4 sm:$0xff]  }
  0xcc   : > { %2232 = vmatmul.mubr.bf16.vlgmr.msra.gmra.mxu0 %v3171_v11  ;;  %v3272_v11 = vld [vmem:[%s4273_s1 + $0x784] ss:$8 sps:$4 sm:$0xff]  }
  0xcd   : > { %2286 = vmatpush1.bf16.msra.mxu0 %v3174_v12  ;;  %2317 = vmatprep.mubr.bf16.mxu0 %v3275_v15  ;;  %v3267_v12 = vld [vmem:[%s4273_s1 + $0x680] ss:$8 sps:$4 sm:$0xff]   ;;  %v3273_v15 = vld [vmem:[%s3510_s13 + $0x30] ss:$72 sps:$4 sm:$0xff]  }
  0xce   : > { %2275 = vmatmul.mubr.bf16.vlgmr.msra.gmra.mxu1 %v3177_v13  ;;  %2287 = vmatprep.subr.bf16.mxu0 %v3185_v16  ;;  %v3278_v13 = vld [vmem:[%s4273_s1 + $0x874] ss:$8 sps:$4 sm:$0xff]   ;;  %v3276_v16 = vld [vmem:[%s4273_s1 + $0x870] ss:$8 sps:$4 sm:$0xff]  }
  0xcf   : > { %2329 = vmatpush1.bf16.msra.mxu1 %v3180_v17  ;;  %2360 = vmatprep.mubr.bf16.mxu1 %v3281_v18  ;;  %v3329_v17 = vld [vmem:[%s3510_s13 + $0x44] ss:$72 sps:$4 sm:$0xff]   ;;  %v3279_v18 = vld [vmem:[%s3510_s13 + $0x38] ss:$72 sps:$4 sm:$0xff]  }
  0xd0   : > { %2330 = vmatprep.subr.bf16.mxu1 %v3188_v19  ;;  %v3284_v19 = vld [vmem:[%s4273_s1 + $0x864] ss:$8 sps:$4 sm:$0xff]  }
  0xd1   : > { %2288 = vmatpush1.bf16.msra.mxu0 %v3183_v20  ;;  %v3282_v20 = vld [vmem:[%s4273_s1 + $0x860] ss:$8 sps:$4 sm:$0xff]  }
  0xd2   : > { %2289 = vmatprep.subr.bf16.mxu0 %v3191_v21  ;;  %v3287_v21 = vld [vmem:[%s4273_s1 + $0x854] ss:$8 sps:$4 sm:$0xff]  }
  0xd3   : > { %2331 = vmatpush1.bf16.msra.mxu1 %v3186_v22  ;;  %v3285_v22 = vld [vmem:[%s4273_s1 + $0x850] ss:$8 sps:$4 sm:$0xff]  }
  0xd4   : > { %2332 = vmatprep.subr.bf16.mxu1 %v3194_v23  ;;  %v3290_v23 = vld [vmem:[%s4273_s1 + $0x844] ss:$8 sps:$4 sm:$0xff]  }
  0xd5   : > { %2290 = vmatpush1.bf16.msra.mxu0 %v3189_v24  ;;  %v3288_v24 = vld [vmem:[%s4273_s1 + $0x840] ss:$8 sps:$4 sm:$0xff]  }
  0xd6   : > { %2291 = vmatprep.subr.bf16.mxu0 %v3197_v25  ;;  %v3293_v25 = vld [vmem:[%s4273_s1 + $0x834] ss:$8 sps:$4 sm:$0xff]  }
  0xd7   : > { %2333 = vmatpush1.bf16.msra.mxu1 %v3192_v26  ;;  %v3291_v26 = vld [vmem:[%s4273_s1 + $0x830] ss:$8 sps:$4 sm:$0xff]  }
  0xd8   : > { %2334 = vmatprep.subr.bf16.mxu1 %v3200_v27  ;;  %v3296_v27 = vld [vmem:[%s4273_s1 + $0x824] ss:$8 sps:$4 sm:$0xff]  }
  0xd9   : > { %2292 = vmatpush1.bf16.msra.mxu0 %v3195_v28  ;;  %v3294_v28 = vld [vmem:[%s4273_s1 + $0x820] ss:$8 sps:$4 sm:$0xff]  }
  0xda   : > { %2293 = vmatprep.subr.bf16.mxu0 %v3203_v29  ;;  %v3299_v29 = vld [vmem:[%s4273_s1 + $0x814] ss:$8 sps:$4 sm:$0xff]  }
  0xdb   : > { %2335 = vmatpush1.bf16.msra.mxu1 %v3198_v30  ;;  %v3297_v30 = vld [vmem:[%s4273_s1 + $0x810] ss:$8 sps:$4 sm:$0xff]  }
  0xdc   : > { %2336 = vmatprep.subr.bf16.mxu1 %v3206_v31  ;;  %v3302_v31 = vld [vmem:[%s4273_s1 + $0x804] ss:$8 sps:$4 sm:$0xff]  }
  0xdd   : > { %2294 = vmatpush1.bf16.msra.mxu0 %v3201_v32  ;;  %v3300_v32 = vld [vmem:[%s4273_s1 + $0x800] ss:$8 sps:$4 sm:$0xff]  }
  0xde   : > { %2295 = vmatprep.subr.bf16.mxu0 %v3209_v33  ;;  %v3305_v33 = vld [vmem:[%s4273_s1 + $0x8f4] ss:$8 sps:$4 sm:$0xff]  }
  0xdf   : > { %2337 = vmatpush1.bf16.msra.mxu1 %v3204_v34  ;;  %v3303_v34 = vld [vmem:[%s4273_s1 + $0x8f0] ss:$8 sps:$4 sm:$0xff]  }
  0xe0   : > { %2338 = vmatprep.subr.bf16.mxu1 %v3212_v35  ;;  %v3308_v35 = vld [vmem:[%s4273_s1 + $0x8e4] ss:$8 sps:$4 sm:$0xff]  }
  0xe1   : > { %2296 = vmatpush1.bf16.msra.mxu0 %v3207_v36  ;;  %v3306_v36 = vld [vmem:[%s4273_s1 + $0x8e0] ss:$8 sps:$4 sm:$0xff]  }
  0xe2   : > { %2297 = vmatprep.subr.bf16.mxu0 %v3215_v37  ;;  %v3311_v37 = vld [vmem:[%s4273_s1 + $0x8d4] ss:$8 sps:$4 sm:$0xff]  }
  0xe3   : > { %2339 = vmatpush1.bf16.msra.mxu1 %v3210_v38  ;;  %v3309_v38 = vld [vmem:[%s4273_s1 + $0x8d0] ss:$8 sps:$4 sm:$0xff]  }
  0xe4   : > { %2340 = vmatprep.subr.bf16.mxu1 %v3218_v39  ;;  %v3314_v39 = vld [vmem:[%s4273_s1 + $0x8c4] ss:$8 sps:$4 sm:$0xff]  }
  0xe5   : > { %2298 = vmatpush1.bf16.msra.mxu0 %v3213_v40  ;;  %v3312_v40 = vld [vmem:[%s4273_s1 + $0x8c0] ss:$8 sps:$4 sm:$0xff]  }
  0xe6   : > { %2299 = vmatprep.subr.bf16.mxu0 %v3221_v41  ;;  %v3317_v41 = vld [vmem:[%s4273_s1 + $0x8b4] ss:$8 sps:$4 sm:$0xff]  }
  0xe7   : > { %2341 = vmatpush1.bf16.msra.mxu1 %v3216_v42  ;;  %v3315_v42 = vld [vmem:[%s4273_s1 + $0x8b0] ss:$8 sps:$4 sm:$0xff]  }
  0xe8   : > { %2342 = vmatprep.subr.bf16.mxu1 %v3224_v43  ;;  %v3320_v43 = vld [vmem:[%s4273_s1 + $0x8a4] ss:$8 sps:$4 sm:$0xff]  }
  0xe9   : > { %2300 = vmatpush1.bf16.msra.mxu0 %v3219_v44  ;;  %v3318_v44 = vld [vmem:[%s4273_s1 + $0x8a0] ss:$8 sps:$4 sm:$0xff]  }
  0xea   : > { %2301 = vmatprep.subr.bf16.mxu0 %v3227_v45  ;;  %v3323_v45 = vld [vmem:[%s4273_s1 + $0x894] ss:$8 sps:$4 sm:$0xff]  }
  0xeb   : > { %2343 = vmatpush1.bf16.msra.mxu1 %v3222_v46  ;;  %v3321_v46 = vld [vmem:[%s4273_s1 + $0x890] ss:$8 sps:$4 sm:$0xff]  }
  0xec   : > { %2344 = vmatprep.subr.bf16.mxu1 %v3230_v47  ;;  %v3326_v47 = vld [vmem:[%s4273_s1 + $0x884] ss:$8 sps:$4 sm:$0xff]  }
  0xed   : > { %2302 = vmatpush2.bf16.msra.mxu0 %v3225_v48  ;;  %v3324_v48 = vld [vmem:[%s4273_s1 + $0x880] ss:$8 sps:$4 sm:$0xff]  }
  0xee   : > { %2303 = vmatprep.subr.bf16.mxu0 %v3233_v49  ;;  %v3327_v49 = vld [vmem:[%s3510_s13 + $0x40] ss:$72 sps:$4 sm:$0xff]  }
  0xef   : > { %2345 = vmatpush2.bf16.msra.mxu1 %v3228_v50 }
  0xf0   : > { %2346 = vmatprep.subr.bf16.mxu1 %v3236_v51 }
  0xf1   : > { %2304 = vmatpush2.bf16.msra.mxu0 %v3231_v52 }
  0xf2   : > { %2305 = vmatprep.subr.bf16.mxu0 %v3239_v53 }
  0xf3   : > { %2347 = vmatpush2.bf16.msra.mxu1 %v3234_v54 }
  0xf4   : > { %2348 = vmatprep.subr.bf16.mxu1 %v3242_v55 }
  0xf5   : > { %2306 = vmatpush2.bf16.msra.mxu0 %v3237_v56 }
  0xf6   : > { %2307 = vmatprep.subr.bf16.mxu0 %v3245_v57 }
  0xf7   : > { %2349 = vmatpush2.bf16.msra.mxu1 %v3240_v58 }
  0xf8   : > { %2350 = vmatprep.subr.bf16.mxu1 %v3248_v59 }
  0xf9   : > { %2308 = vmatpush2.bf16.msra.mxu0 %v3243_v60 }
  0xfa   : > { %2309 = vmatprep.subr.bf16.mxu0 %v3251_v61  ;;  %v487_v61 = vlaneseq }
  0xfb   : > { %2351 = vmatpush2.bf16.msra.mxu1 %v3246_v62 }
  0xfc   : > { %2352 = vmatprep.subr.bf16.mxu1 %v3254_v63 }
  0xfd   : > { %2310 = vmatpush2.bf16.msra.mxu0 %v3249_v0  ;;  %v488_v0 = vshrl.u32 %v487_v61, 7 }
  0xfe   : > { %2311 = vmatprep.subr.bf16.mxu0 %v3257_v1 }
  0xff   : > { %2353 = vmatpush2.bf16.msra.mxu1 %v3252_v2 }
 0x100   : > { %2354 = vmatprep.subr.bf16.mxu1 %v3260_v3 }
 0x101   : > { %2312 = vmatpush2.bf16.msra.mxu0 %v3255_v4  ;;  %v489_v4 = vsub.s32 0, %v488_v0 }
 0x102   : > { %2313 = vmatprep.subr.bf16.mxu0 %v3263_v5  ;;  %v485_v5 = vld [vmem:[%s4274_s2] sm:$0x3] }
 0x103   : > { %2355 = vmatpush2.bf16.msra.mxu1 %v3258_v6 }
 0x104   : > { %2356 = vmatprep.subr.bf16.mxu1 %v3266_v7  ;;  %v493_v7 = vsub.s32 1, %v488_v0 }
 0x105   : > { %2314 = vmatpush2.bf16.msra.mxu0 %v3261_v8 }
 0x106   : > { %2315 = vmatprep.subr.bf16.mxu0 %v3269_v9 }
 0x107   : > { %2357 = vmatpush2.bf16.msra.mxu1 %v3264_v10  ;;  %v490_v10 = vrot.slane %v485_v5, %v489_v4 }
 0x108   : > { %2358 = vmatprep.subr.bf16.mxu1 %v3272_v11  ;;  %v494_v11 = vrot.slane %v485_v5, %v493_v7 }
 0x109   : > { %2316 = vmatpush2.bf16.msra.mxu0 %v3267_v12 }
 0x10a   : > { %2371 = vmatprep.subr.bf16.mxu0 %v3278_v13 }
 0x10b   : > { %2359 = vmatpush2.bf16.msra.mxu1 %v3270_v14 }
 0x10c   : > { %2318 = vmatmul.mubr.bf16.vlgmr.msra.gmra.mxu0 %v3273_v15  ;;  %v2061_v50 = vpop.f32.mrf.mxu0 }
 0x10d   : > { %2372 = vmatpush1.bf16.msra.mxu0 %v3276_v16  ;;  %2403 = vmatprep.mubr.bf16.mxu0 %v3329_v17  ;;  %v2104_v52 = vpop.f32.mrf.mxu1  ;;  %v2062_v14 = vadd.f32 %v2061_v50, %v490_v10 }
 0x10e   : > { %2361 = vmatmul.mubr.bf16.vlgmr.msra.gmra.mxu1 %v3279_v18  ;;  %2373 = vmatprep.subr.bf16.mxu0 %v3284_v19  ;;  %v2063_v51 = vpop.f32.mrf.mxu0 }
 0x10f   : > { %v2106_v54 = vpop.f32.mrf.mxu1  ;;  %v2064_v16 = vadd.f32 %v2063_v51, %v494_v11 }
 0x110   : > { %v2065_v53 = vpop.f32.mrf.mxu0 }
 0x111   : > { %2374 = vmatpush1.bf16.msra.mxu0 %v3282_v20  ;;  %v2108_v56 = vpop.f32.mrf.mxu1  ;;  %v2066_v15 = vadd.f32 %v2065_v53, %v490_v10  ;;  %v2105_v20 = vadd.f32 %v2104_v52, %v2062_v14 }
 0x112   : > { %2375 = vmatprep.subr.bf16.mxu0 %v3287_v21  ;;  %v2067_v55 = vpop.f32.mrf.mxu0 }
 0x113   : > { %v2110_v58 = vpop.f32.mrf.mxu1  ;;  %v2068_v17 = vadd.f32 %v2067_v55, %v494_v11  ;;  %v2109_v21 = vadd.f32 %v2108_v56, %v2066_v15 }
 0x115   : > { %2376 = vmatpush1.bf16.msra.mxu0 %v3285_v22 }
 0x116   : > { %2377 = vmatprep.subr.bf16.mxu0 %v3290_v23  ;;  %v2107_v23 = vadd.f32 %v2106_v54, %v2064_v16 }
 0x119   : > { %2378 = vmatpush1.bf16.msra.mxu0 %v3288_v24  ;;  %v2111_v24 = vadd.f32 %v2110_v58, %v2068_v17 }
 0x11a   : > { %2379 = vmatprep.subr.bf16.mxu0 %v3293_v25 }
 0x11d   : > { %2380 = vmatpush1.bf16.msra.mxu0 %v3291_v26 }
 0x11e   : > { %2381 = vmatprep.subr.bf16.mxu0 %v3296_v27 }
 0x121   : > { %2382 = vmatpush1.bf16.msra.mxu0 %v3294_v28 }
 0x122   : > { %2383 = vmatprep.subr.bf16.mxu0 %v3299_v29 }
 0x125   : > { %2384 = vmatpush1.bf16.msra.mxu0 %v3297_v30 }
 0x126   : > { %2385 = vmatprep.subr.bf16.mxu0 %v3302_v31 }
 0x129   : > { %2386 = vmatpush1.bf16.msra.mxu0 %v3300_v32 }
 0x12a   : > { %2387 = vmatprep.subr.bf16.mxu0 %v3305_v33 }
 0x12d   : > { %2388 = vmatpush2.bf16.msra.mxu0 %v3303_v34 }
 0x12e   : > { %2389 = vmatprep.subr.bf16.mxu0 %v3308_v35 }
 0x131   : > { %2390 = vmatpush2.bf16.msra.mxu0 %v3306_v36 }
 0x132   : > { %2391 = vmatprep.subr.bf16.mxu0 %v3311_v37 }
 0x135   : > { %2392 = vmatpush2.bf16.msra.mxu0 %v3309_v38 }
 0x136   : > { %2393 = vmatprep.subr.bf16.mxu0 %v3314_v39 }
 0x139   : > { %2394 = vmatpush2.bf16.msra.mxu0 %v3312_v40 }
 0x13a   : > { %2395 = vmatprep.subr.bf16.mxu0 %v3317_v41 }
 0x13d   : > { %2396 = vmatpush2.bf16.msra.mxu0 %v3315_v42 }
 0x13e   : > { %2397 = vmatprep.subr.bf16.mxu0 %v3320_v43 }
 0x141   : > { %2398 = vmatpush2.bf16.msra.mxu0 %v3318_v44 }
 0x142   : > { %2399 = vmatprep.subr.bf16.mxu0 %v3323_v45 }
 0x145   : > { %2400 = vmatpush2.bf16.msra.mxu0 %v3321_v46 }
 0x146   : > { %2401 = vmatprep.subr.bf16.mxu0 %v3326_v47 }
 0x149   : > { %2402 = vmatpush2.bf16.msra.mxu0 %v3324_v48 }
 0x14c   : > { %2404 = vmatmul.mubr.bf16.vlgmr.msra.gmra.mxu0 %v3327_v49  ;;  %v2147_v57 = vpop.f32.mrf.mxu0 }
 0x14d   : > { %v2190_v60 = vpop.f32.mrf.mxu1  ;;  %v2148_v25 = vadd.f32 %v2147_v57, %v2105_v20 }
 0x14e   : > { %v2149_v59 = vpop.f32.mrf.mxu0 }
 0x14f   : > { %v2192_v63 = vpop.f32.mrf.mxu1  ;;  %v2150_v28 = vadd.f32 %v2149_v59, %v2107_v23  ;;  %v2191_v32 = vadd.f32 %v2190_v60, %v2148_v25 }
 0x150   : > { %v2151_v62 = vpop.f32.mrf.mxu0 }
 0x151   : > { %v2194_v2 = vpop.f32.mrf.mxu1  ;;  %v2152_v26 = vadd.f32 %v2151_v62, %v2109_v21  ;;  %v2193_v34 = vadd.f32 %v2192_v63, %v2150_v28 }
 0x152   : > { %v2153_v1 = vpop.f32.mrf.mxu0 }
 0x153   : > { %v2196_v6 = vpop.f32.mrf.mxu1  ;;  %v2154_v29 = vadd.f32 %v2153_v1, %v2111_v24  ;;  %v2195_v33 = vadd.f32 %v2194_v2, %v2152_v26 }
 0x155   : > { %v2197_v35 = vadd.f32 %v2196_v6, %v2154_v29 }
 0x18c   : > { %v2233_v3 = vpop.f32.mrf.mxu0 }
 0x18d   : > { %v2234_v36 = vadd.f32 %v2233_v3, %v2191_v32 }
 0x18e   : > { %v2235_v8 = vpop.f32.mrf.mxu0  ;;  %v2276_v9 = vpop.f32.mrf.mxu1 }
 0x18f   : > { %v2236_v40 = vadd.f32 %v2235_v8, %v2193_v34  ;;  %v2277_v42 = vadd.f32 %v2276_v9, %v2234_v36 }
 0x190   : > { %v2237_v12 = vpop.f32.mrf.mxu0  ;;  %v2278_v13 = vpop.f32.mrf.mxu1 }
 0x191   : > { %v2238_v37 = vadd.f32 %v2237_v12, %v2195_v33  ;;  %v2279_v46 = vadd.f32 %v2278_v13, %v2236_v40 }
 0x192   : > { %v2239_v18 = vpop.f32.mrf.mxu0  ;;  %v2280_v19 = vpop.f32.mrf.mxu1 }
 0x193   : > { %v2240_v41 = vadd.f32 %v2239_v18, %v2197_v35  ;;  %v2281_v43 = vadd.f32 %v2280_v19, %v2238_v37 }
 0x194   : > { %v2282_v27 = vpop.f32.mrf.mxu1 }
 0x195   : > { %v2283_v47 = vadd.f32 %v2282_v27, %v2240_v41 }
 0x1cc   : > { %v2319_v22 = vpop.f32.mrf.mxu0 }
 0x1cd   : > { %v2320_v48 = vadd.f32 %v2319_v22, %v2277_v42 }
 0x1ce   : > { %v2321_v30 = vpop.f32.mrf.mxu0  ;;  %v2362_v31 = vpop.f32.mrf.mxu1 }
 0x1cf   : > { %v2322_v51 = vadd.f32 %v2321_v30, %v2279_v46  ;;  %v2363_v55 = vadd.f32 %v2362_v31, %v2320_v48 }
 0x1d0   : > { %v2323_v38 = vpop.f32.mrf.mxu0  ;;  %v2364_v39 = vpop.f32.mrf.mxu1 }
 0x1d1   : > { %v2324_v49 = vadd.f32 %v2323_v38, %v2281_v43  ;;  %v2365_v58 = vadd.f32 %v2364_v39, %v2322_v51 }
 0x1d2   : > { %v2325_v44 = vpop.f32.mrf.mxu0  ;;  %v2366_v45 = vpop.f32.mrf.mxu1 }
 0x1d3   : > { %v2326_v52 = vadd.f32 %v2325_v44, %v2283_v47  ;;  %v2367_v56 = vadd.f32 %v2366_v45, %v2324_v49 }
 0x1d4   : > { %v2368_v53 = vpop.f32.mrf.mxu1 }
 0x1d5   : > { %v2369_v59 = vadd.f32 %v2368_v53, %v2326_v52 }
 0x20c   : > { %v2405_v50 = vpop.f32.mrf.mxu0 }
 0x20d   : > { %v2406_v60 = vadd.f32 %v2405_v50, %v2363_v55 }
 0x20e   : > { %v2407_v54 = vpop.f32.mrf.mxu0 }
 0x20f   : > { %v2408_v63 = vadd.f32 %v2407_v54, %v2365_v58 }
 0x210   : > { %v2409_v57 = vpop.f32.mrf.mxu0 }
 0x211   : > { %v2410_v61 = vadd.f32 %v2409_v57, %v2367_v56 }
 0x212   : > { %v2411_v62 = vpop.f32.mrf.mxu0 }
 0x213   : > { %v2414_v0 = vadd.f32 %v2410_v61, %v2406_v60  ;;  %v2412_v1 = vadd.f32 %v2411_v62, %v2369_v59 }
 0x215   : > { %v2415_v2 = vrot.slane %v2414_v0, 4  ;;  %v2421_v3 = vadd.f32 %v2412_v1, %v2408_v63 }
 0x217   : > { %v2416_v4 = vadd.f32 %v2415_v2, %v2414_v0  ;;  %v2422_v5 = vrot.slane %v2421_v3, 4 }
 0x219   : > { %v2417_v6 = vrot.slane %v2416_v4, 2  ;;  %v2423_v7 = vadd.f32 %v2422_v5, %v2421_v3 }
 0x21b   : > { %v2418_v8 = vadd.f32 %v2417_v6, %v2416_v4  ;;  %v2424_v9 = vrot.slane %v2423_v7, 2 }
 0x21d   : > { %v2419_v10 = vrot.slane %v2418_v8, 1  ;;  %v2425_v11 = vadd.f32 %v2424_v9, %v2423_v7 }
 0x21f   : > { %v2420_v12 = vadd.f32 %v2419_v10, %v2418_v8  ;;  %v2426_v13 = vrot.slane %v2425_v11, 1 }
 0x221   : > { %v2429_v14 = vmul.f32 0.0625, %v2420_v12  ;;  %v2427_v15 = vadd.f32 %v2426_v13, %v2425_v11 }
 0x223   : > { %v2431_v16 = vsub.f32 %v2406_v60, %v2429_v14  ;;  %v2433_v17 = vsub.f32 %v2410_v61, %v2429_v14  ;;  %v2430_v18 = vmul.f32 0.0625, %v2427_v15 }
 0x225   : > { %v2435_v19 = vmul.f32 %v2431_v16, %v2431_v16  ;;  %v2437_v20 = vmul.f32 %v2433_v17, %v2433_v17  ;;  %v2432_v21 = vsub.f32 %v2408_v63, %v2430_v18  ;;  %v2434_v22 = vsub.f32 %v2412_v1, %v2430_v18 }
 0x227   : > { %v2439_v23 = vadd.f32 %v2437_v20, %v2435_v19  ;;  %v2436_v24 = vmul.f32 %v2432_v21, %v2432_v21  ;;  %v2438_v25 = vmul.f32 %v2434_v22, %v2434_v22 }
 0x229   : > { %v2440_v26 = vrot.slane %v2439_v23, 4  ;;  %v2446_v27 = vadd.f32 %v2438_v25, %v2436_v24 }
 0x22b   : > { %v2441_v28 = vadd.f32 %v2440_v26, %v2439_v23  ;;  %v2447_v29 = vrot.slane %v2446_v27, 4 }
 0x22d   : > { %v2442_v30 = vrot.slane %v2441_v28, 2  ;;  %v2448_v31 = vadd.f32 %v2447_v29, %v2446_v27 }
 0x22f   : > { %v2443_v32 = vadd.f32 %v2442_v30, %v2441_v28  ;;  %v2449_v33 = vrot.slane %v2448_v31, 2 }
 0x231   : > { %v2444_v34 = vrot.slane %v2443_v32, 1  ;;  %v2450_v35 = vadd.f32 %v2449_v33, %v2448_v31 }
 0x233   : > { %v2445_v36 = vadd.f32 %v2444_v34, %v2443_v32  ;;  %v2451_v37 = vrot.slane %v2450_v35, 1 }
 0x235   : > { %v2453_v38 = vmul.f32 0.0625, %v2445_v36  ;;  %v2452_v39 = vadd.f32 %v2451_v37, %v2450_v35 }
 0x237   : > { %v2455_v40 = vadd.f32 1e-05, %v2453_v38  ;;  %v2454_v41 = vmul.f32 0.0625, %v2452_v39 }
 0x239   : > { %3330 = vrsqrt.f32 %v2455_v40  ;;  %v2456_v42 = vadd.f32 1e-05, %v2454_v41 }
 0x23b   : > { %3332 = vrsqrt.f32 %v2456_v42 }
 0x246   : > { %v3331_v43 = vpop.eup %3330 }
 0x247   : > { %v2459_v44 = vmul.f32 %v3331_v43, %v2431_v16  ;;  %v2461_v45 = vmul.f32 %v3331_v43, %v2433_v17 }
 0x248   : > { %v3333_v46 = vpop.eup %3332 }
 0x249   : > { %v2460_v47 = vmul.f32 %v3333_v46, %v2432_v21  ;;  %v2462_v48 = vmul.f32 %v3333_v46, %v2434_v22  ;;  %v2463_v49 = vmax.f32 %v2459_v44, 0.0  ;;  %v2465_v50 = vmax.f32 %v2461_v45, 0.0 }
 0x24b   : > { %v2464_v51 = vmax.f32 %v2460_v47, 0.0  ;;  %v2466_v52 = vmax.f32 %v2462_v48, 0.0 }
 0x24d   : > { %v2860_v53 = vpack.c.bf16 %v2464_v51, %v2463_v49  ;;  %v2861_v54 = vpack.c.bf16 %v2466_v52, %v2465_v50 }
 0x24f   : > { %2479 = vst [vmem:[%s177_s18] sm:$0xff] %v2860_v53  ;;  %2480 = vst [vmem:[%s177_s18 + $0x8] sm:$0xff] %v2861_v54 }
 0x250 PF: > { %s13_s12 = sadd.s32 1, %s3340_s12  }
 0x251   : > { %p10_p4 = scmp.ge.s32.totalorder %s13_s12, 4  }
 0x253   :  { %12 = sbr.rel (!%p10_p4) target bundleno = 1 (0x1), region = 62 }

// kernel: generator_forward.17
= control target key start
LH: loop header
LB: loop body
LE: loop exit
PB: predicated region body
PF: predicated region fallthrough
CT: control target
= control target key end

     0   :  { %s3031_s12 = smov 0   ;;  %s3904_s0 = inlined_call_operand.vmem [shape: bf16[32,1024], index: 0, kind: input, shape index: {}]   ;;  %s3905_s1 = inlined_call_operand.vmem [shape: bf16[1024,512], index: 1, kind: input, shape index: {}]   ;;  %s3906_s2 = inlined_call_operand.vmem [shape: f32[1,512], index: 2, kind: input, shape index: {}]   ;;  %s3907_s3 = inlined_call_operand.vmem [shape: bf16[32,512], index: 3, kind: output, shape index: {}]  }
   0x1 LB: > { %s2322_s13 = sadd.s32 4294967295, %s3009_s12   ;;  %p2326_p0 = scmp.ge.s32.totalorder %s3009_s12, 1  ;;  %s3009_s12 = sphi %s3031_s12, %s13_s12  }
   0x2   : > { %p139_p1 = scmp.lt.s32.totalorder %s3009_s12, 3 }
   0x4   : > { %p140_p2 = pnand %p2326_p0, %p139_p1 }
   0x5   : > { %s2327_s24 = sshll.u32 (!%p140_p2), %s2322_s13, 1 }
   0x6   : > { %143 = sbr.rel (%p140_p2) target bundleno = 544 (0x220), region = 32  ;;  %p166_p3 = scmp.lt.s32.totalorder (!%p140_p2), %s2327_s24, 3 }
   0xb   : > { %v2617_v0 = vld [vmem:[%s3905_s1 + $0xe4] ss:$16 sps:$4 sm:$0xff]   ;;  %v2621_v2 = vld [vmem:[%s3905_s1 + $0xe0] ss:$16 sps:$4 sm:$0xff]   ;;  %s3909_s24 = smov (!%p166_p3, %s2327_s24), 3 }
   0xc   : > { %v2619_v1 = vld [vmem:[%s3905_s1 + $0x2e4] ss:$16 sps:$4 sm:$0xff]   ;;  %1785 = vmatprep.subr.bf16.mxu0 %v2617_v0  ;;  %v2622_v3 = vld [vmem:[%s3905_s1 + $0x2e0] ss:$16 sps:$4 sm:$0xff]   ;;  %s2603_s21 = sshll.u32 %s3909_s24, 5  ;;  %s2604_s8 = sshll.u32 %s3909_s24, 4 }
   0xd   : > { %1828 = vmatprep.subr.bf16.mxu1 %v2619_v1  ;;  %v2623_v4 = vld [vmem:[%s3905_s1 + $0xc4] ss:$16 sps:$4 sm:$0xff]   ;;  %1786 = vmatpush1.bf16.msra.mxu0 %v2621_v2  ;;  %v2627_v6 = vld [vmem:[%s3905_s1 + $0xc0] ss:$16 sps:$4 sm:$0xff]   ;;  %s3179_s4 = scalar_lea.vmem %s3904_s0, %s2603_s21  ;;  %s177_s11 = scalar_lea.vmem %s3907_s3, %s2604_s8 }
   0xe   : > { %1829 = vmatpush1.bf16.msra.mxu1 %v2622_v3  ;;  %v2625_v5 = vld [vmem:[%s3905_s1 + $0x2c4] ss:$16 sps:$4 sm:$0xff]   ;;  %1787 = vmatprep.subr.bf16.mxu0 %v2623_v4  ;;  %v2628_v7 = vld [vmem:[%s3905_s1 + $0x2c0] ss:$16 sps:$4 sm:$0xff]   ;;  %v180_v50 = vld [vmem:[%s3179_s4 + $0x8] sm:$0xff] }
   0xf   : > { %1830 = vmatprep.subr.bf16.mxu1 %v2625_v5  ;;  %v2629_v8 = vld [vmem:[%s3905_s1 + $0xa4] ss:$16 sps:$4 sm:$0xff]   ;;  %v2633_v10 = vld [vmem:[%s3905_s1 + $0xa0] ss:$16 sps:$4 sm:$0xff]   ;;  %v184_v51 = vld [vmem:[%s3179_s4 + $0x28] sm:$0xff] }
  0x10   : > { %v2631_v9 = vld [vmem:[%s3905_s1 + $0x2a4] ss:$16 sps:$4 sm:$0xff]   ;;  %v2634_v11 = vld [vmem:[%s3905_s1 + $0x2a0] ss:$16 sps:$4 sm:$0xff]   ;;  %v3205_v55 = vcombine.high %v180_v50, %v184_v51 }
  0x11   : > { %1788 = vmatpush1.bf16.msra.mxu0 %v2627_v6  ;;  %v2635_v12 = vld [vmem:[%s3905_s1 + $0x84] ss:$16 sps:$4 sm:$0xff]   ;;  %v2639_v14 = vld [vmem:[%s3905_s1 + $0x80] ss:$16 sps:$4 sm:$0xff]  }
  0x12   : > { %1831 = vmatpush1.bf16.msra.mxu1 %v2628_v7  ;;  %1789 = vmatprep.subr.bf16.mxu0 %v2629_v8  ;;  %v2637_v13 = vld [vmem:[%s3905_s1 + $0x284] ss:$16 sps:$4 sm:$0xff]   ;;  %v2640_v15 = vld [vmem:[%s3905_s1 + $0x280] ss:$16 sps:$4 sm:$0xff]  }
  0x13   : > { %1832 = vmatprep.subr.bf16.mxu1 %v2631_v9  ;;  %v2641_v16 = vld [vmem:[%s3905_s1 + $0x64] ss:$16 sps:$4 sm:$0xff]   ;;  %v2645_v18 = vld [vmem:[%s3905_s1 + $0x60] ss:$16 sps:$4 sm:$0xff]   ;;  %1860 = vmatprep.mubr.bf16.mxu1 %v3205_v55  ;;  %v3259_v9 = vcombine.low %v180_v50, %v184_v51 }
  0x14   : > { %v2643_v17 = vld [vmem:[%s3905_s1 + $0x264] ss:$16 sps:$4 sm:$0xff]   ;;  %v2646_v19 = vld [vmem:[%s3905_s1 + $0x260] ss:$16 sps:$4 sm:$0xff]  }
  0x15   : > { %1790 = vmatpush1.bf16.msra.mxu0 %v2633_v10  ;;  %v2647_v20 = vld [vmem:[%s3905_s1 + $0x44] ss:$16 sps:$4 sm:$0xff]   ;;  %v2651_v22 = vld [vmem:[%s3905_s1 + $0x40] ss:$16 sps:$4 sm:$0xff]  }
  0x16   : > { %1833 = vmatpush1.bf16.msra.mxu1 %v2634_v11  ;;  %1791 = vmatprep.subr.bf16.mxu0 %v2635_v12  ;;  %v2649_v21 = vld [vmem:[%s3905_s1 + $0x244] ss:$16 sps:$4 sm:$0xff]   ;;  %v2652_v23 = vld [vmem:[%s3905_s1 + $0x240] ss:$16 sps:$4 sm:$0xff]  }
  0x17   : > { %1834 = vmatprep.subr.bf16.mxu1 %v2637_v13  ;;  %v2653_v24 = vld [vmem:[%s3905_s1 + $0x24] ss:$16 sps:$4 sm:$0xff]   ;;  %v2657_v26 = vld [vmem:[%s3905_s1 + $0x20] ss:$16 sps:$4 sm:$0xff]  }
  0x18   : > { %v2655_v25 = vld [vmem:[%s3905_s1 + $0x224] ss:$16 sps:$4 sm:$0xff]   ;;  %v2658_v27 = vld [vmem:[%s3905_s1 + $0x220] ss:$16 sps:$4 sm:$0xff]  }
  0x19   : > { %1792 = vmatpush1.bf16.msra.mxu0 %v2639_v14  ;;  %v2659_v28 = vld [vmem:[%s3905_s1 + $0x4] ss:$16 sps:$4 sm:$0xff]   ;;  %v2663_v30 = vld [vmem:[%s3905_s1] ss:$16 sps:$4 sm:$0xff]  }
  0x1a   : > { %1835 = vmatpush1.bf16.msra.mxu1 %v2640_v15  ;;  %1793 = vmatprep.subr.bf16.mxu0 %v2641_v16  ;;  %v2661_v29 = vld [vmem:[%s3905_s1 + $0x204] ss:$16 sps:$4 sm:$0xff]   ;;  %v2664_v31 = vld [vmem:[%s3905_s1 + $0x200] ss:$16 sps:$4 sm:$0xff]  }
  0x1b   : > { %1836 = vmatprep.subr.bf16.mxu1 %v2643_v17  ;;  %v2665_v32 = vld [vmem:[%s3905_s1 + $0x1e4] ss:$16 sps:$4 sm:$0xff]   ;;  %v2669_v34 = vld [vmem:[%s3905_s1 + $0x1e0] ss:$16 sps:$4 sm:$0xff]  }
  0x1c   : > { %v2667_v33 = vld [vmem:[%s3905_s1 + $0x3e4] ss:$16 sps:$4 sm:$0xff]   ;;  %v2670_v35 = vld [vmem:[%s3905_s1 + $0x3e0] ss:$16 sps:$4 sm:$0xff]  }
  0x1d   : > { %1794 = vmatpush1.bf16.msra.mxu0 %v2645_v18  ;;  %v2671_v36 = vld [vmem:[%s3905_s1 + $0x1c4] ss:$16 sps:$4 sm:$0xff]   ;;  %v2675_v38 = vld [vmem:[%s3905_s1 + $0x1c0] ss:$16 sps:$4 sm:$0xff]  }
  0x1e   : > { %1837 = vmatpush1.bf16.msra.mxu1 %v2646_v19  ;;  %1795 = vmatprep.subr.bf16.mxu0 %v2647_v20  ;;  %v2673_v37 = vld [vmem:[%s3905_s1 + $0x3c4] ss:$16 sps:$4 sm:$0xff]   ;;  %v2676_v39 = vld [vmem:[%s3905_s1 + $0x3c0] ss:$16 sps:$4 sm:$0xff]  }
  0x1f   : > { %1838 = vmatprep.subr.bf16.mxu1 %v2649_v21  ;;  %v2677_v40 = vld [vmem:[%s3905_s1 + $0x1a4] ss:$16 sps:$4 sm:$0xff]   ;;  %v2681_v42 = vld [vmem:[%s3905_s1 + $0x1a0] ss:$16 sps:$4 sm:$0xff]  }
  0x20   : > { %v2679_v41 = vld [vmem:[%s3905_s1 + $0x3a4] ss:$16 sps:$4 sm:$0xff]   ;;  %v2682_v43 = vld [vmem:[%s3905_s1 + $0x3a0] ss:$16 sps:$4 sm:$0xff]  }
  0x21   : > { %1796 = vmatpush1.bf16.msra.mxu0 %v2651_v22  ;;  %v2683_v44 = vld [vmem:[%s3905_s1 + $0x184] ss:$16 sps:$4 sm:$0xff]   ;;  %v2687_v46 = vld [vmem:[%s3905_s1 + $0x180] ss:$16 sps:$4 sm:$0xff]  }
  0x22   : > { %1839 = vmatpush1.bf16.msra.mxu1 %v2652_v23  ;;  %1797 = vmatprep.subr.bf16.mxu0 %v2653_v24  ;;  %v2685_v45 = vld [vmem:[%s3905_s1 + $0x384] ss:$16 sps:$4 sm:$0xff]   ;;  %v2688_v47 = vld [vmem:[%s3905_s1 + $0x380] ss:$16 sps:$4 sm:$0xff]  }
  0x23   : > { %1840 = vmatprep.subr.bf16.mxu1 %v2655_v25  ;;  %v179_v48 = vld [vmem:[%s3179_s4] sm:$0xff] }
  0x24   : > { %v183_v49 = vld [vmem:[%s3179_s4 + $0x20] sm:$0xff] }
  0x25   : > { %1798 = vmatpush1.bf16.msra.mxu0 %v2657_v26  ;;  %v2689_v52 = vld [vmem:[%s3905_s1 + $0x164] ss:$16 sps:$4 sm:$0xff]   ;;  %v3200_v53 = vcombine.high %v179_v48, %v183_v49  ;;  %v2693_v56 = vld [vmem:[%s3905_s1 + $0x160] ss:$16 sps:$4 sm:$0xff]   ;;  %v3257_v8 = vcombine.low %v179_v48, %v183_v49 }
  0x26   : > { %1841 = vmatpush1.bf16.msra.mxu1 %v2658_v27  ;;  %1799 = vmatprep.subr.bf16.mxu0 %v2659_v28  ;;  %v2691_v54 = vld [vmem:[%s3905_s1 + $0x364] ss:$16 sps:$4 sm:$0xff]   ;;  %v2694_v57 = vld [vmem:[%s3905_s1 + $0x360] ss:$16 sps:$4 sm:$0xff]  }
  0x27   : > { %1842 = vmatprep.subr.bf16.mxu1 %v2661_v29  ;;  %1817 = vmatprep.mubr.bf16.mxu0 %v3200_v53  ;;  %v2695_v58 = vld [vmem:[%s3905_s1 + $0x144] ss:$16 sps:$4 sm:$0xff]   ;;  %v2699_v60 = vld [vmem:[%s3905_s1 + $0x140] ss:$16 sps:$4 sm:$0xff]  }
  0x28   : > { %v2697_v59 = vld [vmem:[%s3905_s1 + $0x344] ss:$16 sps:$4 sm:$0xff]   ;;  %v2700_v61 = vld [vmem:[%s3905_s1 + $0x340] ss:$16 sps:$4 sm:$0xff]  }
  0x29   : > { %1800 = vmatpush1.bf16.msra.mxu0 %v2663_v30  ;;  %v2701_v62 = vld [vmem:[%s3905_s1 + $0x124] ss:$16 sps:$4 sm:$0xff]   ;;  %v2705_v0 = vld [vmem:[%s3905_s1 + $0x120] ss:$16 sps:$4 sm:$0xff]  }
  0x2a   : > { %1843 = vmatpush1.bf16.msra.mxu1 %v2664_v31  ;;  %1801 = vmatprep.subr.bf16.mxu0 %v2665_v32  ;;  %v2703_v63 = vld [vmem:[%s3905_s1 + $0x324] ss:$16 sps:$4 sm:$0xff]   ;;  %v2706_v1 = vld [vmem:[%s3905_s1 + $0x320] ss:$16 sps:$4 sm:$0xff]  }
  0x2b   : > { %1844 = vmatprep.subr.bf16.mxu1 %v2667_v33  ;;  %v2707_v2 = vld [vmem:[%s3905_s1 + $0x104] ss:$16 sps:$4 sm:$0xff]   ;;  %v2711_v4 = vld [vmem:[%s3905_s1 + $0x100] ss:$16 sps:$4 sm:$0xff]  }
  0x2c   : > { %v2709_v3 = vld [vmem:[%s3905_s1 + $0x304] ss:$16 sps:$4 sm:$0xff]   ;;  %v2712_v5 = vld [vmem:[%s3905_s1 + $0x300] ss:$16 sps:$4 sm:$0xff]  }
  0x2d   : > { %1802 = vmatpush2.bf16.msra.mxu0 %v2669_v34  ;;  %v2715_v6 = vld [vmem:[%s3905_s1 + $0x4e4] ss:$16 sps:$4 sm:$0xff]   ;;  %v2713_v10 = vld [vmem:[%s3905_s1 + $0x4e0] ss:$16 sps:$4 sm:$0xff]  }
  0x2e   : > { %1845 = vmatpush2.bf16.msra.mxu1 %v2670_v35  ;;  %1803 = vmatprep.subr.bf16.mxu0 %v2671_v36  ;;  %v2718_v7 = vld [vmem:[%s3905_s1 + $0x6e4] ss:$16 sps:$4 sm:$0xff]   ;;  %v2716_v11 = vld [vmem:[%s3905_s1 + $0x6e0] ss:$16 sps:$4 sm:$0xff]  }
  0x2f   : > { %1846 = vmatprep.subr.bf16.mxu1 %v2673_v37  ;;  %v2721_v12 = vld [vmem:[%s3905_s1 + $0x4c4] ss:$16 sps:$4 sm:$0xff]   ;;  %v2719_v14 = vld [vmem:[%s3905_s1 + $0x4c0] ss:$16 sps:$4 sm:$0xff]  }
  0x30   : > { %v2724_v13 = vld [vmem:[%s3905_s1 + $0x6c4] ss:$16 sps:$4 sm:$0xff]   ;;  %v2722_v15 = vld [vmem:[%s3905_s1 + $0x6c0] ss:$16 sps:$4 sm:$0xff]  }
  0x31   : > { %1804 = vmatpush2.bf16.msra.mxu0 %v2675_v38  ;;  %v2727_v16 = vld [vmem:[%s3905_s1 + $0x4a4] ss:$16 sps:$4 sm:$0xff]   ;;  %v2725_v18 = vld [vmem:[%s3905_s1 + $0x4a0] ss:$16 sps:$4 sm:$0xff]   ;;  %v3348_v38 = vld [vmem:[%s3179_s4 + $0x18] sm:$0xff] }
  0x32   : > { %1847 = vmatpush2.bf16.msra.mxu1 %v2676_v39  ;;  %1805 = vmatprep.subr.bf16.mxu0 %v2677_v40  ;;  %v2730_v17 = vld [vmem:[%s3905_s1 + $0x6a4] ss:$16 sps:$4 sm:$0xff]   ;;  %v2728_v19 = vld [vmem:[%s3905_s1 + $0x6a0] ss:$16 sps:$4 sm:$0xff]   ;;  %v3351_v39 = vld [vmem:[%s3179_s4 + $0x38] sm:$0xff] }
  0x33   : > { %1848 = vmatprep.subr.bf16.mxu1 %v2679_v41  ;;  %v2733_v20 = vld [vmem:[%s3905_s1 + $0x484] ss:$16 sps:$4 sm:$0xff]   ;;  %v2731_v22 = vld [vmem:[%s3905_s1 + $0x480] ss:$16 sps:$4 sm:$0xff]  }
  0x34   : > { %v2736_v21 = vld [vmem:[%s3905_s1 + $0x684] ss:$16 sps:$4 sm:$0xff]   ;;  %v2734_v23 = vld [vmem:[%s3905_s1 + $0x680] ss:$16 sps:$4 sm:$0xff]  }
  0x35   : > { %1806 = vmatpush2.bf16.msra.mxu0 %v2681_v42  ;;  %v2739_v24 = vld [vmem:[%s3905_s1 + $0x464] ss:$16 sps:$4 sm:$0xff]   ;;  %v2737_v26 = vld [vmem:[%s3905_s1 + $0x460] ss:$16 sps:$4 sm:$0xff]  }
  0x36   : > { %1849 = vmatpush2.bf16.msra.mxu1 %v2682_v43  ;;  %1807 = vmatprep.subr.bf16.mxu0 %v2683_v44  ;;  %v2742_v25 = vld [vmem:[%s3905_s1 + $0x664] ss:$16 sps:$4 sm:$0xff]   ;;  %v2740_v27 = vld [vmem:[%s3905_s1 + $0x660] ss:$16 sps:$4 sm:$0xff]   ;;  %v3365_v43 = vcombine.high %v3348_v38, %v3351_v39 }
  0x37   : > { %1850 = vmatprep.subr.bf16.mxu1 %v2685_v45  ;;  %v2745_v28 = vld [vmem:[%s3905_s1 + $0x444] ss:$16 sps:$4 sm:$0xff]   ;;  %v2743_v30 = vld [vmem:[%s3905_s1 + $0x440] ss:$16 sps:$4 sm:$0xff]  }
  0x38   : > { %v2748_v29 = vld [vmem:[%s3905_s1 + $0x644] ss:$16 sps:$4 sm:$0xff]   ;;  %v2746_v31 = vld [vmem:[%s3905_s1 + $0x640] ss:$16 sps:$4 sm:$0xff]  }
  0x39   : > { %1808 = vmatpush2.bf16.msra.mxu0 %v2687_v46  ;;  %v2751_v32 = vld [vmem:[%s3905_s1 + $0x424] ss:$16 sps:$4 sm:$0xff]   ;;  %v2749_v34 = vld [vmem:[%s3905_s1 + $0x420] ss:$16 sps:$4 sm:$0xff]  }
  0x3a   : > { %1851 = vmatpush2.bf16.msra.mxu1 %v2688_v47  ;;  %1809 = vmatprep.subr.bf16.mxu0 %v2689_v52  ;;  %v2754_v33 = vld [vmem:[%s3905_s1 + $0x624] ss:$16 sps:$4 sm:$0xff]   ;;  %v2752_v35 = vld [vmem:[%s3905_s1 + $0x620] ss:$16 sps:$4 sm:$0xff]  }
  0x3b   : > { %1852 = vmatprep.subr.bf16.mxu1 %v2691_v54  ;;  %v3342_v36 = vld [vmem:[%s3179_s4 + $0x10] sm:$0xff] }
  0x3c   : > { %v3345_v37 = vld [vmem:[%s3179_s4 + $0x30] sm:$0xff] }
  0x3d   : > { %1810 = vmatpush2.bf16.msra.mxu0 %v2693_v56  ;;  %v2757_v40 = vld [vmem:[%s3905_s1 + $0x404] ss:$16 sps:$4 sm:$0xff]   ;;  %v3358_v41 = vcombine.high %v3342_v36, %v3345_v37  ;;  %v2755_v44 = vld [vmem:[%s3905_s1 + $0x400] ss:$16 sps:$4 sm:$0xff]  }
  0x3e   : > { %1853 = vmatpush2.bf16.msra.mxu1 %v2694_v57  ;;  %1811 = vmatprep.subr.bf16.mxu0 %v2695_v58  ;;  %v2760_v42 = vld [vmem:[%s3905_s1 + $0x604] ss:$16 sps:$4 sm:$0xff]   ;;  %v2758_v45 = vld [vmem:[%s3905_s1 + $0x600] ss:$16 sps:$4 sm:$0xff]  }
  0x3f   : > { %1854 = vmatprep.subr.bf16.mxu1 %v2697_v59  ;;  %v2763_v46 = vld [vmem:[%s3905_s1 + $0x5e4] ss:$16 sps:$4 sm:$0xff]   ;;  %v2761_v48 = vld [vmem:[%s3905_s1 + $0x5e0] ss:$16 sps:$4 sm:$0xff]  }
  0x40   : > { %v2766_v47 = vld [vmem:[%s3905_s1 + $0x7e4] ss:$16 sps:$4 sm:$0xff]   ;;  %v2764_v49 = vld [vmem:[%s3905_s1 + $0x7e0] ss:$16 sps:$4 sm:$0xff]  }
  0x41   : > { %1812 = vmatpush2.bf16.msra.mxu0 %v2699_v60  ;;  %v2769_v50 = vld [vmem:[%s3905_s1 + $0x5c4] ss:$16 sps:$4 sm:$0xff]   ;;  %v2767_v52 = vld [vmem:[%s3905_s1 + $0x5c0] ss:$16 sps:$4 sm:$0xff]  }
  0x42   : > { %1855 = vmatpush2.bf16.msra.mxu1 %v2700_v61  ;;  %1813 = vmatprep.subr.bf16.mxu0 %v2701_v62  ;;  %v2772_v51 = vld [vmem:[%s3905_s1 + $0x7c4] ss:$16 sps:$4 sm:$0xff]   ;;  %v2770_v54 = vld [vmem:[%s3905_s1 + $0x7c0] ss:$16 sps:$4 sm:$0xff]  }
  0x43   : > { %1856 = vmatprep.subr.bf16.mxu1 %v2703_v63  ;;  %v2775_v56 = vld [vmem:[%s3905_s1 + $0x5a4] ss:$16 sps:$4 sm:$0xff]   ;;  %v2773_v58 = vld [vmem:[%s3905_s1 + $0x5a0] ss:$16 sps:$4 sm:$0xff]  }
  0x44   : > { %v2778_v57 = vld [vmem:[%s3905_s1 + $0x7a4] ss:$16 sps:$4 sm:$0xff]   ;;  %v2776_v59 = vld [vmem:[%s3905_s1 + $0x7a0] ss:$16 sps:$4 sm:$0xff]  }
  0x45   : > { %1814 = vmatpush2.bf16.msra.mxu0 %v2705_v0  ;;  %v2781_v60 = vld [vmem:[%s3905_s1 + $0x584] ss:$16 sps:$4 sm:$0xff]   ;;  %v2779_v62 = vld [vmem:[%s3905_s1 + $0x580] ss:$16 sps:$4 sm:$0xff]  }
  0x46   : > { %1857 = vmatpush2.bf16.msra.mxu1 %v2706_v1  ;;  %1815 = vmatprep.subr.bf16.mxu0 %v2707_v2  ;;  %v2784_v61 = vld [vmem:[%s3905_s1 + $0x784] ss:$16 sps:$4 sm:$0xff]   ;;  %v2782_v63 = vld [vmem:[%s3905_s1 + $0x780] ss:$16 sps:$4 sm:$0xff]  }
  0x47   : > { %1858 = vmatprep.subr.bf16.mxu1 %v2709_v3  ;;  %v2787_v0 = vld [vmem:[%s3905_s1 + $0x564] ss:$16 sps:$4 sm:$0xff]   ;;  %v2785_v2 = vld [vmem:[%s3905_s1 + $0x560] ss:$16 sps:$4 sm:$0xff]  }
  0x48   : > { %v2790_v1 = vld [vmem:[%s3905_s1 + $0x764] ss:$16 sps:$4 sm:$0xff]   ;;  %v2788_v3 = vld [vmem:[%s3905_s1 + $0x760] ss:$16 sps:$4 sm:$0xff]  }
  0x49   : > { %1816 = vmatpush2.bf16.msra.mxu0 %v2711_v4  ;;  %v2793_v4 = vld [vmem:[%s3905_s1 + $0x544] ss:$16 sps:$4 sm:$0xff]  }
  0x4a   : > { %1859 = vmatpush2.bf16.msra.mxu1 %v2712_v5  ;;  %1871 = vmatprep.subr.bf16.mxu0 %v2715_v6  ;;  %v2796_v5 = vld [vmem:[%s3905_s1 + $0x744] ss:$16 sps:$4 sm:$0xff]   ;;  %v2791_v6 = vld [vmem:[%s3905_s1 + $0x540] ss:$16 sps:$4 sm:$0xff]  }
  0x4b   : > { %1914 = vmatprep.subr.bf16.mxu1 %v2718_v7  ;;  %v2794_v7 = vld [vmem:[%s3905_s1 + $0x740] ss:$16 sps:$4 sm:$0xff]  }
  0x4c   : > { %1818 = vmatmul.mubr.bf16.vlgmr.msra.gmra.mxu0 %v3257_v8 }
  0x4d   : > { %1861 = vmatmul.mubr.bf16.vlgmr.msra.gmra.mxu1 %v3259_v9  ;;  %1872 = vmatpush1.bf16.msra.mxu0 %v2713_v10  ;;  %v2799_v10 = vld [vmem:[%s3905_s1 + $0x524] ss:$16 sps:$4 sm:$0xff]  }
  0x4e   : > { %1915 = vmatpush1.bf16.msra.mxu1 %v2716_v11  ;;  %1873 = vmatprep.subr.bf16.mxu0 %v2721_v12  ;;  %v2802_v11 = vld [vmem:[%s3905_s1 + $0x724] ss:$16 sps:$4 sm:$0xff]   ;;  %v2797_v12 = vld [vmem:[%s3905_s1 + $0x520] ss:$16 sps:$4 sm:$0xff]  }
  0x4f   : > { %1916 = vmatprep.subr.bf16.mxu1 %v2724_v13  ;;  %1903 = vmatprep.mubr.bf16.mxu0 %v3358_v41  ;;  %v2800_v13 = vld [vmem:[%s3905_s1 + $0x720] ss:$16 sps:$4 sm:$0xff]  }
  0x50   : > { %1946 = vmatprep.mubr.bf16.mxu1 %v3365_v43 }
  0x51   : > { %1874 = vmatpush1.bf16.msra.mxu0 %v2719_v14  ;;  %v2805_v14 = vld [vmem:[%s3905_s1 + $0x504] ss:$16 sps:$4 sm:$0xff]  }
  0x52   : > { %1917 = vmatpush1.bf16.msra.mxu1 %v2722_v15  ;;  %1875 = vmatprep.subr.bf16.mxu0 %v2727_v16  ;;  %v2808_v15 = vld [vmem:[%s3905_s1 + $0x704] ss:$16 sps:$4 sm:$0xff]   ;;  %v2803_v16 = vld [vmem:[%s3905_s1 + $0x500] ss:$16 sps:$4 sm:$0xff]  }
  0x53   : > { %1918 = vmatprep.subr.bf16.mxu1 %v2730_v17  ;;  %v2806_v17 = vld [vmem:[%s3905_s1 + $0x700] ss:$16 sps:$4 sm:$0xff]  }
  0x55   : > { %1876 = vmatpush1.bf16.msra.mxu0 %v2725_v18  ;;  %v2811_v18 = vld [vmem:[%s3905_s1 + $0xec] ss:$16 sps:$4 sm:$0xff]  }
  0x56   : > { %1919 = vmatpush1.bf16.msra.mxu1 %v2728_v19  ;;  %1877 = vmatprep.subr.bf16.mxu0 %v2733_v20  ;;  %v2814_v19 = vld [vmem:[%s3905_s1 + $0x2ec] ss:$16 sps:$4 sm:$0xff]   ;;  %v3479_v20 = vcombine.low %v3342_v36, %v3345_v37  ;;  %v2833_v36 = vld [vmem:[%s3905_s1 + $0x68] ss:$16 sps:$4 sm:$0xff]  }
  0x57   : > { %1920 = vmatprep.subr.bf16.mxu1 %v2736_v21  ;;  %v3483_v21 = vcombine.low %v3348_v38, %v3351_v39  ;;  %v2836_v37 = vld [vmem:[%s3905_s1 + $0x268] ss:$16 sps:$4 sm:$0xff]   ;;  %v2841_v38 = vld [vmem:[%s3905_s1 + $0x4c] ss:$16 sps:$4 sm:$0xff]  }
  0x58   : > { %v2844_v39 = vld [vmem:[%s3905_s1 + $0x24c] ss:$16 sps:$4 sm:$0xff]  }
  0x59   : > { %1878 = vmatpush1.bf16.msra.mxu0 %v2731_v22  ;;  %v2809_v22 = vld [vmem:[%s3905_s1 + $0xe8] ss:$16 sps:$4 sm:$0xff]  }
  0x5a   : > { %1921 = vmatpush1.bf16.msra.mxu1 %v2734_v23  ;;  %1879 = vmatprep.subr.bf16.mxu0 %v2739_v24  ;;  %v2812_v23 = vld [vmem:[%s3905_s1 + $0x2e8] ss:$16 sps:$4 sm:$0xff]   ;;  %v2817_v24 = vld [vmem:[%s3905_s1 + $0xcc] ss:$16 sps:$4 sm:$0xff]  }
  0x5b   : > { %1922 = vmatprep.subr.bf16.mxu1 %v2742_v25  ;;  %v2820_v25 = vld [vmem:[%s3905_s1 + $0x2cc] ss:$16 sps:$4 sm:$0xff]  }
  0x5d   : > { %1880 = vmatpush1.bf16.msra.mxu0 %v2737_v26  ;;  %v2815_v26 = vld [vmem:[%s3905_s1 + $0xc8] ss:$16 sps:$4 sm:$0xff]  }
  0x5e   : > { %1923 = vmatpush1.bf16.msra.mxu1 %v2740_v27  ;;  %1881 = vmatprep.subr.bf16.mxu0 %v2745_v28  ;;  %v2818_v27 = vld [vmem:[%s3905_s1 + $0x2c8] ss:$16 sps:$4 sm:$0xff]   ;;  %v2823_v28 = vld [vmem:[%s3905_s1 + $0xac] ss:$16 sps:$4 sm:$0xff]  }
  0x5f   : > { %1924 = vmatprep.subr.bf16.mxu1 %v2748_v29  ;;  %v2826_v29 = vld [vmem:[%s3905_s1 + $0x2ac] ss:$16 sps:$4 sm:$0xff]  }
  0x61   : > { %1882 = vmatpush1.bf16.msra.mxu0 %v2743_v30  ;;  %v2821_v30 = vld [vmem:[%s3905_s1 + $0xa8] ss:$16 sps:$4 sm:$0xff]  }
  0x62   : > { %1925 = vmatpush1.bf16.msra.mxu1 %v2746_v31  ;;  %1883 = vmatprep.subr.bf16.mxu0 %v2751_v32  ;;  %v2824_v31 = vld [vmem:[%s3905_s1 + $0x2a8] ss:$16 sps:$4 sm:$0xff]   ;;  %v2829_v32 = vld [vmem:[%s3905_s1 + $0x8c] ss:$16 sps:$4 sm:$0xff]  }
  0x63   : > { %1926 = vmatprep.subr.bf16.mxu1 %v2754_v33  ;;  %v2830_v33 = vld [vmem:[%s3905_s1 + $0x288] ss:$16 sps:$4 sm:$0xff]  }
  0x65   : > { %1884 = vmatpush1.bf16.msra.mxu0 %v2749_v34  ;;  %v2835_v34 = vld [vmem:[%s3905_s1 + $0x6c] ss:$16 sps:$4 sm:$0xff]  }
  0x66   : > { %1927 = vmatpush1.bf16.msra.mxu1 %v2752_v35  ;;  %1885 = vmatprep.subr.bf16.mxu0 %v2757_v40  ;;  %v2838_v35 = vld [vmem:[%s3905_s1 + $0x26c] ss:$16 sps:$4 sm:$0xff]   ;;  %v2839_v40 = vld [vmem:[%s3905_s1 + $0x48] ss:$16 sps:$4 sm:$0xff]  }
  0x67   : > { %1928 = vmatprep.subr.bf16.mxu1 %v2760_v42  ;;  %v2842_v42 = vld [vmem:[%s3905_s1 + $0x248] ss:$16 sps:$4 sm:$0xff]  }
  0x69   : > { %1886 = vmatpush1.bf16.msra.mxu0 %v2755_v44  ;;  %v2847_v44 = vld [vmem:[%s3905_s1 + $0x2c] ss:$16 sps:$4 sm:$0xff]  }
  0x6a   : > { %1929 = vmatpush1.bf16.msra.mxu1 %v2758_v45  ;;  %1887 = vmatprep.subr.bf16.mxu0 %v2763_v46  ;;  %v2850_v45 = vld [vmem:[%s3905_s1 + $0x22c] ss:$16 sps:$4 sm:$0xff]   ;;  %v2845_v46 = vld [vmem:[%s3905_s1 + $0x28] ss:$16 sps:$4 sm:$0xff]  }
  0x6b   : > { %1930 = vmatprep.subr.bf16.mxu1 %v2766_v47  ;;  %v2848_v47 = vld [vmem:[%s3905_s1 + $0x228] ss:$16 sps:$4 sm:$0xff]  }
  0x6d   : > { %1888 = vmatpush2.bf16.msra.mxu0 %v2761_v48  ;;  %v2853_v48 = vld [vmem:[%s3905_s1 + $0xc] ss:$16 sps:$4 sm:$0xff]  }
  0x6e   : > { %1931 = vmatpush2.bf16.msra.mxu1 %v2764_v49  ;;  %1889 = vmatprep.subr.bf16.mxu0 %v2769_v50  ;;  %v2856_v49 = vld [vmem:[%s3905_s1 + $0x20c] ss:$16 sps:$4 sm:$0xff]   ;;  %v2851_v50 = vld [vmem:[%s3905_s1 + $0x8] ss:$16 sps:$4 sm:$0xff]  }
  0x6f   : > { %1932 = vmatprep.subr.bf16.mxu1 %v2772_v51  ;;  %v2854_v51 = vld [vmem:[%s3905_s1 + $0x208] ss:$16 sps:$4 sm:$0xff]  }
  0x71   : > { %1890 = vmatpush2.bf16.msra.mxu0 %v2767_v52  ;;  %v2859_v52 = vld [vmem:[%s3905_s1 + $0x1ec] ss:$16 sps:$4 sm:$0xff]  }
  0x72   : > { %1933 = vmatpush2.bf16.msra.mxu1 %v2770_v54  ;;  %1891 = vmatprep.subr.bf16.mxu0 %v2775_v56  ;;  %v2862_v54 = vld [vmem:[%s3905_s1 + $0x3ec] ss:$16 sps:$4 sm:$0xff]   ;;  %v2857_v56 = vld [vmem:[%s3905_s1 + $0x1e8] ss:$16 sps:$4 sm:$0xff]  }
  0x73   : > { %1934 = vmatprep.subr.bf16.mxu1 %v2778_v57  ;;  %v2860_v57 = vld [vmem:[%s3905_s1 + $0x3e8] ss:$16 sps:$4 sm:$0xff]  }
  0x75   : > { %1892 = vmatpush2.bf16.msra.mxu0 %v2773_v58  ;;  %v2865_v58 = vld [vmem:[%s3905_s1 + $0x1cc] ss:$16 sps:$4 sm:$0xff]  }
  0x76   : > { %1935 = vmatpush2.bf16.msra.mxu1 %v2776_v59  ;;  %1893 = vmatprep.subr.bf16.mxu0 %v2781_v60  ;;  %v2868_v59 = vld [vmem:[%s3905_s1 + $0x3cc] ss:$16 sps:$4 sm:$0xff]   ;;  %v2863_v60 = vld [vmem:[%s3905_s1 + $0x1c8] ss:$16 sps:$4 sm:$0xff]  }
  0x77   : > { %1936 = vmatprep.subr.bf16.mxu1 %v2784_v61  ;;  %v2866_v61 = vld [vmem:[%s3905_s1 + $0x3c8] ss:$16 sps:$4 sm:$0xff]  }
  0x79   : > { %1894 = vmatpush2.bf16.msra.mxu0 %v2779_v62  ;;  %v2871_v62 = vld [vmem:[%s3905_s1 + $0x1ac] ss:$16 sps:$4 sm:$0xff]  }
  0x7a   : > { %1937 = vmatpush2.bf16.msra.mxu1 %v2782_v63  ;;  %1895 = vmatprep.subr.bf16.mxu0 %v2787_v0  ;;  %v2874_v63 = vld [vmem:[%s3905_s1 + $0x3ac] ss:$16 sps:$4 sm:$0xff]   ;;  %v2869_v0 = vld [vmem:[%s3905_s1 + $0x1a8] ss:$16 sps:$4 sm:$0xff]  }
  0x7b   : > { %1938 = vmatprep.subr.bf16.mxu1 %v2790_v1  ;;  %v2872_v1 = vld [vmem:[%s3905_s1 + $0x3a8] ss:$16 sps:$4 sm:$0xff]  }
  0x7d   : > { %1896 = vmatpush2.bf16.msra.mxu0 %v2785_v2  ;;  %v2877_v2 = vld [vmem:[%s3905_s1 + $0x18c] ss:$16 sps:$4 sm:$0xff]  }
  0x7e   : > { %1939 = vmatpush2.bf16.msra.mxu1 %v2788_v3  ;;  %1897 = vmatprep.subr.bf16.mxu0 %v2793_v4  ;;  %v2880_v3 = vld [vmem:[%s3905_s1 + $0x38c] ss:$16 sps:$4 sm:$0xff]   ;;  %v2875_v4 = vld [vmem:[%s3905_s1 + $0x188] ss:$16 sps:$4 sm:$0xff]  }
  0x7f   : > { %1940 = vmatprep.subr.bf16.mxu1 %v2796_v5  ;;  %v2878_v5 = vld [vmem:[%s3905_s1 + $0x388] ss:$16 sps:$4 sm:$0xff]  }
  0x81   : > { %1898 = vmatpush2.bf16.msra.mxu0 %v2791_v6  ;;  %v2883_v6 = vld [vmem:[%s3905_s1 + $0x16c] ss:$16 sps:$4 sm:$0xff]  }
  0x82   : > { %1941 = vmatpush2.bf16.msra.mxu1 %v2794_v7  ;;  %1899 = vmatprep.subr.bf16.mxu0 %v2799_v10  ;;  %v2886_v7 = vld [vmem:[%s3905_s1 + $0x36c] ss:$16 sps:$4 sm:$0xff]   ;;  %v2881_v10 = vld [vmem:[%s3905_s1 + $0x168] ss:$16 sps:$4 sm:$0xff]  }
  0x83   : > { %1942 = vmatprep.subr.bf16.mxu1 %v2802_v11  ;;  %v2884_v11 = vld [vmem:[%s3905_s1 + $0x368] ss:$16 sps:$4 sm:$0xff]  }
  0x85   : > { %1900 = vmatpush2.bf16.msra.mxu0 %v2797_v12  ;;  %v2889_v12 = vld [vmem:[%s3905_s1 + $0x14c] ss:$16 sps:$4 sm:$0xff]  }
  0x86   : > { %1943 = vmatpush2.bf16.msra.mxu1 %v2800_v13  ;;  %1901 = vmatprep.subr.bf16.mxu0 %v2805_v14  ;;  %v2892_v13 = vld [vmem:[%s3905_s1 + $0x34c] ss:$16 sps:$4 sm:$0xff]   ;;  %v2887_v14 = vld [vmem:[%s3905_s1 + $0x148] ss:$16 sps:$4 sm:$0xff]  }
  0x87   : > { %1944 = vmatprep.subr.bf16.mxu1 %v2808_v15  ;;  %v2890_v15 = vld [vmem:[%s3905_s1 + $0x348] ss:$16 sps:$4 sm:$0xff]  }
  0x89   : > { %1902 = vmatpush2.bf16.msra.mxu0 %v2803_v16  ;;  %v2895_v16 = vld [vmem:[%s3905_s1 + $0x12c] ss:$16 sps:$4 sm:$0xff]  }
  0x8a   : > { %1945 = vmatpush2.bf16.msra.mxu1 %v2806_v17  ;;  %1957 = vmatprep.subr.bf16.mxu0 %v2811_v18  ;;  %v2898_v17 = vld [vmem:[%s3905_s1 + $0x32c] ss:$16 sps:$4 sm:$0xff]   ;;  %v2893_v18 = vld [vmem:[%s3905_s1 + $0x128] ss:$16 sps:$4 sm:$0xff]  }
  0x8b   : > { %2000 = vmatprep.subr.bf16.mxu1 %v2814_v19  ;;  %v2896_v19 = vld [vmem:[%s3905_s1 + $0x328] ss:$16 sps:$4 sm:$0xff]  }
  0x8c   : > { %1904 = vmatmul.mubr.bf16.vlgmr.msra.gmra.mxu0 %v3479_v20 }
  0x8d   : > { %1947 = vmatmul.mubr.bf16.vlgmr.msra.gmra.mxu1 %v3483_v21  ;;  %1958 = vmatpush1.bf16.msra.mxu0 %v2809_v22  ;;  %v2901_v22 = vld [vmem:[%s3905_s1 + $0x10c] ss:$16 sps:$4 sm:$0xff]  }
  0x8e   : > { %2001 = vmatpush1.bf16.msra.mxu1 %v2812_v23  ;;  %1959 = vmatprep.subr.bf16.mxu0 %v2817_v24  ;;  %v2904_v23 = vld [vmem:[%s3905_s1 + $0x30c] ss:$16 sps:$4 sm:$0xff]   ;;  %v2899_v24 = vld [vmem:[%s3905_s1 + $0x108] ss:$16 sps:$4 sm:$0xff]  }
  0x8f   : > { %2002 = vmatprep.subr.bf16.mxu1 %v2820_v25  ;;  %1989 = vmatprep.mubr.bf16.mxu0 %v3200_v53  ;;  %v2832_v53 = vld [vmem:[%s3905_s1 + $0x28c] ss:$16 sps:$4 sm:$0xff]   ;;  %v2902_v25 = vld [vmem:[%s3905_s1 + $0x308] ss:$16 sps:$4 sm:$0xff]  }
  0x90   : > { %2032 = vmatprep.mubr.bf16.mxu1 %v3205_v55  ;;  %v2827_v55 = vld [vmem:[%s3905_s1 + $0x88] ss:$16 sps:$4 sm:$0xff]  }
  0x91   : > { %1960 = vmatpush1.bf16.msra.mxu0 %v2815_v26  ;;  %v2907_v26 = vld [vmem:[%s3905_s1 + $0x4ec] ss:$16 sps:$4 sm:$0xff]  }
  0x92   : > { %2003 = vmatpush1.bf16.msra.mxu1 %v2818_v27  ;;  %1961 = vmatprep.subr.bf16.mxu0 %v2823_v28  ;;  %v2910_v27 = vld [vmem:[%s3905_s1 + $0x6ec] ss:$16 sps:$4 sm:$0xff]   ;;  %v2905_v28 = vld [vmem:[%s3905_s1 + $0x4e8] ss:$16 sps:$4 sm:$0xff]  }
  0x93   : > { %2004 = vmatprep.subr.bf16.mxu1 %v2826_v29  ;;  %v2908_v29 = vld [vmem:[%s3905_s1 + $0x6e8] ss:$16 sps:$4 sm:$0xff]  }
  0x95   : > { %1962 = vmatpush1.bf16.msra.mxu0 %v2821_v30  ;;  %v2913_v30 = vld [vmem:[%s3905_s1 + $0x4cc] ss:$16 sps:$4 sm:$0xff]  }
  0x96   : > { %2005 = vmatpush1.bf16.msra.mxu1 %v2824_v31  ;;  %1963 = vmatprep.subr.bf16.mxu0 %v2829_v32  ;;  %v2916_v31 = vld [vmem:[%s3905_s1 + $0x6cc] ss:$16 sps:$4 sm:$0xff]   ;;  %v2911_v32 = vld [vmem:[%s3905_s1 + $0x4c8] ss:$16 sps:$4 sm:$0xff]  }
  0x97   : > { %2006 = vmatprep.subr.bf16.mxu1 %v2832_v53  ;;  %v2914_v53 = vld [vmem:[%s3905_s1 + $0x6c8] ss:$16 sps:$4 sm:$0xff]  }
  0x99   : > { %1964 = vmatpush1.bf16.msra.mxu0 %v2827_v55  ;;  %v2919_v55 = vld [vmem:[%s3905_s1 + $0x4ac] ss:$16 sps:$4 sm:$0xff]  }
  0x9a   : > { %2007 = vmatpush1.bf16.msra.mxu1 %v2830_v33  ;;  %1965 = vmatprep.subr.bf16.mxu0 %v2835_v34  ;;  %v2920_v33 = vld [vmem:[%s3905_s1 + $0x6a8] ss:$16 sps:$4 sm:$0xff]   ;;  %v2925_v34 = vld [vmem:[%s3905_s1 + $0x48c] ss:$16 sps:$4 sm:$0xff]  }
  0x9b   : > { %2008 = vmatprep.subr.bf16.mxu1 %v2838_v35  ;;  %v2926_v35 = vld [vmem:[%s3905_s1 + $0x688] ss:$16 sps:$4 sm:$0xff]  }
  0x9d   : > { %1966 = vmatpush1.bf16.msra.mxu0 %v2833_v36  ;;  %v2931_v36 = vld [vmem:[%s3905_s1 + $0x46c] ss:$16 sps:$4 sm:$0xff]  }
  0x9e   : > { %2009 = vmatpush1.bf16.msra.mxu1 %v2836_v37  ;;  %1967 = vmatprep.subr.bf16.mxu0 %v2841_v38  ;;  %v2934_v37 = vld [vmem:[%s3905_s1 + $0x66c] ss:$16 sps:$4 sm:$0xff]   ;;  %v2929_v38 = vld [vmem:[%s3905_s1 + $0x468] ss:$16 sps:$4 sm:$0xff]  }
  0x9f   : > { %2010 = vmatprep.subr.bf16.mxu1 %v2844_v39  ;;  %v2932_v39 = vld [vmem:[%s3905_s1 + $0x668] ss:$16 sps:$4 sm:$0xff]  }
  0xa1   : > { %1968 = vmatpush1.bf16.msra.mxu0 %v2839_v40  ;;  %v2937_v40 = vld [vmem:[%s3905_s1 + $0x44c] ss:$16 sps:$4 sm:$0xff]  }
  0xa2   : > { %2011 = vmatpush1.bf16.msra.mxu1 %v2842_v42  ;;  %1969 = vmatprep.subr.bf16.mxu0 %v2847_v44  ;;  %v2940_v42 = vld [vmem:[%s3905_s1 + $0x64c] ss:$16 sps:$4 sm:$0xff]   ;;  %v2935_v44 = vld [vmem:[%s3905_s1 + $0x448] ss:$16 sps:$4 sm:$0xff]  }
  0xa3   : > { %2012 = vmatprep.subr.bf16.mxu1 %v2850_v45  ;;  %v2938_v45 = vld [vmem:[%s3905_s1 + $0x648] ss:$16 sps:$4 sm:$0xff]  }
  0xa5   : > { %1970 = vmatpush1.bf16.msra.mxu0 %v2845_v46  ;;  %v2943_v46 = vld [vmem:[%s3905_s1 + $0x42c] ss:$16 sps:$4 sm:$0xff]  }
  0xa6   : > { %2013 = vmatpush1.bf16.msra.mxu1 %v2848_v47  ;;  %1971 = vmatprep.subr.bf16.mxu0 %v2853_v48  ;;  %v2946_v47 = vld [vmem:[%s3905_s1 + $0x62c] ss:$16 sps:$4 sm:$0xff]   ;;  %v2941_v48 = vld [vmem:[%s3905_s1 + $0x428] ss:$16 sps:$4 sm:$0xff]  }
  0xa7   : > { %2014 = vmatprep.subr.bf16.mxu1 %v2856_v49  ;;  %v2944_v49 = vld [vmem:[%s3905_s1 + $0x628] ss:$16 sps:$4 sm:$0xff]  }
  0xa9   : > { %1972 = vmatpush1.bf16.msra.mxu0 %v2851_v50  ;;  %v2949_v50 = vld [vmem:[%s3905_s1 + $0x40c] ss:$16 sps:$4 sm:$0xff]  }
  0xaa   : > { %2015 = vmatpush1.bf16.msra.mxu1 %v2854_v51  ;;  %1973 = vmatprep.subr.bf16.mxu0 %v2859_v52  ;;  %v2952_v51 = vld [vmem:[%s3905_s1 + $0x60c] ss:$16 sps:$4 sm:$0xff]   ;;  %v2947_v52 = vld [vmem:[%s3905_s1 + $0x408] ss:$16 sps:$4 sm:$0xff]  }
  0xab   : > { %2016 = vmatprep.subr.bf16.mxu1 %v2862_v54  ;;  %v2950_v54 = vld [vmem:[%s3905_s1 + $0x608] ss:$16 sps:$4 sm:$0xff]  }
  0xad   : > { %1974 = vmatpush2.bf16.msra.mxu0 %v2857_v56  ;;  %v2955_v56 = vld [vmem:[%s3905_s1 + $0x5ec] ss:$16 sps:$4 sm:$0xff]  }
  0xae   : > { %2017 = vmatpush2.bf16.msra.mxu1 %v2860_v57  ;;  %1975 = vmatprep.subr.bf16.mxu0 %v2865_v58  ;;  %v2958_v57 = vld [vmem:[%s3905_s1 + $0x7ec] ss:$16 sps:$4 sm:$0xff]   ;;  %v2953_v58 = vld [vmem:[%s3905_s1 + $0x5e8] ss:$16 sps:$4 sm:$0xff]  }
  0xaf   : > { %2018 = vmatprep.subr.bf16.mxu1 %v2868_v59  ;;  %v2956_v59 = vld [vmem:[%s3905_s1 + $0x7e8] ss:$16 sps:$4 sm:$0xff]  }
  0xb1   : > { %1976 = vmatpush2.bf16.msra.mxu0 %v2863_v60  ;;  %v2961_v60 = vld [vmem:[%s3905_s1 + $0x5cc] ss:$16 sps:$4 sm:$0xff]  }
  0xb2   : > { %2019 = vmatpush2.bf16.msra.mxu1 %v2866_v61  ;;  %1977 = vmatprep.subr.bf16.mxu0 %v2871_v62  ;;  %v2964_v61 = vld [vmem:[%s3905_s1 + $0x7cc] ss:$16 sps:$4 sm:$0xff]   ;;  %v2959_v62 = vld [vmem:[%s3905_s1 + $0x5c8] ss:$16 sps:$4 sm:$0xff]  }
  0xb3   : > { %2020 = vmatprep.subr.bf16.mxu1 %v2874_v63  ;;  %v2962_v63 = vld [vmem:[%s3905_s1 + $0x7c8] ss:$16 sps:$4 sm:$0xff]  }
  0xb5   : > { %1978 = vmatpush2.bf16.msra.mxu0 %v2869_v0  ;;  %v2967_v0 = vld [vmem:[%s3905_s1 + $0x5ac] ss:$16 sps:$4 sm:$0xff]  }
  0xb6   : > { %2021 = vmatpush2.bf16.msra.mxu1 %v2872_v1  ;;  %1979 = vmatprep.subr.bf16.mxu0 %v2877_v2  ;;  %v2970_v1 = vld [vmem:[%s3905_s1 + $0x7ac] ss:$16 sps:$4 sm:$0xff]   ;;  %v2965_v2 = vld [vmem:[%s3905_s1 + $0x5a8] ss:$16 sps:$4 sm:$0xff]  }
  0xb7   : > { %2022 = vmatprep.subr.bf16.mxu1 %v2880_v3  ;;  %v2968_v3 = vld [vmem:[%s3905_s1 + $0x7a8] ss:$16 sps:$4 sm:$0xff]  }
  0xb9   : > { %1980 = vmatpush2.bf16.msra.mxu0 %v2875_v4  ;;  %v2973_v4 = vld [vmem:[%s3905_s1 + $0x58c] ss:$16 sps:$4 sm:$0xff]  }
  0xba   : > { %2023 = vmatpush2.bf16.msra.mxu1 %v2878_v5  ;;  %1981 = vmatprep.subr.bf16.mxu0 %v2883_v6  ;;  %v2976_v5 = vld [vmem:[%s3905_s1 + $0x78c] ss:$16 sps:$4 sm:$0xff]   ;;  %v2971_v6 = vld [vmem:[%s3905_s1 + $0x588] ss:$16 sps:$4 sm:$0xff]  }
  0xbb   : > { %2024 = vmatprep.subr.bf16.mxu1 %v2886_v7  ;;  %v2974_v7 = vld [vmem:[%s3905_s1 + $0x788] ss:$16 sps:$4 sm:$0xff]  }
  0xbd   : > { %1982 = vmatpush2.bf16.msra.mxu0 %v2881_v10  ;;  %v2979_v10 = vld [vmem:[%s3905_s1 + $0x56c] ss:$16 sps:$4 sm:$0xff]  }
  0xbe   : > { %2025 = vmatpush2.bf16.msra.mxu1 %v2884_v11  ;;  %1983 = vmatprep.subr.bf16.mxu0 %v2889_v12  ;;  %v2982_v11 = vld [vmem:[%s3905_s1 + $0x76c] ss:$16 sps:$4 sm:$0xff]   ;;  %v2977_v12 = vld [vmem:[%s3905_s1 + $0x568] ss:$16 sps:$4 sm:$0xff]  }
  0xbf   : > { %2026 = vmatprep.subr.bf16.mxu1 %v2892_v13  ;;  %v2980_v13 = vld [vmem:[%s3905_s1 + $0x768] ss:$16 sps:$4 sm:$0xff]  }
  0xc1   : > { %1984 = vmatpush2.bf16.msra.mxu0 %v2887_v14  ;;  %v2985_v14 = vld [vmem:[%s3905_s1 + $0x54c] ss:$16 sps:$4 sm:$0xff]  }
  0xc2   : > { %2027 = vmatpush2.bf16.msra.mxu1 %v2890_v15  ;;  %1985 = vmatprep.subr.bf16.mxu0 %v2895_v16  ;;  %v2988_v15 = vld [vmem:[%s3905_s1 + $0x74c] ss:$16 sps:$4 sm:$0xff]   ;;  %v2983_v16 = vld [vmem:[%s3905_s1 + $0x548] ss:$16 sps:$4 sm:$0xff]  }
  0xc3   : > { %2028 = vmatprep.subr.bf16.mxu1 %v2898_v17  ;;  %v2986_v17 = vld [vmem:[%s3905_s1 + $0x748] ss:$16 sps:$4 sm:$0xff]  }
  0xc5   : > { %1986 = vmatpush2.bf16.msra.mxu0 %v2893_v18  ;;  %v2991_v18 = vld [vmem:[%s3905_s1 + $0x52c] ss:$16 sps:$4 sm:$0xff]  }
  0xc6   : > { %2029 = vmatpush2.bf16.msra.mxu1 %v2896_v19  ;;  %1987 = vmatprep.subr.bf16.mxu0 %v2901_v22  ;;  %v2994_v19 = vld [vmem:[%s3905_s1 + $0x72c] ss:$16 sps:$4 sm:$0xff]   ;;  %v2989_v22 = vld [vmem:[%s3905_s1 + $0x528] ss:$16 sps:$4 sm:$0xff]  }
  0xc7   : > { %2030 = vmatprep.subr.bf16.mxu1 %v2904_v23  ;;  %v2992_v23 = vld [vmem:[%s3905_s1 + $0x728] ss:$16 sps:$4 sm:$0xff]  }
  0xc9   : > { %1988 = vmatpush2.bf16.msra.mxu0 %v2899_v24  ;;  %v2997_v24 = vld [vmem:[%s3905_s1 + $0x50c] ss:$16 sps:$4 sm:$0xff]  }
  0xca   : > { %2031 = vmatpush2.bf16.msra.mxu1 %v2902_v25  ;;  %2043 = vmatprep.subr.bf16.mxu0 %v2907_v26  ;;  %v3000_v25 = vld [vmem:[%s3905_s1 + $0x70c] ss:$16 sps:$4 sm:$0xff]   ;;  %v2995_v26 = vld [vmem:[%s3905_s1 + $0x508] ss:$16 sps:$4 sm:$0xff]  }
  0xcb   : > { %2086 = vmatprep.subr.bf16.mxu1 %v2910_v27  ;;  %v2998_v27 = vld [vmem:[%s3905_s1 + $0x708] ss:$16 sps:$4 sm:$0xff]  }
  0xcc   : > { %1990 = vmatmul.mubr.bf16.vlgmr.msra.gmra.mxu0 %v3257_v8  ;;  %v2922_v8 = vld [vmem:[%s3905_s1 + $0x6ac] ss:$16 sps:$4 sm:$0xff]  }
  0xcd   : > { %2033 = vmatmul.mubr.bf16.vlgmr.msra.gmra.mxu1 %v3259_v9  ;;  %2044 = vmatpush1.bf16.msra.mxu0 %v2905_v28  ;;  %v2917_v9 = vld [vmem:[%s3905_s1 + $0x4a8] ss:$16 sps:$4 sm:$0xff]  }
  0xce   : > { %2087 = vmatpush1.bf16.msra.mxu1 %v2908_v29  ;;  %2045 = vmatprep.subr.bf16.mxu0 %v2913_v30 }
  0xcf   : > { %2088 = vmatprep.subr.bf16.mxu1 %v2916_v31  ;;  %2075 = vmatprep.mubr.bf16.mxu0 %v3358_v41  ;;  %v2928_v41 = vld [vmem:[%s3905_s1 + $0x68c] ss:$16 sps:$4 sm:$0xff]  }
  0xd0   : > { %2118 = vmatprep.mubr.bf16.mxu1 %v3365_v43  ;;  %v2923_v43 = vld [vmem:[%s3905_s1 + $0x488] ss:$16 sps:$4 sm:$0xff]  }
  0xd1   : > { %2046 = vmatpush1.bf16.msra.mxu0 %v2911_v32 }
  0xd2   : > { %2089 = vmatpush1.bf16.msra.mxu1 %v2914_v53  ;;  %2047 = vmatprep.subr.bf16.mxu0 %v2919_v55  ;;  %v445_v53 = vlaneseq }
  0xd3   : > { %2090 = vmatprep.subr.bf16.mxu1 %v2922_v8 }
  0xd5   : > { %2048 = vmatpush1.bf16.msra.mxu0 %v2917_v9  ;;  %v446_v9 = vshrl.u32 %v445_v53, 7 }
  0xd6   : > { %2091 = vmatpush1.bf16.msra.mxu1 %v2920_v33  ;;  %2049 = vmatprep.subr.bf16.mxu0 %v2925_v34 }
  0xd7   : > { %2092 = vmatprep.subr.bf16.mxu1 %v2928_v41 }
  0xd9   : > { %2050 = vmatpush1.bf16.msra.mxu0 %v2923_v43  ;;  %v451_v43 = vsub.s32 1, %v446_v9 }
  0xda   : > { %2093 = vmatpush1.bf16.msra.mxu1 %v2926_v35  ;;  %2051 = vmatprep.subr.bf16.mxu0 %v2931_v36  ;;  %v443_v35 = vld [vmem:[%s3906_s2] sm:$0xf]  ;;  %v3876_v36 = vsub.s32 0, %v446_v9 }
  0xdb   : > { %2094 = vmatprep.subr.bf16.mxu1 %v2934_v37  ;;  %v452_v37 = vrot.slane %v443_v35, %v451_v43 }
  0xdd   : > { %2052 = vmatpush1.bf16.msra.mxu0 %v2929_v38 }
  0xde   : > { %2095 = vmatpush1.bf16.msra.mxu1 %v2932_v39  ;;  %2053 = vmatprep.subr.bf16.mxu0 %v2937_v40  ;;  %v448_v39 = vrot.slane %v443_v35, %v3876_v36 }
  0xdf   : > { %2096 = vmatprep.subr.bf16.mxu1 %v2940_v42 }
  0xe1   : > { %2054 = vmatpush1.bf16.msra.mxu0 %v2935_v44 }
  0xe2   : > { %2097 = vmatpush1.bf16.msra.mxu1 %v2938_v45  ;;  %2055 = vmatprep.subr.bf16.mxu0 %v2943_v46 }
  0xe3   : > { %2098 = vmatprep.subr.bf16.mxu1 %v2946_v47 }
  0xe5   : > { %2056 = vmatpush1.bf16.msra.mxu0 %v2941_v48 }
  0xe6   : > { %2099 = vmatpush1.bf16.msra.mxu1 %v2944_v49  ;;  %2057 = vmatprep.subr.bf16.mxu0 %v2949_v50 }
  0xe7   : > { %2100 = vmatprep.subr.bf16.mxu1 %v2952_v51 }
  0xe9   : > { %2058 = vmatpush1.bf16.msra.mxu0 %v2947_v52 }
  0xea   : > { %2101 = vmatpush1.bf16.msra.mxu1 %v2950_v54  ;;  %2059 = vmatprep.subr.bf16.mxu0 %v2955_v56 }
  0xeb   : > { %2102 = vmatprep.subr.bf16.mxu1 %v2958_v57 }
  0xed   : > { %2060 = vmatpush2.bf16.msra.mxu0 %v2953_v58 }
  0xee   : > { %2103 = vmatpush2.bf16.msra.mxu1 %v2956_v59  ;;  %2061 = vmatprep.subr.bf16.mxu0 %v2961_v60 }
  0xef   : > { %2104 = vmatprep.subr.bf16.mxu1 %v2964_v61 }
  0xf1   : > { %2062 = vmatpush2.bf16.msra.mxu0 %v2959_v62  ;;  %v455_v62 = vsub.s32 2, %v446_v9 }
  0xf2   : > { %2105 = vmatpush2.bf16.msra.mxu1 %v2962_v63  ;;  %2063 = vmatprep.subr.bf16.mxu0 %v2967_v0 }
  0xf3   : > { %2106 = vmatprep.subr.bf16.mxu1 %v2970_v1 }
  0xf5   : > { %2064 = vmatpush2.bf16.msra.mxu0 %v2965_v2 }
  0xf6   : > { %2107 = vmatpush2.bf16.msra.mxu1 %v2968_v3  ;;  %2065 = vmatprep.subr.bf16.mxu0 %v2973_v4  ;;  %v459_v3 = vsub.s32 3, %v446_v9 }
  0xf7   : > { %2108 = vmatprep.subr.bf16.mxu1 %v2976_v5 }
  0xf9   : > { %2066 = vmatpush2.bf16.msra.mxu0 %v2971_v6  ;;  %v456_v6 = vrot.slane %v443_v35, %v455_v62 }
  0xfa   : > { %2109 = vmatpush2.bf16.msra.mxu1 %v2974_v7  ;;  %2067 = vmatprep.subr.bf16.mxu0 %v2979_v10 }
  0xfb   : > { %2110 = vmatprep.subr.bf16.mxu1 %v2982_v11 }
  0xfd   : > { %2068 = vmatpush2.bf16.msra.mxu0 %v2977_v12  ;;  %v460_v12 = vrot.slane %v443_v35, %v459_v3 }
  0xfe   : > { %2111 = vmatpush2.bf16.msra.mxu1 %v2980_v13  ;;  %2069 = vmatprep.subr.bf16.mxu0 %v2985_v14 }
  0xff   : > { %2112 = vmatprep.subr.bf16.mxu1 %v2988_v15 }
 0x101   : > { %2070 = vmatpush2.bf16.msra.mxu0 %v2983_v16 }
 0x102   : > { %2113 = vmatpush2.bf16.msra.mxu1 %v2986_v17  ;;  %2071 = vmatprep.subr.bf16.mxu0 %v2991_v18 }
 0x103   : > { %2114 = vmatprep.subr.bf16.mxu1 %v2994_v19 }
 0x105   : > { %2072 = vmatpush2.bf16.msra.mxu0 %v2989_v22 }
 0x106   : > { %2115 = vmatpush2.bf16.msra.mxu1 %v2992_v23  ;;  %2073 = vmatprep.subr.bf16.mxu0 %v2997_v24 }
 0x107   : > { %2116 = vmatprep.subr.bf16.mxu1 %v3000_v25 }
 0x109   : > { %2074 = vmatpush2.bf16.msra.mxu0 %v2995_v26 }
 0x10a   : > { %2117 = vmatpush2.bf16.msra.mxu1 %v2998_v27 }
 0x10c   : > { %2076 = vmatmul.mubr.bf16.vlgmr.msra.gmra.mxu0 %v3479_v20  ;;  %v1819_v28 = vpop.f32.mrf.mxu0 }
 0x10d   : > { %2119 = vmatmul.mubr.bf16.vlgmr.msra.gmra.mxu1 %v3483_v21  ;;  %v1862_v29 = vpop.f32.mrf.mxu1  ;;  %v1820_v47 = vadd.f32 %v1819_v28, %v448_v39 }
 0x10e   : > { %v1821_v30 = vpop.f32.mrf.mxu0 }
 0x10f   : > { %v1864_v31 = vpop.f32.mrf.mxu1  ;;  %v1822_v44 = vadd.f32 %v1821_v30, %v452_v37  ;;  %v1863_v57 = vadd.f32 %v1862_v29, %v1820_v47 }
 0x110   : > { %v1823_v32 = vpop.f32.mrf.mxu0 }
 0x111   : > { %v1866_v55 = vpop.f32.mrf.mxu1  ;;  %v1824_v45 = vadd.f32 %v1823_v32, %v448_v39  ;;  %v1865_v50 = vadd.f32 %v1864_v31, %v1822_v44 }
 0x112   : > { %v1825_v8 = vpop.f32.mrf.mxu0 }
 0x113   : > { %v1868_v33 = vpop.f32.mrf.mxu1  ;;  %v1826_v40 = vadd.f32 %v1825_v8, %v452_v37  ;;  %v1867_v51 = vadd.f32 %v1866_v55, %v1824_v45 }
 0x115   : > { %v1869_v48 = vadd.f32 %v1868_v33, %v1826_v40 }
 0x14c   : > { %v1905_v34 = vpop.f32.mrf.mxu0 }
 0x14d   : > { %v1948_v41 = vpop.f32.mrf.mxu1  ;;  %v1906_v60 = vadd.f32 %v1905_v34, %v1863_v57 }
 0x14e   : > { %v1907_v20 = vpop.f32.mrf.mxu0 }
 0x14f   : > { %v1950_v21 = vpop.f32.mrf.mxu1  ;;  %v1908_v58 = vadd.f32 %v1907_v20, %v1865_v50  ;;  %v3885_v4 = vadd.f32 %v1948_v41, %v1906_v60 }
 0x150   : > { %v1909_v38 = vpop.f32.mrf.mxu0 }
 0x151   : > { %v1952_v42 = vpop.f32.mrf.mxu1  ;;  %v1910_v59 = vadd.f32 %v1909_v38, %v1867_v51  ;;  %v3881_v1 = vadd.f32 %v1950_v21, %v1908_v58 }
 0x152   : > { %v1911_v46 = vpop.f32.mrf.mxu0 }
 0x153   : > { %v1954_v49 = vpop.f32.mrf.mxu1  ;;  %v1912_v52 = vadd.f32 %v1911_v46, %v1869_v48  ;;  %v3883_v2 = vadd.f32 %v1952_v42, %v1910_v59 }
 0x155   : > { %v3879_v61 = vadd.f32 %v1954_v49, %v1912_v52  ;;  %v2129_v11 = vadd.f32 %v3883_v2, %v3885_v4 }
 0x157   : > { %v2136_v5 = vadd.f32 %v3879_v61, %v3881_v1  ;;  %v2130_v17 = vrot.slane %v2129_v11, 4 }
 0x159   : > { %v2137_v13 = vrot.slane %v2136_v5, 4  ;;  %v2131_v29 = vadd.f32 %v2130_v17, %v2129_v11 }
 0x15b   : > { %v2138_v24 = vadd.f32 %v2137_v13, %v2136_v5  ;;  %v2132_v43 = vrot.slane %v2131_v29, 2 }
 0x15d   : > { %v2139_v8 = vrot.slane %v2138_v24, 2  ;;  %v2133_v44 = vadd.f32 %v2132_v43, %v2131_v29 }
 0x15f   : > { %v2140_v38 = vadd.f32 %v2139_v8, %v2138_v24  ;;  %v2134_v50 = vrot.slane %v2133_v44, 1 }
 0x161   : > { %v2141_v47 = vrot.slane %v2140_v38, 1  ;;  %v2135_v58 = vadd.f32 %v2134_v50, %v2133_v44 }
 0x18c   : > { %v1991_v54 = vpop.f32.mrf.mxu0 }
 0x18d   : > { %v2034_v56 = vpop.f32.mrf.mxu1  ;;  %v1992_v14 = vadd.f32 %v1991_v54, %v456_v6  ;;  %v2142_v54 = vadd.f32 %v2141_v47, %v2140_v38 }
 0x18e   : > { %v1993_v63 = vpop.f32.mrf.mxu0 }
 0x18f   : > { %v2036_v0 = vpop.f32.mrf.mxu1  ;;  %v1994_v18 = vadd.f32 %v1993_v63, %v460_v12  ;;  %v2035_v25 = vadd.f32 %v2034_v56, %v1992_v14  ;;  %v2157_v62 = vadd.f32 %v2142_v54, %v2135_v58 }
 0x190   : > { %v1995_v7 = vpop.f32.mrf.mxu0 }
 0x191   : > { %v2038_v10 = vpop.f32.mrf.mxu1  ;;  %v1996_v19 = vadd.f32 %v1995_v7, %v456_v6  ;;  %v2037_v30 = vadd.f32 %v2036_v0, %v1994_v18 }
 0x192   : > { %v1997_v15 = vpop.f32.mrf.mxu0 }
 0x193   : > { %v2040_v16 = vpop.f32.mrf.mxu1  ;;  %v1998_v26 = vadd.f32 %v1997_v15, %v460_v12  ;;  %v2039_v31 = vadd.f32 %v2038_v10, %v1996_v19 }
 0x195   : > { %v2041_v9 = vadd.f32 %v2040_v16, %v1998_v26 }
 0x1cc   : > { %v2077_v22 = vpop.f32.mrf.mxu0 }
 0x1cd   : > { %v2120_v23 = vpop.f32.mrf.mxu1  ;;  %v2078_v32 = vadd.f32 %v2077_v22, %v2035_v25 }
 0x1ce   : > { %v2079_v27 = vpop.f32.mrf.mxu0 }
 0x1cf   : > { %v2122_v28 = vpop.f32.mrf.mxu1  ;;  %v2080_v33 = vadd.f32 %v2079_v27, %v2037_v30  ;;  %v2121_v35 = vadd.f32 %v2120_v23, %v2078_v32 }
 0x1d0   : > { %v2081_v53 = vpop.f32.mrf.mxu0 }
 0x1d1   : > { %v2124_v55 = vpop.f32.mrf.mxu1  ;;  %v2082_v34 = vadd.f32 %v2081_v53, %v2039_v31  ;;  %v2123_v39 = vadd.f32 %v2122_v28, %v2080_v33 }
 0x1d2   : > { %v2083_v41 = vpop.f32.mrf.mxu0 }
 0x1d3   : > { %v2125_v20 = vadd.f32 %v2124_v55, %v2082_v34  ;;  %v2084_v21 = vadd.f32 %v2083_v41, %v2041_v9  ;;  %v2126_v37 = vpop.f32.mrf.mxu1 }
 0x1d5   : > { %v2143_v40 = vadd.f32 %v2125_v20, %v2121_v35  ;;  %v2127_v42 = vadd.f32 %v2126_v37, %v2084_v21 }
 0x1d7   : > { %v2144_v45 = vrot.slane %v2143_v40, 4  ;;  %v2150_v46 = vadd.f32 %v2127_v42, %v2123_v39 }
 0x1d9   : > { %v2145_v48 = vadd.f32 %v2144_v45, %v2143_v40  ;;  %v2151_v49 = vrot.slane %v2150_v46, 4 }
 0x1db   : > { %v2146_v51 = vrot.slane %v2145_v48, 2  ;;  %v2152_v52 = vadd.f32 %v2151_v49, %v2150_v46 }
 0x1dd   : > { %v2147_v56 = vadd.f32 %v2146_v51, %v2145_v48  ;;  %v2153_v57 = vrot.slane %v2152_v52, 2 }
 0x1df   : > { %v2148_v59 = vrot.slane %v2147_v56, 1  ;;  %v2154_v60 = vadd.f32 %v2153_v57, %v2152_v52 }
 0x1e1   : > { %v2149_v63 = vadd.f32 %v2148_v59, %v2147_v56  ;;  %v2155_v0 = vrot.slane %v2154_v60, 1 }
 0x1e3   : > { %v2158_v3 = vadd.f32 %v2157_v62, %v2149_v63  ;;  %v2156_v5 = vadd.f32 %v2155_v0, %v2154_v60 }
 0x1e5   : > { %v2159_v6 = vadd.f32 %v2158_v3, %v2156_v5 }
 0x1e7   : > { %v2161_v7 = vmul.f32 0.015625, %v2159_v6 }
 0x1e9   : > { %v2165_v10 = vrot.slane %v2161_v7, %v3876_v36 }
 0x1eb   : > { %v2166_v11 = vsub.f32 %v3885_v4, %v2165_v10  ;;  %v2167_v12 = vsub.f32 %v3881_v1, %v2165_v10  ;;  %v2168_v13 = vsub.f32 %v2121_v35, %v2165_v10  ;;  %v2169_v14 = vsub.f32 %v2123_v39, %v2165_v10 }
 0x1ec   : > { %v2170_v15 = vsub.f32 %v3883_v2, %v2165_v10  ;;  %v2171_v16 = vsub.f32 %v3879_v61, %v2165_v10  ;;  %v2172_v17 = vsub.f32 %v2125_v20, %v2165_v10  ;;  %v2173_v18 = vsub.f32 %v2127_v42, %v2165_v10 }
 0x1ed   : > { %v2174_v19 = vmul.f32 %v2166_v11, %v2166_v11  ;;  %v2175_v22 = vmul.f32 %v2167_v12, %v2167_v12  ;;  %v2176_v23 = vmul.f32 %v2168_v13, %v2168_v13  ;;  %v2177_v24 = vmul.f32 %v2169_v14, %v2169_v14 }
 0x1ee   : > { %v2178_v25 = vmul.f32 %v2170_v15, %v2170_v15  ;;  %v2179_v26 = vmul.f32 %v2171_v16, %v2171_v16  ;;  %v2180_v27 = vmul.f32 %v2172_v17, %v2172_v17  ;;  %v2181_v28 = vmul.f32 %v2173_v18, %v2173_v18 }
 0x1f0   : > { %v2182_v29 = vadd.f32 %v2178_v25, %v2174_v19  ;;  %v2189_v4 = vadd.f32 %v2179_v26, %v2175_v22  ;;  %v2196_v30 = vadd.f32 %v2180_v27, %v2176_v23  ;;  %v2203_v1 = vadd.f32 %v2181_v28, %v2177_v24 }
 0x1f2   : > { %v2183_v31 = vrot.slane %v2182_v29, 4  ;;  %v2190_v32 = vrot.slane %v2189_v4, 4  ;;  %v2197_v53 = vrot.slane %v2196_v30, 4  ;;  %v2204_v2 = vrot.slane %v2203_v1, 4 }
 0x1f4   : > { %v2184_v55 = vadd.f32 %v2183_v31, %v2182_v29  ;;  %v2191_v61 = vadd.f32 %v2190_v32, %v2189_v4  ;;  %v2198_v8 = vadd.f32 %v2197_v53, %v2196_v30  ;;  %v2205_v9 = vadd.f32 %v2204_v2, %v2203_v1 }
 0x1f6   : > { %v2185_v33 = vrot.slane %v2184_v55, 2  ;;  %v2192_v34 = vrot.slane %v2191_v61, 2  ;;  %v2199_v41 = vrot.slane %v2198_v8, 2  ;;  %v2206_v43 = vrot.slane %v2205_v9, 2 }
 0x1f8   : > { %v2186_v35 = vadd.f32 %v2185_v33, %v2184_v55  ;;  %v2193_v20 = vadd.f32 %v2192_v34, %v2191_v61  ;;  %v2200_v21 = vadd.f32 %v2199_v41, %v2198_v8  ;;  %v2207_v37 = vadd.f32 %v2206_v43, %v2205_v9 }
 0x1fa   : > { %v2187_v38 = vrot.slane %v2186_v35, 1  ;;  %v2194_v39 = vrot.slane %v2193_v20, 1  ;;  %v2201_v40 = vrot.slane %v2200_v21, 1  ;;  %v2208_v45 = vrot.slane %v2207_v37, 1 }
 0x1fc   : > { %v2188_v42 = vadd.f32 %v2187_v38, %v2186_v35  ;;  %v2195_v44 = vadd.f32 %v2194_v39, %v2193_v20  ;;  %v2202_v46 = vadd.f32 %v2201_v40, %v2200_v21  ;;  %v2209_v48 = vadd.f32 %v2208_v45, %v2207_v37 }
 0x1fe   : > { %v2210_v47 = vadd.f32 %v2195_v44, %v2188_v42 }
 0x200   : > { %v2211_v49 = vadd.f32 %v2210_v47, %v2202_v46 }
 0x202   : > { %v2212_v50 = vadd.f32 %v2211_v49, %v2209_v48 }
 0x204   : > { %v2213_v51 = vmul.f32 0.015625, %v2212_v50 }
 0x206   : > { %v2214_v52 = vadd.f32 1e-05, %v2213_v51 }
 0x208   : > { %3001 = vrsqrt.f32 %v2214_v52 }
 0x215   : > { %v3002_v54 = vpop.eup %3001 }
 0x216   : > { %v2219_v56 = vrot.slane %v3002_v54, %v3876_v36 }
 0x218   : > { %v2220_v57 = vmul.f32 %v2219_v56, %v2166_v11  ;;  %v2221_v58 = vmul.f32 %v2219_v56, %v2167_v12  ;;  %v2222_v59 = vmul.f32 %v2219_v56, %v2168_v13  ;;  %v2223_v60 = vmul.f32 %v2219_v56, %v2169_v14 }
 0x219   : > { %v2224_v62 = vmul.f32 %v2219_v56, %v2170_v15  ;;  %v2225_v63 = vmul.f32 %v2219_v56, %v2171_v16  ;;  %v2226_v0 = vmul.f32 %v2219_v56, %v2172_v17  ;;  %v2227_v3 = vmul.f32 %v2219_v56, %v2173_v18 }
 0x21a   : > { %v2228_v5 = vmax.f32 %v2220_v57, 0.0  ;;  %v2229_v6 = vmax.f32 %v2221_v58, 0.0  ;;  %v2230_v7 = vmax.f32 %v2222_v59, 0.0  ;;  %v2231_v10 = vmax.f32 %v2223_v60, 0.0 }
 0x21b   : > { %v2232_v19 = vmax.f32 %v2224_v62, 0.0  ;;  %v2233_v22 = vmax.f32 %v2225_v63, 0.0  ;;  %v2234_v36 = vmax.f32 %v2226_v0, 0.0  ;;  %v2235_v23 = vmax.f32 %v2227_v3, 0.0 }
 0x21c   : > { %v2605_v11 = vpack.c.bf16 %v2229_v6, %v2228_v5  ;;  %v2606_v12 = vpack.c.bf16 %v2231_v10, %v2230_v7 }
 0x21d   : > { %v2607_v13 = vpack.c.bf16 %v2233_v22, %v2232_v19  ;;  %v2608_v14 = vpack.c.bf16 %v2235_v23, %v2234_v36 }
 0x21e   : > { %2260 = vst [vmem:[%s177_s11] sm:$0xff] %v2605_v11  ;;  %2261 = vst [vmem:[%s177_s11 + $0x8] sm:$0xff] %v2606_v12 }
 0x21f   : > { %2262 = vst [vmem:[%s177_s11 + $0x10] sm:$0xff] %v2607_v13  ;;  %2263 = vst [vmem:[%s177_s11 + $0x18] sm:$0xff] %v2608_v14 }
 0x220 PF: > { %s13_s12 = sadd.s32 1, %s3009_s12  }
 0x221   : > { %p10_p4 = scmp.ge.s32.totalorder %s13_s12, 4  }
 0x223   :  { %12 = sbr.rel (!%p10_p4) target bundleno = 1 (0x1), region = 62 }

// kernel: generator_forward.18
= control target key start
LH: loop header
LB: loop body
LE: loop exit
PB: predicated region body
PF: predicated region fallthrough
CT: control target
= control target key end

     0   :  { %s1364_s12 = smov 0   ;;  %s1721_s0 = inlined_call_operand.vmem [shape: bf16[128,512], index: 0, kind: input, shape index: {}]   ;;  %s1722_s1 = inlined_call_operand.vmem [shape: bf16[512,256], index: 1, kind: input, shape index: {}]   ;;  %s1723_s2 = inlined_call_operand.vmem [shape: f32[1,256], index: 2, kind: input, shape index: {}]   ;;  %s1724_s3 = inlined_call_operand.vmem [shape: bf16[128,256], index: 3, kind: output, shape index: {}]  }
   0x1 LB: > { %s1093_s13 = sadd.s32 4294967295, %s1341_s12   ;;  %p1097_p0 = scmp.ge.s32.totalorder %s1341_s12, 1  ;;  %s1341_s12 = sphi %s1364_s12, %s13_s12  }
   0x2   : > { %p139_p1 = scmp.lt.s32.totalorder %s1341_s12, 3 }
   0x4   : > { %p140_p2 = pnand %p1097_p0, %p139_p1 }
   0x5   : > { %s1098_s24 = sshll.u32 (!%p140_p2), %s1093_s13, 3 }
   0x6   : > { %143 = sbr.rel (%p140_p2) target bundleno = 858 (0x35a), region = 32  ;;  %p166_p3 = scmp.lt.s32.totalorder (!%p140_p2), %s1098_s24, 15 }
   0xb   : > { %v1213_v0 = vld [vmem:[%s1722_s1 + $0x74] ss:$8 sps:$4 sm:$0xff]   ;;  %v1217_v2 = vld [vmem:[%s1722_s1 + $0x70] ss:$8 sps:$4 sm:$0xff]   ;;  %v1219_v4 = vld [vmem:[%s1722_s1 + $0x64] ss:$8 sps:$4 sm:$0xff]  }
   0xc   : > { %v1215_v1 = vld [vmem:[%s1722_s1 + $0x174] ss:$8 sps:$4 sm:$0xff]   ;;  %671 = vmatprep.subr.bf16.mxu0 %v1213_v0  ;;  %v1218_v3 = vld [vmem:[%s1722_s1 + $0x170] ss:$8 sps:$4 sm:$0xff]   ;;  %v1221_v5 = vld [vmem:[%s1722_s1 + $0x164] ss:$8 sps:$4 sm:$0xff]  }
   0xd   : > { %744 = vmatprep.subr.bf16.mxu1 %v1215_v1  ;;  %672 = vmatpush1.bf16.msra.mxu0 %v1217_v2  ;;  %v1223_v6 = vld [vmem:[%s1722_s1 + $0x60] ss:$8 sps:$4 sm:$0xff]   ;;  %v1225_v8 = vld [vmem:[%s1722_s1 + $0x54] ss:$8 sps:$4 sm:$0xff]   ;;  %v1229_v10 = vld [vmem:[%s1722_s1 + $0x50] ss:$8 sps:$4 sm:$0xff]  }
   0xe   : > { %745 = vmatpush1.bf16.msra.mxu1 %v1218_v3  ;;  %673 = vmatprep.subr.bf16.mxu0 %v1219_v4  ;;  %v1224_v7 = vld [vmem:[%s1722_s1 + $0x160] ss:$8 sps:$4 sm:$0xff]   ;;  %v1227_v9 = vld [vmem:[%s1722_s1 + $0x154] ss:$8 sps:$4 sm:$0xff]   ;;  %v1230_v11 = vld [vmem:[%s1722_s1 + $0x150] ss:$8 sps:$4 sm:$0xff]  }
   0xf   : > { %746 = vmatprep.subr.bf16.mxu1 %v1221_v5  ;;  %v1231_v12 = vld [vmem:[%s1722_s1 + $0x44] ss:$8 sps:$4 sm:$0xff]   ;;  %v1235_v14 = vld [vmem:[%s1722_s1 + $0x40] ss:$8 sps:$4 sm:$0xff]   ;;  %v1237_v16 = vld [vmem:[%s1722_s1 + $0x34] ss:$8 sps:$4 sm:$0xff]  }
  0x10   : > { %v1233_v13 = vld [vmem:[%s1722_s1 + $0x144] ss:$8 sps:$4 sm:$0xff]   ;;  %v1236_v15 = vld [vmem:[%s1722_s1 + $0x140] ss:$8 sps:$4 sm:$0xff]   ;;  %v1239_v17 = vld [vmem:[%s1722_s1 + $0x134] ss:$8 sps:$4 sm:$0xff]  }
  0x11   : > { %674 = vmatpush1.bf16.msra.mxu0 %v1223_v6  ;;  %v1241_v18 = vld [vmem:[%s1722_s1 + $0x30] ss:$8 sps:$4 sm:$0xff]   ;;  %v1243_v20 = vld [vmem:[%s1722_s1 + $0x24] ss:$8 sps:$4 sm:$0xff]   ;;  %v1247_v22 = vld [vmem:[%s1722_s1 + $0x20] ss:$8 sps:$4 sm:$0xff]  }
  0x12   : > { %747 = vmatpush1.bf16.msra.mxu1 %v1224_v7  ;;  %675 = vmatprep.subr.bf16.mxu0 %v1225_v8  ;;  %v1242_v19 = vld [vmem:[%s1722_s1 + $0x130] ss:$8 sps:$4 sm:$0xff]   ;;  %v1245_v21 = vld [vmem:[%s1722_s1 + $0x124] ss:$8 sps:$4 sm:$0xff]   ;;  %v1248_v23 = vld [vmem:[%s1722_s1 + $0x120] ss:$8 sps:$4 sm:$0xff]  }
  0x13   : > { %748 = vmatprep.subr.bf16.mxu1 %v1227_v9  ;;  %v1249_v24 = vld [vmem:[%s1722_s1 + $0x14] ss:$8 sps:$4 sm:$0xff]   ;;  %v1253_v26 = vld [vmem:[%s1722_s1 + $0x10] ss:$8 sps:$4 sm:$0xff]   ;;  %v1255_v28 = vld [vmem:[%s1722_s1 + $0x4] ss:$8 sps:$4 sm:$0xff]  }
  0x14   : > { %v1251_v25 = vld [vmem:[%s1722_s1 + $0x114] ss:$8 sps:$4 sm:$0xff]   ;;  %v1254_v27 = vld [vmem:[%s1722_s1 + $0x110] ss:$8 sps:$4 sm:$0xff]   ;;  %v1257_v29 = vld [vmem:[%s1722_s1 + $0x104] ss:$8 sps:$4 sm:$0xff]  }
  0x15   : > { %676 = vmatpush1.bf16.msra.mxu0 %v1229_v10  ;;  %v1259_v30 = vld [vmem:[%s1722_s1] ss:$8 sps:$4 sm:$0xff]   ;;  %v1261_v32 = vld [vmem:[%s1722_s1 + $0xf4] ss:$8 sps:$4 sm:$0xff]   ;;  %v1265_v34 = vld [vmem:[%s1722_s1 + $0xf0] ss:$8 sps:$4 sm:$0xff]  }
  0x16   : > { %749 = vmatpush1.bf16.msra.mxu1 %v1230_v11  ;;  %677 = vmatprep.subr.bf16.mxu0 %v1231_v12  ;;  %v1260_v31 = vld [vmem:[%s1722_s1 + $0x100] ss:$8 sps:$4 sm:$0xff]   ;;  %v1263_v33 = vld [vmem:[%s1722_s1 + $0x1f4] ss:$8 sps:$4 sm:$0xff]   ;;  %v1266_v35 = vld [vmem:[%s1722_s1 + $0x1f0] ss:$8 sps:$4 sm:$0xff]  }
  0x17   : > { %750 = vmatprep.subr.bf16.mxu1 %v1233_v13  ;;  %v1267_v36 = vld [vmem:[%s1722_s1 + $0xe4] ss:$8 sps:$4 sm:$0xff]   ;;  %s1726_s24 = smov (!%p166_p3, %s1098_s24), 15  ;;  %v1271_v38 = vld [vmem:[%s1722_s1 + $0xe0] ss:$8 sps:$4 sm:$0xff]   ;;  %vm860_vm0 = vcmask 523264  }
  0x18   : > { %v1269_v37 = vld [vmem:[%s1722_s1 + $0x1e4] ss:$8 sps:$4 sm:$0xff]   ;;  %v1272_v39 = vld [vmem:[%s1722_s1 + $0x1e0] ss:$8 sps:$4 sm:$0xff]   ;;  %v1273_v40 = vld [vmem:[%s1722_s1 + $0xd4] ss:$8 sps:$4 sm:$0xff]  }
  0x19   : > { %678 = vmatpush1.bf16.msra.mxu0 %v1235_v14  ;;  %v1275_v41 = vld [vmem:[%s1722_s1 + $0x1d4] ss:$8 sps:$4 sm:$0xff]   ;;  %s1194_s23 = sshll.u32 %s1726_s24, 4  ;;  %v1277_v42 = vld [vmem:[%s1722_s1 + $0xd0] ss:$8 sps:$4 sm:$0xff]   ;;  %s1195_s25 = sshll.u32 %s1726_s24, 3 }
  0x1a   : > { %751 = vmatpush1.bf16.msra.mxu1 %v1236_v15  ;;  %679 = vmatprep.subr.bf16.mxu0 %v1237_v16  ;;  %v1278_v43 = vld [vmem:[%s1722_s1 + $0x1d0] ss:$8 sps:$4 sm:$0xff]   ;;  %v1279_v44 = vld [vmem:[%s1722_s1 + $0xc4] ss:$8 sps:$4 sm:$0xff]   ;;  %s1515_s13 = scalar_lea.vmem %s1721_s0, %s1194_s23  ;;  %v1283_v46 = vld [vmem:[%s1722_s1 + $0xc0] ss:$8 sps:$4 sm:$0xff]   ;;  %v261_v16 = vlaneseq  ;;  %s177_s28 = scalar_lea.vmem %s1724_s3, %s1195_s25 }
  0x1b   : > { %752 = vmatprep.subr.bf16.mxu1 %v1239_v17  ;;  %v1281_v45 = vld [vmem:[%s1722_s1 + $0x1c4] ss:$8 sps:$4 sm:$0xff]   ;;  %v1284_v47 = vld [vmem:[%s1722_s1 + $0x1c0] ss:$8 sps:$4 sm:$0xff]   ;;  %v1285_v48 = vld [vmem:[%s1722_s1 + $0xb4] ss:$8 sps:$4 sm:$0xff]  }
  0x1c   : > { %v1311_v49 = vld [vmem:[%s1515_s13 + $0x4] ss:$16 sps:$4 sm:$0xff]   ;;  %v1314_v51 = vld [vmem:[%s1515_s13 + $0xc] ss:$16 sps:$4 sm:$0xff]   ;;  %v1289_v52 = vld [vmem:[%s1722_s1 + $0xb0] ss:$8 sps:$4 sm:$0xff]  }
  0x1d   : > { %680 = vmatpush1.bf16.msra.mxu0 %v1241_v18  ;;  %v1287_v50 = vld [vmem:[%s1722_s1 + $0x1b4] ss:$8 sps:$4 sm:$0xff]   ;;  %703 = vmatprep.mubr.bf16.mxu0 %v1311_v49  ;;  %v1290_v53 = vld [vmem:[%s1722_s1 + $0x1b0] ss:$8 sps:$4 sm:$0xff]   ;;  %v1291_v54 = vld [vmem:[%s1722_s1 + $0xa4] ss:$8 sps:$4 sm:$0xff]  }
  0x1e   : > { %753 = vmatpush1.bf16.msra.mxu1 %v1242_v19  ;;  %681 = vmatprep.subr.bf16.mxu0 %v1243_v20  ;;  %v1293_v55 = vld [vmem:[%s1722_s1 + $0x1a4] ss:$8 sps:$4 sm:$0xff]   ;;  %v1295_v56 = vld [vmem:[%s1722_s1 + $0xa0] ss:$8 sps:$4 sm:$0xff]   ;;  %v1297_v58 = vld [vmem:[%s1722_s1 + $0x94] ss:$8 sps:$4 sm:$0xff]  }
  0x1f   : > { %754 = vmatprep.subr.bf16.mxu1 %v1245_v21  ;;  %776 = vmatprep.mubr.bf16.mxu1 %v1314_v51  ;;  %v1296_v57 = vld [vmem:[%s1722_s1 + $0x1a0] ss:$8 sps:$4 sm:$0xff]   ;;  %v1299_v59 = vld [vmem:[%s1722_s1 + $0x194] ss:$8 sps:$4 sm:$0xff]   ;;  %v1301_v60 = vld [vmem:[%s1722_s1 + $0x90] ss:$8 sps:$4 sm:$0xff]  }
  0x20   : > { %v1302_v61 = vld [vmem:[%s1722_s1 + $0x190] ss:$8 sps:$4 sm:$0xff]   ;;  %v1303_v62 = vld [vmem:[%s1722_s1 + $0x84] ss:$8 sps:$4 sm:$0xff]   ;;  %v1307_v0 = vld [vmem:[%s1722_s1 + $0x80] ss:$8 sps:$4 sm:$0xff]  }
  0x21   : > { %682 = vmatpush1.bf16.msra.mxu0 %v1247_v22  ;;  %v1305_v63 = vld [vmem:[%s1722_s1 + $0x184] ss:$8 sps:$4 sm:$0xff]   ;;  %v1308_v1 = vld [vmem:[%s1722_s1 + $0x180] ss:$8 sps:$4 sm:$0xff]   ;;  %v262_v21 = vshrl.u32 %v261_v16, 7 }
  0x22   : > { %755 = vmatpush1.bf16.msra.mxu1 %v1248_v23  ;;  %683 = vmatprep.subr.bf16.mxu0 %v1249_v24  ;;  %v1309_v2 = vld [vmem:[%s1515_s13] ss:$16 sps:$4 sm:$0xff]   ;;  %v1312_v3 = vld [vmem:[%s1515_s13 + $0x8] ss:$16 sps:$4 sm:$0xff]   ;;  %v1315_v4 = vld [vmem:[%s1515_s13 + $0x24] ss:$16 sps:$4 sm:$0xff]  }
  0x23   : > { %756 = vmatprep.subr.bf16.mxu1 %v1251_v25  ;;  %v1317_v5 = vld [vmem:[%s1515_s13 + $0x2c] ss:$16 sps:$4 sm:$0xff]   ;;  %v1319_v6 = vld [vmem:[%s1515_s13 + $0x20] ss:$16 sps:$4 sm:$0xff]   ;;  %v1320_v7 = vld [vmem:[%s1515_s13 + $0x28] ss:$16 sps:$4 sm:$0xff]  }
  0x24   : > { %v1321_v8 = vld [vmem:[%s1515_s13 + $0x44] ss:$16 sps:$4 sm:$0xff]   ;;  %v1323_v9 = vld [vmem:[%s1515_s13 + $0x4c] ss:$16 sps:$4 sm:$0xff]   ;;  %v1325_v10 = vld [vmem:[%s1515_s13 + $0x40] ss:$16 sps:$4 sm:$0xff]  }
  0x25   : > { %684 = vmatpush1.bf16.msra.mxu0 %v1253_v26  ;;  %v1326_v11 = vld [vmem:[%s1515_s13 + $0x48] ss:$16 sps:$4 sm:$0xff]   ;;  %v1327_v12 = vld [vmem:[%s1515_s13 + $0x64] ss:$16 sps:$4 sm:$0xff]   ;;  %v1329_v13 = vld [vmem:[%s1515_s13 + $0x6c] ss:$16 sps:$4 sm:$0xff]  }
  0x26   : > { %757 = vmatpush1.bf16.msra.mxu1 %v1254_v27  ;;  %685 = vmatprep.subr.bf16.mxu0 %v1255_v28  ;;  %v1331_v14 = vld [vmem:[%s1515_s13 + $0x60] ss:$16 sps:$4 sm:$0xff]   ;;  %v1332_v15 = vld [vmem:[%s1515_s13 + $0x68] ss:$16 sps:$4 sm:$0xff]   ;;  %v1590_v26 = vsub.s32 0, %v262_v21  ;;  %v267_v28 = vsub.s32 1, %v262_v21 }
  0x27   : > { %758 = vmatprep.subr.bf16.mxu1 %v1257_v29  ;;  %v259_v27 = vld [vmem:[%s1723_s2] sm:$0x3]  ;;  %s1343_s13 = smov 64  }
  0x29   : > { %686 = vmatpush1.bf16.msra.mxu0 %v1259_v30 }
  0x2a   : > { %759 = vmatpush1.bf16.msra.mxu1 %v1260_v31  ;;  %687 = vmatprep.subr.bf16.mxu0 %v1261_v32 }
  0x2b   : > { %760 = vmatprep.subr.bf16.mxu1 %v1263_v33  ;;  %v264_v33 = vrot.slane %v259_v27, %v1590_v26 }
  0x2d   : > { %688 = vmatpush2.bf16.msra.mxu0 %v1265_v34  ;;  %v268_v34 = vrot.slane %v259_v27, %v267_v28 }
  0x2e   : > { %761 = vmatpush2.bf16.msra.mxu1 %v1266_v35  ;;  %689 = vmatprep.subr.bf16.mxu0 %v1267_v36 }
  0x2f   : > { %762 = vmatprep.subr.bf16.mxu1 %v1269_v37 }
  0x31   : > { %690 = vmatpush2.bf16.msra.mxu0 %v1271_v38 }
  0x32   : > { %763 = vmatpush2.bf16.msra.mxu1 %v1272_v39  ;;  %691 = vmatprep.subr.bf16.mxu0 %v1273_v40 }
  0x33   : > { %764 = vmatprep.subr.bf16.mxu1 %v1275_v41 }
  0x35   : > { %692 = vmatpush2.bf16.msra.mxu0 %v1277_v42 }
  0x36   : > { %765 = vmatpush2.bf16.msra.mxu1 %v1278_v43  ;;  %693 = vmatprep.subr.bf16.mxu0 %v1279_v44 }
  0x37   : > { %766 = vmatprep.subr.bf16.mxu1 %v1281_v45 }
  0x39   : > { %694 = vmatpush2.bf16.msra.mxu0 %v1283_v46 }
  0x3a   : > { %767 = vmatpush2.bf16.msra.mxu1 %v1284_v47  ;;  %695 = vmatprep.subr.bf16.mxu0 %v1285_v48 }
  0x3b   : > { %768 = vmatprep.subr.bf16.mxu1 %v1287_v50 }
  0x3d   : > { %696 = vmatpush2.bf16.msra.mxu0 %v1289_v52 }
  0x3e   : > { %769 = vmatpush2.bf16.msra.mxu1 %v1290_v53  ;;  %697 = vmatprep.subr.bf16.mxu0 %v1291_v54 }
  0x3f   : > { %770 = vmatprep.subr.bf16.mxu1 %v1293_v55 }
  0x41   : > { %698 = vmatpush2.bf16.msra.mxu0 %v1295_v56 }
  0x42   : > { %771 = vmatpush2.bf16.msra.mxu1 %v1296_v57  ;;  %699 = vmatprep.subr.bf16.mxu0 %v1297_v58 }
  0x43   : > { %772 = vmatprep.subr.bf16.mxu1 %v1299_v59 }
  0x45   : > { %700 = vmatpush2.bf16.msra.mxu0 %v1301_v60 }
  0x46   : > { %773 = vmatpush2.bf16.msra.mxu1 %v1302_v61  ;;  %701 = vmatprep.subr.bf16.mxu0 %v1303_v62 }
  0x47   : > { %774 = vmatprep.subr.bf16.mxu1 %v1305_v63 }
  0x49   : > { %702 = vmatpush2.bf16.msra.mxu0 %v1307_v0 }
  0x4a   : > { %775 = vmatpush2.bf16.msra.mxu1 %v1308_v1 }
  0x4c   : > { %704 = vmatmul.mubr.bf16.vlgmr.msra.gmra.mxu0 %v1309_v2 }
  0x4d   : > { %777 = vmatmul.mubr.bf16.vlgmr.msra.gmra.mxu1 %v1312_v3  ;;  %713 = vmatprep.mubr.bf16.mxu0 %v1315_v4 }
  0x4e   : > { %786 = vmatprep.mubr.bf16.mxu1 %v1317_v5 }
  0x54   : > { %714 = vmatmul.mubr.bf16.gmra.mxu0 %v1319_v6 }
  0x55   : > { %787 = vmatmul.mubr.bf16.gmra.mxu1 %v1320_v7  ;;  %723 = vmatprep.mubr.bf16.mxu0 %v1321_v8 }
  0x56   : > { %796 = vmatprep.mubr.bf16.mxu1 %v1323_v9 }
  0x5c   : > { %724 = vmatmul.mubr.bf16.gmra.mxu0 %v1325_v10 }
  0x5d   : > { %797 = vmatmul.mubr.bf16.gmra.mxu1 %v1326_v11  ;;  %733 = vmatprep.mubr.bf16.mxu0 %v1327_v12 }
  0x5e   : > { %806 = vmatprep.mubr.bf16.mxu1 %v1329_v13 }
  0x64   : > { %734 = vmatmul.mubr.bf16.gmra.mxu0 %v1331_v14 }
  0x65   : > { %807 = vmatmul.mubr.bf16.gmra.mxu1 %v1332_v15 }
 0x10c   : > { %v705_v17 = vpop.f32.mrf.mxu0 }
 0x10d   : > { %v778_v18 = vpop.f32.mrf.mxu1  ;;  %v706_v41 = vadd.f32 %v705_v17, %v264_v33 }
 0x10e   : > { %v707_v19 = vpop.f32.mrf.mxu0 }
 0x10f   : > { %v780_v20 = vpop.f32.mrf.mxu1  ;;  %v708_v43 = vadd.f32 %v707_v19, %v268_v34  ;;  %v1600_v53 = vadd.f32 %v778_v18, %v706_v41 }
 0x110   : > { %v709_v22 = vpop.f32.mrf.mxu0 }
 0x111   : > { %v782_v23 = vpop.f32.mrf.mxu1  ;;  %v710_v37 = vadd.f32 %v709_v22, %v264_v33  ;;  %v1604_v56 = vadd.f32 %v780_v20, %v708_v43 }
 0x112   : > { %v711_v24 = vpop.f32.mrf.mxu0 }
 0x113   : > { %v784_v25 = vpop.f32.mrf.mxu1  ;;  %v712_v38 = vadd.f32 %v711_v24, %v268_v34  ;;  %v1596_v47 = vadd.f32 %v782_v23, %v710_v37 }
 0x114   : > { %v715_v29 = vpop.f32.mrf.mxu0 }
 0x115   : > { %v788_v30 = vpop.f32.mrf.mxu1  ;;  %v716_v42 = vadd.f32 %v715_v29, %v264_v33  ;;  %v1598_v49 = vadd.f32 %v784_v25, %v712_v38  ;;  %v817_v60 = vadd.f32 %v1596_v47, %v1600_v53 }
 0x116   : > { %v717_v31 = vpop.f32.mrf.mxu0 }
 0x117   : > { %v790_v32 = vpop.f32.mrf.mxu1  ;;  %v718_v44 = vadd.f32 %v717_v31, %v268_v34  ;;  %v1602_v54 = vadd.f32 %v788_v30, %v716_v42  ;;  %v830_v0 = vadd.f32 %v1598_v49, %v1604_v56 }
 0x118   : > { %v719_v35 = vpop.f32.mrf.mxu0 }
 0x119   : > { %v792_v36 = vpop.f32.mrf.mxu1  ;;  %v720_v48 = vadd.f32 %v719_v35, %v264_v33  ;;  %v1606_v57 = vadd.f32 %v790_v32, %v718_v44  ;;  %v818_v4 = vadd.f32 %v817_v60, %v1602_v54 }
 0x11a   : > { %v721_v39 = vpop.f32.mrf.mxu0 }
 0x11b   : > { %v794_v40 = vpop.f32.mrf.mxu1  ;;  %v722_v50 = vadd.f32 %v721_v39, %v268_v34  ;;  %v1610_v61 = vadd.f32 %v792_v36, %v720_v48  ;;  %v831_v7 = vadd.f32 %v830_v0, %v1606_v57 }
 0x11c   : > { %v725_v45 = vpop.f32.mrf.mxu0 }
 0x11d   : > { %v798_v46 = vpop.f32.mrf.mxu1  ;;  %v726_v55 = vadd.f32 %v725_v45, %v264_v33  ;;  %v1614_v1 = vadd.f32 %v794_v40, %v722_v50  ;;  %v819_v10 = vadd.f32 %v818_v4, %v1610_v61 }
 0x11e   : > { %v727_v51 = vpop.f32.mrf.mxu0 }
 0x11f   : > { %v800_v52 = vpop.f32.mrf.mxu1  ;;  %v728_v62 = vadd.f32 %v727_v51, %v268_v34  ;;  %v1617_v5 = vadd.f32 %v798_v46, %v726_v55  ;;  %v832_v14 = vadd.f32 %v831_v7, %v1614_v1 }
 0x120   : > { %v729_v58 = vpop.f32.mrf.mxu0 }
 0x121   : > { %v802_v59 = vpop.f32.mrf.mxu1  ;;  %v730_v63 = vadd.f32 %v729_v58, %v264_v33  ;;  %v801_v11 = vadd.f32 %v800_v52, %v728_v62  ;;  %v820_v17 = vadd.f32 %v819_v10, %v1617_v5 }
 0x122   : > { %v731_v2 = vpop.f32.mrf.mxu0 }
 0x123   : > { %v804_v3 = vpop.f32.mrf.mxu1  ;;  %v732_v6 = vadd.f32 %v731_v2, %v268_v34  ;;  %v1621_v12 = vadd.f32 %v802_v59, %v730_v63  ;;  %v833_v23 = vadd.f32 %v832_v14, %v801_v11 }
 0x124   : > { %v735_v8 = vpop.f32.mrf.mxu0 }
 0x125   : > { %v808_v9 = vpop.f32.mrf.mxu1  ;;  %v736_v13 = vadd.f32 %v735_v8, %v264_v33  ;;  %v805_v18 = vadd.f32 %v804_v3, %v732_v6  ;;  %v821_v24 = vadd.f32 %v820_v17, %v1621_v12 }
 0x126   : > { %v737_v15 = vpop.f32.mrf.mxu0 }
 0x127   : > { %v810_v16 = vpop.f32.mrf.mxu1  ;;  %v1625_v19 = vadd.f32 %v808_v9, %v736_v13  ;;  %v738_v20 = vadd.f32 %v737_v15, %v268_v34  ;;  %v834_v29 = vadd.f32 %v833_v23, %v805_v18 }
 0x128   : > { %v739_v21 = vpop.f32.mrf.mxu0 }
 0x129   : > { %v812_v22 = vpop.f32.mrf.mxu1  ;;  %v811_v25 = vadd.f32 %v810_v16, %v738_v20  ;;  %v740_v27 = vadd.f32 %v739_v21, %v264_v33  ;;  %v822_v30 = vadd.f32 %v821_v24, %v1625_v19 }
 0x12a   : > { %v741_v28 = vpop.f32.mrf.mxu0 }
 0x12b   : > { %v1629_v31 = vadd.f32 %v812_v22, %v740_v27  ;;  %v742_v32 = vadd.f32 %v741_v28, %v268_v34  ;;  %v814_v35 = vpop.f32.mrf.mxu1  ;;  %v835_v36 = vadd.f32 %v834_v29, %v811_v25 }
 0x12d   : > { %v823_v37 = vadd.f32 %v822_v30, %v1629_v31  ;;  %v815_v38 = vadd.f32 %v814_v35, %v742_v32 }
 0x12f   : > { %v824_v39 = vrot.slane %v823_v37, 4  ;;  %v836_v40 = vadd.f32 %v835_v36, %v815_v38 }
 0x131   : > { %v825_v41 = vadd.f32 %v824_v39, %v823_v37  ;;  %v837_v42 = vrot.slane %v836_v40, 4 }
 0x133   : > { %v838_v43 = vadd.f32 %v837_v42, %v836_v40  ;;  %v826_v44 = vrot.slane %v825_v41, 2 }
 0x135   : > { %v839_v45 = vrot.slane %v838_v43, 2  ;;  %v827_v33 = vadd.f32 %v826_v44, %v825_v41 }
 0x137   : > { %v828_v46 = vrot.slane %v827_v33, 1  ;;  %v840_v48 = vadd.f32 %v839_v45, %v838_v43 }
 0x139   : > { %v829_v50 = vadd.f32 %v828_v46, %v827_v33  ;;  %v841_v51 = vrot.slane %v840_v48, 1 }
 0x13b   : > { %844 = vrot.lane.b32.xlu0 %v829_v50, %s1343_s13  ;;  %v842_v34 = vadd.f32 %v841_v51, %v840_v48 }
 0x13f   : > { %850 = vrot.lane.b32.xlu0 %v842_v34, %s1343_s13 }
 0x1ad   : > { %v845_v52 = vpop.permute.xlu0 %844 }
 0x1ae   : > { %v847_v55 = vadd.f32 %v845_v52, %v829_v50 }
 0x1b0   : > { %v848_v58 = vadd.f32 %v847_v55, %v842_v34 }
 0x1b1   : > { %v851_v59 = vpop.permute.xlu0 %850 }
 0x1b2   : > { %v853_v60 = vadd.f32 %v851_v59, %v848_v58 }
 0x1b4   : > { %v855_v62 = vmul.f32 0.00390625, %v853_v60 }
 0x1b6   : > { %857 = vrot.lane.b32.xlu1 %v855_v62, %s1343_s13 }
 0x228   : > { %v858_v63 = vpop.permute.xlu1 %857 }
 0x229   : > { %v861_v0 = vsel %vm860_vm0, %v855_v62, %v858_v63 }
 0x22a   : > { %v865_v2 = vrot.slane %v861_v0, %v1590_v26 }
 0x22c   : > { %v1638_v3 = vsub.f32 %v1604_v56, %v865_v2  ;;  %v1641_v4 = vsub.f32 %v1598_v49, %v865_v2  ;;  %v1644_v6 = vsub.f32 %v1606_v57, %v865_v2  ;;  %v1647_v7 = vsub.f32 %v1614_v1, %v865_v2 }
 0x22d   : > { %v1653_v10 = vsub.f32 %v801_v11, %v865_v2  ;;  %v1658_v49 = vsub.f32 %v1600_v53, %v865_v2  ;;  %v1661_v57 = vsub.f32 %v1596_v47, %v865_v2  ;;  %v1664_v1 = vsub.f32 %v1602_v54, %v865_v2 }
 0x22e   : > { %v883_v8 = vmul.f32 %v1638_v3, %v1638_v3  ;;  %v885_v9 = vmul.f32 %v1641_v4, %v1641_v4  ;;  %v887_v56 = vmul.f32 %v1644_v6, %v1644_v6  ;;  %v1666_v14 = vsub.f32 %v805_v18, %v865_v2 }
 0x22f   : > { %v889_v15 = vmul.f32 %v1647_v7, %v1647_v7  ;;  %v1671_v16 = vsub.f32 %v1610_v61, %v865_v2  ;;  %v882_v17 = vmul.f32 %v1658_v49, %v1658_v49  ;;  %v884_v53 = vmul.f32 %v1661_v57, %v1661_v57 }
 0x230   : > { %v911_v13 = vadd.f32 %v885_v9, %v883_v8  ;;  %v1677_v47 = vsub.f32 %v811_v25, %v865_v2  ;;  %v891_v54 = vmul.f32 %v1653_v10, %v1653_v10  ;;  %v874_v20 = vsub.f32 %v1617_v5, %v865_v2 }
 0x231   : > { %v886_v21 = vmul.f32 %v1664_v1, %v1664_v1  ;;  %v898_v22 = vadd.f32 %v884_v53, %v882_v17  ;;  %v1684_v61 = vsub.f32 %v815_v38, %v865_v2  ;;  %v893_v23 = vmul.f32 %v1666_v14, %v1666_v14 }
 0x232   : > { %v912_v11 = vadd.f32 %v911_v13, %v887_v56  ;;  %v876_v27 = vsub.f32 %v1621_v12, %v865_v2  ;;  %v888_v25 = vmul.f32 %v1671_v16, %v1671_v16  ;;  %v895_v29 = vmul.f32 %v1677_v47, %v1677_v47 }
 0x233   : > { %v899_v28 = vadd.f32 %v898_v22, %v886_v21  ;;  %v878_v30 = vsub.f32 %v1625_v19, %v865_v2  ;;  %v890_v32 = vmul.f32 %v874_v20, %v874_v20  ;;  %v897_v36 = vmul.f32 %v1684_v61, %v1684_v61 }
 0x234   : > { %v913_v18 = vadd.f32 %v912_v11, %v889_v15  ;;  %v880_v38 = vsub.f32 %v1629_v31, %v865_v2  ;;  %v892_v39 = vmul.f32 %v876_v27, %v876_v27 }
 0x235   : > { %v900_v35 = vadd.f32 %v899_v28, %v888_v25  ;;  %v894_v41 = vmul.f32 %v878_v30, %v878_v30 }
 0x236   : > { %v914_v24 = vadd.f32 %v913_v18, %v891_v54  ;;  %v896_v44 = vmul.f32 %v880_v38, %v880_v38 }
 0x237   : > { %v901_v12 = vadd.f32 %v900_v35, %v890_v32 }
 0x238   : > { %v915_v5 = vadd.f32 %v914_v24, %v893_v23 }
 0x239   : > { %v902_v42 = vadd.f32 %v901_v12, %v892_v39 }
 0x23a   : > { %v916_v37 = vadd.f32 %v915_v5, %v895_v29 }
 0x23b   : > { %v903_v45 = vadd.f32 %v902_v42, %v894_v41 }
 0x23c   : > { %v917_v40 = vadd.f32 %v916_v37, %v897_v36 }
 0x23d   : > { %v904_v46 = vadd.f32 %v903_v45, %v896_v44 }
 0x23e   : > { %v918_v43 = vrot.slane %v917_v40, 4 }
 0x23f   : > { %v905_v19 = vrot.slane %v904_v46, 4 }
 0x240   : > { %v919_v33 = vadd.f32 %v918_v43, %v917_v40 }
 0x241   : > { %v906_v51 = vadd.f32 %v905_v19, %v904_v46 }
 0x242   : > { %v920_v48 = vrot.slane %v919_v33, 2 }
 0x243   : > { %v907_v52 = vrot.slane %v906_v51, 2 }
 0x244   : > { %v921_v50 = vadd.f32 %v920_v48, %v919_v33 }
 0x245   : > { %v908_v58 = vadd.f32 %v907_v52, %v906_v51 }
 0x246   : > { %v922_v34 = vrot.slane %v921_v50, 1 }
 0x247   : > { %v909_v31 = vrot.slane %v908_v58, 1 }
 0x248   : > { %v923_v55 = vadd.f32 %v922_v34, %v921_v50 }
 0x249   : > { %v910_v59 = vadd.f32 %v909_v31, %v908_v58 }
 0x24a   : > { %931 = vrot.lane.b32.xlu0 %v923_v55, %s1343_s13 }
 0x24b   : > { %925 = vrot.lane.b32.xlu1 %v910_v59, %s1343_s13 }
 0x2bc   : > { %v932_v0 = vpop.permute.xlu0 %931 }
 0x2bd   : > { %v926_v60 = vpop.permute.xlu1 %925 }
 0x2be   : > { %v928_v62 = vadd.f32 %v926_v60, %v910_v59 }
 0x2c0   : > { %v929_v63 = vadd.f32 %v928_v62, %v923_v55 }
 0x2c2   : > { %v934_v2 = vadd.f32 %v932_v0, %v929_v63 }
 0x2c4   : > { %v935_v8 = vmul.f32 0.00390625, %v934_v2 }
 0x2c6   : > { %937 = vrot.lane.b32.xlu1 %v935_v8, %s1343_s13 }
 0x338   : > { %v938_v9 = vpop.permute.xlu1 %937 }
 0x339   : > { %v940_v56 = vsel %vm860_vm0, %v935_v8, %v938_v9 }
 0x33a   : > { %v941_v13 = vadd.f32 1e-05, %v940_v56 }
 0x33c   : > { %1333 = vrsqrt.f32 %v941_v13 }
 0x349   : > { %v1334_v15 = vpop.eup %1333 }
 0x34a   : > { %v946_v11 = vrot.slane %v1334_v15, %v1590_v26 }
 0x34c   : > { %v947_v17 = vmul.f32 %v946_v11, %v1658_v49  ;;  %v948_v53 = vmul.f32 %v946_v11, %v1638_v3  ;;  %v949_v54 = vmul.f32 %v946_v11, %v1661_v57  ;;  %v950_v18 = vmul.f32 %v946_v11, %v1641_v4 }
 0x34d   : > { %v951_v21 = vmul.f32 %v946_v11, %v1664_v1  ;;  %v952_v22 = vmul.f32 %v946_v11, %v1644_v6  ;;  %v953_v23 = vmul.f32 %v946_v11, %v1671_v16  ;;  %v954_v24 = vmul.f32 %v946_v11, %v1647_v7 }
 0x34e   : > { %v955_v25 = vmul.f32 %v946_v11, %v874_v20  ;;  %v956_v26 = vmul.f32 %v946_v11, %v1653_v10  ;;  %v957_v28 = vmul.f32 %v946_v11, %v876_v27  ;;  %v958_v49 = vmul.f32 %v946_v11, %v1666_v14 }
 0x34f   : > { %v959_v29 = vmul.f32 %v946_v11, %v878_v30  ;;  %v960_v3 = vmul.f32 %v946_v11, %v1677_v47  ;;  %v961_v57 = vmul.f32 %v946_v11, %v880_v38  ;;  %v962_v4 = vmul.f32 %v946_v11, %v1684_v61 }
 0x350   : > { %v963_v1 = vmax.f32 %v947_v17, 0.0  ;;  %v964_v5 = vmax.f32 %v948_v53, 0.0  ;;  %v965_v6 = vmax.f32 %v949_v54, 0.0  ;;  %v966_v32 = vmax.f32 %v950_v18, 0.0 }
 0x351   : > { %v967_v16 = vmax.f32 %v951_v21, 0.0  ;;  %v968_v35 = vmax.f32 %v952_v22, 0.0  ;;  %v969_v7 = vmax.f32 %v953_v23, 0.0  ;;  %v970_v20 = vmax.f32 %v954_v24, 0.0 }
 0x352   : > { %v971_v36 = vmax.f32 %v955_v25, 0.0  ;;  %v972_v10 = vmax.f32 %v956_v26, 0.0  ;;  %v973_v27 = vmax.f32 %v957_v28, 0.0  ;;  %v974_v37 = vmax.f32 %v958_v49, 0.0 }
 0x353   : > { %v975_v14 = vmax.f32 %v959_v29, 0.0  ;;  %v976_v47 = vmax.f32 %v960_v3, 0.0  ;;  %v977_v61 = vmax.f32 %v961_v57, 0.0  ;;  %v978_v30 = vmax.f32 %v962_v4, 0.0 }
 0x354   : > { %v1196_v38 = vpack.c.bf16 %v964_v5, %v963_v1  ;;  %v1197_v39 = vpack.c.bf16 %v966_v32, %v965_v6  ;;  %v1198_v12 = vpack.c.bf16 %v968_v35, %v967_v16  ;;  %v1199_v40 = vpack.c.bf16 %v970_v20, %v969_v7 }
 0x355   : > { %v1200_v41 = vpack.c.bf16 %v972_v10, %v971_v36  ;;  %v1201_v42 = vpack.c.bf16 %v974_v37, %v973_v27  ;;  %v1202_v43 = vpack.c.bf16 %v976_v47, %v975_v14  ;;  %v1203_v44 = vpack.c.bf16 %v978_v30, %v977_v61 }
 0x356   : > { %1027 = vst [vmem:[%s177_s28] sm:$0xff] %v1196_v38  ;;  %1028 = vst [vmem:[%s177_s28 + $0x8] sm:$0xff] %v1197_v39 }
 0x357   : > { %1029 = vst [vmem:[%s177_s28 + $0x10] sm:$0xff] %v1198_v12  ;;  %1030 = vst [vmem:[%s177_s28 + $0x18] sm:$0xff] %v1199_v40 }
 0x358   : > { %1031 = vst [vmem:[%s177_s28 + $0x20] sm:$0xff] %v1200_v41  ;;  %1032 = vst [vmem:[%s177_s28 + $0x28] sm:$0xff] %v1201_v42 }
 0x359   : > { %1033 = vst [vmem:[%s177_s28 + $0x30] sm:$0xff] %v1202_v43  ;;  %1034 = vst [vmem:[%s177_s28 + $0x38] sm:$0xff] %v1203_v44 }
 0x35a PF: > { %s13_s12 = sadd.s32 1, %s1341_s12  }
 0x35b   : > { %p10_p4 = scmp.ge.s32.totalorder %s13_s12, 4  }
 0x35d   :  { %12 = sbr.rel (!%p10_p4) target bundleno = 1 (0x1), region = 62 }

// kernel: generator_forward.19
= control target key start
LH: loop header
LB: loop body
LE: loop exit
PB: predicated region body
PF: predicated region fallthrough
CT: control target
= control target key end

     0   :  { %s9368_s12 = smov 0   ;;  %s11659_s0 = inlined_call_operand.vmem [shape: bf16[512,3200], index: 0, kind: input, shape index: {}]   ;;  %s11660_s1 = inlined_call_operand.vmem [shape: bf16[3200,128], index: 1, kind: input, shape index: {}]   ;;  %s11661_s2 = inlined_call_operand.vmem [shape: f32[1,128], index: 2, kind: input, shape index: {}]   ;;  %s11662_s3 = inlined_call_operand.vmem [shape: f32[512,128], index: 3, kind: output, shape index: {}]  }
   0x1 LB: > { %s6430_s13 = sadd.s32 4294967295, %s9346_s12   ;;  %p6434_p0 = scmp.ge.s32.totalorder %s9346_s12, 1  ;;  %s9346_s12 = sphi %s9368_s12, %s13_s12  }
   0x2   : > { %p139_p1 = scmp.lt.s32.totalorder %s9346_s12, 3 }
   0x4   : > { %p140_p2 = pnand %p6434_p0, %p139_p1 }
   0x6   : > { %143 = sbr.rel (%p140_p2) target bundleno = 1056 (0x420), region = 32 }
   0xb   : > { %v8483_v0 = vld [vmem:[%s11660_s1 + $0x78] sm:$0xff]   ;;  %s6435_s16 = sshll.u32 %s6430_s13, 5  ;;  %v8485_v2 = vld [vmem:[%s11660_s1 + $0x70] sm:$0xff]   ;;  %v8487_v4 = vld [vmem:[%s11660_s1 + $0x68] sm:$0xff]  }
   0xc   : > { %v8484_v1 = vld [vmem:[%s11660_s1 + $0x38] sm:$0xff]   ;;  %7042 = vmatprep.subr.bf16.mxu0 %v8483_v0  ;;  %8458 = vmatprep.subr.bf16.mxu1 %v8483_v0  ;;  %p165_p3 = scmp.lt.s32.totalorder %s6435_s16, 63  ;;  %v8486_v3 = vld [vmem:[%s11660_s1 + $0x30] sm:$0xff]   ;;  %v8488_v5 = vld [vmem:[%s11660_s1 + $0x28] sm:$0xff]  }
   0xd   : > { %7043 = vmatpush3.bf16.msra.mxu0 %v8484_v1  ;;  %8466 = vmatpush3.bf16.msra.mxu1 %v8484_v1  ;;  %v8489_v6 = vld [vmem:[%s11660_s1 + $0x60] sm:$0xff]   ;;  %v8491_v8 = vld [vmem:[%s11660_s1 + $0x58] sm:$0xff]   ;;  %v8493_v10 = vld [vmem:[%s11660_s1 + $0x50] sm:$0xff]  }
   0xe   : > { %7044 = vmatprep.subr.bf16.mxu0 %v8485_v2  ;;  %8459 = vmatprep.subr.bf16.mxu1 %v8485_v2  ;;  %s11686_s16 = smov (!%p165_p3, %s6435_s16), 63  ;;  %v8490_v7 = vld [vmem:[%s11660_s1 + $0x20] sm:$0xff]   ;;  %v8492_v9 = vld [vmem:[%s11660_s1 + $0x18] sm:$0xff]   ;;  %v8494_v13 = vld [vmem:[%s11660_s1 + $0x10] sm:$0xff]  }
   0xf   : > { %s8474_s29 = smul.u32 100, %s11686_s16  ;;  %v8495_v14 = vld [vmem:[%s11660_s1 + $0x48] sm:$0xff]   ;;  %v8497_v16 = vld [vmem:[%s11660_s1 + $0x40] sm:$0xff]   ;;  %v8505_v18 = vld [vmem:[%s11660_s1 + $0xf8] sm:$0xff]  }
  0x10   : > { %v8496_v15 = vld [vmem:[%s11660_s1 + $0x8] sm:$0xff]   ;;  %v8498_v17 = vld [vmem:[%s11660_s1] sm:$0xff]   ;;  %v8508_v21 = vld [vmem:[%s11660_s1 + $0x178] sm:$0xff]  }
  0x11   : > { %7045 = vmatpush3.bf16.msra.mxu0 %v8486_v3  ;;  %8467 = vmatpush3.bf16.msra.mxu1 %v8486_v3  ;;  %s9409_s9 = scalar_lea.vmem %s11659_s0, %s8474_s29  ;;  %v8506_v22 = vld [vmem:[%s11660_s1 + $0xb8] sm:$0xff]   ;;  %v8507_v23 = vld [vmem:[%s11660_s1 + $0xf0] sm:$0xff]   ;;  %v8517_v31 = vld [vmem:[%s11660_s1 + $0xe8] sm:$0xff]  }
  0x12   : > { %7046 = vmatprep.subr.bf16.mxu0 %v8487_v4  ;;  %8460 = vmatprep.subr.bf16.mxu1 %v8487_v4  ;;  %v8501_v11 = vld [vmem:[%s9409_s9 + $0x4] ss:$100 sps:$4 sm:$0xff]   ;;  %v8510_v24 = vld [vmem:[%s11660_s1 + $0x138] sm:$0xff]   ;;  %v8511_v25 = vld [vmem:[%s9409_s9 + $0xcc] ss:$100 sps:$4 sm:$0xff]  }
  0x13   : > { %v8504_v12 = vld [vmem:[%s9409_s9 + $0x964] ss:$100 sps:$4 sm:$0xff]   ;;  %4249 = vmatprep.mubr.bf16.mxu0 %v8501_v11  ;;  %v8513_v26 = vld [vmem:[%s9409_s9 + $0xa2c] ss:$100 sps:$4 sm:$0xff]   ;;  %v8521_v35 = vld [vmem:[%s9409_s9 + $0x194] ss:$100 sps:$4 sm:$0xff]  }
  0x14   : > { %4345 = vmatprep.mubr.bf16.mxu1 %v8504_v12  ;;  %v8499_v19 = vld [vmem:[%s9409_s9] ss:$100 sps:$4 sm:$0xff]   ;;  %v8509_v27 = vld [vmem:[%s11660_s1 + $0xb0] sm:$0xff]   ;;  %v8515_v29 = vld [vmem:[%s9409_s9 + $0xc8] ss:$100 sps:$4 sm:$0xff]  }
  0x15   : > { %7047 = vmatpush3.bf16.msra.mxu0 %v8488_v5  ;;  %8468 = vmatpush3.bf16.msra.mxu1 %v8488_v5  ;;  %v8502_v20 = vld [vmem:[%s9409_s9 + $0x960] ss:$100 sps:$4 sm:$0xff]   ;;  %v8528_v28 = vld [vmem:[%s11660_s1 + $0x170] sm:$0xff]   ;;  %v8516_v30 = vld [vmem:[%s9409_s9 + $0xa28] ss:$100 sps:$4 sm:$0xff]  }
  0x16   : > { %7048 = vmatprep.subr.bf16.mxu0 %v8489_v6  ;;  %8461 = vmatprep.subr.bf16.mxu1 %v8489_v6  ;;  %v8518_v32 = vld [vmem:[%s11660_s1 + $0xa8] sm:$0xff]   ;;  %v8530_v33 = vld [vmem:[%s11660_s1 + $0x130] sm:$0xff]   ;;  %v8519_v34 = vld [vmem:[%s11660_s1 + $0xe0] sm:$0xff]  }
  0x17   : > { %v8523_v36 = vld [vmem:[%s9409_s9 + $0xaf4] ss:$100 sps:$4 sm:$0xff]   ;;  %v8520_v37 = vld [vmem:[%s11660_s1 + $0xa0] sm:$0xff]   ;;  %v8542_v43 = vld [vmem:[%s11660_s1 + $0x168] sm:$0xff]  }
  0x18   : > { %v8525_v38 = vld [vmem:[%s9409_s9 + $0x190] ss:$100 sps:$4 sm:$0xff]   ;;  %v8527_v40 = vld [vmem:[%s11660_s1 + $0xd8] sm:$0xff]   ;;  %v8544_v46 = vld [vmem:[%s11660_s1 + $0x128] sm:$0xff]  }
  0x19   : > { %7049 = vmatpush3.bf16.msra.mxu0 %v8490_v7  ;;  %8469 = vmatpush3.bf16.msra.mxu1 %v8490_v7  ;;  %v8526_v39 = vld [vmem:[%s9409_s9 + $0xaf0] ss:$100 sps:$4 sm:$0xff]   ;;  %v8529_v41 = vld [vmem:[%s11660_s1 + $0x98] sm:$0xff]   ;;  %v8539_v48 = vld [vmem:[%s11660_s1 + $0xc8] sm:$0xff]  }
  0x1a   : > { %7050 = vmatprep.subr.bf16.mxu0 %v8491_v8  ;;  %8462 = vmatprep.subr.bf16.mxu1 %v8491_v8  ;;  %v8531_v42 = vld [vmem:[%s11660_s1 + $0xd0] sm:$0xff]   ;;  %v8533_v44 = vld [vmem:[%s9409_s9 + $0x25c] ss:$100 sps:$4 sm:$0xff]   ;;  %v8540_v51 = vld [vmem:[%s11660_s1 + $0x88] sm:$0xff]  }
  0x1b   : > { %v8535_v45 = vld [vmem:[%s9409_s9 + $0xbbc] ss:$100 sps:$4 sm:$0xff]   ;;  %v8532_v47 = vld [vmem:[%s11660_s1 + $0x90] sm:$0xff]   ;;  %v8545_v53 = vld [vmem:[%s9409_s9 + $0x324] ss:$100 sps:$4 sm:$0xff]  }
  0x1c   : > { %v8537_v49 = vld [vmem:[%s9409_s9 + $0x258] ss:$100 sps:$4 sm:$0xff]   ;;  %v8541_v52 = vld [vmem:[%s11660_s1 + $0xc0] sm:$0xff]   ;;  %v8549_v54 = vld [vmem:[%s9409_s9 + $0xc] ss:$100 sps:$4 sm:$0xff]  }
  0x1d   : > { %7051 = vmatpush3.bf16.msra.mxu0 %v8492_v9  ;;  %8470 = vmatpush3.bf16.msra.mxu1 %v8492_v9  ;;  %v8538_v50 = vld [vmem:[%s9409_s9 + $0xbb8] ss:$100 sps:$4 sm:$0xff]   ;;  %v8559_v55 = vld [vmem:[%s11660_s1 + $0x160] sm:$0xff]   ;;  %v8547_v58 = vld [vmem:[%s9409_s9 + $0x8] ss:$100 sps:$4 sm:$0xff]  }
  0x1e   : > { %7052 = vmatprep.subr.bf16.mxu0 %v8493_v10  ;;  %8463 = vmatprep.subr.bf16.mxu1 %v8493_v10  ;;  %v8560_v56 = vld [vmem:[%s11660_s1 + $0x120] sm:$0xff]   ;;  %v8551_v60 = vld [vmem:[%s11660_s1 + $0x1f8] sm:$0xff]   ;;  %v8553_v62 = vld [vmem:[%s9409_s9 + $0x3ec] ss:$100 sps:$4 sm:$0xff]  }
  0x1f   : > { %v8543_v57 = vld [vmem:[%s11660_s1 + $0x80] sm:$0xff]   ;;  %v8552_v61 = vld [vmem:[%s11660_s1 + $0x1b8] sm:$0xff]   ;;  %v8567_v1 = vld [vmem:[%s11660_s1 + $0x1f0] sm:$0xff]  }
  0x20   : > { %v8550_v59 = vld [vmem:[%s9409_s9 + $0x320] ss:$100 sps:$4 sm:$0xff]   ;;  %v8555_v63 = vld [vmem:[%s9409_s9 + $0xd4] ss:$100 sps:$4 sm:$0xff]   ;;  %v8557_v4 = vld [vmem:[%s9409_s9 + $0x3e8] ss:$100 sps:$4 sm:$0xff]  }
  0x21   : > { %7053 = vmatpush3.bf16.msra.mxu0 %v8494_v13  ;;  %8471 = vmatpush3.bf16.msra.mxu1 %v8494_v13  ;;  %v8569_v0 = vld [vmem:[%s11660_s1 + $0x158] sm:$0xff]   ;;  %v8568_v3 = vld [vmem:[%s11660_s1 + $0x1b0] sm:$0xff]   ;;  %v8584_v9 = vld [vmem:[%s11660_s1 + $0x1e8] sm:$0xff]  }
  0x22   : > { %7054 = vmatprep.subr.bf16.mxu0 %v8495_v14  ;;  %8464 = vmatprep.subr.bf16.mxu1 %v8495_v14  ;;  %v8570_v2 = vld [vmem:[%s11660_s1 + $0x118] sm:$0xff]   ;;  %v8558_v5 = vld [vmem:[%s9409_s9 + $0xd0] ss:$100 sps:$4 sm:$0xff]   ;;  %v8586_v11 = vld [vmem:[%s11660_s1 + $0x1a8] sm:$0xff]  }
  0x23   : > { %v8561_v6 = vld [vmem:[%s9409_s9 + $0x4b4] ss:$100 sps:$4 sm:$0xff]   ;;  %v8563_v7 = vld [vmem:[%s9409_s9 + $0x19c] ss:$100 sps:$4 sm:$0xff]  }
  0x24   : > { %v8583_v8 = vld [vmem:[%s11660_s1 + $0x150] sm:$0xff]   ;;  %v8566_v13 = vld [vmem:[%s9409_s9 + $0x198] ss:$100 sps:$4 sm:$0xff]  }
  0x25   : > { %7055 = vmatpush3.bf16.msra.mxu0 %v8496_v15  ;;  %8472 = vmatpush3.bf16.msra.mxu1 %v8496_v15  ;;  %v8585_v10 = vld [vmem:[%s11660_s1 + $0x110] sm:$0xff]   ;;  %v8571_v14 = vld [vmem:[%s9409_s9 + $0x57c] ss:$100 sps:$4 sm:$0xff]   ;;  %v8593_v15 = vld [vmem:[%s11660_s1 + $0x148] sm:$0xff]  }
  0x26   : > { %7056 = vmatprep.subr.bf16.mxu0 %v8497_v16  ;;  %8465 = vmatprep.subr.bf16.mxu1 %v8497_v16  ;;  %v8565_v12 = vld [vmem:[%s9409_s9 + $0x4b0] ss:$100 sps:$4 sm:$0xff]   ;;  %v8594_v16 = vld [vmem:[%s11660_s1 + $0x108] sm:$0xff]  }
  0x29   : > { %7057 = vmatpush3.bf16.msra.mxu0 %v8498_v17  ;;  %8473 = vmatpush3.bf16.msra.mxu1 %v8498_v17  ;;  %v8573_v17 = vld [vmem:[%s9409_s9 + $0x264] ss:$100 sps:$4 sm:$0xff]  }
  0x2a   : > { %7154 = vmatprep.subr.bf16.mxu1 %v8505_v18  ;;  %7266 = vmatprep.subr.bf16.mxu0 %v8508_v21  ;;  %v8601_v18 = vld [vmem:[%s11660_s1 + $0x1e0] sm:$0xff]  }
  0x2b   : > { %v8576_v21 = vld [vmem:[%s9409_s9 + $0x260] ss:$100 sps:$4 sm:$0xff]  }
  0x2c   : > { %4250 = vmatmul.mubr.bf16.vlgmr.msra.gmra.mxu0 %v8499_v19  ;;  %4346 = vmatmul.mubr.bf16.vlgmr.msra.gmra.mxu1 %v8502_v20  ;;  %v8602_v19 = vld [vmem:[%s11660_s1 + $0x1a0] sm:$0xff]   ;;  %v8575_v20 = vld [vmem:[%s9409_s9 + $0x578] ss:$100 sps:$4 sm:$0xff]  }
  0x2d   : > { %7155 = vmatpush3.bf16.msra.mxu1 %v8506_v22  ;;  %7267 = vmatpush3.bf16.msra.mxu0 %v8510_v24  ;;  %v8577_v22 = vld [vmem:[%s9409_s9 + $0x644] ss:$100 sps:$4 sm:$0xff]  }
  0x2e   : > { %7156 = vmatprep.subr.bf16.mxu1 %v8507_v23  ;;  %4257 = vmatprep.mubr.bf16.mxu0 %v8511_v25  ;;  %v8579_v23 = vld [vmem:[%s9409_s9 + $0x32c] ss:$100 sps:$4 sm:$0xff]   ;;  %v8609_v24 = vld [vmem:[%s11660_s1 + $0x140] sm:$0xff]  }
  0x2f   : > { %4353 = vmatprep.mubr.bf16.mxu1 %v8513_v26  ;;  %7268 = vmatprep.subr.bf16.mxu0 %v8528_v28  ;;  %v8610_v25 = vld [vmem:[%s11660_s1 + $0x100] sm:$0xff]   ;;  %v8617_v26 = vld [vmem:[%s11660_s1 + $0x1d8] sm:$0xff]   ;;  %v8582_v28 = vld [vmem:[%s9409_s9 + $0x328] ss:$100 sps:$4 sm:$0xff]  }
  0x31   : > { %7157 = vmatpush3.bf16.msra.mxu1 %v8509_v27  ;;  %7269 = vmatpush3.bf16.msra.mxu0 %v8530_v33  ;;  %v8581_v27 = vld [vmem:[%s9409_s9 + $0x640] ss:$100 sps:$4 sm:$0xff]   ;;  %v8591_v33 = vld [vmem:[%s9409_s9 + $0x708] ss:$100 sps:$4 sm:$0xff]  }
  0x32   : > { %7158 = vmatprep.subr.bf16.mxu1 %v8517_v31  ;;  %7270 = vmatprep.subr.bf16.mxu0 %v8542_v43  ;;  %v8587_v31 = vld [vmem:[%s9409_s9 + $0x70c] ss:$100 sps:$4 sm:$0xff]  }
  0x33   : > { %v8649_v43 = vld [vmem:[%s11660_s1 + $0x1c8] sm:$0xff]  }
  0x34   : > { %4258 = vmatmul.mubr.bf16.gmra.mxu0 %v8515_v29  ;;  %4354 = vmatmul.mubr.bf16.gmra.mxu1 %v8516_v30  ;;  %v8618_v29 = vld [vmem:[%s11660_s1 + $0x198] sm:$0xff]  }
  0x35   : > { %7159 = vmatpush3.bf16.msra.mxu1 %v8518_v32  ;;  %4265 = vmatprep.mubr.bf16.mxu0 %v8521_v35  ;;  %v8619_v30 = vld [vmem:[%s11660_s1 + $0x278] sm:$0xff]   ;;  %v8633_v35 = vld [vmem:[%s11660_s1 + $0x1d0] sm:$0xff]  }
  0x36   : > { %7160 = vmatprep.subr.bf16.mxu1 %v8519_v34  ;;  %4361 = vmatprep.mubr.bf16.mxu1 %v8523_v36  ;;  %v8589_v32 = vld [vmem:[%s9409_s9 + $0x3f4] ss:$100 sps:$4 sm:$0xff]  }
  0x37   : > { %7271 = vmatpush3.bf16.msra.mxu0 %v8544_v46  ;;  %v8592_v34 = vld [vmem:[%s9409_s9 + $0x3f0] ss:$100 sps:$4 sm:$0xff]   ;;  %v8608_v46 = vld [vmem:[%s9409_s9 + $0x580] ss:$100 sps:$4 sm:$0xff]  }
  0x38   : > { %7272 = vmatprep.subr.bf16.mxu0 %v8559_v55  ;;  %v8634_v36 = vld [vmem:[%s11660_s1 + $0x190] sm:$0xff]   ;;  %v8623_v55 = vld [vmem:[%s9409_s9 + $0xdc] ss:$100 sps:$4 sm:$0xff]  }
  0x39   : > { %7161 = vmatpush3.bf16.msra.mxu1 %v8520_v37  ;;  %v8595_v37 = vld [vmem:[%s9409_s9 + $0x7d4] ss:$100 sps:$4 sm:$0xff]  }
  0x3a   : > { %7162 = vmatprep.subr.bf16.mxu1 %v8527_v40  ;;  %v8600_v40 = vld [vmem:[%s9409_s9 + $0x4b8] ss:$100 sps:$4 sm:$0xff]  }
  0x3b   : > { %7273 = vmatpush3.bf16.msra.mxu0 %v8560_v56  ;;  %v8635_v56 = vld [vmem:[%s11660_s1 + $0x270] sm:$0xff]  }
  0x3c   : > { %4266 = vmatmul.mubr.bf16.gmra.mxu0 %v8525_v38  ;;  %4362 = vmatmul.mubr.bf16.gmra.mxu1 %v8526_v39  ;;  %v8597_v38 = vld [vmem:[%s9409_s9 + $0x4bc] ss:$100 sps:$4 sm:$0xff]   ;;  %v8599_v39 = vld [vmem:[%s9409_s9 + $0x7d0] ss:$100 sps:$4 sm:$0xff]  }
  0x3d   : > { %7163 = vmatpush3.bf16.msra.mxu1 %v8529_v41  ;;  %4273 = vmatprep.mubr.bf16.mxu0 %v8533_v44  ;;  %v8603_v41 = vld [vmem:[%s9409_s9 + $0x89c] ss:$100 sps:$4 sm:$0xff]   ;;  %v8650_v44 = vld [vmem:[%s11660_s1 + $0x188] sm:$0xff]  }
  0x3e   : > { %7164 = vmatprep.subr.bf16.mxu1 %v8531_v42  ;;  %4369 = vmatprep.mubr.bf16.mxu1 %v8535_v45  ;;  %v8605_v42 = vld [vmem:[%s9409_s9 + $0x584] ss:$100 sps:$4 sm:$0xff]   ;;  %v8607_v45 = vld [vmem:[%s9409_s9 + $0x898] ss:$100 sps:$4 sm:$0xff]  }
  0x3f   : > { %7274 = vmatprep.subr.bf16.mxu0 %v8569_v0  ;;  %v8652_v0 = vld [vmem:[%s11660_s1 + $0x228] sm:$0xff]  }
  0x40   : > { %7275 = vmatpush3.bf16.msra.mxu0 %v8570_v2  ;;  %v8631_v2 = vld [vmem:[%s9409_s9 + $0x7d8] ss:$100 sps:$4 sm:$0xff]  }
  0x41   : > { %7165 = vmatpush3.bf16.msra.mxu1 %v8532_v47  ;;  %7276 = vmatprep.subr.bf16.mxu0 %v8583_v8  ;;  %v8611_v47 = vld [vmem:[%s9409_s9 + $0x64c] ss:$100 sps:$4 sm:$0xff]   ;;  %v8684_v8 = vld [vmem:[%s11660_s1 + $0x218] sm:$0xff]  }
  0x42   : > { %7166 = vmatprep.subr.bf16.mxu1 %v8539_v48  ;;  %v8615_v48 = vld [vmem:[%s9409_s9 + $0x14] ss:$100 sps:$4 sm:$0xff]  }
  0x44   : > { %4274 = vmatmul.mubr.bf16.gmra.mxu0 %v8537_v49  ;;  %4370 = vmatmul.mubr.bf16.gmra.mxu1 %v8538_v50  ;;  %v8665_v49 = vld [vmem:[%s11660_s1 + $0x1c0] sm:$0xff]  }
  0x45   : > { %7167 = vmatpush3.bf16.msra.mxu1 %v8540_v51  ;;  %4281 = vmatprep.mubr.bf16.mxu0 %v8545_v53  ;;  %v8666_v50 = vld [vmem:[%s11660_s1 + $0x180] sm:$0xff]   ;;  %v8613_v51 = vld [vmem:[%s9409_s9 + $0x10] ss:$100 sps:$4 sm:$0xff]   ;;  %v8620_v53 = vld [vmem:[%s11660_s1 + $0x238] sm:$0xff]  }
  0x46   : > { %7168 = vmatprep.subr.bf16.mxu1 %v8541_v52  ;;  %4410 = vmatprep.mubr.bf16.mxu1 %v8549_v54  ;;  %v8616_v52 = vld [vmem:[%s9409_s9 + $0x648] ss:$100 sps:$4 sm:$0xff]   ;;  %v8621_v54 = vld [vmem:[%s9409_s9 + $0x714] ss:$100 sps:$4 sm:$0xff]  }
  0x47   : > { %7277 = vmatpush3.bf16.msra.mxu0 %v8585_v10  ;;  %v8641_v10 = vld [vmem:[%s9409_s9 + $0x8a0] ss:$100 sps:$4 sm:$0xff]  }
  0x48   : > { %7278 = vmatprep.subr.bf16.mxu0 %v8593_v15  ;;  %v8645_v15 = vld [vmem:[%s9409_s9 + $0x334] ss:$100 sps:$4 sm:$0xff]  }
  0x49   : > { %7169 = vmatpush3.bf16.msra.mxu1 %v8543_v57  ;;  %v8681_v57 = vld [vmem:[%s11660_s1 + $0x2f8] sm:$0xff]  }
  0x4a   : > { %7378 = vmatprep.subr.bf16.mxu1 %v8551_v60  ;;  %v8625_v60 = vld [vmem:[%s9409_s9 + $0x710] ss:$100 sps:$4 sm:$0xff]  }
  0x4b   : > { %7279 = vmatpush3.bf16.msra.mxu0 %v8594_v16  ;;  %v8716_v16 = vld [vmem:[%s11660_s1 + $0x208] sm:$0xff]  }
  0x4c   : > { %4282 = vmatmul.mubr.bf16.gmra.mxu0 %v8550_v59  ;;  %4411 = vmatmul.mubr.bf16.vlgmr.msra.gmra.mxu1 %v8547_v58  ;;  %v8636_v58 = vld [vmem:[%s11660_s1 + $0x230] sm:$0xff]   ;;  %v8651_v59 = vld [vmem:[%s11660_s1 + $0x268] sm:$0xff]  }
  0x4d   : > { %7379 = vmatpush3.bf16.msra.mxu1 %v8552_v61  ;;  %4289 = vmatprep.mubr.bf16.mxu0 %v8553_v62  ;;  %v8626_v61 = vld [vmem:[%s9409_s9 + $0xd8] ss:$100 sps:$4 sm:$0xff]  }
  0x4e   : > { %4418 = vmatprep.mubr.bf16.mxu1 %v8555_v63  ;;  %7380 = vmatprep.subr.bf16.mxu1 %v8567_v1  ;;  %v8627_v62 = vld [vmem:[%s9409_s9 + $0x7dc] ss:$100 sps:$4 sm:$0xff]   ;;  %v8629_v63 = vld [vmem:[%s9409_s9 + $0x1a4] ss:$100 sps:$4 sm:$0xff]  }
  0x4f   : > { %7280 = vmatprep.subr.bf16.mxu0 %v8609_v24  ;;  %v8667_v1 = vld [vmem:[%s11660_s1 + $0x260] sm:$0xff]   ;;  %v8658_v24 = vld [vmem:[%s9409_s9 + $0x3f8] ss:$100 sps:$4 sm:$0xff]  }
  0x50   : > { %7281 = vmatpush3.bf16.msra.mxu0 %v8610_v25  ;;  %v8659_v25 = vld [vmem:[%s9409_s9 + $0xafc] ss:$100 sps:$4 sm:$0xff]  }
  0x51   : > { %7381 = vmatpush3.bf16.msra.mxu1 %v8568_v3  ;;  %7490 = vmatprep.subr.bf16.mxu0 %v8619_v30  ;;  %v8668_v3 = vld [vmem:[%s11660_s1 + $0x220] sm:$0xff]  }
  0x52   : > { %7382 = vmatprep.subr.bf16.mxu1 %v8584_v9  ;;  %v8699_v9 = vld [vmem:[%s11660_s1 + $0x250] sm:$0xff]   ;;  %v8669_v30 = vld [vmem:[%s9409_s9 + $0xbc4] ss:$100 sps:$4 sm:$0xff]  }
  0x54   : > { %4290 = vmatmul.mubr.bf16.gmra.mxu0 %v8557_v4  ;;  %4419 = vmatmul.mubr.bf16.gmra.mxu1 %v8558_v5  ;;  %v8683_v4 = vld [vmem:[%s11660_s1 + $0x258] sm:$0xff]   ;;  %v8632_v5 = vld [vmem:[%s9409_s9 + $0x1a0] ss:$100 sps:$4 sm:$0xff]  }
  0x55   : > { %4297 = vmatprep.mubr.bf16.mxu0 %v8561_v6  ;;  %4426 = vmatprep.mubr.bf16.mxu1 %v8563_v7  ;;  %v8637_v6 = vld [vmem:[%s9409_s9 + $0x8a4] ss:$100 sps:$4 sm:$0xff]   ;;  %v8639_v7 = vld [vmem:[%s9409_s9 + $0x26c] ss:$100 sps:$4 sm:$0xff]  }
  0x56   : > { %7383 = vmatpush3.bf16.msra.mxu1 %v8586_v11  ;;  %v8642_v11 = vld [vmem:[%s9409_s9 + $0x268] ss:$100 sps:$4 sm:$0xff]  }
  0x57   : > { %7384 = vmatprep.subr.bf16.mxu1 %v8601_v18  ;;  %v8648_v18 = vld [vmem:[%s9409_s9 + $0x330] ss:$100 sps:$4 sm:$0xff]  }
  0x5a   : > { %7385 = vmatpush3.bf16.msra.mxu1 %v8602_v19  ;;  %v8653_v19 = vld [vmem:[%s9409_s9 + $0xa34] ss:$100 sps:$4 sm:$0xff]  }
  0x5b   : > { %7386 = vmatprep.subr.bf16.mxu1 %v8617_v26  ;;  %v8661_v26 = vld [vmem:[%s9409_s9 + $0x4c4] ss:$100 sps:$4 sm:$0xff]  }
  0x5c   : > { %4298 = vmatmul.mubr.bf16.gmra.mxu0 %v8565_v12  ;;  %4427 = vmatmul.mubr.bf16.gmra.mxu1 %v8566_v13  ;;  %v8700_v12 = vld [vmem:[%s11660_s1 + $0x210] sm:$0xff]   ;;  %v8715_v13 = vld [vmem:[%s11660_s1 + $0x248] sm:$0xff]  }
  0x5d   : > { %4305 = vmatprep.mubr.bf16.mxu0 %v8571_v14  ;;  %4434 = vmatprep.mubr.bf16.mxu1 %v8573_v17  ;;  %v8643_v14 = vld [vmem:[%s9409_s9 + $0x96c] ss:$100 sps:$4 sm:$0xff]  }
  0x5e   : > { %7387 = vmatpush3.bf16.msra.mxu1 %v8618_v29  ;;  %v8647_v17 = vld [vmem:[%s9409_s9 + $0x968] ss:$100 sps:$4 sm:$0xff]   ;;  %v8664_v29 = vld [vmem:[%s9409_s9 + $0x4c0] ss:$100 sps:$4 sm:$0xff]  }
  0x5f   : > { %7388 = vmatprep.subr.bf16.mxu1 %v8633_v35  ;;  %v8679_v35 = vld [vmem:[%s9409_s9 + $0x1c] ss:$100 sps:$4 sm:$0xff]  }
  0x62   : > { %7389 = vmatpush3.bf16.msra.mxu1 %v8634_v36  ;;  %v8677_v36 = vld [vmem:[%s9409_s9 + $0x18] ss:$100 sps:$4 sm:$0xff]  }
  0x63   : > { %7390 = vmatprep.subr.bf16.mxu1 %v8649_v43  ;;  %v8713_v43 = vld [vmem:[%s11660_s1 + $0x2e8] sm:$0xff]  }
  0x64   : > { %4306 = vmatmul.mubr.bf16.gmra.mxu0 %v8575_v20  ;;  %4435 = vmatmul.mubr.bf16.gmra.mxu1 %v8576_v21  ;;  %v8655_v20 = vld [vmem:[%s9409_s9 + $0x3fc] ss:$100 sps:$4 sm:$0xff]  }
  0x65   : > { %4313 = vmatprep.mubr.bf16.mxu0 %v8577_v22  ;;  %4442 = vmatprep.mubr.bf16.mxu1 %v8579_v23  ;;  %v8731_v21 = vld [vmem:[%s11660_s1 + $0x240] sm:$0xff]   ;;  %v8657_v23 = vld [vmem:[%s9409_s9 + $0xa30] ss:$100 sps:$4 sm:$0xff]  }
  0x66   : > { %7391 = vmatpush3.bf16.msra.mxu1 %v8650_v44  ;;  %v8732_v22 = vld [vmem:[%s11660_s1 + $0x200] sm:$0xff]   ;;  %v8689_v44 = vld [vmem:[%s9409_s9 + $0x718] ss:$100 sps:$4 sm:$0xff]  }
  0x67   : > { %7392 = vmatprep.subr.bf16.mxu1 %v8665_v49  ;;  %v8729_v49 = vld [vmem:[%s11660_s1 + $0x2e0] sm:$0xff]  }
  0x6a   : > { %7393 = vmatpush3.bf16.msra.mxu1 %v8666_v50  ;;  %v8695_v50 = vld [vmem:[%s9409_s9 + $0x7e0] ss:$100 sps:$4 sm:$0xff]  }
  0x6b   : > { %7602 = vmatprep.subr.bf16.mxu1 %v8681_v57  ;;  %v8761_v57 = vld [vmem:[%s11660_s1 + $0x2d0] sm:$0xff]  }
  0x6c   : > { %4314 = vmatmul.mubr.bf16.gmra.mxu0 %v8581_v27  ;;  %4443 = vmatmul.mubr.bf16.gmra.mxu1 %v8582_v28  ;;  %v8747_v27 = vld [vmem:[%s11660_s1 + $0x378] sm:$0xff]  }
  0x6d   : > { %4321 = vmatprep.mubr.bf16.mxu0 %v8587_v31  ;;  %4450 = vmatprep.mubr.bf16.mxu1 %v8589_v32  ;;  %v8663_v28 = vld [vmem:[%s9409_s9 + $0xaf8] ss:$100 sps:$4 sm:$0xff]   ;;  %v8671_v31 = vld [vmem:[%s9409_s9 + $0x58c] ss:$100 sps:$4 sm:$0xff]   ;;  %v8673_v32 = vld [vmem:[%s9409_s9 + $0xbc0] ss:$100 sps:$4 sm:$0xff]  }
  0x74   : > { %4322 = vmatmul.mubr.bf16.gmra.mxu0 %v8591_v33  ;;  %4451 = vmatmul.mubr.bf16.gmra.mxu1 %v8592_v34  ;;  %v8674_v33 = vld [vmem:[%s9409_s9 + $0x588] ss:$100 sps:$4 sm:$0xff]   ;;  %v8675_v34 = vld [vmem:[%s9409_s9 + $0x654] ss:$100 sps:$4 sm:$0xff]  }
  0x75   : > { %4329 = vmatprep.mubr.bf16.mxu0 %v8595_v37  ;;  %4458 = vmatprep.mubr.bf16.mxu1 %v8597_v38  ;;  %v8680_v37 = vld [vmem:[%s9409_s9 + $0x650] ss:$100 sps:$4 sm:$0xff]   ;;  %v8682_v38 = vld [vmem:[%s11660_s1 + $0x2b8] sm:$0xff]  }
  0x7c   : > { %4330 = vmatmul.mubr.bf16.gmra.mxu0 %v8599_v39  ;;  %4459 = vmatmul.mubr.bf16.gmra.mxu1 %v8600_v40  ;;  %v8685_v39 = vld [vmem:[%s9409_s9 + $0x71c] ss:$100 sps:$4 sm:$0xff]   ;;  %v8687_v40 = vld [vmem:[%s9409_s9 + $0xe4] ss:$100 sps:$4 sm:$0xff]  }
  0x7d   : > { %4337 = vmatprep.mubr.bf16.mxu0 %v8603_v41  ;;  %4466 = vmatprep.mubr.bf16.mxu1 %v8605_v42  ;;  %v8697_v41 = vld [vmem:[%s11660_s1 + $0x2f0] sm:$0xff]  }
  0x7e   : > { %v8698_v42 = vld [vmem:[%s11660_s1 + $0x2b0] sm:$0xff]  }
  0x84   : > { %4338 = vmatmul.mubr.bf16.gmra.mxu0 %v8607_v45  ;;  %4467 = vmatmul.mubr.bf16.gmra.mxu1 %v8608_v46  ;;  %v8690_v45 = vld [vmem:[%s9409_s9 + $0xe0] ss:$100 sps:$4 sm:$0xff]  }
  0x85   : > { %4474 = vmatprep.mubr.bf16.mxu1 %v8611_v47  ;;  %4571 = vmatprep.mubr.bf16.mxu0 %v8615_v48  ;;  %v8691_v46 = vld [vmem:[%s9409_s9 + $0x7e4] ss:$100 sps:$4 sm:$0xff]   ;;  %v8693_v47 = vld [vmem:[%s9409_s9 + $0x1ac] ss:$100 sps:$4 sm:$0xff]  }
  0x86   : > { %v8714_v48 = vld [vmem:[%s11660_s1 + $0x2a8] sm:$0xff]  }
  0x8c   : > { %4475 = vmatmul.mubr.bf16.gmra.mxu1 %v8616_v52  ;;  %4572 = vmatmul.mubr.bf16.vlgmr.msra.gmra.mxu0 %v8613_v51  ;;  %v8696_v51 = vld [vmem:[%s9409_s9 + $0x1a8] ss:$100 sps:$4 sm:$0xff]   ;;  %v8730_v52 = vld [vmem:[%s11660_s1 + $0x2a0] sm:$0xff]  }
  0x8d   : > { %7491 = vmatpush3.bf16.msra.mxu0 %v8620_v53  ;;  %4482 = vmatprep.mubr.bf16.mxu1 %v8621_v54  ;;  %v8745_v53 = vld [vmem:[%s11660_s1 + $0x2d8] sm:$0xff]   ;;  %v8701_v54 = vld [vmem:[%s9409_s9 + $0x8ac] ss:$100 sps:$4 sm:$0xff]  }
  0x8e   : > { %4579 = vmatprep.mubr.bf16.mxu0 %v8623_v55  ;;  %7492 = vmatprep.subr.bf16.mxu0 %v8635_v56  ;;  %v8703_v55 = vld [vmem:[%s9409_s9 + $0x274] ss:$100 sps:$4 sm:$0xff]  }
  0x8f   : > { %v8746_v56 = vld [vmem:[%s11660_s1 + $0x298] sm:$0xff]  }
  0x91   : > { %7493 = vmatpush3.bf16.msra.mxu0 %v8636_v58  ;;  %v8705_v58 = vld [vmem:[%s9409_s9 + $0x8a8] ss:$100 sps:$4 sm:$0xff]  }
  0x92   : > { %7494 = vmatprep.subr.bf16.mxu0 %v8651_v59  ;;  %v8706_v59 = vld [vmem:[%s9409_s9 + $0x270] ss:$100 sps:$4 sm:$0xff]  }
  0x94   : > { %4483 = vmatmul.mubr.bf16.gmra.mxu1 %v8625_v60  ;;  %4580 = vmatmul.mubr.bf16.gmra.mxu0 %v8626_v61  ;;  %v8762_v60 = vld [vmem:[%s11660_s1 + $0x290] sm:$0xff]   ;;  %v8777_v61 = vld [vmem:[%s11660_s1 + $0x2c8] sm:$0xff]  }
  0x95   : > { %4490 = vmatprep.mubr.bf16.mxu1 %v8627_v62  ;;  %4587 = vmatprep.mubr.bf16.mxu0 %v8629_v63  ;;  %v8707_v62 = vld [vmem:[%s9409_s9 + $0x974] ss:$100 sps:$4 sm:$0xff]   ;;  %v8709_v63 = vld [vmem:[%s9409_s9 + $0x33c] ss:$100 sps:$4 sm:$0xff]  }
  0x96   : > { %7495 = vmatpush3.bf16.msra.mxu0 %v8652_v0  ;;  %v8778_v0 = vld [vmem:[%s11660_s1 + $0x288] sm:$0xff]  }
  0x97   : > { %7496 = vmatprep.subr.bf16.mxu0 %v8667_v1  ;;  %v8793_v1 = vld [vmem:[%s11660_s1 + $0x2c0] sm:$0xff]  }
  0x9a   : > { %7497 = vmatpush3.bf16.msra.mxu0 %v8668_v3  ;;  %v8809_v3 = vld [vmem:[%s11660_s1 + $0x3f8] sm:$0xff]  }
  0x9b   : > { %7498 = vmatprep.subr.bf16.mxu0 %v8683_v4  ;;  %v8711_v4 = vld [vmem:[%s9409_s9 + $0x970] ss:$100 sps:$4 sm:$0xff]  }
  0x9c   : > { %4491 = vmatmul.mubr.bf16.gmra.mxu1 %v8631_v2  ;;  %4588 = vmatmul.mubr.bf16.gmra.mxu0 %v8632_v5  ;;  %v8794_v2 = vld [vmem:[%s11660_s1 + $0x280] sm:$0xff]   ;;  %v8712_v5 = vld [vmem:[%s9409_s9 + $0x338] ss:$100 sps:$4 sm:$0xff]  }
  0x9d   : > { %4498 = vmatprep.mubr.bf16.mxu1 %v8637_v6  ;;  %4595 = vmatprep.mubr.bf16.mxu0 %v8639_v7  ;;  %v8717_v6 = vld [vmem:[%s9409_s9 + $0xa3c] ss:$100 sps:$4 sm:$0xff]   ;;  %v8719_v7 = vld [vmem:[%s9409_s9 + $0x404] ss:$100 sps:$4 sm:$0xff]  }
  0x9e   : > { %7499 = vmatpush3.bf16.msra.mxu0 %v8684_v8 }
  0x9f   : > { %7500 = vmatprep.subr.bf16.mxu0 %v8699_v9 }
  0xa2   : > { %7501 = vmatpush3.bf16.msra.mxu0 %v8700_v12  ;;  %v8721_v12 = vld [vmem:[%s9409_s9 + $0xa38] ss:$100 sps:$4 sm:$0xff]  }
  0xa3   : > { %7502 = vmatprep.subr.bf16.mxu0 %v8715_v13  ;;  %v8722_v13 = vld [vmem:[%s9409_s9 + $0x400] ss:$100 sps:$4 sm:$0xff]  }
  0xa4   : > { %4499 = vmatmul.mubr.bf16.gmra.mxu1 %v8641_v10  ;;  %4596 = vmatmul.mubr.bf16.gmra.mxu0 %v8642_v11 }
  0xa5   : > { %4506 = vmatprep.mubr.bf16.mxu1 %v8643_v14  ;;  %4603 = vmatprep.mubr.bf16.mxu0 %v8645_v15 }
  0xa6   : > { %7503 = vmatpush3.bf16.msra.mxu0 %v8716_v16 }
  0xa7   : > { %7504 = vmatprep.subr.bf16.mxu0 %v8731_v21 }
  0xaa   : > { %7505 = vmatpush3.bf16.msra.mxu0 %v8732_v22 }
  0xab   : > { %7714 = vmatprep.subr.bf16.mxu0 %v8747_v27 }
  0xac   : > { %4507 = vmatmul.mubr.bf16.gmra.mxu1 %v8647_v17  ;;  %4604 = vmatmul.mubr.bf16.gmra.mxu0 %v8648_v18  ;;  %v8723_v18 = vld [vmem:[%s9409_s9 + $0xb04] ss:$100 sps:$4 sm:$0xff]  }
  0xad   : > { %4514 = vmatprep.mubr.bf16.mxu1 %v8653_v19  ;;  %4611 = vmatprep.mubr.bf16.mxu0 %v8655_v20  ;;  %v8725_v19 = vld [vmem:[%s9409_s9 + $0x4cc] ss:$100 sps:$4 sm:$0xff]  }
  0xb4   : > { %4515 = vmatmul.mubr.bf16.gmra.mxu1 %v8657_v23  ;;  %4612 = vmatmul.mubr.bf16.gmra.mxu0 %v8658_v24 }
  0xb5   : > { %4522 = vmatprep.mubr.bf16.mxu1 %v8659_v25  ;;  %4619 = vmatprep.mubr.bf16.mxu0 %v8661_v26 }
  0xbc   : > { %4523 = vmatmul.mubr.bf16.gmra.mxu1 %v8663_v28  ;;  %4620 = vmatmul.mubr.bf16.gmra.mxu0 %v8664_v29  ;;  %v8727_v28 = vld [vmem:[%s9409_s9 + $0xb00] ss:$100 sps:$4 sm:$0xff]   ;;  %v8728_v29 = vld [vmem:[%s9409_s9 + $0x4c8] ss:$100 sps:$4 sm:$0xff]  }
  0xbd   : > { %4530 = vmatprep.mubr.bf16.mxu1 %v8669_v30  ;;  %4627 = vmatprep.mubr.bf16.mxu0 %v8671_v31 }
  0xc4   : > { %4531 = vmatmul.mubr.bf16.gmra.mxu1 %v8673_v32  ;;  %4628 = vmatmul.mubr.bf16.gmra.mxu0 %v8674_v33 }
  0xc5   : > { %4635 = vmatprep.mubr.bf16.mxu0 %v8675_v34  ;;  %4732 = vmatprep.mubr.bf16.mxu1 %v8679_v35  ;;  %v8733_v34 = vld [vmem:[%s9409_s9 + $0xbcc] ss:$100 sps:$4 sm:$0xff]   ;;  %v8735_v35 = vld [vmem:[%s9409_s9 + $0x594] ss:$100 sps:$4 sm:$0xff]  }
  0xcc   : > { %4636 = vmatmul.mubr.bf16.gmra.mxu0 %v8680_v37  ;;  %4733 = vmatmul.mubr.bf16.vlgmr.msra.gmra.mxu1 %v8677_v36 }
  0xcd   : > { %7603 = vmatpush3.bf16.msra.mxu1 %v8682_v38  ;;  %4643 = vmatprep.mubr.bf16.mxu0 %v8685_v39 }
  0xce   : > { %4740 = vmatprep.mubr.bf16.mxu1 %v8687_v40  ;;  %7604 = vmatprep.subr.bf16.mxu1 %v8697_v41 }
  0xd1   : > { %7605 = vmatpush3.bf16.msra.mxu1 %v8698_v42 }
  0xd2   : > { %7606 = vmatprep.subr.bf16.mxu1 %v8713_v43 }
  0xd4   : > { %4644 = vmatmul.mubr.bf16.gmra.mxu0 %v8689_v44  ;;  %4741 = vmatmul.mubr.bf16.gmra.mxu1 %v8690_v45  ;;  %v8737_v44 = vld [vmem:[%s9409_s9 + $0xbc8] ss:$100 sps:$4 sm:$0xff]   ;;  %v8738_v45 = vld [vmem:[%s9409_s9 + $0x590] ss:$100 sps:$4 sm:$0xff]  }
  0xd5   : > { %4651 = vmatprep.mubr.bf16.mxu0 %v8691_v46  ;;  %4748 = vmatprep.mubr.bf16.mxu1 %v8693_v47 }
  0xd6   : > { %7607 = vmatpush3.bf16.msra.mxu1 %v8714_v48 }
  0xd7   : > { %7608 = vmatprep.subr.bf16.mxu1 %v8729_v49 }
  0xda   : > { %7609 = vmatpush3.bf16.msra.mxu1 %v8730_v52 }
  0xdb   : > { %7610 = vmatprep.subr.bf16.mxu1 %v8745_v53 }
  0xdc   : > { %4652 = vmatmul.mubr.bf16.gmra.mxu0 %v8695_v50  ;;  %4749 = vmatmul.mubr.bf16.gmra.mxu1 %v8696_v51  ;;  %v8741_v50 = vld [vmem:[%s9409_s9 + $0x65c] ss:$100 sps:$4 sm:$0xff]   ;;  %v8744_v51 = vld [vmem:[%s9409_s9 + $0x24] ss:$100 sps:$4 sm:$0xff]  }
  0xdd   : > { %4659 = vmatprep.mubr.bf16.mxu0 %v8701_v54  ;;  %4756 = vmatprep.mubr.bf16.mxu1 %v8703_v55 }
  0xde   : > { %7611 = vmatpush3.bf16.msra.mxu1 %v8746_v56 }
  0xdf   : > { %7612 = vmatprep.subr.bf16.mxu1 %v8761_v57 }
  0xe2   : > { %7613 = vmatpush3.bf16.msra.mxu1 %v8762_v60  ;;  %v8739_v60 = vld [vmem:[%s9409_s9 + $0x658] ss:$100 sps:$4 sm:$0xff]  }
  0xe3   : > { %7614 = vmatprep.subr.bf16.mxu1 %v8777_v61  ;;  %v8742_v61 = vld [vmem:[%s9409_s9 + $0x20] ss:$100 sps:$4 sm:$0xff]  }
  0xe4   : > { %4660 = vmatmul.mubr.bf16.gmra.mxu0 %v8705_v58  ;;  %4757 = vmatmul.mubr.bf16.gmra.mxu1 %v8706_v59 }
  0xe5   : > { %4667 = vmatprep.mubr.bf16.mxu0 %v8707_v62  ;;  %4764 = vmatprep.mubr.bf16.mxu1 %v8709_v63 }
  0xe6   : > { %7615 = vmatpush3.bf16.msra.mxu1 %v8778_v0 }
  0xe7   : > { %7616 = vmatprep.subr.bf16.mxu1 %v8793_v1 }
  0xea   : > { %7617 = vmatpush3.bf16.msra.mxu1 %v8794_v2  ;;  %v8748_v2 = vld [vmem:[%s11660_s1 + $0x338] sm:$0xff]  }
  0xeb   : > { %7826 = vmatprep.subr.bf16.mxu1 %v8809_v3  ;;  %v8751_v3 = vld [vmem:[%s9409_s9 + $0x724] ss:$100 sps:$4 sm:$0xff]  }
  0xec   : > { %v7058_v8 = vpop.f32.mrf.mxu0  ;;  %v7130_v9 = vpop.f32.mrf.mxu1  ;;  %4668 = vmatmul.mubr.bf16.gmra.mxu0 %v8711_v4  ;;  %4765 = vmatmul.mubr.bf16.gmra.mxu1 %v8712_v5 }
  0xed   : > { %4675 = vmatprep.mubr.bf16.mxu0 %v8717_v6  ;;  %4772 = vmatprep.mubr.bf16.mxu1 %v8719_v7  ;;  %v8754_v6 = vld [vmem:[%s9409_s9 + $0xec] ss:$100 sps:$4 sm:$0xff]  }
  0xee   : > { %v7059_v10 = vpop.f32.mrf.mxu0  ;;  %v7131_v11 = vpop.f32.mrf.mxu1  ;;  %v8763_v7 = vld [vmem:[%s11660_s1 + $0x370] sm:$0xff]  }
  0xef   : > { %v9782_v14 = vadd.f32 %v7059_v10, %v7058_v8  ;;  %v9784_v15 = vadd.f32 %v7131_v11, %v7130_v9  ;;  %v9837_v10 = vld [vmem:[%s11661_s2] ss:$0 sm:$0xff] }
  0xf0   : > { %v7061_v16 = vpop.f32.mrf.mxu0  ;;  %v7133_v17 = vpop.f32.mrf.mxu1 }
  0xf2   : > { %v7062_v20 = vpop.f32.mrf.mxu0  ;;  %v7134_v21 = vpop.f32.mrf.mxu1 }
  0xf3   : > { %v9788_v22 = vadd.f32 %v7062_v20, %v7061_v16  ;;  %v9790_v23 = vadd.f32 %v7134_v21, %v7133_v17  ;;  %v8779_v16 = vld [vmem:[%s11660_s1 + $0x368] sm:$0xff]   ;;  %v4252_v21 = vadd.f32 %v9782_v14, %v9837_v10  ;;  %v8795_v14 = vld [vmem:[%s11660_s1 + $0x360] sm:$0xff]  }
  0xf4   : > { %v7064_v24 = vpop.f32.mrf.mxu0  ;;  %v7136_v25 = vpop.f32.mrf.mxu1  ;;  %4676 = vmatmul.mubr.bf16.gmra.mxu0 %v8721_v12  ;;  %4773 = vmatmul.mubr.bf16.gmra.mxu1 %v8722_v13  ;;  %v8764_v13 = vld [vmem:[%s11660_s1 + $0x330] sm:$0xff]   ;;  %v8752_v20 = vld [vmem:[%s9409_s9 + $0xe8] ss:$100 sps:$4 sm:$0xff]  }
  0xf5   : > { %4683 = vmatprep.mubr.bf16.mxu0 %v8723_v18  ;;  %4780 = vmatprep.mubr.bf16.mxu1 %v8725_v19  ;;  %v8749_v19 = vld [vmem:[%s9409_s9 + $0x720] ss:$100 sps:$4 sm:$0xff]  }
  0xf6   : > { %v7065_v26 = vpop.f32.mrf.mxu0  ;;  %v7137_v27 = vpop.f32.mrf.mxu1 }
  0xf7   : > { %v9794_v30 = vadd.f32 %v7065_v26, %v7064_v24  ;;  %v9796_v31 = vadd.f32 %v7137_v27, %v7136_v25 }
  0xf8   : > { %v7067_v32 = vpop.f32.mrf.mxu0  ;;  %v7139_v33 = vpop.f32.mrf.mxu1 }
  0xfa   : > { %v7068_v36 = vpop.f32.mrf.mxu0  ;;  %v7140_v37 = vpop.f32.mrf.mxu1 }
  0xfb   : > { %v9800_v38 = vadd.f32 %v7068_v36, %v7067_v32  ;;  %v9802_v39 = vadd.f32 %v7140_v37, %v7139_v33  ;;  %v8760_v32 = vld [vmem:[%s9409_s9 + $0x1b4] ss:$100 sps:$4 sm:$0xff]   ;;  %v4255_v36 = vadd.f32 %v9788_v22, %v9837_v10 }
  0xfc   : > { %v7070_v40 = vpop.f32.mrf.mxu0  ;;  %v7142_v41 = vpop.f32.mrf.mxu1  ;;  %4684 = vmatmul.mubr.bf16.gmra.mxu0 %v8727_v28  ;;  %4781 = vmatmul.mubr.bf16.gmra.mxu1 %v8728_v29  ;;  %v8757_v29 = vld [vmem:[%s9409_s9 + $0x7ec] ss:$100 sps:$4 sm:$0xff]   ;;  %v8811_v22 = vld [vmem:[%s11660_s1 + $0x358] sm:$0xff]  }
  0xfd   : > { %4691 = vmatprep.mubr.bf16.mxu0 %v8733_v34  ;;  %4788 = vmatprep.mubr.bf16.mxu1 %v8735_v35  ;;  %v8780_v35 = vld [vmem:[%s11660_s1 + $0x328] sm:$0xff]  }
  0xfe   : > { %v7071_v42 = vpop.f32.mrf.mxu0  ;;  %v7143_v43 = vpop.f32.mrf.mxu1 }
  0xff   : > { %v9806_v46 = vadd.f32 %v7071_v42, %v7070_v40  ;;  %v9808_v47 = vadd.f32 %v7143_v43, %v7142_v41  ;;  %v8796_v43 = vld [vmem:[%s11660_s1 + $0x320] sm:$0xff]  }
 0x100   : > { %v7073_v48 = vpop.f32.mrf.mxu0  ;;  %v7145_v49 = vpop.f32.mrf.mxu1 }
 0x102   : > { %v7074_v52 = vpop.f32.mrf.mxu0  ;;  %v7146_v53 = vpop.f32.mrf.mxu1 }
 0x103   : > { %v9812_v54 = vadd.f32 %v7074_v52, %v7073_v48  ;;  %v9814_v55 = vadd.f32 %v7146_v53, %v7145_v49  ;;  %v8755_v49 = vld [vmem:[%s9409_s9 + $0x7e8] ss:$100 sps:$4 sm:$0xff]  }
 0x104   : > { %v7076_v56 = vpop.f32.mrf.mxu0  ;;  %v7148_v57 = vpop.f32.mrf.mxu1  ;;  %4692 = vmatmul.mubr.bf16.gmra.mxu0 %v8737_v44  ;;  %4789 = vmatmul.mubr.bf16.gmra.mxu1 %v8738_v45 }
 0x105   : > { %4796 = vmatprep.mubr.bf16.mxu1 %v8741_v50  ;;  %4893 = vmatprep.mubr.bf16.mxu0 %v8744_v51  ;;  %v8758_v50 = vld [vmem:[%s9409_s9 + $0x1b0] ss:$100 sps:$4 sm:$0xff]   ;;  %v4260_v51 = vadd.f32 %v9794_v30, %v9837_v10 }
 0x106   : > { %v7077_v58 = vpop.f32.mrf.mxu0  ;;  %v7149_v59 = vpop.f32.mrf.mxu1  ;;  %v8827_v30 = vld [vmem:[%s11660_s1 + $0x350] sm:$0xff]  }
 0x107   : > { %v9818_v62 = vadd.f32 %v7077_v58, %v7076_v56  ;;  %v9820_v63 = vadd.f32 %v7149_v59, %v7148_v57  ;;  %v8767_v59 = vld [vmem:[%s9409_s9 + $0x8b4] ss:$100 sps:$4 sm:$0xff]  }
 0x108   : > { %v7079_v0 = vpop.f32.mrf.mxu0  ;;  %v7151_v1 = vpop.f32.mrf.mxu1 }
 0x10a   : > { %v7080_v4 = vpop.f32.mrf.mxu0  ;;  %v7152_v5 = vpop.f32.mrf.mxu1 }
 0x10b   : > { %v9830_v8 = vadd.f32 %v7080_v4, %v7079_v0  ;;  %v9832_v9 = vadd.f32 %v7152_v5, %v7151_v1  ;;  %v8812_v1 = vld [vmem:[%s11660_s1 + $0x318] sm:$0xff]  }
 0x10c   : > { %v7082_v11 = vpop.f32.mrf.mxu0  ;;  %v7170_v12 = vpop.f32.mrf.mxu1  ;;  %4797 = vmatmul.mubr.bf16.gmra.mxu1 %v8739_v60  ;;  %4894 = vmatmul.mubr.bf16.vlgmr.msra.gmra.mxu0 %v8742_v61  ;;  %v8770_v60 = vld [vmem:[%s9409_s9 + $0x27c] ss:$100 sps:$4 sm:$0xff]  }
 0x10d   : > { %7715 = vmatpush3.bf16.msra.mxu0 %v8748_v2  ;;  %4804 = vmatprep.mubr.bf16.mxu1 %v8751_v3  ;;  %v4263_v2 = vadd.f32 %v9800_v38, %v9837_v10  ;;  %v8843_v38 = vld [vmem:[%s11660_s1 + $0x348] sm:$0xff]  }
 0x10e   : > { %v7083_v17 = vpop.f32.mrf.mxu0  ;;  %v7171_v18 = vpop.f32.mrf.mxu1  ;;  %4901 = vmatprep.mubr.bf16.mxu0 %v8754_v6  ;;  %7716 = vmatprep.subr.bf16.mxu0 %v8763_v7 }
 0x10f   : > { %v9849_v24 = vadd.f32 %v7083_v17, %v7082_v11  ;;  %v7172_v25 = vadd.f32 %v7171_v18, %v7170_v12  ;;  %v8828_v11 = vld [vmem:[%s11660_s1 + $0x310] sm:$0xff]   ;;  %v8768_v17 = vld [vmem:[%s9409_s9 + $0x278] ss:$100 sps:$4 sm:$0xff]   ;;  %v4268_v18 = vadd.f32 %v9806_v46, %v9837_v10  ;;  %v8859_v46 = vld [vmem:[%s11660_s1 + $0x340] sm:$0xff]  }
 0x110   : > { %v7085_v26 = vpop.f32.mrf.mxu0  ;;  %v7173_v27 = vpop.f32.mrf.mxu1 }
 0x111   : > { %v9851_v28 = vadd.f32 %v7172_v25, %v4252_v21  ;;  %7717 = vmatpush3.bf16.msra.mxu0 %v8764_v13 }
 0x112   : > { %v7086_v33 = vpop.f32.mrf.mxu0  ;;  %v7174_v34 = vpop.f32.mrf.mxu1  ;;  %7718 = vmatprep.subr.bf16.mxu0 %v8779_v16  ;;  %v8765_v16 = vld [vmem:[%s9409_s9 + $0x8b0] ss:$100 sps:$4 sm:$0xff]  }
 0x113   : > { %v9863_v37 = vadd.f32 %v7086_v33, %v7085_v26  ;;  %v7175_v40 = vadd.f32 %v7174_v34, %v7173_v27  ;;  %v8773_v27 = vld [vmem:[%s9409_s9 + $0x97c] ss:$100 sps:$4 sm:$0xff]   ;;  %v8844_v34 = vld [vmem:[%s11660_s1 + $0x308] sm:$0xff]  }
 0x114   : > { %v7088_v41 = vpop.f32.mrf.mxu0  ;;  %v7176_v42 = vpop.f32.mrf.mxu1  ;;  %4805 = vmatmul.mubr.bf16.gmra.mxu1 %v8749_v19  ;;  %4902 = vmatmul.mubr.bf16.gmra.mxu0 %v8752_v20 }
 0x115   : > { %v9868_v44 = vadd.f32 %v7175_v40, %v4255_v36  ;;  %4812 = vmatprep.mubr.bf16.mxu1 %v8757_v29  ;;  %4909 = vmatprep.mubr.bf16.mxu0 %v8760_v32  ;;  %v8776_v29 = vld [vmem:[%s9409_s9 + $0x344] ss:$100 sps:$4 sm:$0xff]  }
 0x116   : > { %v7089_v45 = vpop.f32.mrf.mxu0  ;;  %v7177_v48 = vpop.f32.mrf.mxu1  ;;  %7719 = vmatpush3.bf16.msra.mxu0 %v8780_v35  ;;  %v4271_v35 = vadd.f32 %v9812_v54, %v9837_v10  ;;  %v8875_v54 = vld [vmem:[%s11660_s1 + $0x478] sm:$0xff]  }
 0x117   : > { %v9877_v52 = vadd.f32 %v7089_v45, %v7088_v41  ;;  %v7178_v53 = vadd.f32 %v7177_v48, %v7176_v42  ;;  %7720 = vmatprep.subr.bf16.mxu0 %v8795_v14  ;;  %v8860_v42 = vld [vmem:[%s11660_s1 + $0x300] sm:$0xff]   ;;  %v8771_v48 = vld [vmem:[%s9409_s9 + $0x978] ss:$100 sps:$4 sm:$0xff]  }
 0x118   : > { %v7091_v56 = vpop.f32.mrf.mxu0  ;;  %v7179_v57 = vpop.f32.mrf.mxu1 }
 0x119   : > { %v9879_v58 = vadd.f32 %v7178_v53, %v4260_v51 }
 0x11a   : > { %v7092_v61 = vpop.f32.mrf.mxu0  ;;  %v7180_v0 = vpop.f32.mrf.mxu1  ;;  %7721 = vmatpush3.bf16.msra.mxu0 %v8796_v43 }
 0x11b   : > { %v9891_v3 = vadd.f32 %v7092_v61, %v7091_v56  ;;  %v7181_v4 = vadd.f32 %v7180_v0, %v7179_v57  ;;  %7722 = vmatprep.subr.bf16.mxu0 %v8811_v22  ;;  %v8786_v61 = vld [vmem:[%s9409_s9 + $0x40c] ss:$100 sps:$4 sm:$0xff]  }
 0x11c   : > { %v7094_v5 = vpop.f32.mrf.mxu0  ;;  %v7182_v6 = vpop.f32.mrf.mxu1  ;;  %4813 = vmatmul.mubr.bf16.gmra.mxu1 %v8755_v49  ;;  %4910 = vmatmul.mubr.bf16.gmra.mxu0 %v8758_v50  ;;  %v8774_v49 = vld [vmem:[%s9409_s9 + $0x340] ss:$100 sps:$4 sm:$0xff]   ;;  %v4276_v50 = vadd.f32 %v9818_v62, %v9837_v10 }
 0x11d   : > { %v9893_v7 = vadd.f32 %v7181_v4, %v4263_v2  ;;  %4820 = vmatprep.mubr.bf16.mxu1 %v8767_v59  ;;  %4917 = vmatprep.mubr.bf16.mxu0 %v8770_v60  ;;  %v8783_v60 = vld [vmem:[%s9409_s9 + $0xa44] ss:$100 sps:$4 sm:$0xff]  }
 0x11e   : > { %v7095_v12 = vpop.f32.mrf.mxu0  ;;  %v7183_v13 = vpop.f32.mrf.mxu1  ;;  %7723 = vmatpush3.bf16.msra.mxu0 %v8812_v1 }
 0x11f   : > { %v9905_v19 = vadd.f32 %v7095_v12, %v7094_v5  ;;  %v7184_v20 = vadd.f32 %v7183_v13, %v7182_v6  ;;  %7724 = vmatprep.subr.bf16.mxu0 %v8827_v30  ;;  %v4279_v30 = vadd.f32 %v9830_v8, %v9837_v10  ;;  %v8781_v12 = vld [vmem:[%s9409_s9 + $0xa40] ss:$100 sps:$4 sm:$0xff]   ;;  %v8784_v13 = vld [vmem:[%s9409_s9 + $0x408] ss:$100 sps:$4 sm:$0xff]   ;;  %v4284_v8 = vadd.f32 %v9849_v24, %v9837_v10 }
 0x120   : > { %v7097_v21 = vpop.f32.mrf.mxu0  ;;  %v7185_v25 = vpop.f32.mrf.mxu1 }
 0x121   : > { %v9907_v26 = vadd.f32 %v7184_v20, %v4268_v18 }
 0x122   : > { %v7098_v32 = vpop.f32.mrf.mxu0  ;;  %v7186_v33 = vpop.f32.mrf.mxu1  ;;  %7725 = vmatpush3.bf16.msra.mxu0 %v8828_v11 }
 0x123   : > { %v9919_v14 = vadd.f32 %v7098_v32, %v7097_v21  ;;  %v7187_v36 = vadd.f32 %v7186_v33, %v7185_v25  ;;  %7726 = vmatprep.subr.bf16.mxu0 %v8843_v38  ;;  %v8789_v25 = vld [vmem:[%s9409_s9 + $0xb0c] ss:$100 sps:$4 sm:$0xff]   ;;  %v4287_v33 = vadd.f32 %v9863_v37, %v9837_v10  ;;  %v4292_v37 = vadd.f32 %v9877_v52, %v9837_v10 }
 0x124   : > { %v7100_v40 = vpop.f32.mrf.mxu0  ;;  %v7188_v41 = vpop.f32.mrf.mxu1  ;;  %4821 = vmatmul.mubr.bf16.gmra.mxu1 %v8765_v16  ;;  %4918 = vmatmul.mubr.bf16.gmra.mxu0 %v8768_v17 }
 0x125   : > { %v9924_v43 = vadd.f32 %v7187_v36, %v4271_v35  ;;  %4828 = vmatprep.mubr.bf16.mxu1 %v8773_v27  ;;  %4925 = vmatprep.mubr.bf16.mxu0 %v8776_v29  ;;  %v8792_v27 = vld [vmem:[%s9409_s9 + $0x4d4] ss:$100 sps:$4 sm:$0xff]  }
 0x126   : > { %v7101_v22 = vpop.f32.mrf.mxu0  ;;  %v7189_v45 = vpop.f32.mrf.mxu1  ;;  %7727 = vmatpush3.bf16.msra.mxu0 %v8844_v34 }
 0x127   : > { %v9933_v51 = vadd.f32 %v7101_v22, %v7100_v40  ;;  %v7190_v53 = vadd.f32 %v7189_v45, %v7188_v41  ;;  %7728 = vmatprep.subr.bf16.mxu0 %v8859_v46 }
 0x128   : > { %v7103_v56 = vpop.f32.mrf.mxu0  ;;  %v7191_v57 = vpop.f32.mrf.mxu1 }
 0x129   : > { %v9935_v59 = vadd.f32 %v7190_v53, %v4276_v50  ;;  %v8799_v53 = vld [vmem:[%s9409_s9 + $0xbd4] ss:$100 sps:$4 sm:$0xff]  }
 0x12a   : > { %v7104_v0 = vpop.f32.mrf.mxu0  ;;  %v7192_v1 = vpop.f32.mrf.mxu1  ;;  %7729 = vmatpush3.bf16.msra.mxu0 %v8860_v42  ;;  %v8787_v42 = vld [vmem:[%s9409_s9 + $0xb08] ss:$100 sps:$4 sm:$0xff]  }
 0x12b   : > { %v9941_v2 = vadd.f32 %v7104_v0, %v7103_v56  ;;  %v7193_v62 = vadd.f32 %v7192_v1, %v7191_v57  ;;  %7938 = vmatprep.subr.bf16.mxu0 %v8875_v54  ;;  %v8790_v54 = vld [vmem:[%s9409_s9 + $0x4d0] ss:$100 sps:$4 sm:$0xff]   ;;  %v8802_v56 = vld [vmem:[%s9409_s9 + $0x59c] ss:$100 sps:$4 sm:$0xff]  }
 0x12c   : > { %v7106_v4 = vpop.f32.mrf.mxu0  ;;  %v7194_v5 = vpop.f32.mrf.mxu1  ;;  %4829 = vmatmul.mubr.bf16.gmra.mxu1 %v8771_v48  ;;  %4926 = vmatmul.mubr.bf16.gmra.mxu0 %v8774_v49 }
 0x12d   : > { %v9943_v6 = vadd.f32 %v7193_v62, %v4279_v30  ;;  %4836 = vmatprep.mubr.bf16.mxu1 %v8783_v60  ;;  %4933 = vmatprep.mubr.bf16.mxu0 %v8786_v61  ;;  %v4295_v61 = vadd.f32 %v9891_v3, %v9837_v10  ;;  %v4300_v3 = vadd.f32 %v9905_v19, %v9837_v10 }
 0x12e   : > { %v7107_v11 = vpop.f32.mrf.mxu0  ;;  %v7195_v38 = vpop.f32.mrf.mxu1 }
 0x12f   : > { %v9949_v16 = vadd.f32 %v7107_v11, %v7106_v4  ;;  %v7196_v17 = vadd.f32 %v7195_v38, %v7194_v5  ;;  %v8797_v11 = vld [vmem:[%s9409_s9 + $0xbd0] ss:$100 sps:$4 sm:$0xff]   ;;  %v8800_v38 = vld [vmem:[%s9409_s9 + $0x598] ss:$100 sps:$4 sm:$0xff]  }
 0x130   : > { %v7109_v18 = vpop.f32.mrf.mxu0  ;;  %v7197_v20 = vpop.f32.mrf.mxu1 }
 0x131   : > { %v9951_v21 = vadd.f32 %v7196_v17, %v4284_v8 }
 0x132   : > { %v7110_v29 = vpop.f32.mrf.mxu0  ;;  %v7198_v32 = vpop.f32.mrf.mxu1 }
 0x133   : > { %v9957_v34 = vadd.f32 %v7110_v29, %v7109_v18  ;;  %v7199_v46 = vadd.f32 %v7198_v32, %v7197_v20  ;;  %v8805_v20 = vld [vmem:[%s9409_s9 + $0x664] ss:$100 sps:$4 sm:$0xff]   ;;  %v4303_v32 = vadd.f32 %v9919_v14, %v9837_v10  ;;  %v4308_v14 = vadd.f32 %v9933_v51, %v9837_v10  ;;  %v8825_v51 = vld [vmem:[%s11660_s1 + $0x3f0] sm:$0xff]  }
 0x134   : > { %v7112_v24 = vpop.f32.mrf.mxu0  ;;  %v7200_v35 = vpop.f32.mrf.mxu1  ;;  %4837 = vmatmul.mubr.bf16.gmra.mxu1 %v8781_v12  ;;  %4934 = vmatmul.mubr.bf16.gmra.mxu0 %v8784_v13 }
 0x135   : > { %v9959_v36 = vadd.f32 %v7199_v46, %v4287_v33  ;;  %4844 = vmatprep.mubr.bf16.mxu1 %v8789_v25  ;;  %4941 = vmatprep.mubr.bf16.mxu0 %v8792_v27  ;;  %v8808_v25 = vld [vmem:[%s9409_s9 + $0x2c] ss:$100 sps:$4 sm:$0xff]  }
 0x136   : > { %v7113_v40 = vpop.f32.mrf.mxu0  ;;  %v7201_v41 = vpop.f32.mrf.mxu1 }
 0x137   : > { %v9965_v22 = vadd.f32 %v7113_v40, %v7112_v24  ;;  %v7202_v45 = vadd.f32 %v7201_v41, %v7200_v35 }
 0x138   : > { %v7115_v48 = vpop.f32.mrf.mxu0  ;;  %v7203_v49 = vpop.f32.mrf.mxu1 }
 0x139   : > { %v9967_v50 = vadd.f32 %v7202_v45, %v4292_v37 }
 0x13a   : > { %v7116_v57 = vpop.f32.mrf.mxu0  ;;  %v7204_v60 = vpop.f32.mrf.mxu1 }
 0x13b   : > { %v9973_v0 = vadd.f32 %v7116_v57, %v7115_v48  ;;  %v7205_v1 = vadd.f32 %v7204_v60, %v7203_v49  ;;  %v8815_v57 = vld [vmem:[%s9409_s9 + $0x72c] ss:$100 sps:$4 sm:$0xff]  }
 0x13c   : > { %v7118_v52 = vpop.f32.mrf.mxu0  ;;  %v7206_v30 = vpop.f32.mrf.mxu1  ;;  %4845 = vmatmul.mubr.bf16.gmra.mxu1 %v8787_v42  ;;  %4942 = vmatmul.mubr.bf16.gmra.mxu0 %v8790_v54  ;;  %v8803_v42 = vld [vmem:[%s9409_s9 + $0x660] ss:$100 sps:$4 sm:$0xff]   ;;  %v8806_v54 = vld [vmem:[%s9409_s9 + $0x28] ss:$100 sps:$4 sm:$0xff]  }
 0x13d   : > { %v9975_v62 = vadd.f32 %v7205_v1, %v4295_v61  ;;  %4852 = vmatprep.mubr.bf16.mxu1 %v8799_v53  ;;  %4949 = vmatprep.mubr.bf16.mxu0 %v8802_v56  ;;  %v8810_v56 = vld [vmem:[%s11660_s1 + $0x3b8] sm:$0xff]  }
 0x13e   : > { %v7119_v4 = vpop.f32.mrf.mxu0  ;;  %v7207_v5 = vpop.f32.mrf.mxu1  ;;  %v8818_v1 = vld [vmem:[%s9409_s9 + $0xf4] ss:$100 sps:$4 sm:$0xff]  }
 0x13f   : > { %v9981_v12 = vadd.f32 %v7119_v4, %v7118_v52  ;;  %v7208_v13 = vadd.f32 %v7207_v5, %v7206_v30  ;;  %v4311_v52 = vadd.f32 %v9941_v2, %v9837_v10  ;;  %v8841_v2 = vld [vmem:[%s11660_s1 + $0x3e8] sm:$0xff]  }
 0x140   : > { %v7121_v8 = vpop.f32.mrf.mxu0  ;;  %v7209_v17 = vpop.f32.mrf.mxu1 }
 0x141   : > { %v9983_v18 = vadd.f32 %v7208_v13, %v4300_v3  ;;  %v8826_v3 = vld [vmem:[%s11660_s1 + $0x3b0] sm:$0xff]  }
 0x142   : > { %v7122_v27 = vpop.f32.mrf.mxu0  ;;  %v7210_v29 = vpop.f32.mrf.mxu1 }
 0x143   : > { %v9989_v33 = vadd.f32 %v7122_v27, %v7121_v8  ;;  %v7211_v46 = vadd.f32 %v7210_v29, %v7209_v17  ;;  %v8813_v17 = vld [vmem:[%s9409_s9 + $0x728] ss:$100 sps:$4 sm:$0xff]  }
 0x144   : > { %v7124_v19 = vpop.f32.mrf.mxu0  ;;  %v7212_v24 = vpop.f32.mrf.mxu1  ;;  %4853 = vmatmul.mubr.bf16.gmra.mxu1 %v8797_v11  ;;  %4950 = vmatmul.mubr.bf16.gmra.mxu0 %v8800_v38 }
 0x145   : > { %v9991_v35 = vadd.f32 %v7211_v46, %v4303_v32  ;;  %4957 = vmatprep.mubr.bf16.mxu0 %v8805_v20  ;;  %5054 = vmatprep.mubr.bf16.mxu1 %v8808_v25  ;;  %v8816_v20 = vld [vmem:[%s9409_s9 + $0xf0] ss:$100 sps:$4 sm:$0xff]   ;;  %v4316_v25 = vadd.f32 %v9949_v16, %v9837_v10  ;;  %v8857_v16 = vld [vmem:[%s11660_s1 + $0x3e0] sm:$0xff]  }
 0x146   : > { %v7125_v40 = vpop.f32.mrf.mxu0  ;;  %v7213_v41 = vpop.f32.mrf.mxu1 }
 0x147   : > { %v9997_v37 = vadd.f32 %v7125_v40, %v7124_v19  ;;  %v7214_v45 = vadd.f32 %v7213_v41, %v7212_v24  ;;  %v8821_v40 = vld [vmem:[%s9409_s9 + $0x7f4] ss:$100 sps:$4 sm:$0xff]   ;;  %v8824_v41 = vld [vmem:[%s9409_s9 + $0x1bc] ss:$100 sps:$4 sm:$0xff]  }
 0x148   : > { %v7127_v48 = vpop.f32.mrf.mxu0  ;;  %v7215_v49 = vpop.f32.mrf.mxu1 }
 0x149   : > { %v9999_v53 = vadd.f32 %v7214_v45, %v4308_v14  ;;  %v8842_v14 = vld [vmem:[%s11660_s1 + $0x3a8] sm:$0xff]   ;;  %v4319_v45 = vadd.f32 %v9957_v34, %v9837_v10  ;;  %v8873_v34 = vld [vmem:[%s11660_s1 + $0x3d8] sm:$0xff]  }
 0x14a   : > { %v7128_v60 = vpop.f32.mrf.mxu0  ;;  %v7216_v61 = vpop.f32.mrf.mxu1 }
 0x14b   : > { %v10011_v30 = vadd.f32 %v7128_v60, %v7127_v48  ;;  %v7217_v4 = vadd.f32 %v7216_v61, %v7215_v49 }
 0x14c   : > { %v7218_v5 = vpop.f32.mrf.mxu1  ;;  %v7282_v11 = vpop.f32.mrf.mxu0  ;;  %4958 = vmatmul.mubr.bf16.gmra.mxu0 %v8803_v42  ;;  %5055 = vmatmul.mubr.bf16.vlgmr.msra.gmra.mxu1 %v8806_v54 }
 0x14d   : > { %v10013_v38 = vadd.f32 %v7217_v4, %v4311_v52  ;;  %7827 = vmatpush3.bf16.msra.mxu1 %v8810_v56  ;;  %4965 = vmatprep.mubr.bf16.mxu0 %v8815_v57  ;;  %v8858_v57 = vld [vmem:[%s11660_s1 + $0x3a0] sm:$0xff]   ;;  %v8819_v52 = vld [vmem:[%s9409_s9 + $0x7f0] ss:$100 sps:$4 sm:$0xff]   ;;  %v8822_v4 = vld [vmem:[%s9409_s9 + $0x1b8] ss:$100 sps:$4 sm:$0xff]  }
 0x14e   : > { %v7219_v13 = vpop.f32.mrf.mxu1  ;;  %v7283_v8 = vpop.f32.mrf.mxu0  ;;  %5062 = vmatprep.mubr.bf16.mxu1 %v8818_v1  ;;  %7828 = vmatprep.subr.bf16.mxu1 %v8825_v51 }
 0x14f   : > { %v7220_v27 = vadd.f32 %v7219_v13, %v7218_v5  ;;  %v7284_v29 = vadd.f32 %v7283_v8, %v7282_v11  ;;  %v4324_v5 = vadd.f32 %v9965_v22, %v9837_v10  ;;  %v8889_v22 = vld [vmem:[%s11660_s1 + $0x3d0] sm:$0xff]  }
 0x150   : > { %v7221_v32 = vpop.f32.mrf.mxu1  ;;  %v7285_v46 = vpop.f32.mrf.mxu0 }
 0x151   : > { %v10025_v19 = vadd.f32 %v7220_v27, %v4316_v25  ;;  %v10028_v24 = vadd.f32 %v7284_v29, %v9851_v28  ;;  %7829 = vmatpush3.bf16.msra.mxu1 %v8826_v3  ;;  %v8874_v29 = vld [vmem:[%s11660_s1 + $0x398] sm:$0xff]  }
 0x152   : > { %v7222_v42 = vpop.f32.mrf.mxu1  ;;  %v7286_v54 = vpop.f32.mrf.mxu0  ;;  %7830 = vmatprep.subr.bf16.mxu1 %v8841_v2 }
 0x153   : > { %v7223_v28 = vadd.f32 %v7222_v42, %v7221_v32  ;;  %v7287_v48 = vadd.f32 %v7286_v54, %v7285_v46  ;;  %v4327_v32 = vadd.f32 %v9973_v0, %v9837_v10  ;;  %v8890_v0 = vld [vmem:[%s11660_s1 + $0x390] sm:$0xff]  }
 0x154   : > { %v7224_v49 = vpop.f32.mrf.mxu1  ;;  %v7288_v56 = vpop.f32.mrf.mxu0  ;;  %4966 = vmatmul.mubr.bf16.gmra.mxu0 %v8813_v17  ;;  %5063 = vmatmul.mubr.bf16.gmra.mxu1 %v8816_v20  ;;  %v8831_v17 = vld [vmem:[%s9409_s9 + $0x8bc] ss:$100 sps:$4 sm:$0xff]   ;;  %v8834_v20 = vld [vmem:[%s9409_s9 + $0x284] ss:$100 sps:$4 sm:$0xff]  }
 0x155   : > { %v10043_v60 = vadd.f32 %v7223_v28, %v4319_v45  ;;  %v10046_v61 = vadd.f32 %v7287_v48, %v9868_v44  ;;  %4973 = vmatprep.mubr.bf16.mxu0 %v8821_v40  ;;  %5070 = vmatprep.mubr.bf16.mxu1 %v8824_v41  ;;  %v8829_v28 = vld [vmem:[%s9409_s9 + $0x8b8] ss:$100 sps:$4 sm:$0xff]   ;;  %v8832_v48 = vld [vmem:[%s9409_s9 + $0x280] ss:$100 sps:$4 sm:$0xff]  }
 0x156   : > { %v7225_v1 = vpop.f32.mrf.mxu1  ;;  %v7289_v51 = vpop.f32.mrf.mxu0  ;;  %7831 = vmatpush3.bf16.msra.mxu1 %v8842_v14  ;;  %v8905_v14 = vld [vmem:[%s11660_s1 + $0x3c8] sm:$0xff]  }
 0x157   : > { %v7226_v11 = vadd.f32 %v7225_v1, %v7224_v49  ;;  %v7290_v3 = vadd.f32 %v7289_v51, %v7288_v56  ;;  %7832 = vmatprep.subr.bf16.mxu1 %v8857_v16 }
 0x158   : > { %v7227_v44 = vpop.f32.mrf.mxu1  ;;  %v7291_v2 = vpop.f32.mrf.mxu0 }
 0x159   : > { %v10055_v13 = vadd.f32 %v7226_v11, %v4324_v5  ;;  %v10058_v8 = vadd.f32 %v7290_v3, %v9879_v58  ;;  %v8906_v3 = vld [vmem:[%s11660_s1 + $0x388] sm:$0xff]  }
 0x15a   : > { %v7228_v25 = vpop.f32.mrf.mxu1  ;;  %v7292_v27 = vpop.f32.mrf.mxu0  ;;  %7833 = vmatpush3.bf16.msra.mxu1 %v8858_v57 }
 0x15b   : > { %v7229_v46 = vadd.f32 %v7228_v25, %v7227_v44  ;;  %v7293_v58 = vadd.f32 %v7292_v27, %v7291_v2  ;;  %7834 = vmatprep.subr.bf16.mxu1 %v8873_v34  ;;  %v8922_v25 = vld [vmem:[%s11660_s1 + $0x380] sm:$0xff]  }
 0x15c   : > { %v7230_v40 = vpop.f32.mrf.mxu1  ;;  %v7294_v41 = vpop.f32.mrf.mxu0  ;;  %4974 = vmatmul.mubr.bf16.gmra.mxu0 %v8819_v52  ;;  %5071 = vmatmul.mubr.bf16.gmra.mxu1 %v8822_v4  ;;  %v8837_v52 = vld [vmem:[%s9409_s9 + $0x984] ss:$100 sps:$4 sm:$0xff]   ;;  %v8840_v4 = vld [vmem:[%s9409_s9 + $0x34c] ss:$100 sps:$4 sm:$0xff]  }
 0x15d   : > { %v10070_v42 = vadd.f32 %v7229_v46, %v4327_v32  ;;  %v10073_v54 = vadd.f32 %v7293_v58, %v9893_v7  ;;  %4981 = vmatprep.mubr.bf16.mxu0 %v8831_v17  ;;  %5078 = vmatprep.mubr.bf16.mxu1 %v8834_v20  ;;  %v4332_v7 = vadd.f32 %v9981_v12, %v9837_v10  ;;  %v8921_v10 = vld [vmem:[%s11660_s1 + $0x3c0] sm:$0xff]   ;;  %v8838_v58 = vld [vmem:[%s9409_s9 + $0x348] ss:$100 sps:$4 sm:$0xff]  }
 0x15e   : > { %v7231_v16 = vpop.f32.mrf.mxu1  ;;  %v7295_v45 = vpop.f32.mrf.mxu0  ;;  %7835 = vmatpush3.bf16.msra.mxu1 %v8874_v29  ;;  %v10101_v12 = vld [vmem:[%s11661_s2] ss:$0 sm:$0xff] }
 0x15f   : > { %v7232_v49 = vadd.f32 %v7231_v16, %v7230_v40  ;;  %v7296_v56 = vadd.f32 %v7295_v45, %v7294_v41  ;;  %7836 = vmatprep.subr.bf16.mxu1 %v8889_v22  ;;  %v8835_v46 = vld [vmem:[%s9409_s9 + $0x980] ss:$100 sps:$4 sm:$0xff]   ;;  %v4340_v40 = vadd.f32 %v10101_v12, %v9997_v37  ;;  %v4343_v37 = vadd.f32 %v10101_v12, %v10011_v30  ;;  %v8848_v30 = vld [vmem:[%s9409_s9 + $0x410] ss:$100 sps:$4 sm:$0xff]  }
 0x160   : > { %v7233_v57 = vpop.f32.mrf.mxu1  ;;  %v7297_v34 = vpop.f32.mrf.mxu0 }
 0x161   : > { %v10085_v1 = vadd.f32 %v7232_v49, %v4332_v7  ;;  %v10088_v51 = vadd.f32 %v7296_v56, %v9907_v26  ;;  %v4335_v26 = vadd.f32 %v10101_v12, %v9989_v33  ;;  %v8937_v33 = vld [vmem:[%s11660_s1 + $0x4f8] sm:$0xff]  }
 0x162   : > { %v7234_v5 = vpop.f32.mrf.mxu1  ;;  %v7298_v11 = vpop.f32.mrf.mxu0  ;;  %7837 = vmatpush3.bf16.msra.mxu1 %v8890_v0 }
 0x163   : > { %v7235_v44 = vadd.f32 %v7234_v5, %v7233_v57  ;;  %v7299_v2 = vadd.f32 %v7298_v11, %v7297_v34  ;;  %7838 = vmatprep.subr.bf16.mxu1 %v8905_v14 }
 0x164   : > { %v7236_v17 = vpop.f32.mrf.mxu1  ;;  %v7300_v20 = vpop.f32.mrf.mxu0  ;;  %4982 = vmatmul.mubr.bf16.gmra.mxu0 %v8829_v28  ;;  %5079 = vmatmul.mubr.bf16.gmra.mxu1 %v8832_v48  ;;  %v8847_v28 = vld [vmem:[%s9409_s9 + $0xa4c] ss:$100 sps:$4 sm:$0xff]   ;;  %v8850_v48 = vld [vmem:[%s9409_s9 + $0x414] ss:$100 sps:$4 sm:$0xff]  }
 0x165   : > { %v10108_v27 = vadd.f32 %v7235_v44, %v4335_v26  ;;  %v10111_v29 = vadd.f32 %v7299_v2, %v9924_v43  ;;  %4989 = vmatprep.mubr.bf16.mxu0 %v8837_v52  ;;  %5086 = vmatprep.mubr.bf16.mxu1 %v8840_v4 }
 0x166   : > { %v7237_v22 = vpop.f32.mrf.mxu1  ;;  %v7301_v32 = vpop.f32.mrf.mxu0  ;;  %7839 = vmatpush3.bf16.msra.mxu1 %v8906_v3  ;;  %v8845_v3 = vld [vmem:[%s9409_s9 + $0xa48] ss:$100 sps:$4 sm:$0xff]  }
 0x167   : > { %v7238_v41 = vadd.f32 %v7237_v22, %v7236_v17  ;;  %v7302_v0 = vadd.f32 %v7301_v32, %v7300_v20  ;;  %7840 = vmatprep.subr.bf16.mxu1 %v8921_v10  ;;  %v4348_v10 = vadd.f32 %v10101_v12, %v9784_v15 }
 0x168   : > { %v7239_v43 = vpop.f32.mrf.mxu1  ;;  %v7303_v14 = vpop.f32.mrf.mxu0 }
 0x169   : > { %v10120_v16 = vadd.f32 %v7238_v41, %v4340_v40  ;;  %v10123_v45 = vadd.f32 %v7302_v0, %v9935_v59 }
 0x16a   : > { %v7240_v7 = vpop.f32.mrf.mxu1  ;;  %v7304_v49 = vpop.f32.mrf.mxu0  ;;  %7841 = vmatpush3.bf16.msra.mxu1 %v8922_v25 }
 0x16b   : > { %v7241_v56 = vadd.f32 %v7240_v7, %v7239_v43  ;;  %v7305_v57 = vadd.f32 %v7304_v49, %v7303_v14  ;;  %8050 = vmatprep.subr.bf16.mxu1 %v8937_v33  ;;  %v8856_v33 = vld [vmem:[%s9409_s9 + $0x4dc] ss:$100 sps:$4 sm:$0xff]  }
 0x16c   : > { %v7242_v34 = vpop.f32.mrf.mxu1  ;;  %v7306_v52 = vpop.f32.mrf.mxu0  ;;  %4990 = vmatmul.mubr.bf16.gmra.mxu0 %v8835_v46  ;;  %5087 = vmatmul.mubr.bf16.gmra.mxu1 %v8838_v58  ;;  %v4351_v46 = vadd.f32 %v10101_v12, %v9790_v23  ;;  %v4356_v23 = vadd.f32 %v10101_v12, %v9796_v31 }
 0x16d   : > { %v10129_v59 = vadd.f32 %v7241_v56, %v4343_v37  ;;  %v10132_v4 = vadd.f32 %v7305_v57, %v9943_v6  ;;  %4997 = vmatprep.mubr.bf16.mxu0 %v8847_v28  ;;  %5094 = vmatprep.mubr.bf16.mxu1 %v8850_v48  ;;  %v8853_v6 = vld [vmem:[%s9409_s9 + $0xb14] ss:$100 sps:$4 sm:$0xff]  }
 0x16e   : > { %v7243_v5 = vpop.f32.mrf.mxu1  ;;  %v7307_v11 = vpop.f32.mrf.mxu0  ;;  %v8851_v28 = vld [vmem:[%s9409_s9 + $0xb10] ss:$100 sps:$4 sm:$0xff]   ;;  %v8854_v48 = vld [vmem:[%s9409_s9 + $0x4d8] ss:$100 sps:$4 sm:$0xff]  }
 0x16f   : > { %v7244_v26 = vadd.f32 %v7243_v5, %v7242_v34  ;;  %v7308_v44 = vadd.f32 %v7307_v11, %v7306_v52  ;;  %v8866_v52 = vld [vmem:[%s9409_s9 + $0x5a4] ss:$100 sps:$4 sm:$0xff]  }
 0x170   : > { %v7245_v2 = vpop.f32.mrf.mxu1  ;;  %v7309_v17 = vpop.f32.mrf.mxu0 }
 0x171   : > { %v10138_v20 = vadd.f32 %v7244_v26, %v4348_v10  ;;  %v10141_v25 = vadd.f32 %v7308_v44, %v9951_v21 }
 0x172   : > { %v7246_v22 = vpop.f32.mrf.mxu1  ;;  %v7310_v32 = vpop.f32.mrf.mxu0 }
 0x173   : > { %v7247_v58 = vadd.f32 %v7246_v22, %v7245_v2  ;;  %v7311_v15 = vadd.f32 %v7310_v32, %v7309_v17 }
 0x174   : > { %v7248_v40 = vpop.f32.mrf.mxu1  ;;  %v7312_v41 = vpop.f32.mrf.mxu0  ;;  %4998 = vmatmul.mubr.bf16.gmra.mxu0 %v8845_v3  ;;  %5095 = vmatmul.mubr.bf16.gmra.mxu1 %v8848_v30  ;;  %v4359_v3 = vadd.f32 %v10101_v12, %v9802_v39  ;;  %v4364_v39 = vadd.f32 %v10101_v12, %v9808_v47 }
 0x175   : > { %v10147_v0 = vadd.f32 %v7247_v58, %v4351_v46  ;;  %v10150_v21 = vadd.f32 %v7311_v15, %v9959_v36  ;;  %5005 = vmatprep.mubr.bf16.mxu0 %v8853_v6  ;;  %5102 = vmatprep.mubr.bf16.mxu1 %v8856_v33  ;;  %v8863_v36 = vld [vmem:[%s9409_s9 + $0xbdc] ss:$100 sps:$4 sm:$0xff]  }
 0x176   : > { %v7249_v43 = vpop.f32.mrf.mxu1  ;;  %v7313_v14 = vpop.f32.mrf.mxu0  ;;  %v8861_v6 = vld [vmem:[%s9409_s9 + $0xbd8] ss:$100 sps:$4 sm:$0xff]   ;;  %v8864_v33 = vld [vmem:[%s9409_s9 + $0x5a0] ss:$100 sps:$4 sm:$0xff]  }
 0x177   : > { %v7250_v7 = vadd.f32 %v7249_v43, %v7248_v40  ;;  %v7314_v49 = vadd.f32 %v7313_v14, %v7312_v41  ;;  %v8872_v41 = vld [vmem:[%s9409_s9 + $0x34] ss:$100 sps:$4 sm:$0xff]  }
 0x178   : > { %v7251_v37 = vpop.f32.mrf.mxu1  ;;  %v7315_v56 = vpop.f32.mrf.mxu0 }
 0x179   : > { %v10156_v57 = vadd.f32 %v7250_v7, %v4356_v23  ;;  %v10159_v34 = vadd.f32 %v7314_v49, %v9967_v50 }
 0x17a   : > { %v7252_v5 = vpop.f32.mrf.mxu1  ;;  %v7316_v11 = vpop.f32.mrf.mxu0 }
 0x17b   : > { %v7253_v30 = vadd.f32 %v7252_v5, %v7251_v37  ;;  %v7317_v31 = vadd.f32 %v7316_v11, %v7315_v56 }
 0x17c   : > { %v7254_v10 = vpop.f32.mrf.mxu1  ;;  %v7318_v26 = vpop.f32.mrf.mxu0  ;;  %5006 = vmatmul.mubr.bf16.gmra.mxu0 %v8851_v28  ;;  %5103 = vmatmul.mubr.bf16.gmra.mxu1 %v8854_v48  ;;  %v4367_v28 = vadd.f32 %v10101_v12, %v9814_v55  ;;  %v4372_v55 = vadd.f32 %v10101_v12, %v9820_v63  ;;  %v8891_v63 = vld [vmem:[%s11660_s1 + $0x470] sm:$0xff]  }
 0x17d   : > { %v10165_v44 = vadd.f32 %v7253_v30, %v4359_v3  ;;  %v10168_v50 = vadd.f32 %v7317_v31, %v9975_v62  ;;  %5013 = vmatprep.mubr.bf16.mxu0 %v8863_v36  ;;  %5110 = vmatprep.mubr.bf16.mxu1 %v8866_v52  ;;  %v8869_v62 = vld [vmem:[%s9409_s9 + $0x66c] ss:$100 sps:$4 sm:$0xff]  }
 0x17e   : > { %v7255_v2 = vpop.f32.mrf.mxu1  ;;  %v7319_v17 = vpop.f32.mrf.mxu0  ;;  %v8867_v36 = vld [vmem:[%s9409_s9 + $0x668] ss:$100 sps:$4 sm:$0xff]   ;;  %v8870_v52 = vld [vmem:[%s9409_s9 + $0x30] ss:$100 sps:$4 sm:$0xff]  }
 0x17f   : > { %v7256_v22 = vadd.f32 %v7255_v2, %v7254_v10  ;;  %v7320_v32 = vadd.f32 %v7319_v17, %v7318_v26  ;;  %v8879_v26 = vld [vmem:[%s9409_s9 + $0x734] ss:$100 sps:$4 sm:$0xff]  }
 0x180   : > { %v7257_v46 = vpop.f32.mrf.mxu1  ;;  %v7321_v58 = vpop.f32.mrf.mxu0 }
 0x181   : > { %v10174_v15 = vadd.f32 %v7256_v22, %v4364_v39  ;;  %v10177_v40 = vadd.f32 %v7320_v32, %v9983_v18 }
 0x182   : > { %v7258_v43 = vpop.f32.mrf.mxu1  ;;  %v7322_v14 = vpop.f32.mrf.mxu0 }
 0x183   : > { %v7259_v48 = vadd.f32 %v7258_v43, %v7257_v46  ;;  %v7323_v47 = vadd.f32 %v7322_v14, %v7321_v58  ;;  %v8877_v43 = vld [vmem:[%s9409_s9 + $0x730] ss:$100 sps:$4 sm:$0xff]   ;;  %v8880_v14 = vld [vmem:[%s9409_s9 + $0xf8] ss:$100 sps:$4 sm:$0xff]  }
 0x184   : > { %v7260_v23 = vpop.f32.mrf.mxu1  ;;  %v7324_v7 = vpop.f32.mrf.mxu0  ;;  %5014 = vmatmul.mubr.bf16.gmra.mxu0 %v8861_v6  ;;  %5111 = vmatmul.mubr.bf16.gmra.mxu1 %v8864_v33  ;;  %v8882_v6 = vld [vmem:[%s9409_s9 + $0xfc] ss:$100 sps:$4 sm:$0xff]   ;;  %v4375_v33 = vadd.f32 %v10101_v12, %v9832_v9  ;;  %v8892_v9 = vld [vmem:[%s11660_s1 + $0x430] sm:$0xff]   ;;  %v8907_v12 = vld [vmem:[%s11660_s1 + $0x468] sm:$0xff]  }
 0x185   : > { %v10183_v49 = vadd.f32 %v7259_v48, %v4367_v28  ;;  %v10186_v18 = vadd.f32 %v7323_v47, %v9991_v35  ;;  %5118 = vmatprep.mubr.bf16.mxu1 %v8869_v62  ;;  %5215 = vmatprep.mubr.bf16.mxu0 %v8872_v41  ;;  %v8876_v35 = vld [vmem:[%s11660_s1 + $0x438] sm:$0xff]  }
 0x186   : > { %v7261_v37 = vpop.f32.mrf.mxu1  ;;  %v7325_v56 = vpop.f32.mrf.mxu0 }
 0x187   : > { %v7262_v5 = vadd.f32 %v7261_v37, %v7260_v23  ;;  %v7326_v11 = vadd.f32 %v7325_v56, %v7324_v7  ;;  %v8885_v37 = vld [vmem:[%s9409_s9 + $0x7fc] ss:$100 sps:$4 sm:$0xff]   ;;  %v8888_v56 = vld [vmem:[%s9409_s9 + $0x1c4] ss:$100 sps:$4 sm:$0xff]  }
 0x188   : > { %v7263_v3 = vpop.f32.mrf.mxu1  ;;  %v7327_v30 = vpop.f32.mrf.mxu0 }
 0x189   : > { %v10192_v31 = vadd.f32 %v7262_v5, %v4372_v55  ;;  %v10195_v10 = vadd.f32 %v7326_v11, %v9999_v53  ;;  %v8908_v55 = vld [vmem:[%s11660_s1 + $0x428] sm:$0xff]   ;;  %v8923_v5 = vld [vmem:[%s11660_s1 + $0x460] sm:$0xff]  }
 0x18a   : > { %v7264_v2 = vpop.f32.mrf.mxu1  ;;  %v7328_v17 = vpop.f32.mrf.mxu0 }
 0x18b   : > { %v7265_v39 = vadd.f32 %v7264_v2, %v7263_v3  ;;  %v7329_v53 = vadd.f32 %v7328_v17, %v7327_v30  ;;  %v8924_v30 = vld [vmem:[%s11660_s1 + $0x420] sm:$0xff]   ;;  %v8939_v2 = vld [vmem:[%s11660_s1 + $0x458] sm:$0xff]  }
 0x18c   : > { %v7330_v22 = vpop.f32.mrf.mxu0  ;;  %v7394_v32 = vpop.f32.mrf.mxu1  ;;  %5119 = vmatmul.mubr.bf16.gmra.mxu1 %v8867_v36  ;;  %5216 = vmatmul.mubr.bf16.vlgmr.msra.gmra.mxu0 %v8870_v52 }
 0x18d   : > { %v10207_v46 = vadd.f32 %v7265_v39, %v4375_v33  ;;  %v10210_v58 = vadd.f32 %v7329_v53, %v10013_v38  ;;  %7939 = vmatpush3.bf16.msra.mxu0 %v8876_v35  ;;  %5126 = vmatprep.mubr.bf16.mxu1 %v8879_v26  ;;  %v8886_v33 = vld [vmem:[%s9409_s9 + $0x1c0] ss:$100 sps:$4 sm:$0xff]  }
 0x18e   : > { %v7331_v62 = vpop.f32.mrf.mxu0  ;;  %v7395_v41 = vpop.f32.mrf.mxu1  ;;  %5223 = vmatprep.mubr.bf16.mxu0 %v8882_v6  ;;  %7940 = vmatprep.subr.bf16.mxu0 %v8891_v63  ;;  %v8883_v63 = vld [vmem:[%s9409_s9 + $0x7f8] ss:$100 sps:$4 sm:$0xff]  }
 0x18f   : > { %v7332_v38 = vadd.f32 %v7331_v62, %v7330_v22  ;;  %v7396_v28 = vadd.f32 %v7395_v41, %v7394_v32 }
 0x190   : > { %v7333_v48 = vpop.f32.mrf.mxu0  ;;  %v7397_v47 = vpop.f32.mrf.mxu1 }
 0x191   : > { %v10221_v23 = vadd.f32 %v7332_v38, %v10025_v19  ;;  %v10224_v7 = vadd.f32 %v7396_v28, %v10028_v24  ;;  %7941 = vmatpush3.bf16.msra.mxu0 %v8892_v9  ;;  %v8895_v9 = vld [vmem:[%s9409_s9 + $0x8c4] ss:$100 sps:$4 sm:$0xff]  }
 0x192   : > { %v7334_v36 = vpop.f32.mrf.mxu0  ;;  %v7398_v52 = vpop.f32.mrf.mxu1  ;;  %7942 = vmatprep.subr.bf16.mxu0 %v8907_v12  ;;  %v8898_v12 = vld [vmem:[%s9409_s9 + $0x28c] ss:$100 sps:$4 sm:$0xff]  }
 0x193   : > { %v7335_v19 = vadd.f32 %v7334_v36, %v7333_v48  ;;  %v7399_v11 = vadd.f32 %v7398_v52, %v7397_v47 }
 0x194   : > { %v7336_v24 = vpop.f32.mrf.mxu0  ;;  %v7400_v3 = vpop.f32.mrf.mxu1  ;;  %5127 = vmatmul.mubr.bf16.gmra.mxu1 %v8877_v43  ;;  %5224 = vmatmul.mubr.bf16.gmra.mxu0 %v8880_v14  ;;  %v8940_v43 = vld [vmem:[%s11660_s1 + $0x418] sm:$0xff]   ;;  %v8955_v14 = vld [vmem:[%s11660_s1 + $0x450] sm:$0xff]  }
 0x195   : > { %v10238_v35 = vadd.f32 %v7335_v19, %v10043_v60  ;;  %v10241_v26 = vadd.f32 %v7399_v11, %v10046_v61  ;;  %5134 = vmatprep.mubr.bf16.mxu1 %v8885_v37  ;;  %5231 = vmatprep.mubr.bf16.mxu0 %v8888_v56  ;;  %v8956_v37 = vld [vmem:[%s11660_s1 + $0x410] sm:$0xff]   ;;  %v8971_v56 = vld [vmem:[%s11660_s1 + $0x448] sm:$0xff]  }
 0x196   : > { %v7337_v17 = vpop.f32.mrf.mxu0  ;;  %v7401_v6 = vpop.f32.mrf.mxu1  ;;  %7943 = vmatpush3.bf16.msra.mxu0 %v8908_v55  ;;  %v8893_v55 = vld [vmem:[%s9409_s9 + $0x8c0] ss:$100 sps:$4 sm:$0xff]  }
 0x197   : > { %v7338_v39 = vadd.f32 %v7337_v17, %v7336_v24  ;;  %v7402_v53 = vadd.f32 %v7401_v6, %v7400_v3  ;;  %7944 = vmatprep.subr.bf16.mxu0 %v8923_v5 }
 0x198   : > { %v7339_v60 = vpop.f32.mrf.mxu0  ;;  %v7403_v22 = vpop.f32.mrf.mxu1 }
 0x199   : > { %v10249_v61 = vadd.f32 %v7338_v39, %v10055_v13  ;;  %v10252_v32 = vadd.f32 %v7402_v53, %v10058_v8 }
 0x19a   : > { %v7340_v62 = vpop.f32.mrf.mxu0  ;;  %v7404_v41 = vpop.f32.mrf.mxu1  ;;  %7945 = vmatpush3.bf16.msra.mxu0 %v8924_v30  ;;  %v8901_v30 = vld [vmem:[%s9409_s9 + $0x98c] ss:$100 sps:$4 sm:$0xff]  }
 0x19b   : > { %v7341_v38 = vadd.f32 %v7340_v62, %v7339_v60  ;;  %v7405_v13 = vadd.f32 %v7404_v41, %v7403_v22  ;;  %7946 = vmatprep.subr.bf16.mxu0 %v8939_v2  ;;  %v8904_v2 = vld [vmem:[%s9409_s9 + $0x354] ss:$100 sps:$4 sm:$0xff]   ;;  %v8988_v62 = vld [vmem:[%s11660_s1 + $0x400] sm:$0xff]  }
 0x19c   : > { %v7342_v8 = vpop.f32.mrf.mxu0  ;;  %v7406_v28 = vpop.f32.mrf.mxu1  ;;  %5135 = vmatmul.mubr.bf16.gmra.mxu1 %v8883_v63  ;;  %5232 = vmatmul.mubr.bf16.gmra.mxu0 %v8886_v33  ;;  %v8972_v63 = vld [vmem:[%s11660_s1 + $0x408] sm:$0xff]   ;;  %v8987_v33 = vld [vmem:[%s11660_s1 + $0x440] sm:$0xff]  }
 0x19d   : > { %v10263_v48 = vadd.f32 %v7341_v38, %v10070_v42  ;;  %v10266_v47 = vadd.f32 %v7405_v13, %v10073_v54  ;;  %5142 = vmatprep.mubr.bf16.mxu1 %v8895_v9  ;;  %5239 = vmatprep.mubr.bf16.mxu0 %v8898_v12  ;;  %v8896_v42 = vld [vmem:[%s9409_s9 + $0x288] ss:$100 sps:$4 sm:$0xff]   ;;  %v8902_v13 = vld [vmem:[%s9409_s9 + $0x350] ss:$100 sps:$4 sm:$0xff]  }
 0x19e   : > { %v7343_v36 = vpop.f32.mrf.mxu0  ;;  %v7407_v52 = vpop.f32.mrf.mxu1  ;;  %7947 = vmatpush3.bf16.msra.mxu0 %v8940_v43  ;;  %v8899_v38 = vld [vmem:[%s9409_s9 + $0x988] ss:$100 sps:$4 sm:$0xff]  }
 0x19f   : > { %v7344_v5 = vadd.f32 %v7343_v36, %v7342_v8  ;;  %v7408_v54 = vadd.f32 %v7407_v52, %v7406_v28  ;;  %7948 = vmatprep.subr.bf16.mxu0 %v8955_v14 }
 0x1a0   : > { %v7345_v19 = vpop.f32.mrf.mxu0  ;;  %v7409_v11 = vpop.f32.mrf.mxu1 }
 0x1a1   : > { %v10277_v24 = vadd.f32 %v7344_v5, %v10085_v1  ;;  %v10280_v3 = vadd.f32 %v7408_v54, %v10088_v51 }
 0x1a2   : > { %v7346_v17 = vpop.f32.mrf.mxu0  ;;  %v7410_v6 = vpop.f32.mrf.mxu1  ;;  %7949 = vmatpush3.bf16.msra.mxu0 %v8956_v37  ;;  %v8911_v37 = vld [vmem:[%s9409_s9 + $0xa54] ss:$100 sps:$4 sm:$0xff]  }
 0x1a3   : > { %v7347_v39 = vadd.f32 %v7346_v17, %v7345_v19  ;;  %v7411_v53 = vadd.f32 %v7410_v6, %v7409_v11  ;;  %7950 = vmatprep.subr.bf16.mxu0 %v8971_v56  ;;  %v8914_v56 = vld [vmem:[%s9409_s9 + $0x41c] ss:$100 sps:$4 sm:$0xff]  }
 0x1a4   : > { %v7348_v1 = vpop.f32.mrf.mxu0  ;;  %v7412_v60 = vpop.f32.mrf.mxu1  ;;  %5143 = vmatmul.mubr.bf16.gmra.mxu1 %v8893_v55  ;;  %5240 = vmatmul.mubr.bf16.gmra.mxu0 %v8896_v42 }
 0x1a5   : > { %v10291_v51 = vadd.f32 %v7347_v39, %v10108_v27  ;;  %v10294_v22 = vadd.f32 %v7411_v53, %v10111_v29  ;;  %5150 = vmatprep.mubr.bf16.mxu1 %v8901_v30  ;;  %5247 = vmatprep.mubr.bf16.mxu0 %v8904_v2  ;;  %v9003_v27 = vld [vmem:[%s11660_s1 + $0x578] sm:$0xff]  }
 0x1a6   : > { %v7349_v9 = vpop.f32.mrf.mxu0  ;;  %v7413_v12 = vpop.f32.mrf.mxu1  ;;  %7951 = vmatpush3.bf16.msra.mxu0 %v8972_v63  ;;  %v8909_v63 = vld [vmem:[%s9409_s9 + $0xa50] ss:$100 sps:$4 sm:$0xff]  }
 0x1a7   : > { %v7350_v41 = vadd.f32 %v7349_v9, %v7348_v1  ;;  %v7414_v43 = vadd.f32 %v7413_v12, %v7412_v60  ;;  %7952 = vmatprep.subr.bf16.mxu0 %v8987_v33  ;;  %v8912_v33 = vld [vmem:[%s9409_s9 + $0x418] ss:$100 sps:$4 sm:$0xff]   ;;  %v8920_v1 = vld [vmem:[%s9409_s9 + $0x4e4] ss:$100 sps:$4 sm:$0xff]  }
 0x1a8   : > { %v7351_v29 = vpop.f32.mrf.mxu0  ;;  %v7415_v14 = vpop.f32.mrf.mxu1 }
 0x1a9   : > { %v10305_v8 = vadd.f32 %v7350_v41, %v10120_v16  ;;  %v10308_v28 = vadd.f32 %v7414_v43, %v10123_v45 }
 0x1aa   : > { %v7352_v36 = vpop.f32.mrf.mxu0  ;;  %v7416_v52 = vpop.f32.mrf.mxu1  ;;  %7953 = vmatpush3.bf16.msra.mxu0 %v8988_v62 }
 0x1ab   : > { %v7353_v55 = vadd.f32 %v7352_v36, %v7351_v29  ;;  %v7417_v42 = vadd.f32 %v7416_v52, %v7415_v14  ;;  %8162 = vmatprep.subr.bf16.mxu0 %v9003_v27 }
 0x1ac   : > { %v7354_v5 = vpop.f32.mrf.mxu0  ;;  %v7418_v54 = vpop.f32.mrf.mxu1  ;;  %5151 = vmatmul.mubr.bf16.gmra.mxu1 %v8899_v38  ;;  %5248 = vmatmul.mubr.bf16.gmra.mxu0 %v8902_v13 }
 0x1ad   : > { %v10313_v16 = vadd.f32 %v7353_v55, %v10129_v59  ;;  %v10316_v45 = vadd.f32 %v7417_v42, %v10132_v4  ;;  %5158 = vmatprep.mubr.bf16.mxu1 %v8911_v37  ;;  %5255 = vmatprep.mubr.bf16.mxu0 %v8914_v56  ;;  %v8917_v59 = vld [vmem:[%s9409_s9 + $0xb1c] ss:$100 sps:$4 sm:$0xff]   ;;  %v8930_v55 = vld [vmem:[%s9409_s9 + $0x5ac] ss:$100 sps:$4 sm:$0xff]  }
 0x1ae   : > { %v7355_v19 = vpop.f32.mrf.mxu0  ;;  %v7419_v11 = vpop.f32.mrf.mxu1  ;;  %v8915_v37 = vld [vmem:[%s9409_s9 + $0xb18] ss:$100 sps:$4 sm:$0xff]   ;;  %v8918_v56 = vld [vmem:[%s9409_s9 + $0x4e0] ss:$100 sps:$4 sm:$0xff]  }
 0x1af   : > { %v7356_v30 = vadd.f32 %v7355_v19, %v7354_v5  ;;  %v7420_v2 = vadd.f32 %v7419_v11, %v7418_v54 }
 0x1b0   : > { %v7357_v17 = vpop.f32.mrf.mxu0  ;;  %v7421_v6 = vpop.f32.mrf.mxu1 }
 0x1b1   : > { %v10321_v39 = vadd.f32 %v7356_v30, %v10138_v20  ;;  %v10324_v53 = vadd.f32 %v7420_v2, %v10141_v25 }
 0x1b2   : > { %v7358_v4 = vpop.f32.mrf.mxu0  ;;  %v7422_v60 = vpop.f32.mrf.mxu1 }
 0x1b3   : > { %v7359_v9 = vadd.f32 %v7358_v4, %v7357_v17  ;;  %v7423_v12 = vadd.f32 %v7422_v60, %v7421_v6 }
 0x1b4   : > { %v7360_v62 = vpop.f32.mrf.mxu0  ;;  %v7424_v41 = vpop.f32.mrf.mxu1  ;;  %5159 = vmatmul.mubr.bf16.gmra.mxu1 %v8909_v63  ;;  %5256 = vmatmul.mubr.bf16.gmra.mxu0 %v8912_v33 }
 0x1b5   : > { %v10329_v20 = vadd.f32 %v7359_v9, %v10147_v0  ;;  %v10332_v25 = vadd.f32 %v7423_v12, %v10150_v21  ;;  %5166 = vmatprep.mubr.bf16.mxu1 %v8917_v59  ;;  %5263 = vmatprep.mubr.bf16.mxu0 %v8920_v1  ;;  %v8927_v0 = vld [vmem:[%s9409_s9 + $0xbe4] ss:$100 sps:$4 sm:$0xff]   ;;  %v8936_v9 = vld [vmem:[%s9409_s9 + $0x3c] ss:$100 sps:$4 sm:$0xff]  }
 0x1b6   : > { %v7361_v43 = vpop.f32.mrf.mxu0  ;;  %v7425_v27 = vpop.f32.mrf.mxu1  ;;  %v8925_v59 = vld [vmem:[%s9409_s9 + $0xbe0] ss:$100 sps:$4 sm:$0xff]   ;;  %v8928_v1 = vld [vmem:[%s9409_s9 + $0x5a8] ss:$100 sps:$4 sm:$0xff]  }
 0x1b7   : > { %v7362_v29 = vadd.f32 %v7361_v43, %v7360_v62  ;;  %v7426_v14 = vadd.f32 %v7425_v27, %v7424_v41 }
 0x1b8   : > { %v7363_v38 = vpop.f32.mrf.mxu0  ;;  %v7427_v13 = vpop.f32.mrf.mxu1 }
 0x1b9   : > { %v10337_v36 = vadd.f32 %v7362_v29, %v10156_v57  ;;  %v10340_v52 = vadd.f32 %v7426_v14, %v10159_v34 }
 0x1ba   : > { %v7364_v21 = vpop.f32.mrf.mxu0  ;;  %v7428_v42 = vpop.f32.mrf.mxu1 }
 0x1bb   : > { %v7365_v5 = vadd.f32 %v7364_v21, %v7363_v38  ;;  %v7429_v54 = vadd.f32 %v7428_v42, %v7427_v13  ;;  %v8943_v42 = vld [vmem:[%s9409_s9 + $0x73c] ss:$100 sps:$4 sm:$0xff]  }
 0x1bc   : > { %v7366_v19 = vpop.f32.mrf.mxu0  ;;  %v7430_v11 = vpop.f32.mrf.mxu1  ;;  %5167 = vmatmul.mubr.bf16.gmra.mxu1 %v8915_v37  ;;  %5264 = vmatmul.mubr.bf16.gmra.mxu0 %v8918_v56 }
 0x1bd   : > { %v10345_v57 = vadd.f32 %v7365_v5, %v10165_v44  ;;  %v10348_v34 = vadd.f32 %v7429_v54, %v10168_v50  ;;  %5174 = vmatprep.mubr.bf16.mxu1 %v8927_v0  ;;  %5271 = vmatprep.mubr.bf16.mxu0 %v8930_v55  ;;  %v8933_v44 = vld [vmem:[%s9409_s9 + $0x674] ss:$100 sps:$4 sm:$0xff]  }
 0x1be   : > { %v7367_v30 = vpop.f32.mrf.mxu0  ;;  %v7431_v2 = vpop.f32.mrf.mxu1  ;;  %v8931_v0 = vld [vmem:[%s9409_s9 + $0x670] ss:$100 sps:$4 sm:$0xff]   ;;  %v8934_v55 = vld [vmem:[%s9409_s9 + $0x38] ss:$100 sps:$4 sm:$0xff]  }
 0x1bf   : > { %v7368_v17 = vadd.f32 %v7367_v30, %v7366_v19  ;;  %v7432_v6 = vadd.f32 %v7431_v2, %v7430_v11  ;;  %v8946_v19 = vld [vmem:[%s9409_s9 + $0x104] ss:$100 sps:$4 sm:$0xff]   ;;  %v8953_v11 = vld [vmem:[%s11660_s1 + $0x4f0] sm:$0xff]  }
 0x1c0   : > { %v7369_v63 = vpop.f32.mrf.mxu0  ;;  %v7433_v33 = vpop.f32.mrf.mxu1 }
 0x1c1   : > { %v10353_v4 = vadd.f32 %v7368_v17, %v10174_v15  ;;  %v10356_v60 = vadd.f32 %v7432_v6, %v10177_v40 }
 0x1c2   : > { %v7370_v50 = vpop.f32.mrf.mxu0  ;;  %v7434_v12 = vpop.f32.mrf.mxu1 }
 0x1c3   : > { %v7371_v62 = vadd.f32 %v7370_v50, %v7369_v63  ;;  %v7435_v41 = vadd.f32 %v7434_v12, %v7433_v33  ;;  %v8954_v63 = vld [vmem:[%s11660_s1 + $0x4b0] sm:$0xff]   ;;  %v8941_v50 = vld [vmem:[%s9409_s9 + $0x738] ss:$100 sps:$4 sm:$0xff]   ;;  %v8944_v12 = vld [vmem:[%s9409_s9 + $0x100] ss:$100 sps:$4 sm:$0xff]  }
 0x1c4   : > { %v7372_v43 = vpop.f32.mrf.mxu0  ;;  %v7436_v27 = vpop.f32.mrf.mxu1  ;;  %5175 = vmatmul.mubr.bf16.gmra.mxu1 %v8925_v59  ;;  %5272 = vmatmul.mubr.bf16.gmra.mxu0 %v8928_v1 }
 0x1c5   : > { %v10361_v29 = vadd.f32 %v7371_v62, %v10183_v49  ;;  %v10364_v15 = vadd.f32 %v7435_v41, %v10186_v18  ;;  %5279 = vmatprep.mubr.bf16.mxu0 %v8933_v44  ;;  %5376 = vmatprep.mubr.bf16.mxu1 %v8936_v9  ;;  %v8938_v18 = vld [vmem:[%s11660_s1 + $0x4b8] sm:$0xff]  }
 0x1c6   : > { %v7373_v40 = vpop.f32.mrf.mxu0  ;;  %v7437_v14 = vpop.f32.mrf.mxu1 }
 0x1c7   : > { %v7374_v38 = vadd.f32 %v7373_v40, %v7372_v43  ;;  %v7438_v13 = vadd.f32 %v7437_v14, %v7436_v27  ;;  %v8949_v43 = vld [vmem:[%s9409_s9 + $0x804] ss:$100 sps:$4 sm:$0xff]   ;;  %v8952_v27 = vld [vmem:[%s9409_s9 + $0x1cc] ss:$100 sps:$4 sm:$0xff]  }
 0x1c8   : > { %v7375_v37 = vpop.f32.mrf.mxu0  ;;  %v7439_v56 = vpop.f32.mrf.mxu1 }
 0x1c9   : > { %v10369_v21 = vadd.f32 %v7374_v38, %v10192_v31  ;;  %v10372_v49 = vadd.f32 %v7438_v13, %v10195_v10  ;;  %v8970_v38 = vld [vmem:[%s11660_s1 + $0x4a8] sm:$0xff]  }
 0x1ca   : > { %v7376_v5 = vpop.f32.mrf.mxu0  ;;  %v7440_v54 = vpop.f32.mrf.mxu1 }
 0x1cb   : > { %v7377_v30 = vadd.f32 %v7376_v5, %v7375_v37  ;;  %v7441_v2 = vadd.f32 %v7440_v54, %v7439_v56  ;;  %v8986_v5 = vld [vmem:[%s11660_s1 + $0x4a0] sm:$0xff]  }
 0x1cc   : > { %v7442_v17 = vpop.f32.mrf.mxu1  ;;  %v7506_v31 = vpop.f32.mrf.mxu0  ;;  %5280 = vmatmul.mubr.bf16.gmra.mxu0 %v8931_v0  ;;  %5377 = vmatmul.mubr.bf16.vlgmr.msra.gmra.mxu1 %v8934_v55 }
 0x1cd   : > { %v10383_v10 = vadd.f32 %v7377_v30, %v10207_v46  ;;  %v10386_v6 = vadd.f32 %v7441_v2, %v10210_v58  ;;  %8051 = vmatpush3.bf16.msra.mxu1 %v8938_v18  ;;  %5287 = vmatprep.mubr.bf16.mxu0 %v8943_v42  ;;  %v8969_v46 = vld [vmem:[%s11660_s1 + $0x4e8] sm:$0xff]   ;;  %v8947_v30 = vld [vmem:[%s9409_s9 + $0x800] ss:$100 sps:$4 sm:$0xff]  }
 0x1ce   : > { %v7443_v33 = vpop.f32.mrf.mxu1  ;;  %v7507_v59 = vpop.f32.mrf.mxu0  ;;  %5384 = vmatprep.mubr.bf16.mxu1 %v8946_v19  ;;  %8052 = vmatprep.subr.bf16.mxu1 %v8953_v11  ;;  %v8950_v2 = vld [vmem:[%s9409_s9 + $0x1c8] ss:$100 sps:$4 sm:$0xff]  }
 0x1cf   : > { %v7444_v1 = vadd.f32 %v7443_v33, %v7442_v17  ;;  %v7508_v44 = vadd.f32 %v7507_v59, %v7506_v31  ;;  %v8962_v33 = vld [vmem:[%s9409_s9 + $0x294] ss:$100 sps:$4 sm:$0xff]  }
 0x1d0   : > { %v7445_v58 = vpop.f32.mrf.mxu1  ;;  %v7509_v9 = vpop.f32.mrf.mxu0 }
 0x1d1   : > { %v10397_v62 = vadd.f32 %v7444_v1, %v10221_v23  ;;  %v10400_v41 = vadd.f32 %v7508_v44, %v10224_v7  ;;  %8053 = vmatpush3.bf16.msra.mxu1 %v8954_v63  ;;  %v8985_v23 = vld [vmem:[%s11660_s1 + $0x4e0] sm:$0xff]   ;;  %v8959_v63 = vld [vmem:[%s9409_s9 + $0x8cc] ss:$100 sps:$4 sm:$0xff]   ;;  %v9002_v1 = vld [vmem:[%s11660_s1 + $0x498] sm:$0xff]  }
 0x1d2   : > { %v7446_v40 = vpop.f32.mrf.mxu1  ;;  %v7510_v14 = vpop.f32.mrf.mxu0  ;;  %8054 = vmatprep.subr.bf16.mxu1 %v8969_v46 }
 0x1d3   : > { %v7447_v13 = vadd.f32 %v7446_v40, %v7445_v58  ;;  %v7511_v37 = vadd.f32 %v7510_v14, %v7509_v9  ;;  %v9018_v40 = vld [vmem:[%s11660_s1 + $0x490] sm:$0xff]  }
 0x1d4   : > { %v7448_v56 = vpop.f32.mrf.mxu1  ;;  %v7512_v0 = vpop.f32.mrf.mxu0  ;;  %5288 = vmatmul.mubr.bf16.gmra.mxu0 %v8941_v50  ;;  %5385 = vmatmul.mubr.bf16.gmra.mxu1 %v8944_v12 }
 0x1d5   : > { %v10411_v7 = vadd.f32 %v7447_v13, %v10238_v35  ;;  %v10414_v55 = vadd.f32 %v7511_v37, %v10241_v26  ;;  %5295 = vmatprep.mubr.bf16.mxu0 %v8949_v43  ;;  %5392 = vmatprep.mubr.bf16.mxu1 %v8952_v27  ;;  %v9001_v35 = vld [vmem:[%s11660_s1 + $0x4d8] sm:$0xff]   ;;  %v8957_v37 = vld [vmem:[%s9409_s9 + $0x8c8] ss:$100 sps:$4 sm:$0xff]  }
 0x1d6   : > { %v7449_v18 = vpop.f32.mrf.mxu1  ;;  %v7513_v42 = vpop.f32.mrf.mxu0  ;;  %8055 = vmatpush3.bf16.msra.mxu1 %v8970_v38 }
 0x1d7   : > { %v7450_v54 = vadd.f32 %v7449_v18, %v7448_v56  ;;  %v7514_v19 = vadd.f32 %v7513_v42, %v7512_v0  ;;  %8056 = vmatprep.subr.bf16.mxu1 %v8985_v23  ;;  %v8960_v23 = vld [vmem:[%s9409_s9 + $0x290] ss:$100 sps:$4 sm:$0xff]   ;;  %v8968_v42 = vld [vmem:[%s9409_s9 + $0x35c] ss:$100 sps:$4 sm:$0xff]  }
 0x1d8   : > { %v7451_v26 = vpop.f32.mrf.mxu1  ;;  %v7515_v11 = vpop.f32.mrf.mxu0  ;;  %v8965_v18 = vld [vmem:[%s9409_s9 + $0x994] ss:$100 sps:$4 sm:$0xff]  }
 0x1d9   : > { %v10425_v17 = vadd.f32 %v7450_v54, %v10249_v61  ;;  %v10428_v31 = vadd.f32 %v7514_v19, %v10252_v32  ;;  %v9017_v61 = vld [vmem:[%s11660_s1 + $0x4d0] sm:$0xff]   ;;  %v9034_v19 = vld [vmem:[%s11660_s1 + $0x488] sm:$0xff]  }
 0x1da   : > { %v7452_v59 = vpop.f32.mrf.mxu1  ;;  %v7516_v46 = vpop.f32.mrf.mxu0  ;;  %8057 = vmatpush3.bf16.msra.mxu1 %v8986_v5 }
 0x1db   : > { %v7453_v44 = vadd.f32 %v7452_v59, %v7451_v26  ;;  %v7517_v58 = vadd.f32 %v7516_v46, %v7515_v11  ;;  %8058 = vmatprep.subr.bf16.mxu1 %v9001_v35  ;;  %v9050_v59 = vld [vmem:[%s11660_s1 + $0x480] sm:$0xff]  }
 0x1dc   : > { %v7454_v9 = vpop.f32.mrf.mxu1  ;;  %v7518_v50 = vpop.f32.mrf.mxu0  ;;  %5296 = vmatmul.mubr.bf16.gmra.mxu0 %v8947_v30  ;;  %5393 = vmatmul.mubr.bf16.gmra.mxu1 %v8950_v2 }
 0x1dd   : > { %v10439_v32 = vadd.f32 %v7453_v44, %v10263_v48  ;;  %v10442_v12 = vadd.f32 %v7517_v58, %v10266_v47  ;;  %5303 = vmatprep.mubr.bf16.mxu0 %v8959_v63  ;;  %5400 = vmatprep.mubr.bf16.mxu1 %v8962_v33  ;;  %v9033_v48 = vld [vmem:[%s11660_s1 + $0x4c8] sm:$0xff]   ;;  %v8963_v58 = vld [vmem:[%s9409_s9 + $0x990] ss:$100 sps:$4 sm:$0xff]  }
 0x1de   : > { %v7455_v43 = vpop.f32.mrf.mxu1  ;;  %v7519_v27 = vpop.f32.mrf.mxu0  ;;  %8059 = vmatpush3.bf16.msra.mxu1 %v9002_v1 }
 0x1df   : > { %v7456_v14 = vadd.f32 %v7455_v43, %v7454_v9  ;;  %v7520_v38 = vadd.f32 %v7519_v27, %v7518_v50  ;;  %8060 = vmatprep.subr.bf16.mxu1 %v9017_v61  ;;  %v8966_v61 = vld [vmem:[%s9409_s9 + $0x358] ss:$100 sps:$4 sm:$0xff]   ;;  %v8978_v27 = vld [vmem:[%s9409_s9 + $0x424] ss:$100 sps:$4 sm:$0xff]  }
 0x1e0   : > { %v7457_v47 = vpop.f32.mrf.mxu1  ;;  %v7521_v13 = vpop.f32.mrf.mxu0  ;;  %v8975_v43 = vld [vmem:[%s9409_s9 + $0xa5c] ss:$100 sps:$4 sm:$0xff]  }
 0x1e1   : > { %v10453_v56 = vadd.f32 %v7456_v14, %v10277_v24  ;;  %v10456_v0 = vadd.f32 %v7520_v38, %v10280_v3  ;;  %v9049_v24 = vld [vmem:[%s11660_s1 + $0x4c0] sm:$0xff]  }
 0x1e2   : > { %v7458_v5 = vpop.f32.mrf.mxu1  ;;  %v7522_v54 = vpop.f32.mrf.mxu0  ;;  %8061 = vmatpush3.bf16.msra.mxu1 %v9018_v40 }
 0x1e3   : > { %v7459_v35 = vadd.f32 %v7458_v5, %v7457_v47  ;;  %v7523_v26 = vadd.f32 %v7522_v54, %v7521_v13  ;;  %8062 = vmatprep.subr.bf16.mxu1 %v9033_v48 }
 0x1e4   : > { %v7460_v11 = vpop.f32.mrf.mxu1  ;;  %v7524_v30 = vpop.f32.mrf.mxu0  ;;  %5304 = vmatmul.mubr.bf16.gmra.mxu0 %v8957_v37  ;;  %5401 = vmatmul.mubr.bf16.gmra.mxu1 %v8960_v23 }
 0x1e5   : > { %v10467_v3 = vadd.f32 %v7459_v35, %v10291_v51  ;;  %v10470_v2 = vadd.f32 %v7523_v26, %v10294_v22  ;;  %5311 = vmatprep.mubr.bf16.mxu0 %v8965_v18  ;;  %5408 = vmatprep.mubr.bf16.mxu1 %v8968_v42  ;;  %v9065_v51 = vld [vmem:[%s11660_s1 + $0x5f8] sm:$0xff]   ;;  %v8976_v35 = vld [vmem:[%s9409_s9 + $0x420] ss:$100 sps:$4 sm:$0xff]  }
 0x1e6   : > { %v7461_v63 = vpop.f32.mrf.mxu1  ;;  %v7525_v33 = vpop.f32.mrf.mxu0  ;;  %8063 = vmatpush3.bf16.msra.mxu1 %v9034_v19  ;;  %v8973_v19 = vld [vmem:[%s9409_s9 + $0xa58] ss:$100 sps:$4 sm:$0xff]  }
 0x1e7   : > { %v7462_v46 = vadd.f32 %v7461_v63, %v7460_v11  ;;  %v7526_v1 = vadd.f32 %v7525_v33, %v7524_v30  ;;  %8064 = vmatprep.subr.bf16.mxu1 %v9049_v24  ;;  %v8984_v11 = vld [vmem:[%s9409_s9 + $0x4ec] ss:$100 sps:$4 sm:$0xff]  }
 0x1e8   : > { %v7463_v22 = vpop.f32.mrf.mxu1  ;;  %v7527_v44 = vpop.f32.mrf.mxu0 }
 0x1e9   : > { %v10481_v9 = vadd.f32 %v7462_v46, %v10305_v8  ;;  %v10484_v50 = vadd.f32 %v7526_v1, %v10308_v28 }
 0x1ea   : > { %v7464_v40 = vpop.f32.mrf.mxu1  ;;  %v7528_v14 = vpop.f32.mrf.mxu0  ;;  %8065 = vmatpush3.bf16.msra.mxu1 %v9050_v59 }
 0x1eb   : > { %v7465_v38 = vadd.f32 %v7464_v40, %v7463_v22  ;;  %v7529_v48 = vadd.f32 %v7528_v14, %v7527_v44  ;;  %8274 = vmatprep.subr.bf16.mxu1 %v9065_v51 }
 0x1ec   : > { %v7466_v47 = vpop.f32.mrf.mxu1  ;;  %v7530_v13 = vpop.f32.mrf.mxu0  ;;  %5312 = vmatmul.mubr.bf16.gmra.mxu0 %v8963_v58  ;;  %5409 = vmatmul.mubr.bf16.gmra.mxu1 %v8966_v61 }
 0x1ed   : > { %v10489_v8 = vadd.f32 %v7465_v38, %v10313_v16  ;;  %v10492_v28 = vadd.f32 %v7529_v48, %v10316_v45  ;;  %5319 = vmatprep.mubr.bf16.mxu0 %v8975_v43  ;;  %5416 = vmatprep.mubr.bf16.mxu1 %v8978_v27  ;;  %v8981_v16 = vld [vmem:[%s9409_s9 + $0xb24] ss:$100 sps:$4 sm:$0xff]   ;;  %v8994_v38 = vld [vmem:[%s9409_s9 + $0x5b4] ss:$100 sps:$4 sm:$0xff]  }
 0x1ee   : > { %v7467_v37 = vpop.f32.mrf.mxu1  ;;  %v7531_v23 = vpop.f32.mrf.mxu0  ;;  %v8979_v43 = vld [vmem:[%s9409_s9 + $0xb20] ss:$100 sps:$4 sm:$0xff]   ;;  %v8982_v27 = vld [vmem:[%s9409_s9 + $0x4e8] ss:$100 sps:$4 sm:$0xff]  }
 0x1ef   : > { %v7468_v18 = vadd.f32 %v7467_v37, %v7466_v47  ;;  %v7532_v42 = vadd.f32 %v7531_v23, %v7530_v13 }
 0x1f0   : > { %v7469_v5 = vpop.f32.mrf.mxu1  ;;  %v7533_v54 = vpop.f32.mrf.mxu0 }
 0x1f1   : > { %v10497_v26 = vadd.f32 %v7468_v18, %v10321_v39  ;;  %v10500_v24 = vadd.f32 %v7532_v42, %v10324_v53 }
 0x1f2   : > { %v7470_v45 = vpop.f32.mrf.mxu1  ;;  %v7534_v30 = vpop.f32.mrf.mxu0 }
 0x1f3   : > { %v7471_v63 = vadd.f32 %v7470_v45, %v7469_v5  ;;  %v7535_v33 = vadd.f32 %v7534_v30, %v7533_v54 }
 0x1f4   : > { %v7472_v59 = vpop.f32.mrf.mxu1  ;;  %v7536_v46 = vpop.f32.mrf.mxu0  ;;  %5320 = vmatmul.mubr.bf16.gmra.mxu0 %v8973_v19  ;;  %5417 = vmatmul.mubr.bf16.gmra.mxu1 %v8976_v35 }
 0x1f5   : > { %v10505_v39 = vadd.f32 %v7471_v63, %v10329_v20  ;;  %v10508_v53 = vadd.f32 %v7535_v33, %v10332_v25  ;;  %5327 = vmatprep.mubr.bf16.mxu0 %v8981_v16  ;;  %5424 = vmatprep.mubr.bf16.mxu1 %v8984_v11  ;;  %v8991_v20 = vld [vmem:[%s9409_s9 + $0xbec] ss:$100 sps:$4 sm:$0xff]   ;;  %v9000_v63 = vld [vmem:[%s9409_s9 + $0x44] ss:$100 sps:$4 sm:$0xff]  }
 0x1f6   : > { %v7473_v1 = vpop.f32.mrf.mxu1  ;;  %v7537_v51 = vpop.f32.mrf.mxu0  ;;  %v8989_v16 = vld [vmem:[%s9409_s9 + $0xbe8] ss:$100 sps:$4 sm:$0xff]   ;;  %v8992_v11 = vld [vmem:[%s9409_s9 + $0x5b0] ss:$100 sps:$4 sm:$0xff]  }
 0x1f7   : > { %v7474_v22 = vadd.f32 %v7473_v1, %v7472_v59  ;;  %v7538_v44 = vadd.f32 %v7537_v51, %v7536_v46 }
 0x1f8   : > { %v7475_v58 = vpop.f32.mrf.mxu1  ;;  %v7539_v61 = vpop.f32.mrf.mxu0 }
 0x1f9   : > { %v10513_v40 = vadd.f32 %v7474_v22, %v10337_v36  ;;  %v10516_v14 = vadd.f32 %v7538_v44, %v10340_v52 }
 0x1fa   : > { %v7476_v25 = vpop.f32.mrf.mxu1  ;;  %v7540_v48 = vpop.f32.mrf.mxu0 }
 0x1fb   : > { %v7477_v47 = vadd.f32 %v7476_v25, %v7475_v58  ;;  %v7541_v13 = vadd.f32 %v7540_v48, %v7539_v61  ;;  %v9007_v48 = vld [vmem:[%s9409_s9 + $0x744] ss:$100 sps:$4 sm:$0xff]  }
 0x1fc   : > { %v7478_v37 = vpop.f32.mrf.mxu1  ;;  %v7542_v23 = vpop.f32.mrf.mxu0  ;;  %5328 = vmatmul.mubr.bf16.gmra.mxu0 %v8979_v43  ;;  %5425 = vmatmul.mubr.bf16.gmra.mxu1 %v8982_v27 }
 0x1fd   : > { %v10521_v36 = vadd.f32 %v7477_v47, %v10345_v57  ;;  %v10524_v52 = vadd.f32 %v7541_v13, %v10348_v34  ;;  %5335 = vmatprep.mubr.bf16.mxu0 %v8991_v20  ;;  %5432 = vmatprep.mubr.bf16.mxu1 %v8994_v38  ;;  %v8997_v57 = vld [vmem:[%s9409_s9 + $0x67c] ss:$100 sps:$4 sm:$0xff]  }
 0x1fe   : > { %v7479_v18 = vpop.f32.mrf.mxu1  ;;  %v7543_v42 = vpop.f32.mrf.mxu0  ;;  %v8995_v20 = vld [vmem:[%s9409_s9 + $0x678] ss:$100 sps:$4 sm:$0xff]   ;;  %v8998_v38 = vld [vmem:[%s9409_s9 + $0x40] ss:$100 sps:$4 sm:$0xff]  }
 0x1ff   : > { %v7480_v5 = vadd.f32 %v7479_v18, %v7478_v37  ;;  %v7544_v54 = vadd.f32 %v7543_v42, %v7542_v23  ;;  %v9010_v37 = vld [vmem:[%s9409_s9 + $0x10c] ss:$100 sps:$4 sm:$0xff]  }
 0x200   : > { %v7481_v19 = vpop.f32.mrf.mxu1  ;;  %v7545_v35 = vpop.f32.mrf.mxu0  ;;  %v9019_v23 = vld [vmem:[%s11660_s1 + $0x570] sm:$0xff]  }
 0x201   : > { %v10529_v45 = vadd.f32 %v7480_v5, %v10353_v4  ;;  %v10532_v30 = vadd.f32 %v7544_v54, %v10356_v60 }
 0x202   : > { %v7482_v34 = vpop.f32.mrf.mxu1  ;;  %v7546_v33 = vpop.f32.mrf.mxu0 }
 0x203   : > { %v7483_v59 = vadd.f32 %v7482_v34, %v7481_v19  ;;  %v7547_v46 = vadd.f32 %v7546_v33, %v7545_v35  ;;  %v9020_v19 = vld [vmem:[%s11660_s1 + $0x530] sm:$0xff]   ;;  %v9005_v34 = vld [vmem:[%s9409_s9 + $0x740] ss:$100 sps:$4 sm:$0xff]   ;;  %v9008_v33 = vld [vmem:[%s9409_s9 + $0x108] ss:$100 sps:$4 sm:$0xff]  }
 0x204   : > { %v7484_v1 = vpop.f32.mrf.mxu1  ;;  %v7548_v51 = vpop.f32.mrf.mxu0  ;;  %5336 = vmatmul.mubr.bf16.gmra.mxu0 %v8989_v16  ;;  %5433 = vmatmul.mubr.bf16.gmra.mxu1 %v8992_v11 }
 0x205   : > { %v10537_v22 = vadd.f32 %v7483_v59, %v10361_v29  ;;  %v10540_v4 = vadd.f32 %v7547_v46, %v10364_v15  ;;  %5440 = vmatprep.mubr.bf16.mxu1 %v8997_v57  ;;  %5537 = vmatprep.mubr.bf16.mxu0 %v9000_v63  ;;  %v9004_v15 = vld [vmem:[%s11660_s1 + $0x538] sm:$0xff]  }
 0x206   : > { %v7485_v60 = vpop.f32.mrf.mxu1  ;;  %v7549_v44 = vpop.f32.mrf.mxu0 }
 0x207   : > { %v7486_v58 = vadd.f32 %v7485_v60, %v7484_v1  ;;  %v7550_v61 = vadd.f32 %v7549_v44, %v7548_v51  ;;  %v9013_v1 = vld [vmem:[%s9409_s9 + $0x80c] ss:$100 sps:$4 sm:$0xff]   ;;  %v9016_v51 = vld [vmem:[%s9409_s9 + $0x1d4] ss:$100 sps:$4 sm:$0xff]  }
 0x208   : > { %v7487_v43 = vpop.f32.mrf.mxu1  ;;  %v7551_v27 = vpop.f32.mrf.mxu0 }
 0x209   : > { %v10545_v25 = vadd.f32 %v7486_v58, %v10369_v21  ;;  %v10548_v29 = vadd.f32 %v7550_v61, %v10372_v49  ;;  %v9036_v58 = vld [vmem:[%s11660_s1 + $0x528] sm:$0xff]  }
 0x20a   : > { %v7488_v47 = vpop.f32.mrf.mxu1  ;;  %v7552_v13 = vpop.f32.mrf.mxu0 }
 0x20b   : > { %v7489_v18 = vadd.f32 %v7488_v47, %v7487_v43  ;;  %v7553_v42 = vadd.f32 %v7552_v13, %v7551_v27  ;;  %v9052_v47 = vld [vmem:[%s11660_s1 + $0x520] sm:$0xff]  }
 0x20c   : > { %v7554_v5 = vpop.f32.mrf.mxu0  ;;  %v7618_v21 = vpop.f32.mrf.mxu1  ;;  %5441 = vmatmul.mubr.bf16.gmra.mxu1 %v8995_v20  ;;  %5538 = vmatmul.mubr.bf16.vlgmr.msra.gmra.mxu0 %v8998_v38 }
 0x20d   : > { %v10559_v49 = vadd.f32 %v7489_v18, %v10383_v10  ;;  %v10562_v54 = vadd.f32 %v7553_v42, %v10386_v6  ;;  %8163 = vmatpush3.bf16.msra.mxu0 %v9004_v15  ;;  %5448 = vmatprep.mubr.bf16.mxu1 %v9007_v48  ;;  %v9035_v10 = vld [vmem:[%s11660_s1 + $0x568] sm:$0xff]   ;;  %v9014_v42 = vld [vmem:[%s9409_s9 + $0x1d0] ss:$100 sps:$4 sm:$0xff]  }
 0x20e   : > { %v7555_v35 = vpop.f32.mrf.mxu0  ;;  %v7619_v16 = vpop.f32.mrf.mxu1  ;;  %5545 = vmatprep.mubr.bf16.mxu0 %v9010_v37  ;;  %8164 = vmatprep.subr.bf16.mxu0 %v9019_v23  ;;  %v9011_v18 = vld [vmem:[%s9409_s9 + $0x808] ss:$100 sps:$4 sm:$0xff]  }
 0x20f   : > { %v7556_v11 = vadd.f32 %v7555_v35, %v7554_v5  ;;  %v7620_v57 = vadd.f32 %v7619_v16, %v7618_v21  ;;  %v9026_v35 = vld [vmem:[%s9409_s9 + $0x29c] ss:$100 sps:$4 sm:$0xff]  }
 0x210   : > { %v7557_v6 = vpop.f32.mrf.mxu0  ;;  %v7621_v63 = vpop.f32.mrf.mxu1 }
 0x211   : > { %v10573_v59 = vadd.f32 %v7556_v11, %v10397_v62  ;;  %v10576_v46 = vadd.f32 %v7620_v57, %v10400_v41  ;;  %8165 = vmatpush3.bf16.msra.mxu0 %v9020_v19  ;;  %v9051_v62 = vld [vmem:[%s11660_s1 + $0x560] sm:$0xff]   ;;  %v9023_v19 = vld [vmem:[%s9409_s9 + $0x8d4] ss:$100 sps:$4 sm:$0xff]  }
 0x212   : > { %v7558_v60 = vpop.f32.mrf.mxu0  ;;  %v7622_v44 = vpop.f32.mrf.mxu1  ;;  %8166 = vmatprep.subr.bf16.mxu0 %v9035_v10  ;;  %v9068_v11 = vld [vmem:[%s11660_s1 + $0x518] sm:$0xff]  }
 0x213   : > { %v7559_v61 = vadd.f32 %v7558_v60, %v7557_v6  ;;  %v7623_v43 = vadd.f32 %v7622_v44, %v7621_v63  ;;  %v9084_v60 = vld [vmem:[%s11660_s1 + $0x510] sm:$0xff]  }
 0x214   : > { %v7560_v27 = vpop.f32.mrf.mxu0  ;;  %v7624_v20 = vpop.f32.mrf.mxu1  ;;  %5449 = vmatmul.mubr.bf16.gmra.mxu1 %v9005_v34  ;;  %5546 = vmatmul.mubr.bf16.gmra.mxu0 %v9008_v33 }
 0x215   : > { %v10587_v41 = vadd.f32 %v7559_v61, %v10411_v7  ;;  %v10590_v38 = vadd.f32 %v7623_v43, %v10414_v55  ;;  %5456 = vmatprep.mubr.bf16.mxu1 %v9013_v1  ;;  %5553 = vmatprep.mubr.bf16.mxu0 %v9016_v51  ;;  %v9067_v7 = vld [vmem:[%s11660_s1 + $0x558] sm:$0xff]   ;;  %v9021_v43 = vld [vmem:[%s9409_s9 + $0x8d0] ss:$100 sps:$4 sm:$0xff]  }
 0x216   : > { %v7561_v15 = vpop.f32.mrf.mxu0  ;;  %v7625_v48 = vpop.f32.mrf.mxu1  ;;  %8167 = vmatpush3.bf16.msra.mxu0 %v9036_v58 }
 0x217   : > { %v7562_v13 = vadd.f32 %v7561_v15, %v7560_v27  ;;  %v7626_v37 = vadd.f32 %v7625_v48, %v7624_v20  ;;  %8168 = vmatprep.subr.bf16.mxu0 %v9051_v62  ;;  %v9024_v62 = vld [vmem:[%s9409_s9 + $0x298] ss:$100 sps:$4 sm:$0xff]   ;;  %v9032_v48 = vld [vmem:[%s9409_s9 + $0x364] ss:$100 sps:$4 sm:$0xff]  }
 0x218   : > { %v7563_v55 = vpop.f32.mrf.mxu0  ;;  %v7627_v23 = vpop.f32.mrf.mxu1  ;;  %v9029_v15 = vld [vmem:[%s9409_s9 + $0x99c] ss:$100 sps:$4 sm:$0xff]  }
 0x219   : > { %v10601_v5 = vadd.f32 %v7562_v13, %v10425_v17  ;;  %v10604_v21 = vadd.f32 %v7626_v37, %v10428_v31  ;;  %v9083_v17 = vld [vmem:[%s11660_s1 + $0x550] sm:$0xff]   ;;  %v9100_v37 = vld [vmem:[%s11660_s1 + $0x508] sm:$0xff]  }
 0x21a   : > { %v7564_v16 = vpop.f32.mrf.mxu0  ;;  %v7628_v10 = vpop.f32.mrf.mxu1  ;;  %8169 = vmatpush3.bf16.msra.mxu0 %v9052_v47 }
 0x21b   : > { %v7565_v57 = vadd.f32 %v7564_v16, %v7563_v55  ;;  %v7629_v6 = vadd.f32 %v7628_v10, %v7627_v23  ;;  %8170 = vmatprep.subr.bf16.mxu0 %v9067_v7  ;;  %v9116_v16 = vld [vmem:[%s11660_s1 + $0x500] sm:$0xff]  }
 0x21c   : > { %v7566_v63 = vpop.f32.mrf.mxu0  ;;  %v7630_v34 = vpop.f32.mrf.mxu1  ;;  %5457 = vmatmul.mubr.bf16.gmra.mxu1 %v9011_v18  ;;  %5554 = vmatmul.mubr.bf16.gmra.mxu0 %v9014_v42 }
 0x21d   : > { %v10615_v31 = vadd.f32 %v7565_v57, %v10439_v32  ;;  %v10618_v33 = vadd.f32 %v7629_v6, %v10442_v12  ;;  %5464 = vmatprep.mubr.bf16.mxu1 %v9023_v19  ;;  %5561 = vmatprep.mubr.bf16.mxu0 %v9026_v35  ;;  %v9099_v32 = vld [vmem:[%s11660_s1 + $0x548] sm:$0xff]   ;;  %v9027_v6 = vld [vmem:[%s9409_s9 + $0x998] ss:$100 sps:$4 sm:$0xff]  }
 0x21e   : > { %v7567_v1 = vpop.f32.mrf.mxu0  ;;  %v7631_v51 = vpop.f32.mrf.mxu1  ;;  %8171 = vmatpush3.bf16.msra.mxu0 %v9068_v11 }
 0x21f   : > { %v7568_v44 = vadd.f32 %v7567_v1, %v7566_v63  ;;  %v7632_v58 = vadd.f32 %v7631_v51, %v7630_v34  ;;  %8172 = vmatprep.subr.bf16.mxu0 %v9083_v17  ;;  %v9030_v17 = vld [vmem:[%s9409_s9 + $0x360] ss:$100 sps:$4 sm:$0xff]   ;;  %v9042_v51 = vld [vmem:[%s9409_s9 + $0x42c] ss:$100 sps:$4 sm:$0xff]  }
 0x220   : > { %v7569_v12 = vpop.f32.mrf.mxu0  ;;  %v7633_v61 = vpop.f32.mrf.mxu1  ;;  %v9039_v1 = vld [vmem:[%s9409_s9 + $0xa64] ss:$100 sps:$4 sm:$0xff]  }
 0x221   : > { %v10629_v27 = vadd.f32 %v7568_v44, %v10453_v56  ;;  %v10632_v20 = vadd.f32 %v7632_v58, %v10456_v0  ;;  %v9115_v56 = vld [vmem:[%s11660_s1 + $0x540] sm:$0xff]  }
 0x222   : > { %v7570_v47 = vpop.f32.mrf.mxu0  ;;  %v7634_v13 = vpop.f32.mrf.mxu1  ;;  %8173 = vmatpush3.bf16.msra.mxu0 %v9084_v60 }
 0x223   : > { %v7571_v7 = vadd.f32 %v7570_v47, %v7569_v12  ;;  %v7635_v55 = vadd.f32 %v7634_v13, %v7633_v61  ;;  %8174 = vmatprep.subr.bf16.mxu0 %v9099_v32 }
 0x224   : > { %v7572_v23 = vpop.f32.mrf.mxu0  ;;  %v7636_v18 = vpop.f32.mrf.mxu1  ;;  %5465 = vmatmul.mubr.bf16.gmra.mxu1 %v9021_v43  ;;  %5562 = vmatmul.mubr.bf16.gmra.mxu0 %v9024_v62 }
 0x225   : > { %v10643_v0 = vadd.f32 %v7571_v7, %v10467_v3  ;;  %v10646_v42 = vadd.f32 %v7635_v55, %v10470_v2  ;;  %5472 = vmatprep.mubr.bf16.mxu1 %v9029_v15  ;;  %5569 = vmatprep.mubr.bf16.mxu0 %v9032_v48  ;;  %v10654_v3 = vld [vmem:[%s11660_s1 + $0x638] sm:$0xff]   ;;  %v9040_v7 = vld [vmem:[%s9409_s9 + $0x428] ss:$100 sps:$4 sm:$0xff]  }
 0x226   : > { %v7573_v19 = vpop.f32.mrf.mxu0  ;;  %v7637_v35 = vpop.f32.mrf.mxu1  ;;  %8175 = vmatpush3.bf16.msra.mxu0 %v9100_v37  ;;  %v9037_v37 = vld [vmem:[%s9409_s9 + $0xa60] ss:$100 sps:$4 sm:$0xff]  }
 0x227   : > { %v7574_v10 = vadd.f32 %v7573_v19, %v7572_v23  ;;  %v7638_v11 = vadd.f32 %v7637_v35, %v7636_v18  ;;  %8176 = vmatprep.subr.bf16.mxu0 %v9115_v56  ;;  %v9048_v23 = vld [vmem:[%s9409_s9 + $0x4f4] ss:$100 sps:$4 sm:$0xff]  }
 0x228   : > { %v7575_v2 = vpop.f32.mrf.mxu0  ;;  %v7639_v57 = vpop.f32.mrf.mxu1 }
 0x229   : > { %v10659_v63 = vadd.f32 %v7574_v10, %v10481_v9  ;;  %v10662_v34 = vadd.f32 %v7638_v11, %v10484_v50 }
 0x22a   : > { %v7576_v60 = vpop.f32.mrf.mxu0  ;;  %v7640_v44 = vpop.f32.mrf.mxu1  ;;  %8177 = vmatpush3.bf16.msra.mxu0 %v9116_v16 }
 0x22b   : > { %v7577_v58 = vadd.f32 %v7576_v60, %v7575_v2  ;;  %v7641_v32 = vadd.f32 %v7640_v44, %v7639_v57  ;;  %8410 = vmatprep.subr.bf16.mxu0 %v10654_v3  ;;  %v9046_v60 = vld [vmem:[%s9409_s9 + $0x4f0] ss:$100 sps:$4 sm:$0xff]  }
 0x22c   : > { %v7578_v12 = vpop.f32.mrf.mxu0  ;;  %v7642_v61 = vpop.f32.mrf.mxu1  ;;  %5473 = vmatmul.mubr.bf16.gmra.mxu1 %v9027_v6  ;;  %5570 = vmatmul.mubr.bf16.gmra.mxu0 %v9030_v17 }
 0x22d   : > { %v10668_v9 = vadd.f32 %v7577_v58, %v10489_v8  ;;  %v10671_v50 = vadd.f32 %v7641_v32, %v10492_v28  ;;  %5480 = vmatprep.mubr.bf16.mxu1 %v9039_v1  ;;  %5577 = vmatprep.mubr.bf16.mxu0 %v9042_v51  ;;  %v9045_v8 = vld [vmem:[%s9409_s9 + $0xb2c] ss:$100 sps:$4 sm:$0xff]   ;;  %v9058_v32 = vld [vmem:[%s9409_s9 + $0x5bc] ss:$100 sps:$4 sm:$0xff]  }
 0x22e   : > { %v7579_v43 = vpop.f32.mrf.mxu0  ;;  %v7643_v62 = vpop.f32.mrf.mxu1  ;;  %v9043_v51 = vld [vmem:[%s9409_s9 + $0xb28] ss:$100 sps:$4 sm:$0xff]  }
 0x22f   : > { %v7580_v15 = vadd.f32 %v7579_v43, %v7578_v12  ;;  %v7644_v48 = vadd.f32 %v7643_v62, %v7642_v61 }
 0x230   : > { %v7581_v47 = vpop.f32.mrf.mxu0  ;;  %v7645_v13 = vpop.f32.mrf.mxu1 }
 0x231   : > { %v10676_v55 = vadd.f32 %v7580_v15, %v10497_v26  ;;  %v10679_v56 = vadd.f32 %v7644_v48, %v10500_v24 }
 0x232   : > { %v7582_v28 = vpop.f32.mrf.mxu0  ;;  %v7646_v18 = vpop.f32.mrf.mxu1 }
 0x233   : > { %v7583_v19 = vadd.f32 %v7582_v28, %v7581_v47  ;;  %v7647_v35 = vadd.f32 %v7646_v18, %v7645_v13  ;;  %v9056_v28 = vld [vmem:[%s9409_s9 + $0x5b8] ss:$100 sps:$4 sm:$0xff]  }
 0x234   : > { %v7584_v16 = vpop.f32.mrf.mxu0  ;;  %v7648_v10 = vpop.f32.mrf.mxu1  ;;  %5481 = vmatmul.mubr.bf16.gmra.mxu1 %v9037_v37  ;;  %5578 = vmatmul.mubr.bf16.gmra.mxu0 %v9040_v7 }
 0x235   : > { %v10684_v26 = vadd.f32 %v7583_v19, %v10505_v39  ;;  %v10687_v24 = vadd.f32 %v7647_v35, %v10508_v53  ;;  %5488 = vmatprep.mubr.bf16.mxu1 %v9045_v8  ;;  %5585 = vmatprep.mubr.bf16.mxu0 %v9048_v23  ;;  %v9055_v39 = vld [vmem:[%s9409_s9 + $0xbf4] ss:$100 sps:$4 sm:$0xff]   ;;  %v9064_v35 = vld [vmem:[%s9409_s9 + $0x4c] ss:$100 sps:$4 sm:$0xff]  }
 0x236   : > { %v7585_v11 = vpop.f32.mrf.mxu0  ;;  %v7649_v2 = vpop.f32.mrf.mxu1  ;;  %v9053_v23 = vld [vmem:[%s9409_s9 + $0xbf0] ss:$100 sps:$4 sm:$0xff]  }
 0x237   : > { %v7586_v57 = vadd.f32 %v7585_v11, %v7584_v16  ;;  %v7650_v6 = vadd.f32 %v7649_v2, %v7648_v10 }
 0x238   : > { %v7587_v17 = vpop.f32.mrf.mxu0  ;;  %v7651_v1 = vpop.f32.mrf.mxu1 }
 0x239   : > { %v10692_v44 = vadd.f32 %v7586_v57, %v10513_v40  ;;  %v10695_v58 = vadd.f32 %v7650_v6, %v10516_v14 }
 0x23a   : > { %v7588_v53 = vpop.f32.mrf.mxu0  ;;  %v7652_v12 = vpop.f32.mrf.mxu1 }
 0x23b   : > { %v7589_v61 = vadd.f32 %v7588_v53, %v7587_v17  ;;  %v7653_v43 = vadd.f32 %v7652_v12, %v7651_v1  ;;  %v9062_v53 = vld [vmem:[%s9409_s9 + $0x48] ss:$100 sps:$4 sm:$0xff]  }
 0x23c   : > { %v7590_v62 = vpop.f32.mrf.mxu0  ;;  %v7654_v15 = vpop.f32.mrf.mxu1  ;;  %5489 = vmatmul.mubr.bf16.gmra.mxu1 %v9043_v51  ;;  %5586 = vmatmul.mubr.bf16.gmra.mxu0 %v9046_v60 }
 0x23d   : > { %v10700_v40 = vadd.f32 %v7589_v61, %v10521_v36  ;;  %v10703_v14 = vadd.f32 %v7653_v43, %v10524_v52  ;;  %5496 = vmatprep.mubr.bf16.mxu1 %v9055_v39  ;;  %5593 = vmatprep.mubr.bf16.mxu0 %v9058_v32  ;;  %v9061_v36 = vld [vmem:[%s9409_s9 + $0x684] ss:$100 sps:$4 sm:$0xff]   ;;  %v9071_v61 = vld [vmem:[%s9409_s9 + $0x74c] ss:$100 sps:$4 sm:$0xff]  }
 0x23e   : > { %v7591_v48 = vpop.f32.mrf.mxu0  ;;  %v7655_v47 = vpop.f32.mrf.mxu1  ;;  %v9059_v32 = vld [vmem:[%s9409_s9 + $0x680] ss:$100 sps:$4 sm:$0xff]  }
 0x23f   : > { %v7592_v13 = vadd.f32 %v7591_v48, %v7590_v62  ;;  %v7656_v37 = vadd.f32 %v7655_v47, %v7654_v15  ;;  %v9074_v15 = vld [vmem:[%s9409_s9 + $0x114] ss:$100 sps:$4 sm:$0xff]  }
 0x240   : > { %v7593_v7 = vpop.f32.mrf.mxu0  ;;  %v7657_v8 = vpop.f32.mrf.mxu1  ;;  %v9081_v48 = vld [vmem:[%s11660_s1 + $0x5f0] sm:$0xff]  }
 0x241   : > { %v10708_v18 = vadd.f32 %v7592_v13, %v10529_v45  ;;  %v10711_v19 = vadd.f32 %v7656_v37, %v10532_v30 }
 0x242   : > { %v7594_v52 = vpop.f32.mrf.mxu0  ;;  %v7658_v16 = vpop.f32.mrf.mxu1 }
 0x243   : > { %v7595_v10 = vadd.f32 %v7594_v52, %v7593_v7  ;;  %v7659_v11 = vadd.f32 %v7658_v16, %v7657_v8  ;;  %v9082_v8 = vld [vmem:[%s11660_s1 + $0x5b0] sm:$0xff]   ;;  %v9069_v16 = vld [vmem:[%s9409_s9 + $0x748] ss:$100 sps:$4 sm:$0xff]  }
 0x244   : > { %v7596_v2 = vpop.f32.mrf.mxu0  ;;  %v7660_v57 = vpop.f32.mrf.mxu1  ;;  %5497 = vmatmul.mubr.bf16.gmra.mxu1 %v9053_v23  ;;  %5594 = vmatmul.mubr.bf16.gmra.mxu0 %v9056_v28 }
 0x245   : > { %v10716_v6 = vadd.f32 %v7595_v10, %v10537_v22  ;;  %v10719_v45 = vadd.f32 %v7659_v11, %v10540_v4  ;;  %5601 = vmatprep.mubr.bf16.mxu0 %v9061_v36  ;;  %5698 = vmatprep.mubr.bf16.mxu1 %v9064_v35  ;;  %v9066_v4 = vld [vmem:[%s11660_s1 + $0x5b8] sm:$0xff]   ;;  %v9072_v10 = vld [vmem:[%s9409_s9 + $0x110] ss:$100 sps:$4 sm:$0xff]  }
 0x246   : > { %v7597_v30 = vpop.f32.mrf.mxu0  ;;  %v7661_v17 = vpop.f32.mrf.mxu1 }
 0x247   : > { %v7598_v1 = vadd.f32 %v7597_v30, %v7596_v2  ;;  %v7662_v51 = vadd.f32 %v7661_v17, %v7660_v57  ;;  %v9077_v57 = vld [vmem:[%s9409_s9 + $0x814] ss:$100 sps:$4 sm:$0xff]   ;;  %v9080_v30 = vld [vmem:[%s9409_s9 + $0x1dc] ss:$100 sps:$4 sm:$0xff]  }
 0x248   : > { %v7599_v60 = vpop.f32.mrf.mxu0  ;;  %v7663_v39 = vpop.f32.mrf.mxu1 }
 0x249   : > { %v10724_v12 = vadd.f32 %v7598_v1, %v10545_v25  ;;  %v10727_v22 = vadd.f32 %v7662_v51, %v10548_v29  ;;  %v9098_v51 = vld [vmem:[%s11660_s1 + $0x5a8] sm:$0xff]  }
 0x24a   : > { %v7600_v43 = vpop.f32.mrf.mxu0  ;;  %v7664_v62 = vpop.f32.mrf.mxu1 }
 0x24b   : > { %v7601_v47 = vadd.f32 %v7600_v43, %v7599_v60  ;;  %v7665_v13 = vadd.f32 %v7664_v62, %v7663_v39  ;;  %v9114_v62 = vld [vmem:[%s11660_s1 + $0x5a0] sm:$0xff]  }
 0x24c   : > { %v7666_v37 = vpop.f32.mrf.mxu1  ;;  %v7730_v25 = vpop.f32.mrf.mxu0  ;;  %5602 = vmatmul.mubr.bf16.gmra.mxu0 %v9059_v32  ;;  %5699 = vmatmul.mubr.bf16.vlgmr.msra.gmra.mxu1 %v9062_v53 }
 0x24d   : > { %v10738_v29 = vadd.f32 %v7601_v47, %v10559_v49  ;;  %v10741_v7 = vadd.f32 %v7665_v13, %v10562_v54  ;;  %8275 = vmatpush3.bf16.msra.mxu1 %v9066_v4  ;;  %5609 = vmatprep.mubr.bf16.mxu0 %v9071_v61  ;;  %v9097_v49 = vld [vmem:[%s11660_s1 + $0x5e8] sm:$0xff]   ;;  %v9075_v13 = vld [vmem:[%s9409_s9 + $0x810] ss:$100 sps:$4 sm:$0xff]  }
 0x24e   : > { %v7667_v23 = vpop.f32.mrf.mxu1  ;;  %v7731_v28 = vpop.f32.mrf.mxu0  ;;  %5706 = vmatprep.mubr.bf16.mxu1 %v9074_v15  ;;  %8276 = vmatprep.subr.bf16.mxu1 %v9081_v48 }
 0x24f   : > { %v7668_v36 = vadd.f32 %v7667_v23, %v7666_v37  ;;  %v7732_v35 = vadd.f32 %v7731_v28, %v7730_v25  ;;  %v9078_v37 = vld [vmem:[%s9409_s9 + $0x1d8] ss:$100 sps:$4 sm:$0xff]   ;;  %v9090_v28 = vld [vmem:[%s9409_s9 + $0x2a4] ss:$100 sps:$4 sm:$0xff]  }
 0x250   : > { %v7669_v54 = vpop.f32.mrf.mxu1  ;;  %v7733_v52 = vpop.f32.mrf.mxu0  ;;  %v9087_v23 = vld [vmem:[%s9409_s9 + $0x8dc] ss:$100 sps:$4 sm:$0xff]  }
 0x251   : > { %v10752_v11 = vadd.f32 %v7668_v36, %v10573_v59  ;;  %v10755_v2 = vadd.f32 %v7732_v35, %v10576_v46  ;;  %8277 = vmatpush3.bf16.msra.mxu1 %v9082_v8  ;;  %v9113_v59 = vld [vmem:[%s11660_s1 + $0x5e0] sm:$0xff]   ;;  %v9130_v35 = vld [vmem:[%s11660_s1 + $0x598] sm:$0xff]  }
 0x252   : > { %v7670_v17 = vpop.f32.mrf.mxu1  ;;  %v7734_v1 = vpop.f32.mrf.mxu0  ;;  %8278 = vmatprep.subr.bf16.mxu1 %v9097_v49 }
 0x253   : > { %v7671_v60 = vadd.f32 %v7670_v17, %v7669_v54  ;;  %v7735_v39 = vadd.f32 %v7734_v1, %v7733_v52  ;;  %v9145_v1 = vld [vmem:[%s11660_s1 + $0x590] sm:$0xff]  }
 0x254   : > { %v7672_v32 = vpop.f32.mrf.mxu1  ;;  %v7736_v53 = vpop.f32.mrf.mxu0  ;;  %5610 = vmatmul.mubr.bf16.gmra.mxu0 %v9069_v16  ;;  %5707 = vmatmul.mubr.bf16.gmra.mxu1 %v9072_v10 }
 0x255   : > { %v10766_v46 = vadd.f32 %v7671_v60, %v10587_v41  ;;  %v10769_v4 = vadd.f32 %v7735_v39, %v10590_v38  ;;  %5617 = vmatprep.mubr.bf16.mxu0 %v9077_v57  ;;  %5714 = vmatprep.mubr.bf16.mxu1 %v9080_v30  ;;  %v9129_v41 = vld [vmem:[%s11660_s1 + $0x5d8] sm:$0xff]  }
 0x256   : > { %v7673_v61 = vpop.f32.mrf.mxu1  ;;  %v7737_v43 = vpop.f32.mrf.mxu0  ;;  %8279 = vmatpush3.bf16.msra.mxu1 %v9098_v51 }
 0x257   : > { %v7674_v15 = vadd.f32 %v7673_v61, %v7672_v32  ;;  %v7738_v48 = vadd.f32 %v7737_v43, %v7736_v53  ;;  %8280 = vmatprep.subr.bf16.mxu1 %v9113_v59  ;;  %v9085_v59 = vld [vmem:[%s9409_s9 + $0x8d8] ss:$100 sps:$4 sm:$0xff]   ;;  %v9088_v32 = vld [vmem:[%s9409_s9 + $0x2a0] ss:$100 sps:$4 sm:$0xff]  }
 0x258   : > { %v7675_v38 = vpop.f32.mrf.mxu1  ;;  %v7739_v47 = vpop.f32.mrf.mxu0  ;;  %v9093_v43 = vld [vmem:[%s9409_s9 + $0x9a4] ss:$100 sps:$4 sm:$0xff]  }
 0x259   : > { %v10780_v25 = vadd.f32 %v7674_v15, %v10601_v5  ;;  %v10783_v8 = vadd.f32 %v7738_v48, %v10604_v21  ;;  %v9144_v5 = vld [vmem:[%s11660_s1 + $0x5d0] sm:$0xff]  }
 0x25a   : > { %v7676_v49 = vpop.f32.mrf.mxu1  ;;  %v7740_v36 = vpop.f32.mrf.mxu0  ;;  %8281 = vmatpush3.bf16.msra.mxu1 %v9114_v62  ;;  %v9096_v62 = vld [vmem:[%s9409_s9 + $0x36c] ss:$100 sps:$4 sm:$0xff]  }
 0x25b   : > { %v7677_v54 = vadd.f32 %v7676_v49, %v7675_v38  ;;  %v7741_v52 = vadd.f32 %v7740_v36, %v7739_v47  ;;  %8282 = vmatprep.subr.bf16.mxu1 %v9129_v41  ;;  %v9160_v41 = vld [vmem:[%s11660_s1 + $0x588] sm:$0xff]   ;;  %v9175_v36 = vld [vmem:[%s11660_s1 + $0x580] sm:$0xff]  }
 0x25c   : > { %v7678_v16 = vpop.f32.mrf.mxu1  ;;  %v7742_v10 = vpop.f32.mrf.mxu0  ;;  %5618 = vmatmul.mubr.bf16.gmra.mxu0 %v9075_v13  ;;  %5715 = vmatmul.mubr.bf16.gmra.mxu1 %v9078_v37 }
 0x25d   : > { %v10794_v21 = vadd.f32 %v7677_v54, %v10615_v31  ;;  %v10797_v57 = vadd.f32 %v7741_v52, %v10618_v33  ;;  %5625 = vmatprep.mubr.bf16.mxu0 %v9087_v23  ;;  %5722 = vmatprep.mubr.bf16.mxu1 %v9090_v28  ;;  %v9159_v31 = vld [vmem:[%s11660_s1 + $0x5c8] sm:$0xff]  }
 0x25e   : > { %v7679_v30 = vpop.f32.mrf.mxu1  ;;  %v7743_v17 = vpop.f32.mrf.mxu0  ;;  %8283 = vmatpush3.bf16.msra.mxu1 %v9130_v35 }
 0x25f   : > { %v7680_v51 = vadd.f32 %v7679_v30, %v7678_v16  ;;  %v7744_v60 = vadd.f32 %v7743_v17, %v7742_v10  ;;  %8284 = vmatprep.subr.bf16.mxu1 %v9144_v5  ;;  %v9091_v5 = vld [vmem:[%s9409_s9 + $0x9a0] ss:$100 sps:$4 sm:$0xff]   ;;  %v9094_v16 = vld [vmem:[%s9409_s9 + $0x368] ss:$100 sps:$4 sm:$0xff]   ;;  %v9106_v17 = vld [vmem:[%s9409_s9 + $0x434] ss:$100 sps:$4 sm:$0xff]  }
 0x260   : > { %v7681_v33 = vpop.f32.mrf.mxu1  ;;  %v7745_v39 = vpop.f32.mrf.mxu0  ;;  %v9103_v30 = vld [vmem:[%s9409_s9 + $0xa6c] ss:$100 sps:$4 sm:$0xff]  }
 0x261   : > { %v10808_v53 = vadd.f32 %v7680_v51, %v10629_v27  ;;  %v10811_v61 = vadd.f32 %v7744_v60, %v10632_v20  ;;  %v9174_v27 = vld [vmem:[%s11660_s1 + $0x5c0] sm:$0xff]  }
 0x262   : > { %v7682_v15 = vpop.f32.mrf.mxu1  ;;  %v7746_v48 = vpop.f32.mrf.mxu0  ;;  %8285 = vmatpush3.bf16.msra.mxu1 %v9145_v1 }
 0x263   : > { %v7683_v38 = vadd.f32 %v7682_v15, %v7681_v33  ;;  %v7747_v47 = vadd.f32 %v7746_v48, %v7745_v39  ;;  %8286 = vmatprep.subr.bf16.mxu1 %v9159_v31 }
 0x264   : > { %v7684_v13 = vpop.f32.mrf.mxu1  ;;  %v7748_v37 = vpop.f32.mrf.mxu0  ;;  %5626 = vmatmul.mubr.bf16.gmra.mxu0 %v9085_v59  ;;  %5723 = vmatmul.mubr.bf16.gmra.mxu1 %v9088_v32 }
 0x265   : > { %v10822_v20 = vadd.f32 %v7683_v38, %v10643_v0  ;;  %v10825_v23 = vadd.f32 %v7747_v47, %v10646_v42  ;;  %5633 = vmatprep.mubr.bf16.mxu0 %v9093_v43  ;;  %5730 = vmatprep.mubr.bf16.mxu1 %v9096_v62  ;;  %v9104_v38 = vld [vmem:[%s9409_s9 + $0x430] ss:$100 sps:$4 sm:$0xff]  }
 0x266   : > { %v7685_v28 = vpop.f32.mrf.mxu1  ;;  %v7749_v49 = vpop.f32.mrf.mxu0  ;;  %8287 = vmatpush3.bf16.msra.mxu1 %v9160_v41  ;;  %v9101_v41 = vld [vmem:[%s9409_s9 + $0xa68] ss:$100 sps:$4 sm:$0xff]  }
 0x267   : > { %v7686_v35 = vadd.f32 %v7685_v28, %v7684_v13  ;;  %v7750_v54 = vadd.f32 %v7749_v49, %v7748_v37  ;;  %8288 = vmatprep.subr.bf16.mxu1 %v9174_v27  ;;  %v9112_v13 = vld [vmem:[%s9409_s9 + $0x4fc] ss:$100 sps:$4 sm:$0xff]  }
 0x268   : > { %v7687_v52 = vpop.f32.mrf.mxu1  ;;  %v7751_v0 = vpop.f32.mrf.mxu0 }
 0x269   : > { %v10833_v42 = vadd.f32 %v7686_v35, %v10659_v63  ;;  %v10836_v10 = vadd.f32 %v7750_v54, %v10662_v34 }
 0x26a   : > { %v7688_v1 = vpop.f32.mrf.mxu1  ;;  %v7752_v51 = vpop.f32.mrf.mxu0  ;;  %8289 = vmatpush3.bf16.msra.mxu1 %v9175_v36 }
 0x26b   : > { %v7689_v60 = vadd.f32 %v7688_v1, %v7687_v52  ;;  %v7753_v31 = vadd.f32 %v7752_v51, %v7751_v0  ;;  %v9110_v1 = vld [vmem:[%s9409_s9 + $0x4f8] ss:$100 sps:$4 sm:$0xff]  }
 0x26c   : > { %v7690_v33 = vpop.f32.mrf.mxu1  ;;  %v7754_v39 = vpop.f32.mrf.mxu0  ;;  %5634 = vmatmul.mubr.bf16.gmra.mxu0 %v9091_v5  ;;  %5731 = vmatmul.mubr.bf16.gmra.mxu1 %v9094_v16 }
 0x26d   : > { %v10841_v63 = vadd.f32 %v7689_v60, %v10668_v9  ;;  %v10844_v34 = vadd.f32 %v7753_v31, %v10671_v50  ;;  %5641 = vmatprep.mubr.bf16.mxu0 %v9103_v30  ;;  %5738 = vmatprep.mubr.bf16.mxu1 %v9106_v17  ;;  %v9109_v9 = vld [vmem:[%s9409_s9 + $0xb34] ss:$100 sps:$4 sm:$0xff]   ;;  %v9122_v31 = vld [vmem:[%s9409_s9 + $0x5c4] ss:$100 sps:$4 sm:$0xff]  }
 0x26e   : > { %v7691_v59 = vpop.f32.mrf.mxu1  ;;  %v7755_v32 = vpop.f32.mrf.mxu0  ;;  %v9107_v17 = vld [vmem:[%s9409_s9 + $0xb30] ss:$100 sps:$4 sm:$0xff]  }
 0x26f   : > { %v7692_v43 = vadd.f32 %v7691_v59, %v7690_v33  ;;  %v7756_v62 = vadd.f32 %v7755_v32, %v7754_v39 }
 0x270   : > { %v7693_v15 = vpop.f32.mrf.mxu1  ;;  %v7757_v48 = vpop.f32.mrf.mxu0 }
 0x271   : > { %v10849_v47 = vadd.f32 %v7692_v43, %v10676_v55  ;;  %v10852_v27 = vadd.f32 %v7756_v62, %v10679_v56 }
 0x272   : > { %v7694_v50 = vpop.f32.mrf.mxu1  ;;  %v7758_v37 = vpop.f32.mrf.mxu0 }
 0x273   : > { %v7695_v28 = vadd.f32 %v7694_v50, %v7693_v15  ;;  %v7759_v49 = vadd.f32 %v7758_v37, %v7757_v48  ;;  %v9120_v50 = vld [vmem:[%s9409_s9 + $0x5c0] ss:$100 sps:$4 sm:$0xff]  }
 0x274   : > { %v7696_v36 = vpop.f32.mrf.mxu1  ;;  %v7760_v35 = vpop.f32.mrf.mxu0  ;;  %5642 = vmatmul.mubr.bf16.gmra.mxu0 %v9101_v41  ;;  %5739 = vmatmul.mubr.bf16.gmra.mxu1 %v9104_v38 }
 0x275   : > { %v10857_v55 = vadd.f32 %v7695_v28, %v10684_v26  ;;  %v10860_v56 = vadd.f32 %v7759_v49, %v10687_v24  ;;  %5649 = vmatprep.mubr.bf16.mxu0 %v9109_v9  ;;  %5746 = vmatprep.mubr.bf16.mxu1 %v9112_v13  ;;  %v9119_v26 = vld [vmem:[%s9409_s9 + $0xbfc] ss:$100 sps:$4 sm:$0xff]   ;;  %v9128_v49 = vld [vmem:[%s9409_s9 + $0x54] ss:$100 sps:$4 sm:$0xff]  }
 0x276   : > { %v7697_v54 = vpop.f32.mrf.mxu1  ;;  %v7761_v52 = vpop.f32.mrf.mxu0  ;;  %v9117_v13 = vld [vmem:[%s9409_s9 + $0xbf8] ss:$100 sps:$4 sm:$0xff]  }
 0x277   : > { %v7698_v0 = vadd.f32 %v7697_v54, %v7696_v36  ;;  %v7762_v5 = vadd.f32 %v7761_v52, %v7760_v35 }
 0x278   : > { %v7699_v16 = vpop.f32.mrf.mxu1  ;;  %v7763_v30 = vpop.f32.mrf.mxu0 }
 0x279   : > { %v10865_v51 = vadd.f32 %v7698_v0, %v10692_v44  ;;  %v10868_v60 = vadd.f32 %v7762_v5, %v10695_v58 }
 0x27a   : > { %v7700_v24 = vpop.f32.mrf.mxu1  ;;  %v7764_v33 = vpop.f32.mrf.mxu0 }
 0x27b   : > { %v7701_v39 = vadd.f32 %v7700_v24, %v7699_v16  ;;  %v7765_v59 = vadd.f32 %v7764_v33, %v7763_v30  ;;  %v9126_v24 = vld [vmem:[%s9409_s9 + $0x50] ss:$100 sps:$4 sm:$0xff]  }
 0x27c   : > { %v7702_v32 = vpop.f32.mrf.mxu1  ;;  %v7766_v43 = vpop.f32.mrf.mxu0  ;;  %5650 = vmatmul.mubr.bf16.gmra.mxu0 %v9107_v17  ;;  %5747 = vmatmul.mubr.bf16.gmra.mxu1 %v9110_v1 }
 0x27d   : > { %v10873_v44 = vadd.f32 %v7701_v39, %v10700_v40  ;;  %v10876_v58 = vadd.f32 %v7765_v59, %v10703_v14  ;;  %5657 = vmatprep.mubr.bf16.mxu0 %v9119_v26  ;;  %5754 = vmatprep.mubr.bf16.mxu1 %v9122_v31  ;;  %v9125_v40 = vld [vmem:[%s9409_s9 + $0x68c] ss:$100 sps:$4 sm:$0xff]   ;;  %v9134_v39 = vld [vmem:[%s9409_s9 + $0x754] ss:$100 sps:$4 sm:$0xff]  }
 0x27e   : > { %v7703_v62 = vpop.f32.mrf.mxu1  ;;  %v7767_v15 = vpop.f32.mrf.mxu0  ;;  %v9123_v31 = vld [vmem:[%s9409_s9 + $0x688] ss:$100 sps:$4 sm:$0xff]  }
 0x27f   : > { %v7704_v48 = vadd.f32 %v7703_v62, %v7702_v32  ;;  %v7768_v41 = vadd.f32 %v7767_v15, %v7766_v43  ;;  %v9137_v32 = vld [vmem:[%s9409_s9 + $0x11c] ss:$100 sps:$4 sm:$0xff]   ;;  %v9146_v43 = vld [vmem:[%s11660_s1 + $0x630] sm:$0xff]  }
 0x280   : > { %v7705_v38 = vpop.f32.mrf.mxu1  ;;  %v7769_v9 = vpop.f32.mrf.mxu0 }
 0x281   : > { %v10881_v37 = vadd.f32 %v7704_v48, %v10708_v18  ;;  %v10884_v28 = vadd.f32 %v7768_v41, %v10711_v19 }
 0x282   : > { %v7706_v14 = vpop.f32.mrf.mxu1  ;;  %v7770_v36 = vpop.f32.mrf.mxu0 }
 0x283   : > { %v7707_v35 = vadd.f32 %v7706_v14, %v7705_v38  ;;  %v7771_v54 = vadd.f32 %v7770_v36, %v7769_v9  ;;  %v9132_v14 = vld [vmem:[%s9409_s9 + $0x750] ss:$100 sps:$4 sm:$0xff]  }
 0x284   : > { %v7708_v52 = vpop.f32.mrf.mxu1  ;;  %v7772_v0 = vpop.f32.mrf.mxu0  ;;  %5658 = vmatmul.mubr.bf16.gmra.mxu0 %v9117_v13  ;;  %5755 = vmatmul.mubr.bf16.gmra.mxu1 %v9120_v50  ;;  %v9161_v13 = vld [vmem:[%s11660_s1 + $0x628] sm:$0xff]  }
 0x285   : > { %v10889_v5 = vadd.f32 %v7707_v35, %v10716_v6  ;;  %v10892_v18 = vadd.f32 %v7771_v54, %v10719_v45  ;;  %5762 = vmatprep.mubr.bf16.mxu1 %v9125_v40  ;;  %5859 = vmatprep.mubr.bf16.mxu0 %v9128_v49  ;;  %v9140_v35 = vld [vmem:[%s9409_s9 + $0x81c] ss:$100 sps:$4 sm:$0xff]   ;;  %v9143_v54 = vld [vmem:[%s9409_s9 + $0x1e4] ss:$100 sps:$4 sm:$0xff]  }
 0x286   : > { %v7709_v19 = vpop.f32.mrf.mxu1  ;;  %v7773_v16 = vpop.f32.mrf.mxu0 }
 0x287   : > { %v7710_v30 = vadd.f32 %v7709_v19, %v7708_v52  ;;  %v7774_v17 = vadd.f32 %v7773_v16, %v7772_v0 }
 0x288   : > { %v7711_v1 = vpop.f32.mrf.mxu1  ;;  %v7775_v26 = vpop.f32.mrf.mxu0 }
 0x289   : > { %v10897_v33 = vadd.f32 %v7710_v30, %v10724_v12  ;;  %v10900_v6 = vadd.f32 %v7774_v17, %v10727_v22  ;;  %v9176_v30 = vld [vmem:[%s11660_s1 + $0x620] sm:$0xff]  }
 0x28a   : > { %v7712_v45 = vpop.f32.mrf.mxu1  ;;  %v7776_v59 = vpop.f32.mrf.mxu0 }
 0x28b   : > { %v7713_v62 = vadd.f32 %v7712_v45, %v7711_v1  ;;  %v7777_v15 = vadd.f32 %v7776_v59, %v7775_v26  ;;  %v9189_v45 = vld [vmem:[%s11660_s1 + $0x618] sm:$0xff]  }
 0x28c   : > { %v7778_v48 = vpop.f32.mrf.mxu0  ;;  %v7842_v41 = vpop.f32.mrf.mxu1  ;;  %5763 = vmatmul.mubr.bf16.gmra.mxu1 %v9123_v31  ;;  %5860 = vmatmul.mubr.bf16.vlgmr.msra.gmra.mxu0 %v9126_v24 }
 0x28d   : > { %v10908_v12 = vadd.f32 %v7713_v62, %v10738_v29  ;;  %v10911_v22 = vadd.f32 %v7777_v15, %v10741_v7  ;;  %8411 = vmatpush3.bf16.msra.mxu0 %v10654_v3  ;;  %5770 = vmatprep.mubr.bf16.mxu1 %v9134_v39  ;;  %v9135_v7 = vld [vmem:[%s9409_s9 + $0x118] ss:$100 sps:$4 sm:$0xff]   ;;  %v9149_v15 = vld [vmem:[%s9409_s9 + $0x8e4] ss:$100 sps:$4 sm:$0xff]  }
 0x28e   : > { %v7779_v38 = vpop.f32.mrf.mxu0  ;;  %v7843_v9 = vpop.f32.mrf.mxu1  ;;  %5867 = vmatprep.mubr.bf16.mxu0 %v9137_v32  ;;  %8412 = vmatprep.subr.bf16.mxu0 %v9146_v43  ;;  %v9138_v32 = vld [vmem:[%s9409_s9 + $0x818] ss:$100 sps:$4 sm:$0xff]  }
 0x28f   : > { %v7780_v50 = vadd.f32 %v7779_v38, %v7778_v48  ;;  %v7844_v40 = vadd.f32 %v7843_v9, %v7842_v41  ;;  %v9152_v48 = vld [vmem:[%s9409_s9 + $0x2ac] ss:$100 sps:$4 sm:$0xff]  }
 0x290   : > { %v7781_v29 = vpop.f32.mrf.mxu0  ;;  %v7845_v49 = vpop.f32.mrf.mxu1 }
 0x291   : > { %v10920_v36 = vadd.f32 %v7780_v50, %v10752_v11  ;;  %v10923_v3 = vadd.f32 %v7844_v40, %v10755_v2  ;;  %8413 = vmatpush3.bf16.msra.mxu0 %v9146_v43  ;;  %v9141_v43 = vld [vmem:[%s9409_s9 + $0x1e0] ss:$100 sps:$4 sm:$0xff]   ;;  %v9202_v50 = vld [vmem:[%s11660_s1 + $0x610] sm:$0xff]  }
 0x292   : > { %v7782_v52 = vpop.f32.mrf.mxu0  ;;  %v7846_v0 = vpop.f32.mrf.mxu1  ;;  %8414 = vmatprep.subr.bf16.mxu0 %v9161_v13 }
 0x293   : > { %v7783_v19 = vadd.f32 %v7782_v52, %v7781_v29  ;;  %v7847_v16 = vadd.f32 %v7846_v0, %v7845_v49  ;;  %v9147_v0 = vld [vmem:[%s9409_s9 + $0x8e0] ss:$100 sps:$4 sm:$0xff]  }
 0x294   : > { %v7784_v17 = vpop.f32.mrf.mxu0  ;;  %v7848_v1 = vpop.f32.mrf.mxu1  ;;  %5771 = vmatmul.mubr.bf16.gmra.mxu1 %v9132_v14  ;;  %5868 = vmatmul.mubr.bf16.gmra.mxu0 %v9135_v7 }
 0x295   : > { %v10931_v11 = vadd.f32 %v7783_v19, %v10766_v46  ;;  %v10934_v2 = vadd.f32 %v7847_v16, %v10769_v4  ;;  %5778 = vmatprep.mubr.bf16.mxu1 %v9140_v35  ;;  %5875 = vmatprep.mubr.bf16.mxu0 %v9143_v54  ;;  %v9215_v54 = vld [vmem:[%s11660_s1 + $0x608] sm:$0xff]  }
 0x296   : > { %v7785_v26 = vpop.f32.mrf.mxu0  ;;  %v7849_v31 = vpop.f32.mrf.mxu1  ;;  %8415 = vmatpush3.bf16.msra.mxu0 %v9161_v13  ;;  %v9150_v19 = vld [vmem:[%s9409_s9 + $0x2a8] ss:$100 sps:$4 sm:$0xff]  }
 0x297   : > { %v7786_v24 = vadd.f32 %v7785_v26, %v7784_v17  ;;  %v7850_v39 = vadd.f32 %v7849_v31, %v7848_v1  ;;  %8416 = vmatprep.subr.bf16.mxu0 %v9176_v30  ;;  %v9158_v17 = vld [vmem:[%s9409_s9 + $0x374] ss:$100 sps:$4 sm:$0xff]  }
 0x298   : > { %v7787_v59 = vpop.f32.mrf.mxu0  ;;  %v7851_v46 = vpop.f32.mrf.mxu1 }
 0x299   : > { %v10942_v4 = vadd.f32 %v7786_v24, %v10780_v25  ;;  %v10945_v62 = vadd.f32 %v7850_v39, %v10783_v8  ;;  %v9228_v39 = vld [vmem:[%s11660_s1 + $0x600] sm:$0xff]  }
 0x29a   : > { %v7788_v41 = vpop.f32.mrf.mxu0  ;;  %v7852_v38 = vpop.f32.mrf.mxu1  ;;  %8417 = vmatpush3.bf16.msra.mxu0 %v9176_v30  ;;  %v9155_v30 = vld [vmem:[%s9409_s9 + $0x9ac] ss:$100 sps:$4 sm:$0xff]  }
 0x29b   : > { %v7789_v9 = vadd.f32 %v7788_v41, %v7787_v59  ;;  %v7853_v13 = vadd.f32 %v7852_v38, %v7851_v46  ;;  %8418 = vmatprep.subr.bf16.mxu0 %v9189_v45  ;;  %v9153_v38 = vld [vmem:[%s9409_s9 + $0x9a8] ss:$100 sps:$4 sm:$0xff]  }
 0x29c   : > { %v7790_v40 = vpop.f32.mrf.mxu0  ;;  %v7854_v29 = vpop.f32.mrf.mxu1  ;;  %5779 = vmatmul.mubr.bf16.gmra.mxu1 %v9138_v32  ;;  %5876 = vmatmul.mubr.bf16.gmra.mxu0 %v9141_v43 }
 0x29d   : > { %v10953_v25 = vadd.f32 %v7789_v9, %v10794_v21  ;;  %v10956_v8 = vadd.f32 %v7853_v13, %v10797_v57  ;;  %5786 = vmatprep.mubr.bf16.mxu1 %v9149_v15  ;;  %5883 = vmatprep.mubr.bf16.mxu0 %v9152_v48  ;;  %v9156_v9 = vld [vmem:[%s9409_s9 + $0x370] ss:$100 sps:$4 sm:$0xff]  }
 0x29e   : > { %v7791_v49 = vpop.f32.mrf.mxu0  ;;  %v7855_v14 = vpop.f32.mrf.mxu1  ;;  %8419 = vmatpush3.bf16.msra.mxu0 %v9189_v45 }
 0x29f   : > { %v7792_v7 = vadd.f32 %v7791_v49, %v7790_v40  ;;  %v7856_v35 = vadd.f32 %v7855_v14, %v7854_v29  ;;  %8420 = vmatprep.subr.bf16.mxu0 %v9202_v50 }
 0x2a0   : > { %v7793_v52 = vpop.f32.mrf.mxu0  ;;  %v7857_v21 = vpop.f32.mrf.mxu1 }
 0x2a1   : > { %v10964_v57 = vadd.f32 %v7792_v7, %v10808_v53  ;;  %v10967_v16 = vadd.f32 %v7856_v35, %v10811_v61 }
 0x2a2   : > { %v7794_v1 = vpop.f32.mrf.mxu0  ;;  %v7858_v26 = vpop.f32.mrf.mxu1  ;;  %8421 = vmatpush3.bf16.msra.mxu0 %v9202_v50  ;;  %v9167_v50 = vld [vmem:[%s9409_s9 + $0x43c] ss:$100 sps:$4 sm:$0xff]  }
 0x2a3   : > { %v7795_v31 = vadd.f32 %v7794_v1, %v7793_v52  ;;  %v7859_v24 = vadd.f32 %v7858_v26, %v7857_v21  ;;  %8422 = vmatprep.subr.bf16.mxu0 %v9215_v54  ;;  %v9165_v1 = vld [vmem:[%s9409_s9 + $0x438] ss:$100 sps:$4 sm:$0xff]  }
 0x2a4   : > { %v7796_v45 = vpop.f32.mrf.mxu0  ;;  %v7860_v59 = vpop.f32.mrf.mxu1  ;;  %5787 = vmatmul.mubr.bf16.gmra.mxu1 %v9147_v0  ;;  %5884 = vmatmul.mubr.bf16.gmra.mxu0 %v9150_v19 }
 0x2a5   : > { %v10975_v53 = vadd.f32 %v7795_v31, %v10822_v20  ;;  %v10978_v61 = vadd.f32 %v7859_v24, %v10825_v23  ;;  %5794 = vmatprep.mubr.bf16.mxu1 %v9155_v30  ;;  %5891 = vmatprep.mubr.bf16.mxu0 %v9158_v17  ;;  %v9164_v23 = vld [vmem:[%s9409_s9 + $0xa74] ss:$100 sps:$4 sm:$0xff]   ;;  %v9173_v24 = vld [vmem:[%s9409_s9 + $0x504] ss:$100 sps:$4 sm:$0xff]  }
 0x2a6   : > { %v7797_v46 = vpop.f32.mrf.mxu0  ;;  %v7861_v32 = vpop.f32.mrf.mxu1  ;;  %8423 = vmatpush3.bf16.msra.mxu0 %v9215_v54  ;;  %v9162_v17 = vld [vmem:[%s9409_s9 + $0xa70] ss:$100 sps:$4 sm:$0xff]  }
 0x2a7   : > { %v7798_v43 = vadd.f32 %v7797_v46, %v7796_v45  ;;  %v7862_v15 = vadd.f32 %v7861_v32, %v7860_v59  ;;  %8424 = vmatprep.subr.bf16.mxu0 %v9228_v39 }
 0x2a8   : > { %v7799_v48 = vpop.f32.mrf.mxu0  ;;  %v7863_v41 = vpop.f32.mrf.mxu1 }
 0x2a9   : > { %v10983_v20 = vadd.f32 %v7798_v43, %v10833_v42  ;;  %v10986_v13 = vadd.f32 %v7862_v15, %v10836_v10 }
 0x2aa   : > { %v7800_v40 = vpop.f32.mrf.mxu0  ;;  %v7864_v29 = vpop.f32.mrf.mxu1  ;;  %8425 = vmatpush3.bf16.msra.mxu0 %v9228_v39 }
 0x2ab   : > { %v7801_v49 = vadd.f32 %v7800_v40, %v7799_v48  ;;  %v7865_v14 = vadd.f32 %v7864_v29, %v7863_v41 }
 0x2ac   : > { %v7802_v7 = vpop.f32.mrf.mxu0  ;;  %v7866_v35 = vpop.f32.mrf.mxu1  ;;  %5795 = vmatmul.mubr.bf16.gmra.mxu1 %v9153_v38  ;;  %5892 = vmatmul.mubr.bf16.gmra.mxu0 %v9156_v9 }
 0x2ad   : > { %v10991_v42 = vadd.f32 %v7801_v49, %v10841_v63  ;;  %v10994_v10 = vadd.f32 %v7865_v14, %v10844_v34  ;;  %5802 = vmatprep.mubr.bf16.mxu1 %v9164_v23  ;;  %5899 = vmatprep.mubr.bf16.mxu0 %v9167_v50  ;;  %v9170_v63 = vld [vmem:[%s9409_s9 + $0xb3c] ss:$100 sps:$4 sm:$0xff]   ;;  %v9182_v49 = vld [vmem:[%s9409_s9 + $0x5cc] ss:$100 sps:$4 sm:$0xff]  }
 0x2ae   : > { %v7803_v54 = vpop.f32.mrf.mxu0  ;;  %v7867_v52 = vpop.f32.mrf.mxu1  ;;  %v9168_v23 = vld [vmem:[%s9409_s9 + $0xb38] ss:$100 sps:$4 sm:$0xff]   ;;  %v9171_v50 = vld [vmem:[%s9409_s9 + $0x500] ss:$100 sps:$4 sm:$0xff]  }
 0x2af   : > { %v7804_v21 = vadd.f32 %v7803_v54, %v7802_v7  ;;  %v7868_v0 = vadd.f32 %v7867_v52, %v7866_v35 }
 0x2b0   : > { %v7805_v19 = vpop.f32.mrf.mxu0  ;;  %v7869_v30 = vpop.f32.mrf.mxu1 }
 0x2b1   : > { %v10999_v26 = vadd.f32 %v7804_v21, %v10849_v47  ;;  %v11002_v31 = vadd.f32 %v7868_v0, %v10852_v27 }
 0x2b2   : > { %v7806_v34 = vpop.f32.mrf.mxu0  ;;  %v7870_v39 = vpop.f32.mrf.mxu1 }
 0x2b3   : > { %v7807_v45 = vadd.f32 %v7806_v34, %v7805_v19  ;;  %v7871_v59 = vadd.f32 %v7870_v39, %v7869_v30 }
 0x2b4   : > { %v7808_v46 = vpop.f32.mrf.mxu0  ;;  %v7872_v32 = vpop.f32.mrf.mxu1  ;;  %5803 = vmatmul.mubr.bf16.gmra.mxu1 %v9162_v17  ;;  %5900 = vmatmul.mubr.bf16.gmra.mxu0 %v9165_v1 }
 0x2b5   : > { %v11007_v47 = vadd.f32 %v7807_v45, %v10857_v55  ;;  %v11010_v27 = vadd.f32 %v7871_v59, %v10860_v56  ;;  %5810 = vmatprep.mubr.bf16.mxu1 %v9170_v63  ;;  %5907 = vmatprep.mubr.bf16.mxu0 %v9173_v24  ;;  %v9179_v55 = vld [vmem:[%s9409_s9 + $0xc04] ss:$100 sps:$4 sm:$0xff]   ;;  %v9188_v45 = vld [vmem:[%s9409_s9 + $0x5c] ss:$100 sps:$4 sm:$0xff]  }
 0x2b6   : > { %v7809_v43 = vpop.f32.mrf.mxu0  ;;  %v7873_v15 = vpop.f32.mrf.mxu1  ;;  %v9177_v63 = vld [vmem:[%s9409_s9 + $0xc00] ss:$100 sps:$4 sm:$0xff]   ;;  %v9180_v24 = vld [vmem:[%s9409_s9 + $0x5c8] ss:$100 sps:$4 sm:$0xff]  }
 0x2b7   : > { %v7810_v48 = vadd.f32 %v7809_v43, %v7808_v46  ;;  %v7874_v41 = vadd.f32 %v7873_v15, %v7872_v32 }
 0x2b8   : > { %v7811_v38 = vpop.f32.mrf.mxu0  ;;  %v7875_v9 = vpop.f32.mrf.mxu1 }
 0x2b9   : > { %v11015_v40 = vadd.f32 %v7810_v48, %v10865_v51  ;;  %v11018_v29 = vadd.f32 %v7874_v41, %v10868_v60 }
 0x2ba   : > { %v7812_v56 = vpop.f32.mrf.mxu0  ;;  %v7876_v14 = vpop.f32.mrf.mxu1 }
 0x2bb   : > { %v7813_v7 = vadd.f32 %v7812_v56, %v7811_v38  ;;  %v7877_v35 = vadd.f32 %v7876_v14, %v7875_v9 }
 0x2bc   : > { %v7814_v54 = vpop.f32.mrf.mxu0  ;;  %v7878_v52 = vpop.f32.mrf.mxu1  ;;  %5811 = vmatmul.mubr.bf16.gmra.mxu1 %v9168_v23  ;;  %5908 = vmatmul.mubr.bf16.gmra.mxu0 %v9171_v50 }
 0x2bd   : > { %v11023_v51 = vadd.f32 %v7813_v7, %v10873_v44  ;;  %v11026_v60 = vadd.f32 %v7877_v35, %v10876_v58  ;;  %5818 = vmatprep.mubr.bf16.mxu1 %v9179_v55  ;;  %5915 = vmatprep.mubr.bf16.mxu0 %v9182_v49  ;;  %v9185_v44 = vld [vmem:[%s9409_s9 + $0x694] ss:$100 sps:$4 sm:$0xff]   ;;  %v9195_v7 = vld [vmem:[%s9409_s9 + $0x124] ss:$100 sps:$4 sm:$0xff]  }
 0x2be   : > { %v7815_v21 = vpop.f32.mrf.mxu0  ;;  %v7879_v0 = vpop.f32.mrf.mxu1  ;;  %v9183_v55 = vld [vmem:[%s9409_s9 + $0x690] ss:$100 sps:$4 sm:$0xff]   ;;  %v9186_v49 = vld [vmem:[%s9409_s9 + $0x58] ss:$100 sps:$4 sm:$0xff]  }
 0x2bf   : > { %v7816_v19 = vadd.f32 %v7815_v21, %v7814_v54  ;;  %v7880_v30 = vadd.f32 %v7879_v0, %v7878_v52 }
 0x2c0   : > { %v7817_v17 = vpop.f32.mrf.mxu0  ;;  %v7881_v1 = vpop.f32.mrf.mxu1 }
 0x2c1   : > { %v11031_v34 = vadd.f32 %v7816_v19, %v10881_v37  ;;  %v11034_v39 = vadd.f32 %v7880_v30, %v10884_v28 }
 0x2c2   : > { %v7818_v58 = vpop.f32.mrf.mxu0  ;;  %v7882_v59 = vpop.f32.mrf.mxu1 }
 0x2c3   : > { %v7819_v46 = vadd.f32 %v7818_v58, %v7817_v17  ;;  %v7883_v32 = vadd.f32 %v7882_v59, %v7881_v1 }
 0x2c4   : > { %v7820_v43 = vpop.f32.mrf.mxu0  ;;  %v7884_v15 = vpop.f32.mrf.mxu1  ;;  %5819 = vmatmul.mubr.bf16.gmra.mxu1 %v9177_v63  ;;  %5916 = vmatmul.mubr.bf16.gmra.mxu0 %v9180_v24 }
 0x2c5   : > { %v11039_v37 = vadd.f32 %v7819_v46, %v10889_v5  ;;  %v11042_v28 = vadd.f32 %v7883_v32, %v10892_v18  ;;  %5923 = vmatprep.mubr.bf16.mxu0 %v9185_v44  ;;  %6020 = vmatprep.mubr.bf16.mxu1 %v9188_v45  ;;  %v9192_v5 = vld [vmem:[%s9409_s9 + $0x75c] ss:$100 sps:$4 sm:$0xff]   ;;  %v9201_v46 = vld [vmem:[%s9409_s9 + $0x1ec] ss:$100 sps:$4 sm:$0xff]  }
 0x2c6   : > { %v7821_v48 = vpop.f32.mrf.mxu0  ;;  %v7885_v41 = vpop.f32.mrf.mxu1  ;;  %v9190_v44 = vld [vmem:[%s9409_s9 + $0x758] ss:$100 sps:$4 sm:$0xff]   ;;  %v9193_v45 = vld [vmem:[%s9409_s9 + $0x120] ss:$100 sps:$4 sm:$0xff]  }
 0x2c7   : > { %v7822_v38 = vadd.f32 %v7821_v48, %v7820_v43  ;;  %v7886_v9 = vadd.f32 %v7885_v41, %v7884_v15 }
 0x2c8   : > { %v7823_v23 = vpop.f32.mrf.mxu0  ;;  %v7887_v50 = vpop.f32.mrf.mxu1 }
 0x2c9   : > { %v11047_v56 = vadd.f32 %v7822_v38, %v10897_v33  ;;  %v11050_v14 = vadd.f32 %v7886_v9, %v10900_v6 }
 0x2ca   : > { %v7824_v18 = vpop.f32.mrf.mxu0  ;;  %v7888_v35 = vpop.f32.mrf.mxu1 }
 0x2cb   : > { %v7825_v54 = vadd.f32 %v7824_v18, %v7823_v23  ;;  %v7889_v52 = vadd.f32 %v7888_v35, %v7887_v50 }
 0x2cc   : > { %v7890_v21 = vpop.f32.mrf.mxu1  ;;  %v7954_v0 = vpop.f32.mrf.mxu0  ;;  %5924 = vmatmul.mubr.bf16.gmra.mxu0 %v9183_v55  ;;  %6021 = vmatmul.mubr.bf16.vlgmr.msra.gmra.mxu1 %v9186_v49 }
 0x2cd   : > { %v11055_v33 = vadd.f32 %v7825_v54, %v10908_v12  ;;  %v11058_v6 = vadd.f32 %v7889_v52, %v10911_v22  ;;  %5931 = vmatprep.mubr.bf16.mxu0 %v9192_v5  ;;  %6028 = vmatprep.mubr.bf16.mxu1 %v9195_v7  ;;  %v9198_v12 = vld [vmem:[%s9409_s9 + $0x824] ss:$100 sps:$4 sm:$0xff]   ;;  %v9208_v54 = vld [vmem:[%s9409_s9 + $0x2b4] ss:$100 sps:$4 sm:$0xff]  }
 0x2ce   : > { %v7891_v19 = vpop.f32.mrf.mxu1  ;;  %v7955_v30 = vpop.f32.mrf.mxu0  ;;  %v9196_v5 = vld [vmem:[%s9409_s9 + $0x820] ss:$100 sps:$4 sm:$0xff]   ;;  %v9199_v7 = vld [vmem:[%s9409_s9 + $0x1e8] ss:$100 sps:$4 sm:$0xff]  }
 0x2cf   : > { %v7892_v17 = vadd.f32 %v7891_v19, %v7890_v21  ;;  %v7956_v1 = vadd.f32 %v7955_v30, %v7954_v0 }
 0x2d0   : > { %v7893_v63 = vpop.f32.mrf.mxu1  ;;  %v7957_v24 = vpop.f32.mrf.mxu0 }
 0x2d1   : > { %v11063_v58 = vadd.f32 %v7892_v17, %v10920_v36  ;;  %v11066_v59 = vadd.f32 %v7956_v1, %v10923_v3 }
 0x2d2   : > { %v7894_v22 = vpop.f32.mrf.mxu1  ;;  %v7958_v32 = vpop.f32.mrf.mxu0 }
 0x2d3   : > { %v7895_v43 = vadd.f32 %v7894_v22, %v7893_v63  ;;  %v7959_v15 = vadd.f32 %v7958_v32, %v7957_v24 }
 0x2d4   : > { %v7896_v48 = vpop.f32.mrf.mxu1  ;;  %v7960_v41 = vpop.f32.mrf.mxu0  ;;  %5932 = vmatmul.mubr.bf16.gmra.mxu0 %v9190_v44  ;;  %6029 = vmatmul.mubr.bf16.gmra.mxu1 %v9193_v45 }
 0x2d5   : > { %v11071_v36 = vadd.f32 %v7895_v43, %v10931_v11  ;;  %v11074_v3 = vadd.f32 %v7959_v15, %v10934_v2  ;;  %5939 = vmatprep.mubr.bf16.mxu0 %v9198_v12  ;;  %6036 = vmatprep.mubr.bf16.mxu1 %v9201_v46  ;;  %v9205_v11 = vld [vmem:[%s9409_s9 + $0x8ec] ss:$100 sps:$4 sm:$0xff]   ;;  %v9214_v43 = vld [vmem:[%s9409_s9 + $0x37c] ss:$100 sps:$4 sm:$0xff]  }
 0x2d6   : > { %v7897_v38 = vpop.f32.mrf.mxu1  ;;  %v7961_v9 = vpop.f32.mrf.mxu0  ;;  %v9203_v12 = vld [vmem:[%s9409_s9 + $0x8e8] ss:$100 sps:$4 sm:$0xff]   ;;  %v9206_v46 = vld [vmem:[%s9409_s9 + $0x2b0] ss:$100 sps:$4 sm:$0xff]  }
 0x2d7   : > { %v7898_v23 = vadd.f32 %v7897_v38, %v7896_v48  ;;  %v7962_v50 = vadd.f32 %v7961_v9, %v7960_v41 }
 0x2d8   : > { %v7899_v55 = vpop.f32.mrf.mxu1  ;;  %v7963_v49 = vpop.f32.mrf.mxu0 }
 0x2d9   : > { %v11079_v18 = vadd.f32 %v7898_v23, %v10942_v4  ;;  %v11082_v35 = vadd.f32 %v7962_v50, %v10945_v62 }
 0x2da   : > { %v7900_v2 = vpop.f32.mrf.mxu1  ;;  %v7964_v52 = vpop.f32.mrf.mxu0 }
 0x2db   : > { %v7901_v21 = vadd.f32 %v7900_v2, %v7899_v55  ;;  %v7965_v0 = vadd.f32 %v7964_v52, %v7963_v49 }
 0x2dc   : > { %v7902_v19 = vpop.f32.mrf.mxu1  ;;  %v7966_v30 = vpop.f32.mrf.mxu0  ;;  %5940 = vmatmul.mubr.bf16.gmra.mxu0 %v9196_v5  ;;  %6037 = vmatmul.mubr.bf16.gmra.mxu1 %v9199_v7 }
 0x2dd   : > { %v11087_v4 = vadd.f32 %v7901_v21, %v10953_v25  ;;  %v11090_v62 = vadd.f32 %v7965_v0, %v10956_v8  ;;  %5947 = vmatprep.mubr.bf16.mxu0 %v9205_v11  ;;  %6044 = vmatprep.mubr.bf16.mxu1 %v9208_v54  ;;  %v9211_v25 = vld [vmem:[%s9409_s9 + $0x9b4] ss:$100 sps:$4 sm:$0xff]   ;;  %v9221_v21 = vld [vmem:[%s9409_s9 + $0x444] ss:$100 sps:$4 sm:$0xff]  }
 0x2de   : > { %v7903_v17 = vpop.f32.mrf.mxu1  ;;  %v7967_v1 = vpop.f32.mrf.mxu0  ;;  %v9209_v11 = vld [vmem:[%s9409_s9 + $0x9b0] ss:$100 sps:$4 sm:$0xff]   ;;  %v9212_v54 = vld [vmem:[%s9409_s9 + $0x378] ss:$100 sps:$4 sm:$0xff]  }
 0x2df   : > { %v7904_v63 = vadd.f32 %v7903_v17, %v7902_v19  ;;  %v7968_v24 = vadd.f32 %v7967_v1, %v7966_v30 }
 0x2e0   : > { %v7905_v44 = vpop.f32.mrf.mxu1  ;;  %v7969_v45 = vpop.f32.mrf.mxu0 }
 0x2e1   : > { %v11095_v22 = vadd.f32 %v7904_v63, %v10964_v57  ;;  %v11098_v32 = vadd.f32 %v7968_v24, %v10967_v16 }
 0x2e2   : > { %v7906_v8 = vpop.f32.mrf.mxu1  ;;  %v7970_v15 = vpop.f32.mrf.mxu0 }
 0x2e3   : > { %v7907_v48 = vadd.f32 %v7906_v8, %v7905_v44  ;;  %v7971_v41 = vadd.f32 %v7970_v15, %v7969_v45 }
 0x2e4   : > { %v7908_v38 = vpop.f32.mrf.mxu1  ;;  %v7972_v9 = vpop.f32.mrf.mxu0  ;;  %5948 = vmatmul.mubr.bf16.gmra.mxu0 %v9203_v12  ;;  %6045 = vmatmul.mubr.bf16.gmra.mxu1 %v9206_v46 }
 0x2e5   : > { %v11103_v57 = vadd.f32 %v7907_v48, %v10975_v53  ;;  %v11106_v16 = vadd.f32 %v7971_v41, %v10978_v61  ;;  %5955 = vmatprep.mubr.bf16.mxu0 %v9211_v25  ;;  %6052 = vmatprep.mubr.bf16.mxu1 %v9214_v43  ;;  %v9218_v53 = vld [vmem:[%s9409_s9 + $0xa7c] ss:$100 sps:$4 sm:$0xff]   ;;  %v9227_v48 = vld [vmem:[%s9409_s9 + $0x50c] ss:$100 sps:$4 sm:$0xff]  }
 0x2e6   : > { %v7909_v23 = vpop.f32.mrf.mxu1  ;;  %v7973_v50 = vpop.f32.mrf.mxu0  ;;  %v9216_v25 = vld [vmem:[%s9409_s9 + $0xa78] ss:$100 sps:$4 sm:$0xff]   ;;  %v9219_v43 = vld [vmem:[%s9409_s9 + $0x440] ss:$100 sps:$4 sm:$0xff]  }
 0x2e7   : > { %v7910_v55 = vadd.f32 %v7909_v23, %v7908_v38  ;;  %v7974_v49 = vadd.f32 %v7973_v50, %v7972_v9 }
 0x2e8   : > { %v7911_v5 = vpop.f32.mrf.mxu1  ;;  %v7975_v7 = vpop.f32.mrf.mxu0 }
 0x2e9   : > { %v11111_v2 = vadd.f32 %v7910_v55, %v10983_v20  ;;  %v11114_v52 = vadd.f32 %v7974_v49, %v10986_v13 }
 0x2ea   : > { %v7912_v61 = vpop.f32.mrf.mxu1  ;;  %v7976_v0 = vpop.f32.mrf.mxu0 }
 0x2eb   : > { %v7913_v19 = vadd.f32 %v7912_v61, %v7911_v5  ;;  %v7977_v30 = vadd.f32 %v7976_v0, %v7975_v7 }
 0x2ec   : > { %v7914_v17 = vpop.f32.mrf.mxu1  ;;  %v7978_v1 = vpop.f32.mrf.mxu0  ;;  %5956 = vmatmul.mubr.bf16.gmra.mxu0 %v9209_v11  ;;  %6053 = vmatmul.mubr.bf16.gmra.mxu1 %v9212_v54 }
 0x2ed   : > { %v11119_v20 = vadd.f32 %v7913_v19, %v10991_v42  ;;  %v11122_v13 = vadd.f32 %v7977_v30, %v10994_v10  ;;  %5963 = vmatprep.mubr.bf16.mxu0 %v9218_v53  ;;  %6060 = vmatprep.mubr.bf16.mxu1 %v9221_v21  ;;  %v9224_v42 = vld [vmem:[%s9409_s9 + $0xb44] ss:$100 sps:$4 sm:$0xff]   ;;  %v9234_v19 = vld [vmem:[%s9409_s9 + $0x5d4] ss:$100 sps:$4 sm:$0xff]  }
 0x2ee   : > { %v7915_v63 = vpop.f32.mrf.mxu1  ;;  %v7979_v24 = vpop.f32.mrf.mxu0  ;;  %v9222_v53 = vld [vmem:[%s9409_s9 + $0xb40] ss:$100 sps:$4 sm:$0xff]   ;;  %v9225_v21 = vld [vmem:[%s9409_s9 + $0x508] ss:$100 sps:$4 sm:$0xff]  }
 0x2ef   : > { %v7916_v44 = vadd.f32 %v7915_v63, %v7914_v17  ;;  %v7980_v45 = vadd.f32 %v7979_v24, %v7978_v1 }
 0x2f0   : > { %v7917_v12 = vpop.f32.mrf.mxu1  ;;  %v7981_v46 = vpop.f32.mrf.mxu0 }
 0x2f1   : > { %v11127_v8 = vadd.f32 %v7916_v44, %v10999_v26  ;;  %v11130_v15 = vadd.f32 %v7980_v45, %v11002_v31 }
 0x2f2   : > { %v7918_v10 = vpop.f32.mrf.mxu1  ;;  %v7982_v41 = vpop.f32.mrf.mxu0 }
 0x2f3   : > { %v7919_v38 = vadd.f32 %v7918_v10, %v7917_v12  ;;  %v7983_v9 = vadd.f32 %v7982_v41, %v7981_v46 }
 0x2f4   : > { %v7920_v23 = vpop.f32.mrf.mxu1  ;;  %v7984_v50 = vpop.f32.mrf.mxu0  ;;  %5964 = vmatmul.mubr.bf16.gmra.mxu0 %v9216_v25  ;;  %6061 = vmatmul.mubr.bf16.gmra.mxu1 %v9219_v43 }
 0x2f5   : > { %v11135_v26 = vadd.f32 %v7919_v38, %v11007_v47  ;;  %v11138_v31 = vadd.f32 %v7983_v9, %v11010_v27  ;;  %5971 = vmatprep.mubr.bf16.mxu0 %v9224_v42  ;;  %6068 = vmatprep.mubr.bf16.mxu1 %v9227_v48  ;;  %v9231_v47 = vld [vmem:[%s9409_s9 + $0xc0c] ss:$100 sps:$4 sm:$0xff]   ;;  %v9238_v38 = vld [vmem:[%s9409_s9 + $0x60] ss:$100 sps:$4 sm:$0xff]  }
 0x2f6   : > { %v7921_v55 = vpop.f32.mrf.mxu1  ;;  %v7985_v49 = vpop.f32.mrf.mxu0  ;;  %v9229_v42 = vld [vmem:[%s9409_s9 + $0xc08] ss:$100 sps:$4 sm:$0xff]   ;;  %v9232_v48 = vld [vmem:[%s9409_s9 + $0x5d0] ss:$100 sps:$4 sm:$0xff]  }
 0x2f7   : > { %v7922_v5 = vadd.f32 %v7921_v55, %v7920_v23  ;;  %v7986_v7 = vadd.f32 %v7985_v49, %v7984_v50 }
 0x2f8   : > { %v7923_v11 = vpop.f32.mrf.mxu1  ;;  %v7987_v54 = vpop.f32.mrf.mxu0 }
 0x2f9   : > { %v11143_v61 = vadd.f32 %v7922_v5, %v11015_v40  ;;  %v11146_v0 = vadd.f32 %v7986_v7, %v11018_v29 }
 0x2fa   : > { %v7924_v27 = vpop.f32.mrf.mxu1  ;;  %v7988_v30 = vpop.f32.mrf.mxu0 }
 0x2fb   : > { %v7925_v17 = vadd.f32 %v7924_v27, %v7923_v11  ;;  %v7989_v1 = vadd.f32 %v7988_v30, %v7987_v54 }
 0x2fc   : > { %v7926_v63 = vpop.f32.mrf.mxu1  ;;  %v7990_v24 = vpop.f32.mrf.mxu0  ;;  %5972 = vmatmul.mubr.bf16.gmra.mxu0 %v9222_v53  ;;  %6069 = vmatmul.mubr.bf16.gmra.mxu1 %v9225_v21 }
 0x2fd   : > { %v11151_v40 = vadd.f32 %v7925_v17, %v11023_v51  ;;  %v11154_v29 = vadd.f32 %v7989_v1, %v11026_v60  ;;  %5979 = vmatprep.mubr.bf16.mxu0 %v9231_v47  ;;  %6076 = vmatprep.mubr.bf16.mxu1 %v9234_v19  ;;  %v9237_v51 = vld [vmem:[%s9409_s9 + $0x69c] ss:$100 sps:$4 sm:$0xff]   ;;  %v9239_v19 = vld [vmem:[%s9409_s9 + $0x128] ss:$100 sps:$4 sm:$0xff]   ;;  %v9243_v17 = vld [vmem:[%s9409_s9 + $0x1f0] ss:$100 sps:$4 sm:$0xff]  }
 0x2fe   : > { %v7927_v44 = vpop.f32.mrf.mxu1  ;;  %v7991_v45 = vpop.f32.mrf.mxu0  ;;  %v9235_v47 = vld [vmem:[%s9409_s9 + $0x698] ss:$100 sps:$4 sm:$0xff]  }
 0x2ff   : > { %v7928_v12 = vadd.f32 %v7927_v44, %v7926_v63  ;;  %v7992_v46 = vadd.f32 %v7991_v45, %v7990_v24 }
 0x300   : > { %v7929_v25 = vpop.f32.mrf.mxu1  ;;  %v7993_v43 = vpop.f32.mrf.mxu0 }
 0x301   : > { %v11159_v10 = vadd.f32 %v7928_v12, %v11031_v34  ;;  %v11162_v41 = vadd.f32 %v7992_v46, %v11034_v39 }
 0x302   : > { %v7930_v60 = vpop.f32.mrf.mxu1  ;;  %v7994_v9 = vpop.f32.mrf.mxu0 }
 0x303   : > { %v7931_v23 = vadd.f32 %v7930_v60, %v7929_v25  ;;  %v7995_v50 = vadd.f32 %v7994_v9, %v7993_v43 }
 0x304   : > { %v7932_v55 = vpop.f32.mrf.mxu1  ;;  %v7996_v49 = vpop.f32.mrf.mxu0  ;;  %5980 = vmatmul.mubr.bf16.gmra.mxu0 %v9229_v42  ;;  %6077 = vmatmul.mubr.bf16.gmra.mxu1 %v9232_v48 }
 0x305   : > { %v11167_v34 = vadd.f32 %v7931_v23, %v11039_v37  ;;  %v11170_v39 = vadd.f32 %v7995_v50, %v11042_v28  ;;  %6084 = vmatprep.mubr.bf16.mxu1 %v9237_v51  ;;  %8426 = vmatprep.mubr.bf16.mxu0 %v9238_v38  ;;  %v9242_v37 = vld [vmem:[%s9409_s9 + $0x764] ss:$100 sps:$4 sm:$0xff]   ;;  %v9244_v38 = vld [vmem:[%s9409_s9 + $0x2b8] ss:$100 sps:$4 sm:$0xff]  }
 0x306   : > { %v7933_v5 = vpop.f32.mrf.mxu1  ;;  %v7997_v7 = vpop.f32.mrf.mxu0  ;;  %v9240_v51 = vld [vmem:[%s9409_s9 + $0x760] ss:$100 sps:$4 sm:$0xff]  }
 0x307   : > { %v7934_v11 = vadd.f32 %v7933_v5, %v7932_v55  ;;  %v7998_v54 = vadd.f32 %v7997_v7, %v7996_v49  ;;  %v9248_v23 = vld [vmem:[%s9409_s9 + $0x380] ss:$100 sps:$4 sm:$0xff]  }
 0x308   : > { %v7935_v53 = vpop.f32.mrf.mxu1  ;;  %v7999_v21 = vpop.f32.mrf.mxu0 }
 0x309   : > { %v11175_v27 = vadd.f32 %v7934_v11, %v11047_v56  ;;  %v11178_v30 = vadd.f32 %v7998_v54, %v11050_v14 }
 0x30a   : > { %v7936_v28 = vpop.f32.mrf.mxu1  ;;  %v8000_v1 = vpop.f32.mrf.mxu0 }
 0x30b   : > { %v7937_v63 = vadd.f32 %v7936_v28, %v7935_v53  ;;  %v8001_v24 = vadd.f32 %v8000_v1, %v7999_v21 }
 0x30c   : > { %v8002_v44 = vpop.f32.mrf.mxu0  ;;  %v8066_v45 = vpop.f32.mrf.mxu1  ;;  %6085 = vmatmul.mubr.bf16.gmra.mxu1 %v9235_v47  ;;  %8427 = vmatmul.mubr.bf16.vlgmr.msra.gmra.mxu0 %v9239_v19 }
 0x30d   : > { %v11183_v56 = vadd.f32 %v7937_v63, %v11055_v33  ;;  %v11186_v14 = vadd.f32 %v8001_v24, %v11058_v6  ;;  %6092 = vmatprep.mubr.bf16.mxu1 %v9242_v37  ;;  %8430 = vmatprep.mubr.bf16.mxu0 %v9243_v17  ;;  %v9247_v33 = vld [vmem:[%s9409_s9 + $0x82c] ss:$100 sps:$4 sm:$0xff]  }
 0x30e   : > { %v8003_v12 = vpop.f32.mrf.mxu0  ;;  %v8067_v46 = vpop.f32.mrf.mxu1  ;;  %v9245_v37 = vld [vmem:[%s9409_s9 + $0x828] ss:$100 sps:$4 sm:$0xff]   ;;  %v9253_v63 = vld [vmem:[%s9409_s9 + $0x510] ss:$100 sps:$4 sm:$0xff]  }
 0x30f   : > { %v8004_v25 = vadd.f32 %v8003_v12, %v8002_v44  ;;  %v8068_v43 = vadd.f32 %v8067_v46, %v8066_v45  ;;  %v9249_v17 = vld [vmem:[%s9409_s9 + $0x448] ss:$100 sps:$4 sm:$0xff]  }
 0x310   : > { %v8005_v42 = vpop.f32.mrf.mxu0  ;;  %v8069_v48 = vpop.f32.mrf.mxu1 }
 0x311   : > { %v11191_v60 = vadd.f32 %v8004_v25, %v11063_v58  ;;  %v11194_v9 = vadd.f32 %v8068_v43, %v11066_v59 }
 0x312   : > { %v8006_v6 = vpop.f32.mrf.mxu0  ;;  %v8070_v50 = vpop.f32.mrf.mxu1 }
 0x313   : > { %v8007_v55 = vadd.f32 %v8006_v6, %v8005_v42  ;;  %v8071_v49 = vadd.f32 %v8070_v50, %v8069_v48 }
 0x314   : > { %v8008_v5 = vpop.f32.mrf.mxu0  ;;  %v8072_v7 = vpop.f32.mrf.mxu1  ;;  %6093 = vmatmul.mubr.bf16.gmra.mxu1 %v9240_v51  ;;  %8431 = vmatmul.mubr.bf16.gmra.mxu0 %v9244_v38 }
 0x315   : > { %v11199_v58 = vadd.f32 %v8007_v55, %v11071_v36  ;;  %v11202_v59 = vadd.f32 %v8071_v49, %v11074_v3  ;;  %6100 = vmatprep.mubr.bf16.mxu1 %v9247_v33  ;;  %8434 = vmatprep.mubr.bf16.mxu0 %v9248_v23  ;;  %v9252_v36 = vld [vmem:[%s9409_s9 + $0x8f4] ss:$100 sps:$4 sm:$0xff]   ;;  %v9258_v55 = vld [vmem:[%s9409_s9 + $0x6a0] ss:$100 sps:$4 sm:$0xff]  }
 0x316   : > { %v8009_v11 = vpop.f32.mrf.mxu0  ;;  %v8073_v54 = vpop.f32.mrf.mxu1  ;;  %v9250_v33 = vld [vmem:[%s9409_s9 + $0x8f0] ss:$100 sps:$4 sm:$0xff]   ;;  %v9254_v23 = vld [vmem:[%s9409_s9 + $0x5d8] ss:$100 sps:$4 sm:$0xff]  }
 0x317   : > { %v8010_v53 = vadd.f32 %v8009_v11, %v8008_v5  ;;  %v8074_v21 = vadd.f32 %v8073_v54, %v8072_v7 }
 0x318   : > { %v8011_v47 = vpop.f32.mrf.mxu0  ;;  %v8075_v19 = vpop.f32.mrf.mxu1 }
 0x319   : > { %v11207_v28 = vadd.f32 %v8010_v53, %v11079_v18  ;;  %v11210_v1 = vadd.f32 %v8074_v21, %v11082_v35 }
 0x31a   : > { %v8012_v3 = vpop.f32.mrf.mxu0  ;;  %v8076_v24 = vpop.f32.mrf.mxu1 }
 0x31b   : > { %v8013_v44 = vadd.f32 %v8012_v3, %v8011_v47  ;;  %v8077_v45 = vadd.f32 %v8076_v24, %v8075_v19 }
 0x31c   : > { %v8014_v12 = vpop.f32.mrf.mxu0  ;;  %v8078_v46 = vpop.f32.mrf.mxu1  ;;  %6101 = vmatmul.mubr.bf16.gmra.mxu1 %v9245_v37  ;;  %8435 = vmatmul.mubr.bf16.gmra.mxu0 %v9249_v17 }
 0x31d   : > { %v11215_v18 = vadd.f32 %v8013_v44, %v11087_v4  ;;  %v11218_v35 = vadd.f32 %v8077_v45, %v11090_v62  ;;  %6108 = vmatprep.mubr.bf16.mxu1 %v9252_v36  ;;  %8438 = vmatprep.mubr.bf16.mxu0 %v9253_v63  ;;  %v9257_v4 = vld [vmem:[%s9409_s9 + $0x9bc] ss:$100 sps:$4 sm:$0xff]   ;;  %v9259_v63 = vld [vmem:[%s9409_s9 + $0x768] ss:$100 sps:$4 sm:$0xff]   ;;  %v9263_v44 = vld [vmem:[%s9409_s9 + $0x830] ss:$100 sps:$4 sm:$0xff]  }
 0x31e   : > { %v8015_v25 = vpop.f32.mrf.mxu0  ;;  %v8079_v43 = vpop.f32.mrf.mxu1  ;;  %v9255_v36 = vld [vmem:[%s9409_s9 + $0x9b8] ss:$100 sps:$4 sm:$0xff]  }
 0x31f   : > { %v8016_v42 = vadd.f32 %v8015_v25, %v8014_v12  ;;  %v8080_v48 = vadd.f32 %v8079_v43, %v8078_v46 }
 0x320   : > { %v8017_v51 = vpop.f32.mrf.mxu0  ;;  %v8081_v38 = vpop.f32.mrf.mxu1 }
 0x321   : > { %v11223_v6 = vadd.f32 %v8016_v42, %v11095_v22  ;;  %v11226_v50 = vadd.f32 %v8080_v48, %v11098_v32 }
 0x322   : > { %v8018_v62 = vpop.f32.mrf.mxu0  ;;  %v8082_v49 = vpop.f32.mrf.mxu1 }
 0x323   : > { %v8019_v5 = vadd.f32 %v8018_v62, %v8017_v51  ;;  %v8083_v7 = vadd.f32 %v8082_v49, %v8081_v38 }
 0x324   : > { %v8020_v11 = vpop.f32.mrf.mxu0  ;;  %v8084_v54 = vpop.f32.mrf.mxu1  ;;  %6109 = vmatmul.mubr.bf16.gmra.mxu1 %v9250_v33  ;;  %8439 = vmatmul.mubr.bf16.gmra.mxu0 %v9254_v23 }
 0x325   : > { %v11231_v22 = vadd.f32 %v8019_v5, %v11103_v57  ;;  %v11234_v32 = vadd.f32 %v8083_v7, %v11106_v16  ;;  %6116 = vmatprep.mubr.bf16.mxu1 %v9257_v4  ;;  %8442 = vmatprep.mubr.bf16.mxu0 %v9258_v55  ;;  %v9262_v57 = vld [vmem:[%s9409_s9 + $0xa84] ss:$100 sps:$4 sm:$0xff]   ;;  %v9264_v55 = vld [vmem:[%s9409_s9 + $0x8f8] ss:$100 sps:$4 sm:$0xff]  }
 0x326   : > { %v8021_v53 = vpop.f32.mrf.mxu0  ;;  %v8085_v21 = vpop.f32.mrf.mxu1  ;;  %v9260_v4 = vld [vmem:[%s9409_s9 + $0xa80] ss:$100 sps:$4 sm:$0xff]  }
 0x327   : > { %v8022_v47 = vadd.f32 %v8021_v53, %v8020_v11  ;;  %v8086_v19 = vadd.f32 %v8085_v21, %v8084_v54  ;;  %v9268_v5 = vld [vmem:[%s9409_s9 + $0x9c0] ss:$100 sps:$4 sm:$0xff]  }
 0x328   : > { %v8023_v37 = vpop.f32.mrf.mxu0  ;;  %v8087_v17 = vpop.f32.mrf.mxu1 }
 0x329   : > { %v11239_v3 = vadd.f32 %v8022_v47, %v11111_v2  ;;  %v11242_v24 = vadd.f32 %v8086_v19, %v11114_v52 }
 0x32a   : > { %v8024_v16 = vpop.f32.mrf.mxu0  ;;  %v8088_v45 = vpop.f32.mrf.mxu1 }
 0x32b   : > { %v8025_v12 = vadd.f32 %v8024_v16, %v8023_v37  ;;  %v8089_v46 = vadd.f32 %v8088_v45, %v8087_v17 }
 0x32c   : > { %v8026_v25 = vpop.f32.mrf.mxu0  ;;  %v8090_v43 = vpop.f32.mrf.mxu1  ;;  %6117 = vmatmul.mubr.bf16.gmra.mxu1 %v9255_v36  ;;  %8443 = vmatmul.mubr.bf16.gmra.mxu0 %v9259_v63 }
 0x32d   : > { %v11247_v2 = vadd.f32 %v8025_v12, %v11119_v20  ;;  %v11250_v52 = vadd.f32 %v8089_v46, %v11122_v13  ;;  %6124 = vmatprep.mubr.bf16.mxu1 %v9262_v57  ;;  %8446 = vmatprep.mubr.bf16.mxu0 %v9263_v44  ;;  %v9267_v20 = vld [vmem:[%s9409_s9 + $0xb4c] ss:$100 sps:$4 sm:$0xff]  }
 0x32e   : > { %v8027_v42 = vpop.f32.mrf.mxu0  ;;  %v8091_v48 = vpop.f32.mrf.mxu1  ;;  %v9265_v57 = vld [vmem:[%s9409_s9 + $0xb48] ss:$100 sps:$4 sm:$0xff]   ;;  %v9273_v12 = vld [vmem:[%s9409_s9 + $0xb50] ss:$100 sps:$4 sm:$0xff]  }
 0x32f   : > { %v8028_v51 = vadd.f32 %v8027_v42, %v8026_v25  ;;  %v8092_v38 = vadd.f32 %v8091_v48, %v8090_v43  ;;  %v9269_v44 = vld [vmem:[%s9409_s9 + $0xa88] ss:$100 sps:$4 sm:$0xff]  }
 0x330   : > { %v8029_v33 = vpop.f32.mrf.mxu0  ;;  %v8093_v23 = vpop.f32.mrf.mxu1 }
 0x331   : > { %v11255_v62 = vadd.f32 %v8028_v51, %v11127_v8  ;;  %v11258_v49 = vadd.f32 %v8092_v38, %v11130_v15 }
 0x332   : > { %v8030_v13 = vpop.f32.mrf.mxu0  ;;  %v8094_v7 = vpop.f32.mrf.mxu1 }
 0x333   : > { %v8031_v11 = vadd.f32 %v8030_v13, %v8029_v33  ;;  %v8095_v54 = vadd.f32 %v8094_v7, %v8093_v23 }
 0x334   : > { %v8032_v53 = vpop.f32.mrf.mxu0  ;;  %v8096_v21 = vpop.f32.mrf.mxu1  ;;  %6125 = vmatmul.mubr.bf16.gmra.mxu1 %v9260_v4  ;;  %8447 = vmatmul.mubr.bf16.gmra.mxu0 %v9264_v55 }
 0x335   : > { %v11263_v8 = vadd.f32 %v8031_v11, %v11135_v26  ;;  %v11266_v15 = vadd.f32 %v8095_v54, %v11138_v31  ;;  %6132 = vmatprep.mubr.bf16.mxu1 %v9267_v20  ;;  %8450 = vmatprep.mubr.bf16.mxu0 %v9268_v5  ;;  %v9272_v26 = vld [vmem:[%s9409_s9 + $0xc14] ss:$100 sps:$4 sm:$0xff]  }
 0x336   : > { %v8033_v47 = vpop.f32.mrf.mxu0  ;;  %v8097_v19 = vpop.f32.mrf.mxu1  ;;  %v9270_v20 = vld [vmem:[%s9409_s9 + $0xc10] ss:$100 sps:$4 sm:$0xff]   ;;  %v9274_v5 = vld [vmem:[%s9409_s9 + $0xc18] ss:$100 sps:$4 sm:$0xff]   ;;  %s6438_s9 = sshll.u32 %s11686_s16, 3 }
 0x337   : > { %v8034_v37 = vadd.f32 %v8033_v47, %v8032_v53  ;;  %v8098_v17 = vadd.f32 %v8097_v19, %v8096_v21  ;;  %s11564_s15 = scalar_lea.vmem %s11662_s3, %s6438_s9 }
 0x338   : > { %v8035_v36 = vpop.f32.mrf.mxu0  ;;  %v8099_v63 = vpop.f32.mrf.mxu1 }
 0x339   : > { %v11271_v16 = vadd.f32 %v8034_v37, %v11143_v61  ;;  %v11274_v45 = vadd.f32 %v8098_v17, %v11146_v0 }
 0x33a   : > { %v8036_v31 = vpop.f32.mrf.mxu0  ;;  %v8100_v46 = vpop.f32.mrf.mxu1 }
 0x33b   : > { %v8037_v25 = vadd.f32 %v8036_v31, %v8035_v36  ;;  %v8101_v43 = vadd.f32 %v8100_v46, %v8099_v63 }
 0x33c   : > { %v8038_v42 = vpop.f32.mrf.mxu0  ;;  %v8102_v48 = vpop.f32.mrf.mxu1  ;;  %6133 = vmatmul.mubr.bf16.gmra.mxu1 %v9265_v57  ;;  %8451 = vmatmul.mubr.bf16.gmra.mxu0 %v9269_v44 }
 0x33d   : > { %v11279_v51 = vadd.f32 %v8037_v25, %v11151_v40  ;;  %v11282_v61 = vadd.f32 %v8101_v43, %v11154_v29  ;;  %6140 = vmatprep.mubr.bf16.mxu1 %v9272_v26  ;;  %8454 = vmatprep.mubr.bf16.mxu0 %v9273_v12 }
 0x33e   : > { %v8039_v0 = vpop.f32.mrf.mxu0  ;;  %v8103_v38 = vpop.f32.mrf.mxu1 }
 0x33f   : > { %v8040_v33 = vadd.f32 %v8039_v0, %v8038_v42  ;;  %v8104_v23 = vadd.f32 %v8103_v38, %v8102_v48 }
 0x340   : > { %v8041_v4 = vpop.f32.mrf.mxu0  ;;  %v8105_v55 = vpop.f32.mrf.mxu1 }
 0x341   : > { %v11287_v13 = vadd.f32 %v8040_v33, %v11159_v10  ;;  %v11290_v7 = vadd.f32 %v8104_v23, %v11162_v41 }
 0x342   : > { %v8042_v40 = vpop.f32.mrf.mxu0  ;;  %v8106_v11 = vpop.f32.mrf.mxu1 }
 0x343   : > { %v8043_v29 = vadd.f32 %v8042_v40, %v8041_v4  ;;  %v8107_v54 = vadd.f32 %v8106_v11, %v8105_v55 }
 0x344   : > { %v8044_v53 = vpop.f32.mrf.mxu0  ;;  %v8108_v21 = vpop.f32.mrf.mxu1  ;;  %6141 = vmatmul.mubr.bf16.gmra.mxu1 %v9270_v20  ;;  %8455 = vmatmul.mubr.bf16.gmra.mxu0 %v9274_v5 }
 0x345   : > { %v11293_v47 = vadd.f32 %v8043_v29, %v11167_v34  ;;  %v11296_v19 = vadd.f32 %v8107_v54, %v11170_v39 }
 0x346   : > { %v8045_v37 = vpop.f32.mrf.mxu0  ;;  %v8109_v10 = vpop.f32.mrf.mxu1 }
 0x347   : > { %v8046_v17 = vadd.f32 %v8045_v37, %v8044_v53  ;;  %v8110_v36 = vadd.f32 %v8109_v10, %v8108_v21 }
 0x348   : > { %v8047_v41 = vpop.f32.mrf.mxu0  ;;  %v8111_v63 = vpop.f32.mrf.mxu1 }
 0x349   : > { %v11299_v57 = vadd.f32 %v8046_v17, %v11175_v27  ;;  %v11302_v44 = vadd.f32 %v8110_v36, %v11178_v30 }
 0x34a   : > { %v8048_v26 = vpop.f32.mrf.mxu0  ;;  %v8112_v12 = vpop.f32.mrf.mxu1 }
 0x34b   : > { %v8049_v31 = vadd.f32 %v8048_v26, %v8047_v41  ;;  %v8113_v34 = vadd.f32 %v8112_v12, %v8111_v63 }
 0x34c   : > { %v8114_v46 = vpop.f32.mrf.mxu1  ;;  %v8178_v25 = vpop.f32.mrf.mxu0 }
 0x34d   : > { %v11305_v39 = vadd.f32 %v8049_v31, %v11183_v56  ;;  %v11308_v43 = vadd.f32 %v8113_v34, %v11186_v14 }
 0x34e   : > { %v8115_v42 = vpop.f32.mrf.mxu1  ;;  %v8179_v48 = vpop.f32.mrf.mxu0 }
 0x34f   : > { %v8116_v0 = vadd.f32 %v8115_v42, %v8114_v46  ;;  %v8180_v27 = vadd.f32 %v8179_v48, %v8178_v25 }
 0x350   : > { %v8117_v38 = vpop.f32.mrf.mxu1  ;;  %v8181_v33 = vpop.f32.mrf.mxu0 }
 0x351   : > { %v11311_v30 = vadd.f32 %v8116_v0, %v11191_v60  ;;  %v11314_v23 = vadd.f32 %v8180_v27, %v11194_v9 }
 0x352   : > { %v8118_v4 = vpop.f32.mrf.mxu1  ;;  %v8182_v55 = vpop.f32.mrf.mxu0 }
 0x353   : > { %v8119_v20 = vadd.f32 %v8118_v4, %v8117_v38  ;;  %v8183_v56 = vadd.f32 %v8182_v55, %v8181_v33 }
 0x354   : > { %v8120_v5 = vpop.f32.mrf.mxu1  ;;  %v8184_v40 = vpop.f32.mrf.mxu0 }
 0x355   : > { %v11317_v14 = vadd.f32 %v8119_v20, %v11199_v58  ;;  %v11320_v11 = vadd.f32 %v8183_v56, %v11202_v59 }
 0x356   : > { %v8121_v29 = vpop.f32.mrf.mxu1  ;;  %v8185_v54 = vpop.f32.mrf.mxu0 }
 0x357   : > { %v8122_v53 = vadd.f32 %v8121_v29, %v8120_v5  ;;  %v8186_v60 = vadd.f32 %v8185_v54, %v8184_v40 }
 0x358   : > { %v8123_v21 = vpop.f32.mrf.mxu1  ;;  %v8187_v37 = vpop.f32.mrf.mxu0 }
 0x359   : > { %v11323_v9 = vadd.f32 %v8122_v53, %v11207_v28  ;;  %v11326_v10 = vadd.f32 %v8186_v60, %v11210_v1 }
 0x35a   : > { %v8124_v17 = vpop.f32.mrf.mxu1  ;;  %v8188_v36 = vpop.f32.mrf.mxu0 }
 0x35b   : > { %v8125_v41 = vadd.f32 %v8124_v17, %v8123_v21  ;;  %v8189_v58 = vadd.f32 %v8188_v36, %v8187_v37 }
 0x35c   : > { %v8126_v63 = vpop.f32.mrf.mxu1  ;;  %v8190_v26 = vpop.f32.mrf.mxu0 }
 0x35d   : > { %v11329_v59 = vadd.f32 %v8125_v41, %v11215_v18  ;;  %v11332_v12 = vadd.f32 %v8189_v58, %v11218_v35 }
 0x35e   : > { %v8127_v31 = vpop.f32.mrf.mxu1  ;;  %v8191_v34 = vpop.f32.mrf.mxu0 }
 0x35f   : > { %v8128_v46 = vadd.f32 %v8127_v31, %v8126_v63  ;;  %v8192_v28 = vadd.f32 %v8191_v34, %v8190_v26 }
 0x360   : > { %v8129_v25 = vpop.f32.mrf.mxu1  ;;  %v8193_v42 = vpop.f32.mrf.mxu0 }
 0x361   : > { %v11335_v1 = vadd.f32 %v8128_v46, %v11223_v6  ;;  %v11338_v48 = vadd.f32 %v8192_v28, %v11226_v50 }
 0x362   : > { %v8130_v0 = vpop.f32.mrf.mxu1  ;;  %v8194_v27 = vpop.f32.mrf.mxu0 }
 0x363   : > { %v8131_v38 = vadd.f32 %v8130_v0, %v8129_v25  ;;  %v8195_v18 = vadd.f32 %v8194_v27, %v8193_v42 }
 0x364   : > { %v8132_v33 = vpop.f32.mrf.mxu1  ;;  %v8196_v4 = vpop.f32.mrf.mxu0 }
 0x365   : > { %v11341_v35 = vadd.f32 %v8131_v38, %v11231_v22  ;;  %v11344_v55 = vadd.f32 %v8195_v18, %v11234_v32 }
 0x366   : > { %v8133_v20 = vpop.f32.mrf.mxu1  ;;  %v8197_v56 = vpop.f32.mrf.mxu0 }
 0x367   : > { %v8134_v5 = vadd.f32 %v8133_v20, %v8132_v33  ;;  %v8198_v6 = vadd.f32 %v8197_v56, %v8196_v4 }
 0x368   : > { %v8135_v40 = vpop.f32.mrf.mxu1  ;;  %v8199_v29 = vpop.f32.mrf.mxu0 }
 0x369   : > { %v11347_v50 = vadd.f32 %v8134_v5, %v11239_v3  ;;  %v11350_v54 = vadd.f32 %v8198_v6, %v11242_v24 }
 0x36a   : > { %v8136_v53 = vpop.f32.mrf.mxu1  ;;  %v8200_v60 = vpop.f32.mrf.mxu0 }
 0x36b   : > { %v8137_v21 = vadd.f32 %v8136_v53, %v8135_v40  ;;  %v8201_v22 = vadd.f32 %v8200_v60, %v8199_v29 }
 0x36c   : > { %v8138_v37 = vpop.f32.mrf.mxu1  ;;  %v8202_v17 = vpop.f32.mrf.mxu0 }
 0x36d   : > { %v11353_v32 = vadd.f32 %v8137_v21, %v11247_v2  ;;  %v11356_v36 = vadd.f32 %v8201_v22, %v11250_v52 }
 0x36e   : > { %v8139_v41 = vpop.f32.mrf.mxu1  ;;  %v8203_v58 = vpop.f32.mrf.mxu0 }
 0x36f   : > { %v8140_v63 = vadd.f32 %v8139_v41, %v8138_v37  ;;  %v8204_v3 = vadd.f32 %v8203_v58, %v8202_v17 }
 0x370   : > { %v8141_v26 = vpop.f32.mrf.mxu1  ;;  %v8205_v31 = vpop.f32.mrf.mxu0 }
 0x371   : > { %v11359_v24 = vadd.f32 %v8140_v63, %v11255_v62  ;;  %v11362_v34 = vadd.f32 %v8204_v3, %v11258_v49 }
 0x372   : > { %v8142_v46 = vpop.f32.mrf.mxu1  ;;  %v8206_v28 = vpop.f32.mrf.mxu0 }
 0x373   : > { %v8143_v25 = vadd.f32 %v8142_v46, %v8141_v26  ;;  %v8207_v2 = vadd.f32 %v8206_v28, %v8205_v31 }
 0x374   : > { %v8144_v42 = vpop.f32.mrf.mxu1  ;;  %v8208_v0 = vpop.f32.mrf.mxu0 }
 0x375   : > { %v11365_v52 = vadd.f32 %v8143_v25, %v11263_v8  ;;  %v11368_v27 = vadd.f32 %v8207_v2, %v11266_v15 }
 0x376   : > { %v8145_v38 = vpop.f32.mrf.mxu1  ;;  %v8209_v18 = vpop.f32.mrf.mxu0 }
 0x377   : > { %v8146_v33 = vadd.f32 %v8145_v38, %v8144_v42  ;;  %v8210_v62 = vadd.f32 %v8209_v18, %v8208_v0 }
 0x378   : > { %v8147_v4 = vpop.f32.mrf.mxu1  ;;  %v8211_v20 = vpop.f32.mrf.mxu0 }
 0x379   : > { %v11371_v49 = vadd.f32 %v8146_v33, %v11271_v16  ;;  %v11374_v56 = vadd.f32 %v8210_v62, %v11274_v45 }
 0x37a   : > { %v8148_v5 = vpop.f32.mrf.mxu1  ;;  %v8212_v6 = vpop.f32.mrf.mxu0 }
 0x37b   : > { %v8149_v40 = vadd.f32 %v8148_v5, %v8147_v4  ;;  %v8213_v8 = vadd.f32 %v8212_v6, %v8211_v20 }
 0x37c   : > { %v8150_v29 = vpop.f32.mrf.mxu1  ;;  %v8214_v53 = vpop.f32.mrf.mxu0 }
 0x37d   : > { %v11377_v15 = vadd.f32 %v8149_v40, %v11279_v51  ;;  %v11380_v60 = vadd.f32 %v8213_v8, %v11282_v61 }
 0x37e   : > { %v8151_v21 = vpop.f32.mrf.mxu1  ;;  %v8215_v22 = vpop.f32.mrf.mxu0 }
 0x37f   : > { %v8152_v37 = vadd.f32 %v8151_v21, %v8150_v29  ;;  %v8216_v16 = vadd.f32 %v8215_v22, %v8214_v53 }
 0x380   : > { %v8153_v17 = vpop.f32.mrf.mxu1  ;;  %v8217_v41 = vpop.f32.mrf.mxu0 }
 0x381   : > { %v11383_v45 = vadd.f32 %v8152_v37, %v11287_v13  ;;  %v11386_v58 = vadd.f32 %v8216_v16, %v11290_v7 }
 0x382   : > { %v8154_v63 = vpop.f32.mrf.mxu1  ;;  %v8218_v3 = vpop.f32.mrf.mxu0 }
 0x383   : > { %v8155_v26 = vadd.f32 %v8154_v63, %v8153_v17  ;;  %v8219_v51 = vadd.f32 %v8218_v3, %v8217_v41 }
 0x384   : > { %v8156_v31 = vpop.f32.mrf.mxu1  ;;  %v8220_v46 = vpop.f32.mrf.mxu0 }
 0x385   : > { %v11389_v61 = vadd.f32 %v8155_v26, %v11293_v47  ;;  %v11392_v28 = vadd.f32 %v8219_v51, %v11296_v19 }
 0x386   : > { %v8157_v25 = vpop.f32.mrf.mxu1  ;;  %v8221_v2 = vpop.f32.mrf.mxu0 }
 0x387   : > { %v8158_v42 = vadd.f32 %v8157_v25, %v8156_v31  ;;  %v8222_v13 = vadd.f32 %v8221_v2, %v8220_v46 }
 0x388   : > { %v8159_v0 = vpop.f32.mrf.mxu1  ;;  %v8223_v38 = vpop.f32.mrf.mxu0 }
 0x389   : > { %v11395_v7 = vadd.f32 %v8158_v42, %v11299_v57  ;;  %v11398_v18 = vadd.f32 %v8222_v13, %v11302_v44 }
 0x38a   : > { %v8160_v33 = vpop.f32.mrf.mxu1  ;;  %v8224_v62 = vpop.f32.mrf.mxu0 }
 0x38b   : > { %v8161_v4 = vadd.f32 %v8160_v33, %v8159_v0  ;;  %v8225_v47 = vadd.f32 %v8224_v62, %v8223_v38 }
 0x38c   : > { %v8226_v20 = vpop.f32.mrf.mxu0  ;;  %v11400_v5 = vpop.f32.mrf.mxu1 }
 0x38d   : > { %v11403_v19 = vadd.f32 %v8161_v4, %v11305_v39  ;;  %v11406_v6 = vadd.f32 %v8225_v47, %v11308_v43 }
 0x38e   : > { %v8227_v40 = vpop.f32.mrf.mxu0  ;;  %v11408_v8 = vpop.f32.mrf.mxu1 }
 0x38f   : > { %v8228_v57 = vadd.f32 %v8227_v40, %v8226_v20 }
 0x390   : > { %v8229_v29 = vpop.f32.mrf.mxu0  ;;  %v11410_v44 = vpop.f32.mrf.mxu1 }
 0x391   : > { %v11413_v53 = vadd.f32 %v8228_v57, %v11311_v30 }
 0x392   : > { %v8230_v21 = vpop.f32.mrf.mxu0  ;;  %v11415_v22 = vpop.f32.mrf.mxu1 }
 0x393   : > { %v8231_v37 = vadd.f32 %v8230_v21, %v8229_v29 }
 0x394   : > { %v8232_v16 = vpop.f32.mrf.mxu0  ;;  %v11417_v39 = vpop.f32.mrf.mxu1 }
 0x395   : > { %v11420_v43 = vadd.f32 %v8231_v37, %v11317_v14 }
 0x396   : > { %v8233_v17 = vpop.f32.mrf.mxu0  ;;  %v11422_v41 = vpop.f32.mrf.mxu1 }
 0x397   : > { %11663 = vst [vmem:[#allocation2_spill] sm:$0xff] %v11420_v43  ;;  %v8234_v63 = vadd.f32 %v8233_v17, %v8232_v16 }
 0x398   : > { %v8235_v3 = vpop.f32.mrf.mxu0  ;;  %v11424_v26 = vpop.f32.mrf.mxu1 }
 0x399   : > { %v11427_v30 = vadd.f32 %v8234_v63, %v11323_v9 }
 0x39a   : > { %v8236_v51 = vpop.f32.mrf.mxu0  ;;  %v11429_v31 = vpop.f32.mrf.mxu1 }
 0x39b   : > { %v8237_v46 = vadd.f32 %v8236_v51, %v8235_v3 }
 0x39c   : > { %v8238_v25 = vpop.f32.mrf.mxu0  ;;  %v11431_v2 = vpop.f32.mrf.mxu1 }
 0x39d   : > { %v11434_v14 = vadd.f32 %v8237_v46, %v11329_v59 }
 0x39e   : > { %v8239_v42 = vpop.f32.mrf.mxu0  ;;  %v11436_v13 = vpop.f32.mrf.mxu1 }
 0x39f   : > { %v8240_v0 = vadd.f32 %v8239_v42, %v8238_v25 }
 0x3a0   : > { %v8241_v38 = vpop.f32.mrf.mxu0  ;;  %v11438_v33 = vpop.f32.mrf.mxu1 }
 0x3a1   : > { %v11441_v9 = vadd.f32 %v8240_v0, %v11335_v1 }
 0x3a2   : > { %v8242_v62 = vpop.f32.mrf.mxu0  ;;  %v11443_v4 = vpop.f32.mrf.mxu1 }
 0x3a3   : > { %11664 = vst [vmem:[#allocation3_spill] sm:$0xff] %v11441_v9  ;;  %v8243_v47 = vadd.f32 %v8242_v62, %v8241_v38 }
 0x3a4   : > { %v8244_v20 = vpop.f32.mrf.mxu0  ;;  %v11445_v40 = vpop.f32.mrf.mxu1 }
 0x3a5   : > { %v11448_v59 = vadd.f32 %v8243_v47, %v11341_v35 }
 0x3a6   : > { %v8245_v57 = vpop.f32.mrf.mxu0  ;;  %v11450_v29 = vpop.f32.mrf.mxu1 }
 0x3a7   : > { %11665 = vst [vmem:[#allocation4_spill] sm:$0xff] %v11448_v59  ;;  %v8246_v21 = vadd.f32 %v8245_v57, %v8244_v20 }
 0x3a8   : > { %v8247_v37 = vpop.f32.mrf.mxu0  ;;  %v11452_v16 = vpop.f32.mrf.mxu1 }
 0x3a9   : > { %v11455_v1 = vadd.f32 %v8246_v21, %v11347_v50 }
 0x3aa   : > { %v8248_v17 = vpop.f32.mrf.mxu0  ;;  %v11457_v63 = vpop.f32.mrf.mxu1 }
 0x3ab   : > { %11666 = vst [vmem:[#allocation5_spill] sm:$0xff] %v11455_v1  ;;  %v8249_v3 = vadd.f32 %v8248_v17, %v8247_v37 }
 0x3ac   : > { %v8250_v51 = vpop.f32.mrf.mxu0  ;;  %v11459_v46 = vpop.f32.mrf.mxu1 }
 0x3ad   : > { %v11462_v35 = vadd.f32 %v8249_v3, %v11353_v32 }
 0x3ae   : > { %v8251_v25 = vpop.f32.mrf.mxu0  ;;  %v11464_v42 = vpop.f32.mrf.mxu1 }
 0x3af   : > { %11667 = vst [vmem:[#allocation6_spill] sm:$0xff] %v11462_v35  ;;  %v8252_v0 = vadd.f32 %v8251_v25, %v8250_v51 }
 0x3b0   : > { %v8253_v38 = vpop.f32.mrf.mxu0  ;;  %v11466_v62 = vpop.f32.mrf.mxu1 }
 0x3b1   : > { %v11469_v50 = vadd.f32 %v8252_v0, %v11359_v24 }
 0x3b2   : > { %v8254_v47 = vpop.f32.mrf.mxu0  ;;  %v11471_v20 = vpop.f32.mrf.mxu1 }
 0x3b3   : > { %11668 = vst [vmem:[#allocation7_spill] sm:$0xff] %v11469_v50  ;;  %v8255_v57 = vadd.f32 %v8254_v47, %v8253_v38 }
 0x3b4   : > { %v8256_v21 = vpop.f32.mrf.mxu0  ;;  %v11473_v37 = vpop.f32.mrf.mxu1 }
 0x3b5   : > { %v11476_v32 = vadd.f32 %v8255_v57, %v11365_v52 }
 0x3b6   : > { %v8257_v17 = vpop.f32.mrf.mxu0  ;;  %v11478_v3 = vpop.f32.mrf.mxu1 }
 0x3b7   : > { %11669 = vst [vmem:[#allocation8_spill] sm:$0xff] %v11476_v32  ;;  %v8258_v51 = vadd.f32 %v8257_v17, %v8256_v21 }
 0x3b8   : > { %v8259_v25 = vpop.f32.mrf.mxu0  ;;  %v11480_v59 = vpop.f32.mrf.mxu1 }
 0x3b9   : > { %v11483_v24 = vadd.f32 %v8258_v51, %v11371_v49 }
 0x3ba   : > { %v8260_v0 = vpop.f32.mrf.mxu0  ;;  %v11485_v50 = vpop.f32.mrf.mxu1 }
 0x3bb   : > { %11670 = vst [vmem:[#allocation9_spill] sm:$0xff] %v11483_v24  ;;  %v8261_v38 = vadd.f32 %v8260_v0, %v8259_v25 }
 0x3bc   : > { %v8262_v47 = vpop.f32.mrf.mxu0  ;;  %v11487_v35 = vpop.f32.mrf.mxu1 }
 0x3bd   : > { %v11490_v52 = vadd.f32 %v8261_v38, %v11377_v15 }
 0x3be   : > { %v8263_v57 = vpop.f32.mrf.mxu0  ;;  %v11492_v32 = vpop.f32.mrf.mxu1 }
 0x3bf   : > { %11671 = vst [vmem:[#allocation10_spill] sm:$0xff] %v11490_v52  ;;  %v8264_v21 = vadd.f32 %v8263_v57, %v8262_v47  ;;  %v8298_v47 = vadd.f32 %v11422_v41, %v11417_v39 }
 0x3c0   : > { %v8265_v17 = vpop.f32.mrf.mxu0  ;;  %v11494_v9 = vpop.f32.mrf.mxu1 }
 0x3c1   : > { %v11497_v49 = vadd.f32 %v8264_v21, %v11383_v45  ;;  %v8292_v21 = vadd.f32 %v11408_v8, %v11400_v5 }
 0x3c2   : > { %v8266_v51 = vpop.f32.mrf.mxu0  ;;  %v11499_v24 = vpop.f32.mrf.mxu1 }
 0x3c3   : > { %11672 = vst [vmem:[#allocation11_spill] sm:$0xff] %v11497_v49  ;;  %v8267_v25 = vadd.f32 %v8266_v51, %v8265_v17  ;;  %v6023_v8 = vadd.f32 %v8292_v21, %v11314_v23 }
 0x3c4   : > { %v8268_v0 = vpop.f32.mrf.mxu0  ;;  %v11501_v1 = vpop.f32.mrf.mxu1 }
 0x3c5   : > { %v11504_v15 = vadd.f32 %v8267_v25, %v11389_v61  ;;  %v8301_v61 = vadd.f32 %v11429_v31, %v11424_v26 }
 0x3c6   : > { %v8269_v38 = vpop.f32.mrf.mxu0  ;;  %v11506_v52 = vpop.f32.mrf.mxu1 }
 0x3c7   : > { %11673 = vst [vmem:[#allocation12_spill] sm:$0xff] %v11504_v15  ;;  %v8270_v57 = vadd.f32 %v8269_v38, %v8268_v0  ;;  %v6031_v15 = vadd.f32 %v8298_v47, %v11326_v10  ;;  %v8295_v0 = vadd.f32 %v11415_v22, %v11410_v44  ;;  %v6034_v26 = vadd.f32 %v8301_v61, %v11332_v12 }
 0x3c8   : > { %v8271_v43 = vpop.f32.mrf.mxu0  ;;  %v11510_v45 = vpop.f32.mrf.mxu1 }
 0x3c9   : > { %v11515_v17 = vadd.f32 %v8270_v57, %v11395_v7  ;;  %v6026_v23 = vadd.f32 %v8295_v0, %v11320_v11 }
 0x3ca   : > { %v8272_v51 = vpop.f32.mrf.mxu0  ;;  %v11517_v49 = vpop.f32.mrf.mxu1 }
 0x3cb   : > { %v8273_v25 = vadd.f32 %v8272_v51, %v8271_v43  ;;  %v8310_v43 = vadd.f32 %v11450_v29, %v11445_v40  ;;  %v8313_v40 = vadd.f32 %v11457_v63, %v11452_v16  ;;  %v8322_v16 = vadd.f32 %v11478_v3, %v11473_v37 }
 0x3cc   : > { %v11522_v39 = vpop.f32.mrf.mxu1  ;;  %v8428_v41 = vpop.f32.mrf.mxu0 }
 0x3cd   : > { %v11527_v5 = vadd.f32 %v8273_v25, %v11403_v19  ;;  %v6192_v7 = vadd.f32 %v8428_v41, %v6031_v15  ;;  %v8304_v19 = vadd.f32 %v11436_v13, %v11431_v2  ;;  %v6047_v12 = vadd.f32 %v8310_v43, %v11350_v54 }
 0x3ce   : > { %v11530_v38 = vpop.f32.mrf.mxu1  ;;  %v6183_v57 = vpop.f32.mrf.mxu0  ;;  %v8307_v2 = vadd.f32 %v11443_v4, %v11438_v33  ;;  %v6050_v54 = vadd.f32 %v8313_v40, %v11356_v36  ;;  %v8316_v33 = vadd.f32 %v11464_v42, %v11459_v46  ;;  %v8325_v36 = vadd.f32 %v11485_v50, %v11480_v59 }
 0x3cf   : > { %9275 = vtanh.f32 %v6192_v7  ;;  %v6184_v10 = vadd.f32 %v6183_v57, %v6023_v8  ;;  %v6039_v11 = vadd.f32 %v8304_v19, %v11338_v48  ;;  %v6063_v46 = vadd.f32 %v8322_v16, %v11374_v56 }
 0x3d0   : > { %v11535_v31 = vpop.f32.mrf.mxu1  ;;  %v8429_v47 = vpop.f32.mrf.mxu0  ;;  %v6042_v48 = vadd.f32 %v8307_v2, %v11344_v55  ;;  %v8319_v57 = vadd.f32 %v11471_v20, %v11466_v62  ;;  %v8334_v56 = vadd.f32 %v11506_v52, %v11501_v1  ;;  %v6066_v19 = vadd.f32 %v8325_v36, %v11380_v60 }
 0x3d1   : > { %9277 = vtanh.f32 %v6184_v10  ;;  %v6195_v44 = vadd.f32 %v8429_v47, %v6034_v26  ;;  %v6055_v10 = vadd.f32 %v8316_v33, %v11362_v34  ;;  %v8328_v34 = vadd.f32 %v11492_v32, %v11487_v35 }
 0x3d2   : > { %v11540_v22 = vpop.f32.mrf.mxu1  ;;  %v6186_v15 = vpop.f32.mrf.mxu0  ;;  %v8337_v60 = vadd.f32 %v11517_v49, %v11510_v45  ;;  %v8331_v2 = vadd.f32 %v11499_v24, %v11494_v9 }
 0x3d3   : > { %9279 = vtanh.f32 %v6195_v44  ;;  %v6187_v29 = vadd.f32 %v6186_v15, %v6026_v23  ;;  %v6058_v15 = vadd.f32 %v8319_v57, %v11368_v27  ;;  %v8343_v36 = vadd.f32 %v11540_v22, %v11535_v31  ;;  %v11674_v22 = vld [vmem:[#allocation2_spill] sm:$0xff] }
 0x3d4   : > { %v11545_v21 = vpop.f32.mrf.mxu1  ;;  %v8432_v51 = vpop.f32.mrf.mxu0  ;;  %v6082_v16 = vadd.f32 %v8337_v60, %v11406_v6 }
 0x3d5   : > { %9281 = vtanh.f32 %v6187_v29  ;;  %v6208_v13 = vadd.f32 %v8432_v51, %v6047_v12  ;;  %v6079_v12 = vadd.f32 %v8334_v56, %v11398_v18 }
 0x3d6   : > { %v11550_v61 = vpop.f32.mrf.mxu1  ;;  %v6199_v25 = vpop.f32.mrf.mxu0 }
 0x3d7   : > { %9283 = vtanh.f32 %v6208_v13  ;;  %v6200_v63 = vadd.f32 %v6199_v25, %v6039_v11  ;;  %v6071_v13 = vadd.f32 %v8328_v34, %v11386_v58  ;;  %v8346_v25 = vadd.f32 %v11550_v61, %v11545_v21 }
 0x3d8   : > { %v11556_v41 = vpop.f32.mrf.mxu1  ;;  %v8433_v0 = vpop.f32.mrf.mxu0 }
 0x3d9   : > { %9285 = vtanh.f32 %v6200_v63  ;;  %v6211_v4 = vadd.f32 %v8433_v0, %v6050_v54  ;;  %v8340_v54 = vadd.f32 %v11530_v38, %v11522_v39  ;;  %v6074_v0 = vadd.f32 %v8331_v2, %v11392_v28 }
 0x3da   : > { %v11566_v37 = vpop.f32.mrf.mxu1  ;;  %v6202_v3 = vpop.f32.mrf.mxu0 }
 0x3db   : > { %9287 = vtanh.f32 %v6211_v4  ;;  %v6203_v7 = vadd.f32 %v6202_v3, %v6042_v48  ;;  %v8349_v4 = vadd.f32 %v11566_v37, %v11556_v41  ;;  %v6095_v48 = vadd.f32 %v8346_v25, %v11427_v30 }
 0x3dc   : > { %v9276_v42 = vpop.eup %9275  ;;  %v11571_v8 = vpop.f32.mrf.mxu1 }
 0x3dd   : > { %v8436_v55 = vpop.f32.mrf.mxu0  ;;  %6344 = vst [vmem:[%s11564_s15 + $0x10] sm:$0xff] %v9276_v42  ;;  %9289 = vtanh.f32 %v6203_v7  ;;  %v6087_v7 = vadd.f32 %v8340_v54, %v11413_v53 }
 0x3de   : > { %v6224_v43 = vadd.f32 %v8436_v55, %v6063_v46  ;;  %v9278_v26 = vpop.eup %9277  ;;  %v11577_v59 = vpop.f32.mrf.mxu1  ;;  %v6098_v55 = vadd.f32 %v8349_v4, %v11434_v14  ;;  %v11680_v4 = vld [vmem:[#allocation7_spill] sm:$0xff] }
 0x3df   : > { %v6215_v50 = vpop.f32.mrf.mxu0  ;;  %6342 = vst [vmem:[%s11564_s15] sm:$0xff] %v9278_v26  ;;  %v8352_v31 = vadd.f32 %v11577_v59, %v11571_v8  ;;  %v6090_v26 = vadd.f32 %v8343_v36, %v11674_v22  ;;  %v11681_v36 = vld [vmem:[#allocation10_spill] sm:$0xff] }
 0x3e0   : > { %9291 = vtanh.f32 %v6224_v43  ;;  %v6216_v47 = vadd.f32 %v6215_v50, %v6055_v10  ;;  %v9280_v62 = vpop.eup %9279  ;;  %v11583_v20 = vpop.f32.mrf.mxu1 }
 0x3e1   : > { %v8437_v44 = vpop.f32.mrf.mxu0  ;;  %6345 = vst [vmem:[%s11564_s15 + $0x18] sm:$0xff] %v9280_v62  ;;  %v11675_v62 = vld [vmem:[#allocation5_spill] sm:$0xff] }
 0x3e2   : > { %9293 = vtanh.f32 %v6216_v47  ;;  %v6227_v23 = vadd.f32 %v8437_v44, %v6066_v19  ;;  %v9282_v1 = vpop.eup %9281  ;;  %v11589_v52 = vpop.f32.mrf.mxu1 }
 0x3e3   : > { %v6218_v40 = vpop.f32.mrf.mxu0  ;;  %6343 = vst [vmem:[%s11564_s15 + $0x8] sm:$0xff] %v9282_v1  ;;  %v8355_v8 = vadd.f32 %v11589_v52, %v11583_v20  ;;  %v11676_v1 = vld [vmem:[#allocation3_spill] sm:$0xff] }
 0x3e4   : > { %9295 = vtanh.f32 %v6227_v23  ;;  %v6219_v29 = vadd.f32 %v6218_v40, %v6058_v15  ;;  %v9284_v35 = vpop.eup %9283  ;;  %v8356_v32 = vpop.f32.mrf.mxu1  ;;  %v6103_v40 = vadd.f32 %v8352_v31, %v11676_v1  ;;  %v11684_v1 = vld [vmem:[#allocation12_spill] sm:$0xff] }
 0x3e5   : > { %v8440_v51 = vpop.f32.mrf.mxu0  ;;  %6348 = vst [vmem:[%s11564_s15 + $0x30] sm:$0xff] %v9284_v35 }
 0x3e6   : > { %9297 = vtanh.f32 %v6219_v29  ;;  %v6240_v27 = vadd.f32 %v8440_v51, %v6079_v12  ;;  %v9286_v11 = vpop.eup %9285  ;;  %v8357_v49 = vpop.f32.mrf.mxu1  ;;  %v11677_v51 = vld [vmem:[#allocation6_spill] sm:$0xff] }
 0x3e7   : > { %v6231_v45 = vpop.f32.mrf.mxu0  ;;  %6346 = vst [vmem:[%s11564_s15 + $0x20] sm:$0xff] %v9286_v11  ;;  %v8358_v42 = vadd.f32 %v8357_v49, %v8356_v32  ;;  %v11678_v49 = vld [vmem:[#allocation4_spill] sm:$0xff] }
 0x3e8   : > { %9299 = vtanh.f32 %v6240_v27  ;;  %v6232_v18 = vadd.f32 %v6231_v45, %v6071_v13  ;;  %v9288_v63 = vpop.eup %9287  ;;  %v8359_v9 = vpop.f32.mrf.mxu1  ;;  %v6106_v45 = vadd.f32 %v8355_v8, %v11678_v49 }
 0x3e9   : > { %v8441_v24 = vpop.f32.mrf.mxu0  ;;  %6349 = vst [vmem:[%s11564_s15 + $0x38] sm:$0xff] %v9288_v63  ;;  %v6111_v44 = vadd.f32 %v8358_v42, %v11675_v62 }
 0x3ea   : > { %9301 = vtanh.f32 %v6232_v18  ;;  %v6243_v58 = vadd.f32 %v8441_v24, %v6082_v16  ;;  %v9290_v33 = vpop.eup %9289  ;;  %v8360_v21 = vpop.f32.mrf.mxu1  ;;  %v11679_v24 = vld [vmem:[#allocation9_spill] sm:$0xff] }
 0x3eb   : > { %v6234_v61 = vpop.f32.mrf.mxu0  ;;  %6347 = vst [vmem:[%s11564_s15 + $0x28] sm:$0xff] %v9290_v33  ;;  %v8361_v19 = vadd.f32 %v8360_v21, %v8359_v9 }
 0x3ec   : > { %9303 = vtanh.f32 %v6243_v58  ;;  %v6235_v6 = vadd.f32 %v6234_v61, %v6074_v0  ;;  %v8362_v39 = vpop.f32.mrf.mxu1 }
 0x3ed   : > { %v9292_v3 = vpop.eup %9291  ;;  %v8444_v38 = vpop.f32.mrf.mxu0  ;;  %v6114_v2 = vadd.f32 %v8361_v19, %v11677_v51 }
 0x3ee   : > { %6352 = vst [vmem:[%s11564_s15 + $0x50] sm:$0xff] %v9292_v3  ;;  %9305 = vtanh.f32 %v6235_v6  ;;  %v6256_v28 = vadd.f32 %v8444_v38, %v6095_v48  ;;  %v8363_v41 = vpop.f32.mrf.mxu1 }
 0x3ef   : > { %v9294_v46 = vpop.eup %9293  ;;  %v6247_v37 = vpop.f32.mrf.mxu0  ;;  %v8364_v20 = vadd.f32 %v8363_v41, %v8362_v39 }
 0x3f0   : > { %6350 = vst [vmem:[%s11564_s15 + $0x40] sm:$0xff] %v9294_v46  ;;  %9307 = vtanh.f32 %v6256_v28  ;;  %v6248_v30 = vadd.f32 %v6247_v37, %v6087_v7  ;;  %v8365_v43 = vpop.f32.mrf.mxu1 }
 0x3f1   : > { %v9296_v57 = vpop.eup %9295  ;;  %v8445_v10 = vpop.f32.mrf.mxu0  ;;  %v6119_v6 = vadd.f32 %v8364_v20, %v11680_v4 }
 0x3f2   : > { %6353 = vst [vmem:[%s11564_s15 + $0x58] sm:$0xff] %v9296_v57  ;;  %9309 = vtanh.f32 %v6248_v30  ;;  %v6259_v53 = vadd.f32 %v8445_v10, %v6098_v55  ;;  %v8366_v56 = vpop.f32.mrf.mxu1  ;;  %v11682_v30 = vld [vmem:[#allocation8_spill] sm:$0xff] }
 0x3f3   : > { %v9298_v50 = vpop.eup %9297  ;;  %v6250_v47 = vpop.f32.mrf.mxu0  ;;  %v8367_v21 = vadd.f32 %v8366_v56, %v8365_v43  ;;  %v11683_v56 = vld [vmem:[#allocation11_spill] sm:$0xff] }
 0x3f4   : > { %6351 = vst [vmem:[%s11564_s15 + $0x48] sm:$0xff] %v9298_v50  ;;  %9311 = vtanh.f32 %v6259_v53  ;;  %v6251_v14 = vadd.f32 %v6250_v47, %v6090_v26  ;;  %v8368_v23 = vpop.f32.mrf.mxu1 }
 0x3f5   : > { %v9300_v34 = vpop.eup %9299  ;;  %v8448_v15 = vpop.f32.mrf.mxu0  ;;  %v6122_v55 = vadd.f32 %v8367_v21, %v11682_v30 }
 0x3f6   : > { %6356 = vst [vmem:[%s11564_s15 + $0x70] sm:$0xff] %v9300_v34  ;;  %9313 = vtanh.f32 %v6251_v14  ;;  %v6272_v59 = vadd.f32 %v8448_v15, %v6111_v44  ;;  %v8369_v29 = vpop.f32.mrf.mxu1 }
 0x3f7   : > { %v9302_v60 = vpop.eup %9301  ;;  %v6263_v12 = vpop.f32.mrf.mxu0  ;;  %v8370_v35 = vadd.f32 %v8369_v29, %v8368_v23 }
 0x3f8   : > { %6354 = vst [vmem:[%s11564_s15 + $0x60] sm:$0xff] %v9302_v60  ;;  %9315 = vtanh.f32 %v6272_v59  ;;  %v6264_v32 = vadd.f32 %v6263_v12, %v6103_v40  ;;  %v8371_v13 = vpop.f32.mrf.mxu1 }
 0x3f9   : > { %v9304_v27 = vpop.eup %9303  ;;  %v8449_v11 = vpop.f32.mrf.mxu0  ;;  %v6127_v54 = vadd.f32 %v8370_v35, %v11679_v24 }
 0x3fa   : > { %6357 = vst [vmem:[%s11564_s15 + $0x78] sm:$0xff] %v9304_v27  ;;  %9317 = vtanh.f32 %v6264_v32  ;;  %v6275_v52 = vadd.f32 %v8449_v11, %v6114_v2  ;;  %v8372_v18 = vpop.f32.mrf.mxu1 }
 0x3fb   : > { %v9306_v25 = vpop.eup %9305  ;;  %v6266_v16 = vpop.f32.mrf.mxu0  ;;  %v8373_v63 = vadd.f32 %v8372_v18, %v8371_v13 }
 0x3fc   : > { %6355 = vst [vmem:[%s11564_s15 + $0x68] sm:$0xff] %v9306_v25  ;;  %9319 = vtanh.f32 %v6275_v52  ;;  %v6267_v9 = vadd.f32 %v6266_v16, %v6106_v45  ;;  %v8374_v0 = vpop.f32.mrf.mxu1 }
 0x3fd   : > { %v9308_v58 = vpop.eup %9307  ;;  %v8452_v33 = vpop.f32.mrf.mxu0  ;;  %v6130_v28 = vadd.f32 %v8373_v63, %v11681_v36 }
 0x3fe   : > { %6360 = vst [vmem:[%s11564_s15 + $0x90] sm:$0xff] %v9308_v58  ;;  %9321 = vtanh.f32 %v6267_v9  ;;  %v6288_v61 = vadd.f32 %v8452_v33, %v6127_v54  ;;  %v8375_v3 = vpop.f32.mrf.mxu1 }
 0x3ff   : > { %v9310_v48 = vpop.eup %9309  ;;  %v6279_v39 = vpop.f32.mrf.mxu0  ;;  %v8376_v37 = vadd.f32 %v8375_v3, %v8374_v0 }
 0x400   : > { %6358 = vst [vmem:[%s11564_s15 + $0x80] sm:$0xff] %v9310_v48  ;;  %9323 = vtanh.f32 %v6288_v61  ;;  %v6280_v38 = vadd.f32 %v6279_v39, %v6119_v6  ;;  %v8377_v46 = vpop.f32.mrf.mxu1 }
 0x401   : > { %v9312_v7 = vpop.eup %9311  ;;  %v8453_v41 = vpop.f32.mrf.mxu0  ;;  %v6135_v47 = vadd.f32 %v8376_v37, %v11683_v56 }
 0x402   : > { %6361 = vst [vmem:[%s11564_s15 + $0x98] sm:$0xff] %v9312_v7  ;;  %9325 = vtanh.f32 %v6280_v38  ;;  %v6291_v42 = vadd.f32 %v8453_v41, %v6130_v28  ;;  %v8378_v43 = vpop.f32.mrf.mxu1 }
 0x403   : > { %v9314_v57 = vpop.eup %9313  ;;  %v6282_v10 = vpop.f32.mrf.mxu0  ;;  %v8379_v50 = vadd.f32 %v8378_v43, %v8377_v46 }
 0x404   : > { %6359 = vst [vmem:[%s11564_s15 + $0x88] sm:$0xff] %v9314_v57  ;;  %9327 = vtanh.f32 %v6291_v42  ;;  %v6283_v31 = vadd.f32 %v6282_v10, %v6122_v55  ;;  %v8380_v22 = vpop.f32.mrf.mxu1 }
 0x405   : > { %v9316_v53 = vpop.eup %9315  ;;  %v8456_v26 = vpop.f32.mrf.mxu0  ;;  %v6138_v40 = vadd.f32 %v8379_v50, %v11684_v1 }
 0x406   : > { %6364 = vst [vmem:[%s11564_s15 + $0xb0] sm:$0xff] %v9316_v53  ;;  %9329 = vtanh.f32 %v6283_v31  ;;  %v8381_v14 = vpop.f32.mrf.mxu1 }
 0x407   : > { %v9318_v19 = vpop.eup %9317  ;;  %v6295_v62 = vpop.f32.mrf.mxu0  ;;  %v8382_v44 = vadd.f32 %v8381_v14, %v8380_v22 }
 0x408   : > { %6362 = vst [vmem:[%s11564_s15 + $0xa0] sm:$0xff] %v9318_v19  ;;  %v6296_v34 = vadd.f32 %v6295_v62, %v6135_v47  ;;  %v8383_v15 = vpop.f32.mrf.mxu1 }
 0x409   : > { %v9320_v23 = vpop.eup %9319  ;;  %v8457_v8 = vpop.f32.mrf.mxu0  ;;  %v6143_v59 = vadd.f32 %v8382_v44, %v11515_v17 }
 0x40a   : > { %6365 = vst [vmem:[%s11564_s15 + $0xb8] sm:$0xff] %v9320_v23  ;;  %9331 = vtanh.f32 %v6296_v34  ;;  %v8384_v29 = vpop.f32.mrf.mxu1 }
 0x40b   : > { %v9322_v60 = vpop.eup %9321  ;;  %v6298_v12 = vpop.f32.mrf.mxu0  ;;  %v6304_v35 = vadd.f32 %v8456_v26, %v6143_v59  ;;  %v8385_v32 = vadd.f32 %v8384_v29, %v8383_v15 }
 0x40c   : > { %6363 = vst [vmem:[%s11564_s15 + $0xa8] sm:$0xff] %v9322_v60  ;;  %v6299_v51 = vadd.f32 %v6298_v12, %v6138_v40 }
 0x40d   : > { %v9324_v2 = vpop.eup %9323  ;;  %9333 = vtanh.f32 %v6304_v35  ;;  %v6146_v17 = vadd.f32 %v8385_v32, %v11527_v5 }
 0x40e   : > { %6368 = vst [vmem:[%s11564_s15 + $0xd0] sm:$0xff] %v9324_v2  ;;  %9335 = vtanh.f32 %v6299_v51 }
 0x40f   : > { %v9326_v27 = vpop.eup %9325  ;;  %v6307_v13 = vadd.f32 %v8457_v8, %v6146_v17 }
 0x410   : > { %6366 = vst [vmem:[%s11564_s15 + $0xc0] sm:$0xff] %v9326_v27 }
 0x411   : > { %v9328_v11 = vpop.eup %9327  ;;  %9337 = vtanh.f32 %v6307_v13 }
 0x412   : > { %6369 = vst [vmem:[%s11564_s15 + $0xd8] sm:$0xff] %v9328_v11 }
 0x413   : > { %v9330_v20 = vpop.eup %9329 }
 0x414   : > { %6367 = vst [vmem:[%s11564_s15 + $0xc8] sm:$0xff] %v9330_v20 }
 0x417   : > { %v9332_v52 = vpop.eup %9331 }
 0x418   : > { %6370 = vst [vmem:[%s11564_s15 + $0xe0] sm:$0xff] %v9332_v52 }
 0x41a   : > { %v9334_v49 = vpop.eup %9333 }
 0x41b   : > { %v9336_v45 = vpop.eup %9335  ;;  %6372 = vst [vmem:[%s11564_s15 + $0xf0] sm:$0xff] %v9334_v49 }
 0x41c   : > { %6371 = vst [vmem:[%s11564_s15 + $0xe8] sm:$0xff] %v9336_v45 }
 0x41e   : > { %v9338_v25 = vpop.eup %9337 }
 0x41f   : > { %6373 = vst [vmem:[%s11564_s15 + $0xf8] sm:$0xff] %v9338_v25 }
 0x420 PF: > { %s13_s12 = sadd.s32 1, %s9346_s12  }
 0x421   : > { %p10_p4 = scmp.ge.s32.totalorder %s13_s12, 4  }
 0x423   :  { %12 = sbr.rel (!%p10_p4) target bundleno = 1 (0x1), region = 62 }

</bundles_post_ra>
